<compile_context>
chip_gen: v7x
topology: tpu7x:2x2x1
jax: 0.10.0
libtpu: 0.0.40
codegen_flags: <defaults>
</compile_context>

<pallas_src>
from functools import partial

import numpy as np
import jax
import jax.numpy as jnp
from jax import lax
from jax.experimental import pallas as pl
from jax.experimental.pallas import tpu as pltpu


# ----------------------------------------------------------------------------- helpers

def _round_up(x, m):
    return ((x + m - 1) // m) * m


def _pad_flat(x):
    """(N, C, H, W) -> (N, C, Lbuf) zero-padded flat layout.

    Padded-grid element (hb, wb) of the (H+2, W+2) zero-bordered image lives at flat
    index 1 + hb*Wp + wb (1-element left margin so all 9 tap windows are in-bounds)."""
    N, C, H, W = x.shape
    Hp, Wp = H + 2, W + 2
    Lbuf = _round_up(Hp * Wp + 2, 128)
    xp = jnp.pad(x, ((0, 0), (0, 0), (1, 1), (1, 1))).reshape(N, C, Hp * Wp)
    xp = jnp.pad(xp, ((0, 0), (0, 0), (1, Lbuf - Hp * Wp - 1)))
    return xp, Lbuf


def _col_mask(H, W):
    """(1, H*Wp) f32 mask: 1.0 on valid output columns, 0.0 on the 2 junk cols per row."""
    Wp = W + 2
    col = np.arange(H * Wp) % Wp
    m = ((col >= 1) & (col <= W)).astype(np.float32)
    return jnp.asarray(m.reshape(1, H * Wp))


def _cat_weight(w):
    """OIHW (Cout, Cin, 3, 3) -> (Cout, 9*Cin), column order (dy*3+dx)*Cin + cin."""
    cout, cin = w.shape[0], w.shape[1]
    return jnp.transpose(w, (0, 2, 3, 1)).reshape(cout, 9 * cin)


def pixel_shuffle_nchw(x, r):
    """torch.nn.PixelShuffle(r) on an NCHW tensor."""
    N, C, H, W = x.shape
    c = C // (r * r)
    x = x.reshape(N, c, r, r, H, W)
    x = jnp.transpose(x, (0, 1, 4, 2, 5, 3))
    return x.reshape(N, c, H * r, W * r)


# ----------------------------------------------------------------------------- in-kernel conv

def _conv3x3_flat(src_ref, col_ref, wcat, bias, cin, Wp, Nsp):
    """3x3 conv on a zero-bordered flat (cin, Lbuf) buffer.

    Returns (cout, H*Wp) = output rows 1..H over the full padded width; the two junk
    columns per row are the caller's responsibility (masked or sliced away)."""
    if cin % 8 == 0:
        # im2col into VMEM scratch (sublane-aligned groups), then ONE big MXU matmul.
        for k in range(9):
            off = (k // 3) * Wp + (k % 3)
            col_ref[k * cin:(k + 1) * cin, :] = src_ref[:, off:off + Nsp]
        z = jnp.dot(wcat, col_ref[0:9 * cin, :], preferred_element_type=jnp.float32)
    else:
        # tiny Cin (e.g. the 3-channel head): 9 whole-image tap matmuls, f32 accumulate.
        z = None
        for k in range(9):
            off = (k // 3) * Wp + (k % 3)
            zk = jnp.dot(wcat[:, k * cin:(k + 1) * cin], src_ref[:, off:off + Nsp],
                         preferred_element_type=jnp.float32)
            z = zk if z is None else z + zk
    return z + bias  # bias (Cout, 1) broadcast along lanes, added once per conv


# ----------------------------------------------------------------------------- fused trunk kernel

def _make_trunk_kernel(F, Fout, idx, H, W, res_scale):
    Wp = W + 2
    Nsp = H * Wp
    lo = 1 + Wp  # flat index of padded-grid position (1, 0): start of the writable rows

    def kernel(x_ref, mask_ref, wh_ref, bh_ref, wb_ref, bb_ref, we_ref, be_ref,
               wf_ref, bf_ref, out_ref, bufx, bufr, bufy, col):
        mask = mask_ref[...]                                   # (1, Nsp)

        def conv(src_ref, wcat, bias, cin):
            return _conv3x3_flat(src_ref, col, wcat, bias, cin, Wp, Nsp)

        # Zero once: the never-written border rows / margins act as the conv zero padding.
        bufx[...] = jnp.zeros_like(bufx)
        bufr[...] = jnp.zeros_like(bufr)
        bufy[...] = jnp.zeros_like(bufy)

        # head: 3 -> F
        zh = conv(x_ref, wh_ref[...], bh_ref[...], 3) * mask
        bufx[:, lo:lo + Nsp] = zh                              # long-skip copy
        bufr[:, lo:lo + Nsp] = zh                              # running residual state

        # residual blocks (idx is static -> unrolled at trace time)
        for i in range(idx):
            z0 = conv(bufr, wb_ref[2 * i], bb_ref[2 * i], F)
            bufy[:, lo:lo + Nsp] = jnp.maximum(z0, 0.0) * mask
            z1 = conv(bufy, wb_ref[2 * i + 1], bb_ref[2 * i + 1], F)
            bufr[:, lo:lo + Nsp] = (z1 * res_scale) * mask + bufr[:, lo:lo + Nsp]

        # body_end + long skip
        ze = conv(bufr, we_ref[...], be_ref[...], F)
        bufr[:, lo:lo + Nsp] = ze * mask + bufx[:, lo:lo + Nsp]

        # final fused conv (first upscale conv when scale > 1, else the tail conv);
        # junk columns are sliced off host-side.
        zf = conv(bufr, wf_ref[...], bf_ref[...], F)
        out_ref[...] = zf.astype(out_ref.dtype)

    return kernel


def trunk_pallas(x, p, idx, final_w, final_b, res_scale=1.0):
    """head -> idx ResBlocks -> body_end(+skip) -> final conv, fused in one pallas_call."""
    N, Cin0, H, W = x.shape
    F = p["head"][1].shape[0]
    Fout = final_b.shape[0]
    Wp = W + 2
    Nsp = H * Wp

    xflat, Lbuf = _pad_flat(x)
    mask = _col_mask(H, W)

    wh = _cat_weight(p["head"][0])
    bh = p["head"][1].reshape(F, 1)
    if idx > 0:
        wb = jnp.stack([_cat_weight(w) for blk in p["body"][:idx] for w in (blk[0], blk[2])])
        bb = jnp.stack([b.reshape(F, 1) for blk in p["body"][:idx] for b in (blk[1], blk[3])])
    else:
        wb = jnp.zeros((1, F, 9 * F), jnp.float32)
        bb = jnp.zeros((1, F, 1), jnp.float32)
    we = _cat_weight(p["body_end"][0])
    be = p["body_end"][1].reshape(F, 1)
    wf = _cat_weight(final_w)
    bf = final_b.reshape(Fout, 1)

    kernel = _make_trunk_kernel(F, Fout, idx, H, W, float(res_scale))

    out = pl.pallas_call(
        kernel,
        out_shape=jax.ShapeDtypeStruct((N, Fout, Nsp), jnp.float32),
        grid=(N,),
        in_specs=[
            pl.BlockSpec((None, Cin0, Lbuf), lambda n: (n, 0, 0)),
            pl.BlockSpec((1, Nsp), lambda n: (0, 0)),
            pl.BlockSpec(wh.shape, lambda n: (0, 0)),
            pl.BlockSpec(bh.shape, lambda n: (0, 0)),
            pl.BlockSpec(wb.shape, lambda n: (0, 0, 0)),
            pl.BlockSpec(bb.shape, lambda n: (0, 0, 0)),
            pl.BlockSpec(we.shape, lambda n: (0, 0)),
            pl.BlockSpec(be.shape, lambda n: (0, 0)),
            pl.BlockSpec(wf.shape, lambda n: (0, 0)),
            pl.BlockSpec(bf.shape, lambda n: (0, 0)),
        ],
        out_specs=pl.BlockSpec((None, Fout, Nsp), lambda n: (n, 0, 0)),
        scratch_shapes=[
            pltpu.VMEM((F, Lbuf), jnp.float32),       # head output (long skip)
            pltpu.VMEM((F, Lbuf), jnp.float32),       # running residual state
            pltpu.VMEM((F, Lbuf), jnp.float32),       # resblock intermediate
            pltpu.VMEM((9 * F, Nsp), jnp.float32),    # im2col slab
        ],
        compiler_params=pltpu.CompilerParams(dimension_semantics=("parallel",)),
    )(xflat, mask, wh, bh, wb, bb, we, be, wf, bf)

    return out.reshape(N, Fout, H, Wp)[:, :, :, 1:W + 1]


# ----------------------------------------------------------------------------- standalone conv kernel

def _make_conv_kernel(Cin, Cout, H, W):
    Wp = W + 2
    Nsp = H * Wp

    def kernel(x_ref, w_ref, b_ref, out_ref, col):
        z = _conv3x3_flat(x_ref, col, w_ref[...], b_ref[...], Cin, Wp, Nsp)
        out_ref[...] = z.astype(out_ref.dtype)

    return kernel


def conv3x3_pallas(x, w, b):
    """Single 3x3 conv (pad=1), whole-image im2col matmul with lane-dense spatial output."""
    N, Cin, H, W = x.shape
    Cout = w.shape[0]
    Wp = W + 2
    Nsp = H * Wp

    xflat, Lbuf = _pad_flat(x)
    wcat = _cat_weight(w)
    b2 = b.reshape(Cout, 1)

    out = pl.pallas_call(
        _make_conv_kernel(Cin, Cout, H, W),
        out_shape=jax.ShapeDtypeStruct((N, Cout, Nsp), jnp.float32),
        grid=(N,),
        in_specs=[
            pl.BlockSpec((None, Cin, Lbuf), lambda n: (n, 0, 0)),
            pl.BlockSpec(wcat.shape, lambda n: (0, 0)),
            pl.BlockSpec(b2.shape, lambda n: (0, 0)),
        ],
        out_specs=pl.BlockSpec((None, Cout, Nsp), lambda n: (n, 0, 0)),
        scratch_shapes=[pltpu.VMEM((9 * Cin, Nsp), jnp.float32)],
        compiler_params=pltpu.CompilerParams(dimension_semantics=("parallel",)),
    )(xflat, wcat, b2)

    return out.reshape(N, Cout, H, Wp)[:, :, :, 1:W + 1]


# ----------------------------------------------------------------------------- subnet forward

def nas_forward_pallas(x, p, *, idx, scale, res_scale):
    """One NAS subnet: fused trunk -> [PixelShuffle -> conv]* -> tail."""
    if scale > 1:
        ups = p["up"]
        z = trunk_pallas(x, p, idx, ups[0][0], ups[0][1], res_scale)   # (N, 4F, H, W)
        z = pixel_shuffle_nchw(z, 2)
        for (w, b) in ups[1:]:
            z = conv3x3_pallas(z, w, b)
            z = pixel_shuffle_nchw(z, 2)
        return conv3x3_pallas(z, p["tail"][0], p["tail"][1])
    return trunk_pallas(x, p, idx, p["tail"][0], p["tail"][1], res_scale)


# ----------------------------------------------------------------------------- pure-JAX reference

def conv3x3_ref(x, w, b, *, relu=False, skip=None, res_scale=1.0):
    out = lax.conv_general_dilated(x, w, (1, 1), "SAME",
                                   dimension_numbers=("NCHW", "OIHW", "NCHW"))
    out = out + b[None, :, None, None]
    if relu:
        out = jnp.maximum(out, 0.0)
    if skip is not None:
        out = out * res_scale + skip
    return out


def nas_forward_ref(x, p, *, idx, scale, res_scale):
    x = conv3x3_ref(x, *p["head"])
    res = x
    for i in range(idx):
        w0, b0, w1, b1 = p["body"][i]
        y = conv3x3_ref(res, w0, b0, relu=True)
        res = conv3x3_ref(y, w1, b1, skip=res, res_scale=res_scale)
    res = conv3x3_ref(res, *p["body_end"], skip=x, res_scale=1.0)
    r = res
    if scale > 1:
        for (w, b) in p["up"]:
            r = conv3x3_ref(r, w, b)
            r = pixel_shuffle_nchw(r, 2)
    return conv3x3_ref(r, *p["tail"])


# ----------------------------------------------------------------------------- params

def _conv_init(key, cin, cout):
    kw, kb = jax.random.split(key)
    w = jax.random.normal(kw, (cout, cin, 3, 3), jnp.float32) / np.sqrt(9.0 * cin)
    b = 0.1 * jax.random.normal(kb, (cout,), jnp.float32)
    return w, b


def init_subnet(key, num_feature, num_block, num_channel=3, scale=4):
    n_up = int(np.log2(scale)) if scale > 1 else 0
    keys = list(jax.random.split(key, 3 + 2 * num_block + n_up))
    ki = iter(keys)
    p = {"head": _conv_init(next(ki), num_channel, num_feature), "body": []}
    for _ in range(num_block):
        w0, b0 = _conv_init(next(ki), num_feature, num_feature)
        w1, b1 = _conv_init(next(ki), num_feature, num_feature)
        p["body"].append((w0, b0, w1, b1))
    p["body_end"] = _conv_init(next(ki), num_feature, num_feature)
    p["up"] = [_conv_init(next(ki), num_feature, 4 * num_feature) for _ in range(n_up)]
    p["tail"] = _conv_init(next(ki), num_feature, num_channel)
    return p


# ----------------------------------------------------------------------------- main

if __name__ == "__main__":
    key = jax.random.PRNGKey(0)

    subnet_bs = [2, 1]          # per-subnet (padded) batch sizes
    num_features = [8, 16]      # per-subnet num_feature
    num_block = 2
    idx = 2                     # number of residual blocks applied (== subnet_num_block)
    scale = 4
    num_channel = 3
    H = W = 16
    res_scale = 1.0

    k_params, k_inputs = jax.random.split(key)
    pkeys = jax.random.split(k_params, len(subnet_bs))
    xkeys = jax.random.split(k_inputs, len(subnet_bs))

    params = [init_subnet(pk, nf, num_block, num_channel, scale)
              for pk, nf in zip(pkeys, num_features)]
    xs = [jax.random.normal(xk, (bs, num_channel, H, W), jnp.float32)
          for xk, bs in zip(xkeys, subnet_bs)]

    fwd = jax.jit(partial(nas_forward_pallas, idx=idx, scale=scale, res_scale=res_scale))

    # hFusedNAS.forward: list of per-subnet inputs -> list of per-subnet outputs.
    outs = [fwd(x, p) for x, p in zip(xs, params)]
    outs = jax.block_until_ready(outs)

    refs = [nas_forward_ref(x, p, idx=idx, scale=scale, res_scale=res_scale)
            for x, p in zip(xs, params)]
    refs = jax.block_until_ready(refs)

    for o, r, bs in zip(outs, refs, subnet_bs):
        assert o.shape == (bs, num_channel, H * scale, W * scale), o.shape
        err = float(jnp.max(jnp.abs(o - r)))
        assert err < 5e-2, f"max abs err {err}"

    print("KERNEL_OK")
</pallas_src>

<mosaic_0001>
module attributes {stable_mosaic.version = 11 : i64} {
  func.func @kernel(%arg0: i32, %arg1: memref<1x3x384xf32, #tpu.memory_space<vmem>>, %arg2: memref<1x288xf32, #tpu.memory_space<vmem>>, %arg3: memref<8x27xf32, #tpu.memory_space<vmem>>, %arg4: memref<8x1xf32, #tpu.memory_space<vmem>>, %arg5: memref<4x8x72xf32, #tpu.memory_space<vmem>>, %arg6: memref<4x8x1xf32, #tpu.memory_space<vmem>>, %arg7: memref<8x72xf32, #tpu.memory_space<vmem>>, %arg8: memref<8x1xf32, #tpu.memory_space<vmem>>, %arg9: memref<32x72xf32, #tpu.memory_space<vmem>>, %arg10: memref<32x1xf32, #tpu.memory_space<vmem>>, %arg11: memref<1x32x288xf32, #tpu.memory_space<vmem>>, %arg12: memref<8x384xf32, #tpu.memory_space<vmem>>, %arg13: memref<8x384xf32, #tpu.memory_space<vmem>>, %arg14: memref<8x384xf32, #tpu.memory_space<vmem>>, %arg15: memref<72x288xf32, #tpu.memory_space<vmem>>) attributes {dimension_semantics = [#tpu.dimension_semantics<parallel>], iteration_bounds = array<i64: 2>, scalar_prefetch = 0 : i64, scratch_operands = 4 : i64, tpu.core_type = #tpu.core_type<tc>, window_params = [{transform_indices = @transform_0, window_bounds = array<i64: 1, 3, 384>}, {pipeline_mode = #tpu.pipeline_mode<synchronous>, transform_indices = @transform_1, window_bounds = array<i64: 1, 288>}, {pipeline_mode = #tpu.pipeline_mode<synchronous>, transform_indices = @transform_2, window_bounds = array<i64: 8, 27>}, {pipeline_mode = #tpu.pipeline_mode<synchronous>, transform_indices = @transform_3, window_bounds = array<i64: 8, 1>}, {pipeline_mode = #tpu.pipeline_mode<synchronous>, transform_indices = @transform_4, window_bounds = array<i64: 4, 8, 72>}, {pipeline_mode = #tpu.pipeline_mode<synchronous>, transform_indices = @transform_5, window_bounds = array<i64: 4, 8, 1>}, {pipeline_mode = #tpu.pipeline_mode<synchronous>, transform_indices = @transform_6, window_bounds = array<i64: 8, 72>}, {pipeline_mode = #tpu.pipeline_mode<synchronous>, transform_indices = @transform_7, window_bounds = array<i64: 8, 1>}, {pipeline_mode = #tpu.pipeline_mode<synchronous>, transform_indices = @transform_8, window_bounds = array<i64: 32, 72>}, {pipeline_mode = #tpu.pipeline_mode<synchronous>, transform_indices = @transform_9, window_bounds = array<i64: 32, 1>}, {transform_indices = @transform_10, window_bounds = array<i64: 1, 32, 288>}]} {
    %c0 = arith.constant 0 : index
    %c0_0 = arith.constant 0 : index
    %0 = vector.load %arg2[%c0, %c0_0] : memref<1x288xf32, #tpu.memory_space<vmem>>, vector<1x288xf32>
    %cst = arith.constant 0.000000e+00 : f32
    %1 = vector.broadcast %cst : f32 to vector<8x384xf32>
    %c0_1 = arith.constant 0 : index
    %c0_2 = arith.constant 0 : index
    %2 = vector.load %arg12[%c0_1, %c0_2] : memref<8x384xf32, #tpu.memory_space<vmem>>, vector<8x384xf32>
    tpu.vector_store %arg12[%c0_1, %c0_2], %1 {strides = array<i32>} : memref<8x384xf32, #tpu.memory_space<vmem>>, vector<8x384xf32>,
    %cst_3 = arith.constant 0.000000e+00 : f32
    %3 = vector.broadcast %cst_3 : f32 to vector<8x384xf32>
    %c0_4 = arith.constant 0 : index
    %c0_5 = arith.constant 0 : index
    %4 = vector.load %arg13[%c0_4, %c0_5] : memref<8x384xf32, #tpu.memory_space<vmem>>, vector<8x384xf32>
    tpu.vector_store %arg13[%c0_4, %c0_5], %3 {strides = array<i32>} : memref<8x384xf32, #tpu.memory_space<vmem>>, vector<8x384xf32>,
    %cst_6 = arith.constant 0.000000e+00 : f32
    %5 = vector.broadcast %cst_6 : f32 to vector<8x384xf32>
    %c0_7 = arith.constant 0 : index
    %c0_8 = arith.constant 0 : index
    %6 = vector.load %arg14[%c0_7, %c0_8] : memref<8x384xf32, #tpu.memory_space<vmem>>, vector<8x384xf32>
    tpu.vector_store %arg14[%c0_7, %c0_8], %5 {strides = array<i32>} : memref<8x384xf32, #tpu.memory_space<vmem>>, vector<8x384xf32>,
    %c0_9 = arith.constant 0 : index
    %c0_10 = arith.constant 0 : index
    %7 = vector.load %arg3[%c0_9, %c0_10] : memref<8x27xf32, #tpu.memory_space<vmem>>, vector<8x27xf32>
    %c0_11 = arith.constant 0 : index
    %c0_12 = arith.constant 0 : index
    %8 = vector.load %arg4[%c0_11, %c0_12] : memref<8x1xf32, #tpu.memory_space<vmem>>, vector<8x1xf32>
    %9 = vector.extract_strided_slice %7 {offsets = [0, 0], sizes = [8, 3], strides = [1, 1]} : vector<8x27xf32> to vector<8x3xf32>
    %c0_13 = arith.constant 0 : index
    %c0_14 = arith.constant 0 : index
    %c0_15 = arith.constant 0 : index
    %10 = vector.load %arg1[%c0_13, %c0_14, %c0_15] : memref<1x3x384xf32, #tpu.memory_space<vmem>>, vector<1x3x288xf32>
    %11 = vector.shape_cast %10 : vector<1x3x288xf32> to vector<3x288xf32>
    %cst_16 = arith.constant dense<0.000000e+00> : vector<8x288xf32>
    %12 = tpu.matmul %9, %11, %cst_16 {dimension_numbers = #tpu.dot_dimension_numbers<[1], [0], [0], [1], [0, 0, 1, 1], [], []>} : vector<8x3xf32>, vector<3x288xf32>, vector<8x288xf32> -> vector<8x288xf32>
    %13 = vector.extract_strided_slice %7 {offsets = [0, 3], sizes = [8, 3], strides = [1, 1]} : vector<8x27xf32> to vector<8x3xf32>
    %c0_17 = arith.constant 0 : index
    %c0_18 = arith.constant 0 : index
    %c1 = arith.constant 1 : index
    %14 = vector.load %arg1[%c0_17, %c0_18, %c1] : memref<1x3x384xf32, #tpu.memory_space<vmem>>, vector<1x3x288xf32>
    %15 = vector.shape_cast %14 : vector<1x3x288xf32> to vector<3x288xf32>
    %cst_19 = arith.constant dense<0.000000e+00> : vector<8x288xf32>
    %16 = tpu.matmul %13, %15, %cst_19 {dimension_numbers = #tpu.dot_dimension_numbers<[1], [0], [0], [1], [0, 0, 1, 1], [], []>} : vector<8x3xf32>, vector<3x288xf32>, vector<8x288xf32> -> vector<8x288xf32>
    %17 = arith.addf %12, %16 : vector<8x288xf32>
    %18 = vector.extract_strided_slice %7 {offsets = [0, 6], sizes = [8, 3], strides = [1, 1]} : vector<8x27xf32> to vector<8x3xf32>
    %c0_20 = arith.constant 0 : index
    %c0_21 = arith.constant 0 : index
    %c2 = arith.constant 2 : index
    %19 = vector.load %arg1[%c0_20, %c0_21, %c2] : memref<1x3x384xf32, #tpu.memory_space<vmem>>, vector<1x3x288xf32>
    %20 = vector.shape_cast %19 : vector<1x3x288xf32> to vector<3x288xf32>
    %cst_22 = arith.constant dense<0.000000e+00> : vector<8x288xf32>
    %21 = tpu.matmul %18, %20, %cst_22 {dimension_numbers = #tpu.dot_dimension_numbers<[1], [0], [0], [1], [0, 0, 1, 1], [], []>} : vector<8x3xf32>, vector<3x288xf32>, vector<8x288xf32> -> vector<8x288xf32>
    %22 = arith.addf %17, %21 : vector<8x288xf32>
    %23 = vector.extract_strided_slice %7 {offsets = [0, 9], sizes = [8, 3], strides = [1, 1]} : vector<8x27xf32> to vector<8x3xf32>
    %c0_23 = arith.constant 0 : index
    %c0_24 = arith.constant 0 : index
    %c18 = arith.constant 18 : index
    %24 = vector.load %arg1[%c0_23, %c0_24, %c18] : memref<1x3x384xf32, #tpu.memory_space<vmem>>, vector<1x3x288xf32>
    %25 = vector.shape_cast %24 : vector<1x3x288xf32> to vector<3x288xf32>
    %cst_25 = arith.constant dense<0.000000e+00> : vector<8x288xf32>
    %26 = tpu.matmul %23, %25, %cst_25 {dimension_numbers = #tpu.dot_dimension_numbers<[1], [0], [0], [1], [0, 0, 1, 1], [], []>} : vector<8x3xf32>, vector<3x288xf32>, vector<8x288xf32> -> vector<8x288xf32>
    %27 = arith.addf %22, %26 : vector<8x288xf32>
    %28 = vector.extract_strided_slice %7 {offsets = [0, 12], sizes = [8, 3], strides = [1, 1]} : vector<8x27xf32> to vector<8x3xf32>
    %c0_26 = arith.constant 0 : index
    %c0_27 = arith.constant 0 : index
    %c19 = arith.constant 19 : index
    %29 = vector.load %arg1[%c0_26, %c0_27, %c19] : memref<1x3x384xf32, #tpu.memory_space<vmem>>, vector<1x3x288xf32>
    %30 = vector.shape_cast %29 : vector<1x3x288xf32> to vector<3x288xf32>
    %cst_28 = arith.constant dense<0.000000e+00> : vector<8x288xf32>
    %31 = tpu.matmul %28, %30, %cst_28 {dimension_numbers = #tpu.dot_dimension_numbers<[1], [0], [0], [1], [0, 0, 1, 1], [], []>} : vector<8x3xf32>, vector<3x288xf32>, vector<8x288xf32> -> vector<8x288xf32>
    %32 = arith.addf %27, %31 : vector<8x288xf32>
    %33 = vector.extract_strided_slice %7 {offsets = [0, 15], sizes = [8, 3], strides = [1, 1]} : vector<8x27xf32> to vector<8x3xf32>
    %c0_29 = arith.constant 0 : index
    %c0_30 = arith.constant 0 : index
    %c20 = arith.constant 20 : index
    %34 = vector.load %arg1[%c0_29, %c0_30, %c20] : memref<1x3x384xf32, #tpu.memory_space<vmem>>, vector<1x3x288xf32>
    %35 = vector.shape_cast %34 : vector<1x3x288xf32> to vector<3x288xf32>
    %cst_31 = arith.constant dense<0.000000e+00> : vector<8x288xf32>
    %36 = tpu.matmul %33, %35, %cst_31 {dimension_numbers = #tpu.dot_dimension_numbers<[1], [0], [0], [1], [0, 0, 1, 1], [], []>} : vector<8x3xf32>, vector<3x288xf32>, vector<8x288xf32> -> vector<8x288xf32>
    %37 = arith.addf %32, %36 : vector<8x288xf32>
    %38 = vector.extract_strided_slice %7 {offsets = [0, 18], sizes = [8, 3], strides = [1, 1]} : vector<8x27xf32> to vector<8x3xf32>
    %c0_32 = arith.constant 0 : index
    %c0_33 = arith.constant 0 : index
    %c36 = arith.constant 36 : index
    %39 = vector.load %arg1[%c0_32, %c0_33, %c36] : memref<1x3x384xf32, #tpu.memory_space<vmem>>, vector<1x3x288xf32>
    %40 = vector.shape_cast %39 : vector<1x3x288xf32> to vector<3x288xf32>
    %cst_34 = arith.constant dense<0.000000e+00> : vector<8x288xf32>
    %41 = tpu.matmul %38, %40, %cst_34 {dimension_numbers = #tpu.dot_dimension_numbers<[1], [0], [0], [1], [0, 0, 1, 1], [], []>} : vector<8x3xf32>, vector<3x288xf32>, vector<8x288xf32> -> vector<8x288xf32>
    %42 = arith.addf %37, %41 : vector<8x288xf32>
    %43 = vector.extract_strided_slice %7 {offsets = [0, 21], sizes = [8, 3], strides = [1, 1]} : vector<8x27xf32> to vector<8x3xf32>
    %c0_35 = arith.constant 0 : index
    %c0_36 = arith.constant 0 : index
    %c37 = arith.constant 37 : index
    %44 = vector.load %arg1[%c0_35, %c0_36, %c37] : memref<1x3x384xf32, #tpu.memory_space<vmem>>, vector<1x3x288xf32>
    %45 = vector.shape_cast %44 : vector<1x3x288xf32> to vector<3x288xf32>
    %cst_37 = arith.constant dense<0.000000e+00> : vector<8x288xf32>
    %46 = tpu.matmul %43, %45, %cst_37 {dimension_numbers = #tpu.dot_dimension_numbers<[1], [0], [0], [1], [0, 0, 1, 1], [], []>} : vector<8x3xf32>, vector<3x288xf32>, vector<8x288xf32> -> vector<8x288xf32>
    %47 = arith.addf %42, %46 : vector<8x288xf32>
    %48 = vector.extract_strided_slice %7 {offsets = [0, 24], sizes = [8, 3], strides = [1, 1]} : vector<8x27xf32> to vector<8x3xf32>
    %c0_38 = arith.constant 0 : index
    %c0_39 = arith.constant 0 : index
    %c38 = arith.constant 38 : index
    %49 = vector.load %arg1[%c0_38, %c0_39, %c38] : memref<1x3x384xf32, #tpu.memory_space<vmem>>, vector<1x3x288xf32>
    %50 = vector.shape_cast %49 : vector<1x3x288xf32> to vector<3x288xf32>
    %cst_40 = arith.constant dense<0.000000e+00> : vector<8x288xf32>
    %51 = tpu.matmul %48, %50, %cst_40 {dimension_numbers = #tpu.dot_dimension_numbers<[1], [0], [0], [1], [0, 0, 1, 1], [], []>} : vector<8x3xf32>, vector<3x288xf32>, vector<8x288xf32> -> vector<8x288xf32>
    %52 = arith.addf %47, %51 : vector<8x288xf32>
    %53 = vector.broadcast %8 : vector<8x1xf32> to vector<8x288xf32>
    %54 = arith.addf %52, %53 : vector<8x288xf32>
    %55 = vector.broadcast %0 : vector<1x288xf32> to vector<8x288xf32>
    %56 = arith.mulf %54, %55 : vector<8x288xf32>
    %c0_41 = arith.constant 0 : index
    %c19_42 = arith.constant 19 : index
    %57 = vector.load %arg12[%c0_41, %c19_42] : memref<8x384xf32, #tpu.memory_space<vmem>>, vector<8x288xf32>
    tpu.vector_store %arg12[%c0_41, %c19_42], %56 {strides = array<i32>} : memref<8x384xf32, #tpu.memory_space<vmem>>, vector<8x288xf32>,
    %c0_43 = arith.constant 0 : index
    %c19_44 = arith.constant 19 : index
    %58 = vector.load %arg13[%c0_43, %c19_44] : memref<8x384xf32, #tpu.memory_space<vmem>>, vector<8x288xf32>
    tpu.vector_store %arg13[%c0_43, %c19_44], %56 {strides = array<i32>} : memref<8x384xf32, #tpu.memory_space<vmem>>, vector<8x288xf32>,
    %c0_45 = arith.constant 0 : index
    %c0_46 = arith.constant 0 : index
    %c0_47 = arith.constant 0 : index
    %59 = vector.load %arg5[%c0_45, %c0_46, %c0_47] : memref<4x8x72xf32, #tpu.memory_space<vmem>>, vector<1x8x72xf32>
    %60 = vector.shape_cast %59 : vector<1x8x72xf32> to vector<8x72xf32>
    %c0_48 = arith.constant 0 : index
    %c0_49 = arith.constant 0 : index
    %c0_50 = arith.constant 0 : index
    %61 = vector.load %arg6[%c0_48, %c0_49, %c0_50] : memref<4x8x1xf32, #tpu.memory_space<vmem>>, vector<1x8x1xf32>
    %62 = vector.shape_cast %61 : vector<1x8x1xf32> to vector<8x1xf32>
    %c0_51 = arith.constant 0 : index
    %c0_52 = arith.constant 0 : index
    %63 = vector.load %arg13[%c0_51, %c0_52] : memref<8x384xf32, #tpu.memory_space<vmem>>, vector<8x288xf32>
    %c0_53 = arith.constant 0 : index
    %c0_54 = arith.constant 0 : index
    %64 = vector.load %arg15[%c0_53, %c0_54] : memref<72x288xf32, #tpu.memory_space<vmem>>, vector<8x288xf32>
    tpu.vector_store %arg15[%c0_53, %c0_54], %63 {strides = array<i32>} : memref<72x288xf32, #tpu.memory_space<vmem>>, vector<8x288xf32>,
    %c0_55 = arith.constant 0 : index
    %c1_56 = arith.constant 1 : index
    %65 = vector.load %arg13[%c0_55, %c1_56] : memref<8x384xf32, #tpu.memory_space<vmem>>, vector<8x288xf32>
    %c8 = arith.constant 8 : index
    %c0_57 = arith.constant 0 : index
    %66 = vector.load %arg15[%c8, %c0_57] : memref<72x288xf32, #tpu.memory_space<vmem>>, vector<8x288xf32>
    tpu.vector_store %arg15[%c8, %c0_57], %65 {strides = array<i32>} : memref<72x288xf32, #tpu.memory_space<vmem>>, vector<8x288xf32>,
    %c0_58 = arith.constant 0 : index
    %c2_59 = arith.constant 2 : index
    %67 = vector.load %arg13[%c0_58, %c2_59] : memref<8x384xf32, #tpu.memory_space<vmem>>, vector<8x288xf32>
    %c16 = arith.constant 16 : index
    %c0_60 = arith.constant 0 : index
    %68 = vector.load %arg15[%c16, %c0_60] : memref<72x288xf32, #tpu.memory_space<vmem>>, vector<8x288xf32>
    tpu.vector_store %arg15[%c16, %c0_60], %67 {strides = array<i32>} : memref<72x288xf32, #tpu.memory_space<vmem>>, vector<8x288xf32>,
    %c0_61 = arith.constant 0 : index
    %c18_62 = arith.constant 18 : index
    %69 = vector.load %arg13[%c0_61, %c18_62] : memref<8x384xf32, #tpu.memory_space<vmem>>, vector<8x288xf32>
    %c24 = arith.constant 24 : index
    %c0_63 = arith.constant 0 : index
    %70 = vector.load %arg15[%c24, %c0_63] : memref<72x288xf32, #tpu.memory_space<vmem>>, vector<8x288xf32>
    tpu.vector_store %arg15[%c24, %c0_63], %69 {strides = array<i32>} : memref<72x288xf32, #tpu.memory_space<vmem>>, vector<8x288xf32>,
    %c0_64 = arith.constant 0 : index
    %c19_65 = arith.constant 19 : index
    %71 = vector.load %arg13[%c0_64, %c19_65] : memref<8x384xf32, #tpu.memory_space<vmem>>, vector<8x288xf32>
    %c32 = arith.constant 32 : index
    %c0_66 = arith.constant 0 : index
    %72 = vector.load %arg15[%c32, %c0_66] : memref<72x288xf32, #tpu.memory_space<vmem>>, vector<8x288xf32>
    tpu.vector_store %arg15[%c32, %c0_66], %71 {strides = array<i32>} : memref<72x288xf32, #tpu.memory_space<vmem>>, vector<8x288xf32>,
    %c0_67 = arith.constant 0 : index
    %c20_68 = arith.constant 20 : index
    %73 = vector.load %arg13[%c0_67, %c20_68] : memref<8x384xf32, #tpu.memory_space<vmem>>, vector<8x288xf32>
    %c40 = arith.constant 40 : index
    %c0_69 = arith.constant 0 : index
    %74 = vector.load %arg15[%c40, %c0_69] : memref<72x288xf32, #tpu.memory_space<vmem>>, vector<8x288xf32>
    tpu.vector_store %arg15[%c40, %c0_69], %73 {strides = array<i32>} : memref<72x288xf32, #tpu.memory_space<vmem>>, vector<8x288xf32>,
    %c0_70 = arith.constant 0 : index
    %c36_71 = arith.constant 36 : index
    %75 = vector.load %arg13[%c0_70, %c36_71] : memref<8x384xf32, #tpu.memory_space<vmem>>, vector<8x288xf32>
    %c48 = arith.constant 48 : index
    %c0_72 = arith.constant 0 : index
    %76 = vector.load %arg15[%c48, %c0_72] : memref<72x288xf32, #tpu.memory_space<vmem>>, vector<8x288xf32>
    tpu.vector_store %arg15[%c48, %c0_72], %75 {strides = array<i32>} : memref<72x288xf32, #tpu.memory_space<vmem>>, vector<8x288xf32>,
    %c0_73 = arith.constant 0 : index
    %c37_74 = arith.constant 37 : index
    %77 = vector.load %arg13[%c0_73, %c37_74] : memref<8x384xf32, #tpu.memory_space<vmem>>, vector<8x288xf32>
    %c56 = arith.constant 56 : index
    %c0_75 = arith.constant 0 : index
    %78 = vector.load %arg15[%c56, %c0_75] : memref<72x288xf32, #tpu.memory_space<vmem>>, vector<8x288xf32>
    tpu.vector_store %arg15[%c56, %c0_75], %77 {strides = array<i32>} : memref<72x288xf32, #tpu.memory_space<vmem>>, vector<8x288xf32>,
    %c0_76 = arith.constant 0 : index
    %c38_77 = arith.constant 38 : index
    %79 = vector.load %arg13[%c0_76, %c38_77] : memref<8x384xf32, #tpu.memory_space<vmem>>, vector<8x288xf32>
    %c64 = arith.constant 64 : index
    %c0_78 = arith.constant 0 : index
    %80 = vector.load %arg15[%c64, %c0_78] : memref<72x288xf32, #tpu.memory_space<vmem>>, vector<8x288xf32>
    tpu.vector_store %arg15[%c64, %c0_78], %79 {strides = array<i32>} : memref<72x288xf32, #tpu.memory_space<vmem>>, vector<8x288xf32>,
    %c0_79 = arith.constant 0 : index
    %c0_80 = arith.constant 0 : index
    %81 = vector.load %arg15[%c0_79, %c0_80] : memref<72x288xf32, #tpu.memory_space<vmem>>, vector<72x288xf32>
    %cst_81 = arith.constant dense<0.000000e+00> : vector<8x288xf32>
    %82 = tpu.matmul %60, %81, %cst_81 {dimension_numbers = #tpu.dot_dimension_numbers<[1], [0], [0], [1], [0, 0, 1, 1], [], []>} : vector<8x72xf32>, vector<72x288xf32>, vector<8x288xf32> -> vector<8x288xf32>
    %83 = vector.broadcast %62 : vector<8x1xf32> to vector<8x288xf32>
    %84 = arith.addf %82, %83 : vector<8x288xf32>
    %cst_82 = arith.constant 0.000000e+00 : f32
    %85 = vector.broadcast %cst_82 : f32 to vector<8x288xf32>
    %86 = arith.maximumf %84, %85 : vector<8x288xf32>
    %87 = vector.broadcast %0 : vector<1x288xf32> to vector<8x288xf32>
    %88 = arith.mulf %86, %87 : vector<8x288xf32>
    %c0_83 = arith.constant 0 : index
    %c19_84 = arith.constant 19 : index
    %89 = vector.load %arg14[%c0_83, %c19_84] : memref<8x384xf32, #tpu.memory_space<vmem>>, vector<8x288xf32>
    tpu.vector_store %arg14[%c0_83, %c19_84], %88 {strides = array<i32>} : memref<8x384xf32, #tpu.memory_space<vmem>>, vector<8x288xf32>,
    %c1_85 = arith.constant 1 : index
    %c0_86 = arith.constant 0 : index
    %c0_87 = arith.constant 0 : index
    %90 = vector.load %arg5[%c1_85, %c0_86, %c0_87] : memref<4x8x72xf32, #tpu.memory_space<vmem>>, vector<1x8x72xf32>
    %91 = vector.shape_cast %90 : vector<1x8x72xf32> to vector<8x72xf32>
    %c1_88 = arith.constant 1 : index
    %c0_89 = arith.constant 0 : index
    %c0_90 = arith.constant 0 : index
    %92 = vector.load %arg6[%c1_88, %c0_89, %c0_90] : memref<4x8x1xf32, #tpu.memory_space<vmem>>, vector<1x8x1xf32>
    %93 = vector.shape_cast %92 : vector<1x8x1xf32> to vector<8x1xf32>
    %c0_91 = arith.constant 0 : index
    %c0_92 = arith.constant 0 : index
    %94 = vector.load %arg14[%c0_91, %c0_92] : memref<8x384xf32, #tpu.memory_space<vmem>>, vector<8x288xf32>
    %c0_93 = arith.constant 0 : index
    %c0_94 = arith.constant 0 : index
    %95 = vector.load %arg15[%c0_93, %c0_94] : memref<72x288xf32, #tpu.memory_space<vmem>>, vector<8x288xf32>
    tpu.vector_store %arg15[%c0_93, %c0_94], %94 {strides = array<i32>} : memref<72x288xf32, #tpu.memory_space<vmem>>, vector<8x288xf32>,
    %c0_95 = arith.constant 0 : index
    %c1_96 = arith.constant 1 : index
    %96 = vector.load %arg14[%c0_95, %c1_96] : memref<8x384xf32, #tpu.memory_space<vmem>>, vector<8x288xf32>
    %c8_97 = arith.constant 8 : index
    %c0_98 = arith.constant 0 : index
    %97 = vector.load %arg15[%c8_97, %c0_98] : memref<72x288xf32, #tpu.memory_space<vmem>>, vector<8x288xf32>
    tpu.vector_store %arg15[%c8_97, %c0_98], %96 {strides = array<i32>} : memref<72x288xf32, #tpu.memory_space<vmem>>, vector<8x288xf32>,
    %c0_99 = arith.constant 0 : index
    %c2_100 = arith.constant 2 : index
    %98 = vector.load %arg14[%c0_99, %c2_100] : memref<8x384xf32, #tpu.memory_space<vmem>>, vector<8x288xf32>
    %c16_101 = arith.constant 16 : index
    %c0_102 = arith.constant 0 : index
    %99 = vector.load %arg15[%c16_101, %c0_102] : memref<72x288xf32, #tpu.memory_space<vmem>>, vector<8x288xf32>
    tpu.vector_store %arg15[%c16_101, %c0_102], %98 {strides = array<i32>} : memref<72x288xf32, #tpu.memory_space<vmem>>, vector<8x288xf32>,
    %c0_103 = arith.constant 0 : index
    %c18_104 = arith.constant 18 : index
    %100 = vector.load %arg14[%c0_103, %c18_104] : memref<8x384xf32, #tpu.memory_space<vmem>>, vector<8x288xf32>
    %c24_105 = arith.constant 24 : index
    %c0_106 = arith.constant 0 : index
    %101 = vector.load %arg15[%c24_105, %c0_106] : memref<72x288xf32, #tpu.memory_space<vmem>>, vector<8x288xf32>
    tpu.vector_store %arg15[%c24_105, %c0_106], %100 {strides = array<i32>} : memref<72x288xf32, #tpu.memory_space<vmem>>, vector<8x288xf32>,
    %c0_107 = arith.constant 0 : index
    %c19_108 = arith.constant 19 : index
    %102 = vector.load %arg14[%c0_107, %c19_108] : memref<8x384xf32, #tpu.memory_space<vmem>>, vector<8x288xf32>
    %c32_109 = arith.constant 32 : index
    %c0_110 = arith.constant 0 : index
    %103 = vector.load %arg15[%c32_109, %c0_110] : memref<72x288xf32, #tpu.memory_space<vmem>>, vector<8x288xf32>
    tpu.vector_store %arg15[%c32_109, %c0_110], %102 {strides = array<i32>} : memref<72x288xf32, #tpu.memory_space<vmem>>, vector<8x288xf32>,
    %c0_111 = arith.constant 0 : index
    %c20_112 = arith.constant 20 : index
    %104 = vector.load %arg14[%c0_111, %c20_112] : memref<8x384xf32, #tpu.memory_space<vmem>>, vector<8x288xf32>
    %c40_113 = arith.constant 40 : index
    %c0_114 = arith.constant 0 : index
    %105 = vector.load %arg15[%c40_113, %c0_114] : memref<72x288xf32, #tpu.memory_space<vmem>>, vector<8x288xf32>
    tpu.vector_store %arg15[%c40_113, %c0_114], %104 {strides = array<i32>} : memref<72x288xf32, #tpu.memory_space<vmem>>, vector<8x288xf32>,
    %c0_115 = arith.constant 0 : index
    %c36_116 = arith.constant 36 : index
    %106 = vector.load %arg14[%c0_115, %c36_116] : memref<8x384xf32, #tpu.memory_space<vmem>>, vector<8x288xf32>
    %c48_117 = arith.constant 48 : index
    %c0_118 = arith.constant 0 : index
    %107 = vector.load %arg15[%c48_117, %c0_118] : memref<72x288xf32, #tpu.memory_space<vmem>>, vector<8x288xf32>
    tpu.vector_store %arg15[%c48_117, %c0_118], %106 {strides = array<i32>} : memref<72x288xf32, #tpu.memory_space<vmem>>, vector<8x288xf32>,
    %c0_119 = arith.constant 0 : index
    %c37_120 = arith.constant 37 : index
    %108 = vector.load %arg14[%c0_119, %c37_120] : memref<8x384xf32, #tpu.memory_space<vmem>>, vector<8x288xf32>
    %c56_121 = arith.constant 56 : index
    %c0_122 = arith.constant 0 : index
    %109 = vector.load %arg15[%c56_121, %c0_122] : memref<72x288xf32, #tpu.memory_space<vmem>>, vector<8x288xf32>
    tpu.vector_store %arg15[%c56_121, %c0_122], %108 {strides = array<i32>} : memref<72x288xf32, #tpu.memory_space<vmem>>, vector<8x288xf32>,
    %c0_123 = arith.constant 0 : index
    %c38_124 = arith.constant 38 : index
    %110 = vector.load %arg14[%c0_123, %c38_124] : memref<8x384xf32, #tpu.memory_space<vmem>>, vector<8x288xf32>
    %c64_125 = arith.constant 64 : index
    %c0_126 = arith.constant 0 : index
    %111 = vector.load %arg15[%c64_125, %c0_126] : memref<72x288xf32, #tpu.memory_space<vmem>>, vector<8x288xf32>
    tpu.vector_store %arg15[%c64_125, %c0_126], %110 {strides = array<i32>} : memref<72x288xf32, #tpu.memory_space<vmem>>, vector<8x288xf32>,
    %c0_127 = arith.constant 0 : index
    %c0_128 = arith.constant 0 : index
    %112 = vector.load %arg15[%c0_127, %c0_128] : memref<72x288xf32, #tpu.memory_space<vmem>>, vector<72x288xf32>
    %cst_129 = arith.constant dense<0.000000e+00> : vector<8x288xf32>
    %113 = tpu.matmul %91, %112, %cst_129 {dimension_numbers = #tpu.dot_dimension_numbers<[1], [0], [0], [1], [0, 0, 1, 1], [], []>} : vector<8x72xf32>, vector<72x288xf32>, vector<8x288xf32> -> vector<8x288xf32>
    %114 = vector.broadcast %93 : vector<8x1xf32> to vector<8x288xf32>
    %115 = arith.addf %113, %114 : vector<8x288xf32>
    %cst_130 = arith.constant 1.000000e+00 : f32
    %116 = vector.broadcast %cst_130 : f32 to vector<8x288xf32>
    %117 = arith.mulf %115, %116 : vector<8x288xf32>
    %118 = vector.broadcast %0 : vector<1x288xf32> to vector<8x288xf32>
    %119 = arith.mulf %117, %118 : vector<8x288xf32>
    %c0_131 = arith.constant 0 : index
    %c19_132 = arith.constant 19 : index
    %120 = vector.load %arg13[%c0_131, %c19_132] : memref<8x384xf32, #tpu.memory_space<vmem>>, vector<8x288xf32>
    %121 = arith.addf %119, %120 : vector<8x288xf32>
    %c0_133 = arith.constant 0 : index
    %c19_134 = arith.constant 19 : index
    %122 = vector.load %arg13[%c0_133, %c19_134] : memref<8x384xf32, #tpu.memory_space<vmem>>, vector<8x288xf32>
    tpu.vector_store %arg13[%c0_133, %c19_134], %121 {strides = array<i32>} : memref<8x384xf32, #tpu.memory_space<vmem>>, vector<8x288xf32>,
    %c2_135 = arith.constant 2 : index
    %c0_136 = arith.constant 0 : index
    %c0_137 = arith.constant 0 : index
    %123 = vector.load %arg5[%c2_135, %c0_136, %c0_137] : memref<4x8x72xf32, #tpu.memory_space<vmem>>, vector<1x8x72xf32>
    %124 = vector.shape_cast %123 : vector<1x8x72xf32> to vector<8x72xf32>
    %c2_138 = arith.constant 2 : index
    %c0_139 = arith.constant 0 : index
    %c0_140 = arith.constant 0 : index
    %125 = vector.load %arg6[%c2_138, %c0_139, %c0_140] : memref<4x8x1xf32, #tpu.memory_space<vmem>>, vector<1x8x1xf32>
    %126 = vector.shape_cast %125 : vector<1x8x1xf32> to vector<8x1xf32>
    %c0_141 = arith.constant 0 : index
    %c0_142 = arith.constant 0 : index
    %127 = vector.load %arg13[%c0_141, %c0_142] : memref<8x384xf32, #tpu.memory_space<vmem>>, vector<8x288xf32>
    %c0_143 = arith.constant 0 : index
    %c0_144 = arith.constant 0 : index
    %128 = vector.load %arg15[%c0_143, %c0_144] : memref<72x288xf32, #tpu.memory_space<vmem>>, vector<8x288xf32>
    tpu.vector_store %arg15[%c0_143, %c0_144], %127 {strides = array<i32>} : memref<72x288xf32, #tpu.memory_space<vmem>>, vector<8x288xf32>,
    %c0_145 = arith.constant 0 : index
    %c1_146 = arith.constant 1 : index
    %129 = vector.load %arg13[%c0_145, %c1_146] : memref<8x384xf32, #tpu.memory_space<vmem>>, vector<8x288xf32>
    %c8_147 = arith.constant 8 : index
    %c0_148 = arith.constant 0 : index
    %130 = vector.load %arg15[%c8_147, %c0_148] : memref<72x288xf32, #tpu.memory_space<vmem>>, vector<8x288xf32>
    tpu.vector_store %arg15[%c8_147, %c0_148], %129 {strides = array<i32>} : memref<72x288xf32, #tpu.memory_space<vmem>>, vector<8x288xf32>,
    %c0_149 = arith.constant 0 : index
    %c2_150 = arith.constant 2 : index
    %131 = vector.load %arg13[%c0_149, %c2_150] : memref<8x384xf32, #tpu.memory_space<vmem>>, vector<8x288xf32>
    %c16_151 = arith.constant 16 : index
    %c0_152 = arith.constant 0 : index
    %132 = vector.load %arg15[%c16_151, %c0_152] : memref<72x288xf32, #tpu.memory_space<vmem>>, vector<8x288xf32>
    tpu.vector_store %arg15[%c16_151, %c0_152], %131 {strides = array<i32>} : memref<72x288xf32, #tpu.memory_space<vmem>>, vector<8x288xf32>,
    %c0_153 = arith.constant 0 : index
    %c18_154 = arith.constant 18 : index
    %133 = vector.load %arg13[%c0_153, %c18_154] : memref<8x384xf32, #tpu.memory_space<vmem>>, vector<8x288xf32>
    %c24_155 = arith.constant 24 : index
    %c0_156 = arith.constant 0 : index
    %134 = vector.load %arg15[%c24_155, %c0_156] : memref<72x288xf32, #tpu.memory_space<vmem>>, vector<8x288xf32>
    tpu.vector_store %arg15[%c24_155, %c0_156], %133 {strides = array<i32>} : memref<72x288xf32, #tpu.memory_space<vmem>>, vector<8x288xf32>,
    %c0_157 = arith.constant 0 : index
    %c19_158 = arith.constant 19 : index
    %135 = vector.load %arg13[%c0_157, %c19_158] : memref<8x384xf32, #tpu.memory_space<vmem>>, vector<8x288xf32>
    %c32_159 = arith.constant 32 : index
    %c0_160 = arith.constant 0 : index
    %136 = vector.load %arg15[%c32_159, %c0_160] : memref<72x288xf32, #tpu.memory_space<vmem>>, vector<8x288xf32>
    tpu.vector_store %arg15[%c32_159, %c0_160], %135 {strides = array<i32>} : memref<72x288xf32, #tpu.memory_space<vmem>>, vector<8x288xf32>,
    %c0_161 = arith.constant 0 : index
    %c20_162 = arith.constant 20 : index
    %137 = vector.load %arg13[%c0_161, %c20_162] : memref<8x384xf32, #tpu.memory_space<vmem>>, vector<8x288xf32>
    %c40_163 = arith.constant 40 : index
    %c0_164 = arith.constant 0 : index
    %138 = vector.load %arg15[%c40_163, %c0_164] : memref<72x288xf32, #tpu.memory_space<vmem>>, vector<8x288xf32>
    tpu.vector_store %arg15[%c40_163, %c0_164], %137 {strides = array<i32>} : memref<72x288xf32, #tpu.memory_space<vmem>>, vector<8x288xf32>,
    %c0_165 = arith.constant 0 : index
    %c36_166 = arith.constant 36 : index
    %139 = vector.load %arg13[%c0_165, %c36_166] : memref<8x384xf32, #tpu.memory_space<vmem>>, vector<8x288xf32>
    %c48_167 = arith.constant 48 : index
    %c0_168 = arith.constant 0 : index
    %140 = vector.load %arg15[%c48_167, %c0_168] : memref<72x288xf32, #tpu.memory_space<vmem>>, vector<8x288xf32>
    tpu.vector_store %arg15[%c48_167, %c0_168], %139 {strides = array<i32>} : memref<72x288xf32, #tpu.memory_space<vmem>>, vector<8x288xf32>,
    %c0_169 = arith.constant 0 : index
    %c37_170 = arith.constant 37 : index
    %141 = vector.load %arg13[%c0_169, %c37_170] : memref<8x384xf32, #tpu.memory_space<vmem>>, vector<8x288xf32>
    %c56_171 = arith.constant 56 : index
    %c0_172 = arith.constant 0 : index
    %142 = vector.load %arg15[%c56_171, %c0_172] : memref<72x288xf32, #tpu.memory_space<vmem>>, vector<8x288xf32>
    tpu.vector_store %arg15[%c56_171, %c0_172], %141 {strides = array<i32>} : memref<72x288xf32, #tpu.memory_space<vmem>>, vector<8x288xf32>,
    %c0_173 = arith.constant 0 : index
    %c38_174 = arith.constant 38 : index
    %143 = vector.load %arg13[%c0_173, %c38_174] : memref<8x384xf32, #tpu.memory_space<vmem>>, vector<8x288xf32>
    %c64_175 = arith.constant 64 : index
    %c0_176 = arith.constant 0 : index
    %144 = vector.load %arg15[%c64_175, %c0_176] : memref<72x288xf32, #tpu.memory_space<vmem>>, vector<8x288xf32>
    tpu.vector_store %arg15[%c64_175, %c0_176], %143 {strides = array<i32>} : memref<72x288xf32, #tpu.memory_space<vmem>>, vector<8x288xf32>,
    %c0_177 = arith.constant 0 : index
    %c0_178 = arith.constant 0 : index
    %145 = vector.load %arg15[%c0_177, %c0_178] : memref<72x288xf32, #tpu.memory_space<vmem>>, vector<72x288xf32>
    %cst_179 = arith.constant dense<0.000000e+00> : vector<8x288xf32>
    %146 = tpu.matmul %124, %145, %cst_179 {dimension_numbers = #tpu.dot_dimension_numbers<[1], [0], [0], [1], [0, 0, 1, 1], [], []>} : vector<8x72xf32>, vector<72x288xf32>, vector<8x288xf32> -> vector<8x288xf32>
    %147 = vector.broadcast %126 : vector<8x1xf32> to vector<8x288xf32>
    %148 = arith.addf %146, %147 : vector<8x288xf32>
    %cst_180 = arith.constant 0.000000e+00 : f32
    %149 = vector.broadcast %cst_180 : f32 to vector<8x288xf32>
    %150 = arith.maximumf %148, %149 : vector<8x288xf32>
    %151 = vector.broadcast %0 : vector<1x288xf32> to vector<8x288xf32>
    %152 = arith.mulf %150, %151 : vector<8x288xf32>
    %c0_181 = arith.constant 0 : index
    %c19_182 = arith.constant 19 : index
    %153 = vector.load %arg14[%c0_181, %c19_182] : memref<8x384xf32, #tpu.memory_space<vmem>>, vector<8x288xf32>
    tpu.vector_store %arg14[%c0_181, %c19_182], %152 {strides = array<i32>} : memref<8x384xf32, #tpu.memory_space<vmem>>, vector<8x288xf32>,
    %c3 = arith.constant 3 : index
    %c0_183 = arith.constant 0 : index
    %c0_184 = arith.constant 0 : index
    %154 = vector.load %arg5[%c3, %c0_183, %c0_184] : memref<4x8x72xf32, #tpu.memory_space<vmem>>, vector<1x8x72xf32>
    %155 = vector.shape_cast %154 : vector<1x8x72xf32> to vector<8x72xf32>
    %c3_185 = arith.constant 3 : index
    %c0_186 = arith.constant 0 : index
    %c0_187 = arith.constant 0 : index
    %156 = vector.load %arg6[%c3_185, %c0_186, %c0_187] : memref<4x8x1xf32, #tpu.memory_space<vmem>>, vector<1x8x1xf32>
    %157 = vector.shape_cast %156 : vector<1x8x1xf32> to vector<8x1xf32>
    %c0_188 = arith.constant 0 : index
    %c0_189 = arith.constant 0 : index
    %158 = vector.load %arg14[%c0_188, %c0_189] : memref<8x384xf32, #tpu.memory_space<vmem>>, vector<8x288xf32>
    %c0_190 = arith.constant 0 : index
    %c0_191 = arith.constant 0 : index
    %159 = vector.load %arg15[%c0_190, %c0_191] : memref<72x288xf32, #tpu.memory_space<vmem>>, vector<8x288xf32>
    tpu.vector_store %arg15[%c0_190, %c0_191], %158 {strides = array<i32>} : memref<72x288xf32, #tpu.memory_space<vmem>>, vector<8x288xf32>,
    %c0_192 = arith.constant 0 : index
    %c1_193 = arith.constant 1 : index
    %160 = vector.load %arg14[%c0_192, %c1_193] : memref<8x384xf32, #tpu.memory_space<vmem>>, vector<8x288xf32>
    %c8_194 = arith.constant 8 : index
    %c0_195 = arith.constant 0 : index
    %161 = vector.load %arg15[%c8_194, %c0_195] : memref<72x288xf32, #tpu.memory_space<vmem>>, vector<8x288xf32>
    tpu.vector_store %arg15[%c8_194, %c0_195], %160 {strides = array<i32>} : memref<72x288xf32, #tpu.memory_space<vmem>>, vector<8x288xf32>,
    %c0_196 = arith.constant 0 : index
    %c2_197 = arith.constant 2 : index
    %162 = vector.load %arg14[%c0_196, %c2_197] : memref<8x384xf32, #tpu.memory_space<vmem>>, vector<8x288xf32>
    %c16_198 = arith.constant 16 : index
    %c0_199 = arith.constant 0 : index
    %163 = vector.load %arg15[%c16_198, %c0_199] : memref<72x288xf32, #tpu.memory_space<vmem>>, vector<8x288xf32>
    tpu.vector_store %arg15[%c16_198, %c0_199], %162 {strides = array<i32>} : memref<72x288xf32, #tpu.memory_space<vmem>>, vector<8x288xf32>,
    %c0_200 = arith.constant 0 : index
    %c18_201 = arith.constant 18 : index
    %164 = vector.load %arg14[%c0_200, %c18_201] : memref<8x384xf32, #tpu.memory_space<vmem>>, vector<8x288xf32>
    %c24_202 = arith.constant 24 : index
    %c0_203 = arith.constant 0 : index
    %165 = vector.load %arg15[%c24_202, %c0_203] : memref<72x288xf32, #tpu.memory_space<vmem>>, vector<8x288xf32>
    tpu.vector_store %arg15[%c24_202, %c0_203], %164 {strides = array<i32>} : memref<72x288xf32, #tpu.memory_space<vmem>>, vector<8x288xf32>,
    %c0_204 = arith.constant 0 : index
    %c19_205 = arith.constant 19 : index
    %166 = vector.load %arg14[%c0_204, %c19_205] : memref<8x384xf32, #tpu.memory_space<vmem>>, vector<8x288xf32>
    %c32_206 = arith.constant 32 : index
    %c0_207 = arith.constant 0 : index
    %167 = vector.load %arg15[%c32_206, %c0_207] : memref<72x288xf32, #tpu.memory_space<vmem>>, vector<8x288xf32>
    tpu.vector_store %arg15[%c32_206, %c0_207], %166 {strides = array<i32>} : memref<72x288xf32, #tpu.memory_space<vmem>>, vector<8x288xf32>,
    %c0_208 = arith.constant 0 : index
    %c20_209 = arith.constant 20 : index
    %168 = vector.load %arg14[%c0_208, %c20_209] : memref<8x384xf32, #tpu.memory_space<vmem>>, vector<8x288xf32>
    %c40_210 = arith.constant 40 : index
    %c0_211 = arith.constant 0 : index
    %169 = vector.load %arg15[%c40_210, %c0_211] : memref<72x288xf32, #tpu.memory_space<vmem>>, vector<8x288xf32>
    tpu.vector_store %arg15[%c40_210, %c0_211], %168 {strides = array<i32>} : memref<72x288xf32, #tpu.memory_space<vmem>>, vector<8x288xf32>,
    %c0_212 = arith.constant 0 : index
    %c36_213 = arith.constant 36 : index
    %170 = vector.load %arg14[%c0_212, %c36_213] : memref<8x384xf32, #tpu.memory_space<vmem>>, vector<8x288xf32>
    %c48_214 = arith.constant 48 : index
    %c0_215 = arith.constant 0 : index
    %171 = vector.load %arg15[%c48_214, %c0_215] : memref<72x288xf32, #tpu.memory_space<vmem>>, vector<8x288xf32>
    tpu.vector_store %arg15[%c48_214, %c0_215], %170 {strides = array<i32>} : memref<72x288xf32, #tpu.memory_space<vmem>>, vector<8x288xf32>,
    %c0_216 = arith.constant 0 : index
    %c37_217 = arith.constant 37 : index
    %172 = vector.load %arg14[%c0_216, %c37_217] : memref<8x384xf32, #tpu.memory_space<vmem>>, vector<8x288xf32>
    %c56_218 = arith.constant 56 : index
    %c0_219 = arith.constant 0 : index
    %173 = vector.load %arg15[%c56_218, %c0_219] : memref<72x288xf32, #tpu.memory_space<vmem>>, vector<8x288xf32>
    tpu.vector_store %arg15[%c56_218, %c0_219], %172 {strides = array<i32>} : memref<72x288xf32, #tpu.memory_space<vmem>>, vector<8x288xf32>,
    %c0_220 = arith.constant 0 : index
    %c38_221 = arith.constant 38 : index
    %174 = vector.load %arg14[%c0_220, %c38_221] : memref<8x384xf32, #tpu.memory_space<vmem>>, vector<8x288xf32>
    %c64_222 = arith.constant 64 : index
    %c0_223 = arith.constant 0 : index
    %175 = vector.load %arg15[%c64_222, %c0_223] : memref<72x288xf32, #tpu.memory_space<vmem>>, vector<8x288xf32>
    tpu.vector_store %arg15[%c64_222, %c0_223], %174 {strides = array<i32>} : memref<72x288xf32, #tpu.memory_space<vmem>>, vector<8x288xf32>,
    %c0_224 = arith.constant 0 : index
    %c0_225 = arith.constant 0 : index
    %176 = vector.load %arg15[%c0_224, %c0_225] : memref<72x288xf32, #tpu.memory_space<vmem>>, vector<72x288xf32>
    %cst_226 = arith.constant dense<0.000000e+00> : vector<8x288xf32>
    %177 = tpu.matmul %155, %176, %cst_226 {dimension_numbers = #tpu.dot_dimension_numbers<[1], [0], [0], [1], [0, 0, 1, 1], [], []>} : vector<8x72xf32>, vector<72x288xf32>, vector<8x288xf32> -> vector<8x288xf32>
    %178 = vector.broadcast %157 : vector<8x1xf32> to vector<8x288xf32>
    %179 = arith.addf %177, %178 : vector<8x288xf32>
    %cst_227 = arith.constant 1.000000e+00 : f32
    %180 = vector.broadcast %cst_227 : f32 to vector<8x288xf32>
    %181 = arith.mulf %179, %180 : vector<8x288xf32>
    %182 = vector.broadcast %0 : vector<1x288xf32> to vector<8x288xf32>
    %183 = arith.mulf %181, %182 : vector<8x288xf32>
    %c0_228 = arith.constant 0 : index
    %c19_229 = arith.constant 19 : index
    %184 = vector.load %arg13[%c0_228, %c19_229] : memref<8x384xf32, #tpu.memory_space<vmem>>, vector<8x288xf32>
    %185 = arith.addf %183, %184 : vector<8x288xf32>
    %c0_230 = arith.constant 0 : index
    %c19_231 = arith.constant 19 : index
    %186 = vector.load %arg13[%c0_230, %c19_231] : memref<8x384xf32, #tpu.memory_space<vmem>>, vector<8x288xf32>
    tpu.vector_store %arg13[%c0_230, %c19_231], %185 {strides = array<i32>} : memref<8x384xf32, #tpu.memory_space<vmem>>, vector<8x288xf32>,
    %c0_232 = arith.constant 0 : index
    %c0_233 = arith.constant 0 : index
    %187 = vector.load %arg7[%c0_232, %c0_233] : memref<8x72xf32, #tpu.memory_space<vmem>>, vector<8x72xf32>
    %c0_234 = arith.constant 0 : index
    %c0_235 = arith.constant 0 : index
    %188 = vector.load %arg8[%c0_234, %c0_235] : memref<8x1xf32, #tpu.memory_space<vmem>>, vector<8x1xf32>
    %c0_236 = arith.constant 0 : index
    %c0_237 = arith.constant 0 : index
    %189 = vector.load %arg13[%c0_236, %c0_237] : memref<8x384xf32, #tpu.memory_space<vmem>>, vector<8x288xf32>
    %c0_238 = arith.constant 0 : index
    %c0_239 = arith.constant 0 : index
    %190 = vector.load %arg15[%c0_238, %c0_239] : memref<72x288xf32, #tpu.memory_space<vmem>>, vector<8x288xf32>
    tpu.vector_store %arg15[%c0_238, %c0_239], %189 {strides = array<i32>} : memref<72x288xf32, #tpu.memory_space<vmem>>, vector<8x288xf32>,
    %c0_240 = arith.constant 0 : index
    %c1_241 = arith.constant 1 : index
    %191 = vector.load %arg13[%c0_240, %c1_241] : memref<8x384xf32, #tpu.memory_space<vmem>>, vector<8x288xf32>
    %c8_242 = arith.constant 8 : index
    %c0_243 = arith.constant 0 : index
    %192 = vector.load %arg15[%c8_242, %c0_243] : memref<72x288xf32, #tpu.memory_space<vmem>>, vector<8x288xf32>
    tpu.vector_store %arg15[%c8_242, %c0_243], %191 {strides = array<i32>} : memref<72x288xf32, #tpu.memory_space<vmem>>, vector<8x288xf32>,
    %c0_244 = arith.constant 0 : index
    %c2_245 = arith.constant 2 : index
    %193 = vector.load %arg13[%c0_244, %c2_245] : memref<8x384xf32, #tpu.memory_space<vmem>>, vector<8x288xf32>
    %c16_246 = arith.constant 16 : index
    %c0_247 = arith.constant 0 : index
    %194 = vector.load %arg15[%c16_246, %c0_247] : memref<72x288xf32, #tpu.memory_space<vmem>>, vector<8x288xf32>
    tpu.vector_store %arg15[%c16_246, %c0_247], %193 {strides = array<i32>} : memref<72x288xf32, #tpu.memory_space<vmem>>, vector<8x288xf32>,
    %c0_248 = arith.constant 0 : index
    %c18_249 = arith.constant 18 : index
    %195 = vector.load %arg13[%c0_248, %c18_249] : memref<8x384xf32, #tpu.memory_space<vmem>>, vector<8x288xf32>
    %c24_250 = arith.constant 24 : index
    %c0_251 = arith.constant 0 : index
    %196 = vector.load %arg15[%c24_250, %c0_251] : memref<72x288xf32, #tpu.memory_space<vmem>>, vector<8x288xf32>
    tpu.vector_store %arg15[%c24_250, %c0_251], %195 {strides = array<i32>} : memref<72x288xf32, #tpu.memory_space<vmem>>, vector<8x288xf32>,
    %c0_252 = arith.constant 0 : index
    %c19_253 = arith.constant 19 : index
    %197 = vector.load %arg13[%c0_252, %c19_253] : memref<8x384xf32, #tpu.memory_space<vmem>>, vector<8x288xf32>
    %c32_254 = arith.constant 32 : index
    %c0_255 = arith.constant 0 : index
    %198 = vector.load %arg15[%c32_254, %c0_255] : memref<72x288xf32, #tpu.memory_space<vmem>>, vector<8x288xf32>
    tpu.vector_store %arg15[%c32_254, %c0_255], %197 {strides = array<i32>} : memref<72x288xf32, #tpu.memory_space<vmem>>, vector<8x288xf32>,
    %c0_256 = arith.constant 0 : index
    %c20_257 = arith.constant 20 : index
    %199 = vector.load %arg13[%c0_256, %c20_257] : memref<8x384xf32, #tpu.memory_space<vmem>>, vector<8x288xf32>
    %c40_258 = arith.constant 40 : index
    %c0_259 = arith.constant 0 : index
    %200 = vector.load %arg15[%c40_258, %c0_259] : memref<72x288xf32, #tpu.memory_space<vmem>>, vector<8x288xf32>
    tpu.vector_store %arg15[%c40_258, %c0_259], %199 {strides = array<i32>} : memref<72x288xf32, #tpu.memory_space<vmem>>, vector<8x288xf32>,
    %c0_260 = arith.constant 0 : index
    %c36_261 = arith.constant 36 : index
    %201 = vector.load %arg13[%c0_260, %c36_261] : memref<8x384xf32, #tpu.memory_space<vmem>>, vector<8x288xf32>
    %c48_262 = arith.constant 48 : index
    %c0_263 = arith.constant 0 : index
    %202 = vector.load %arg15[%c48_262, %c0_263] : memref<72x288xf32, #tpu.memory_space<vmem>>, vector<8x288xf32>
    tpu.vector_store %arg15[%c48_262, %c0_263], %201 {strides = array<i32>} : memref<72x288xf32, #tpu.memory_space<vmem>>, vector<8x288xf32>,
    %c0_264 = arith.constant 0 : index
    %c37_265 = arith.constant 37 : index
    %203 = vector.load %arg13[%c0_264, %c37_265] : memref<8x384xf32, #tpu.memory_space<vmem>>, vector<8x288xf32>
    %c56_266 = arith.constant 56 : index
    %c0_267 = arith.constant 0 : index
    %204 = vector.load %arg15[%c56_266, %c0_267] : memref<72x288xf32, #tpu.memory_space<vmem>>, vector<8x288xf32>
    tpu.vector_store %arg15[%c56_266, %c0_267], %203 {strides = array<i32>} : memref<72x288xf32, #tpu.memory_space<vmem>>, vector<8x288xf32>,
    %c0_268 = arith.constant 0 : index
    %c38_269 = arith.constant 38 : index
    %205 = vector.load %arg13[%c0_268, %c38_269] : memref<8x384xf32, #tpu.memory_space<vmem>>, vector<8x288xf32>
    %c64_270 = arith.constant 64 : index
    %c0_271 = arith.constant 0 : index
    %206 = vector.load %arg15[%c64_270, %c0_271] : memref<72x288xf32, #tpu.memory_space<vmem>>, vector<8x288xf32>
    tpu.vector_store %arg15[%c64_270, %c0_271], %205 {strides = array<i32>} : memref<72x288xf32, #tpu.memory_space<vmem>>, vector<8x288xf32>,
    %c0_272 = arith.constant 0 : index
    %c0_273 = arith.constant 0 : index
    %207 = vector.load %arg15[%c0_272, %c0_273] : memref<72x288xf32, #tpu.memory_space<vmem>>, vector<72x288xf32>
    %cst_274 = arith.constant dense<0.000000e+00> : vector<8x288xf32>
    %208 = tpu.matmul %187, %207, %cst_274 {dimension_numbers = #tpu.dot_dimension_numbers<[1], [0], [0], [1], [0, 0, 1, 1], [], []>} : vector<8x72xf32>, vector<72x288xf32>, vector<8x288xf32> -> vector<8x288xf32>
    %209 = vector.broadcast %188 : vector<8x1xf32> to vector<8x288xf32>
    %210 = arith.addf %208, %209 : vector<8x288xf32>
    %211 = vector.broadcast %0 : vector<1x288xf32> to vector<8x288xf32>
    %212 = arith.mulf %210, %211 : vector<8x288xf32>
    %c0_275 = arith.constant 0 : index
    %c19_276 = arith.constant 19 : index
    %213 = vector.load %arg12[%c0_275, %c19_276] : memref<8x384xf32, #tpu.memory_space<vmem>>, vector<8x288xf32>
    %214 = arith.addf %212, %213 : vector<8x288xf32>
    %c0_277 = arith.constant 0 : index
    %c19_278 = arith.constant 19 : index
    %215 = vector.load %arg13[%c0_277, %c19_278] : memref<8x384xf32, #tpu.memory_space<vmem>>, vector<8x288xf32>
    tpu.vector_store %arg13[%c0_277, %c19_278], %214 {strides = array<i32>} : memref<8x384xf32, #tpu.memory_space<vmem>>, vector<8x288xf32>,
    %c0_279 = arith.constant 0 : index
    %c0_280 = arith.constant 0 : index
    %216 = vector.load %arg9[%c0_279, %c0_280] : memref<32x72xf32, #tpu.memory_space<vmem>>, vector<32x72xf32>
    %c0_281 = arith.constant 0 : index
    %c0_282 = arith.constant 0 : index
    %217 = vector.load %arg10[%c0_281, %c0_282] : memref<32x1xf32, #tpu.memory_space<vmem>>, vector<32x1xf32>
    %c0_283 = arith.constant 0 : index
    %c0_284 = arith.constant 0 : index
    %218 = vector.load %arg13[%c0_283, %c0_284] : memref<8x384xf32, #tpu.memory_space<vmem>>, vector<8x288xf32>
    %c0_285 = arith.constant 0 : index
    %c0_286 = arith.constant 0 : index
    %219 = vector.load %arg15[%c0_285, %c0_286] : memref<72x288xf32, #tpu.memory_space<vmem>>, vector<8x288xf32>
    tpu.vector_store %arg15[%c0_285, %c0_286], %218 {strides = array<i32>} : memref<72x288xf32, #tpu.memory_space<vmem>>, vector<8x288xf32>,
    %c0_287 = arith.constant 0 : index
    %c1_288 = arith.constant 1 : index
    %220 = vector.load %arg13[%c0_287, %c1_288] : memref<8x384xf32, #tpu.memory_space<vmem>>, vector<8x288xf32>
    %c8_289 = arith.constant 8 : index
    %c0_290 = arith.constant 0 : index
    %221 = vector.load %arg15[%c8_289, %c0_290] : memref<72x288xf32, #tpu.memory_space<vmem>>, vector<8x288xf32>
    tpu.vector_store %arg15[%c8_289, %c0_290], %220 {strides = array<i32>} : memref<72x288xf32, #tpu.memory_space<vmem>>, vector<8x288xf32>,
    %c0_291 = arith.constant 0 : index
    %c2_292 = arith.constant 2 : index
    %222 = vector.load %arg13[%c0_291, %c2_292] : memref<8x384xf32, #tpu.memory_space<vmem>>, vector<8x288xf32>
    %c16_293 = arith.constant 16 : index
    %c0_294 = arith.constant 0 : index
    %223 = vector.load %arg15[%c16_293, %c0_294] : memref<72x288xf32, #tpu.memory_space<vmem>>, vector<8x288xf32>
    tpu.vector_store %arg15[%c16_293, %c0_294], %222 {strides = array<i32>} : memref<72x288xf32, #tpu.memory_space<vmem>>, vector<8x288xf32>,
    %c0_295 = arith.constant 0 : index
    %c18_296 = arith.constant 18 : index
    %224 = vector.load %arg13[%c0_295, %c18_296] : memref<8x384xf32, #tpu.memory_space<vmem>>, vector<8x288xf32>
    %c24_297 = arith.constant 24 : index
    %c0_298 = arith.constant 0 : index
    %225 = vector.load %arg15[%c24_297, %c0_298] : memref<72x288xf32, #tpu.memory_space<vmem>>, vector<8x288xf32>
    tpu.vector_store %arg15[%c24_297, %c0_298], %224 {strides = array<i32>} : memref<72x288xf32, #tpu.memory_space<vmem>>, vector<8x288xf32>,
    %c0_299 = arith.constant 0 : index
    %c19_300 = arith.constant 19 : index
    %226 = vector.load %arg13[%c0_299, %c19_300] : memref<8x384xf32, #tpu.memory_space<vmem>>, vector<8x288xf32>
    %c32_301 = arith.constant 32 : index
    %c0_302 = arith.constant 0 : index
    %227 = vector.load %arg15[%c32_301, %c0_302] : memref<72x288xf32, #tpu.memory_space<vmem>>, vector<8x288xf32>
    tpu.vector_store %arg15[%c32_301, %c0_302], %226 {strides = array<i32>} : memref<72x288xf32, #tpu.memory_space<vmem>>, vector<8x288xf32>,
    %c0_303 = arith.constant 0 : index
    %c20_304 = arith.constant 20 : index
    %228 = vector.load %arg13[%c0_303, %c20_304] : memref<8x384xf32, #tpu.memory_space<vmem>>, vector<8x288xf32>
    %c40_305 = arith.constant 40 : index
    %c0_306 = arith.constant 0 : index
    %229 = vector.load %arg15[%c40_305, %c0_306] : memref<72x288xf32, #tpu.memory_space<vmem>>, vector<8x288xf32>
    tpu.vector_store %arg15[%c40_305, %c0_306], %228 {strides = array<i32>} : memref<72x288xf32, #tpu.memory_space<vmem>>, vector<8x288xf32>,
    %c0_307 = arith.constant 0 : index
    %c36_308 = arith.constant 36 : index
    %230 = vector.load %arg13[%c0_307, %c36_308] : memref<8x384xf32, #tpu.memory_space<vmem>>, vector<8x288xf32>
    %c48_309 = arith.constant 48 : index
    %c0_310 = arith.constant 0 : index
    %231 = vector.load %arg15[%c48_309, %c0_310] : memref<72x288xf32, #tpu.memory_space<vmem>>, vector<8x288xf32>
    tpu.vector_store %arg15[%c48_309, %c0_310], %230 {strides = array<i32>} : memref<72x288xf32, #tpu.memory_space<vmem>>, vector<8x288xf32>,
    %c0_311 = arith.constant 0 : index
    %c37_312 = arith.constant 37 : index
    %232 = vector.load %arg13[%c0_311, %c37_312] : memref<8x384xf32, #tpu.memory_space<vmem>>, vector<8x288xf32>
    %c56_313 = arith.constant 56 : index
    %c0_314 = arith.constant 0 : index
    %233 = vector.load %arg15[%c56_313, %c0_314] : memref<72x288xf32, #tpu.memory_space<vmem>>, vector<8x288xf32>
    tpu.vector_store %arg15[%c56_313, %c0_314], %232 {strides = array<i32>} : memref<72x288xf32, #tpu.memory_space<vmem>>, vector<8x288xf32>,
    %c0_315 = arith.constant 0 : index
    %c38_316 = arith.constant 38 : index
    %234 = vector.load %arg13[%c0_315, %c38_316] : memref<8x384xf32, #tpu.memory_space<vmem>>, vector<8x288xf32>
    %c64_317 = arith.constant 64 : index
    %c0_318 = arith.constant 0 : index
    %235 = vector.load %arg15[%c64_317, %c0_318] : memref<72x288xf32, #tpu.memory_space<vmem>>, vector<8x288xf32>
    tpu.vector_store %arg15[%c64_317, %c0_318], %234 {strides = array<i32>} : memref<72x288xf32, #tpu.memory_space<vmem>>, vector<8x288xf32>,
    %c0_319 = arith.constant 0 : index
    %c0_320 = arith.constant 0 : index
    %236 = vector.load %arg15[%c0_319, %c0_320] : memref<72x288xf32, #tpu.memory_space<vmem>>, vector<72x288xf32>
    %cst_321 = arith.constant dense<0.000000e+00> : vector<32x288xf32>
    %237 = tpu.matmul %216, %236, %cst_321 {dimension_numbers = #tpu.dot_dimension_numbers<[1], [0], [0], [1], [0, 0, 1, 1], [], []>} : vector<32x72xf32>, vector<72x288xf32>, vector<32x288xf32> -> vector<32x288xf32>
    %238 = vector.broadcast %217 : vector<32x1xf32> to vector<32x288xf32>
    %239 = arith.addf %237, %238 : vector<32x288xf32>
    %c0_322 = arith.constant 0 : index
    %c0_323 = arith.constant 0 : index
    %c0_324 = arith.constant 0 : index
    %240 = vector.load %arg11[%c0_322, %c0_323, %c0_324] : memref<1x32x288xf32, #tpu.memory_space<vmem>>, vector<1x32x288xf32>
    %241 = vector.shape_cast %240 : vector<1x32x288xf32> to vector<32x288xf32>
    %242 = vector.shape_cast %239 : vector<32x288xf32> to vector<1x32x288xf32>
    tpu.vector_store %arg11[%c0_322, %c0_323, %c0_324], %242 {strides = array<i32>} : memref<1x32x288xf32, #tpu.memory_space<vmem>>, vector<1x32x288xf32>,
    return
  }
  func.func @transform_0(%arg0: i32) -> (i32, i32, i32) {
    %c0_i32 = arith.constant 0 : i32
    %c0_i32_0 = arith.constant 0 : i32
    %c0_i32_1 = arith.constant 0 : i32
    return %arg0, %c0_i32, %c0_i32_0 : i32, i32, i32
  }
  func.func @transform_1(%arg0: i32) -> (i32, i32) {
    %c0_i32 = arith.constant 0 : i32
    %c0_i32_0 = arith.constant 0 : i32
    %c0_i32_1 = arith.constant 0 : i32
    return %c0_i32, %c0_i32_0 : i32, i32
  }
  func.func @transform_2(%arg0: i32) -> (i32, i32) {
    %c0_i32 = arith.constant 0 : i32
    %c0_i32_0 = arith.constant 0 : i32
    %c0_i32_1 = arith.constant 0 : i32
    return %c0_i32, %c0_i32_0 : i32, i32
  }
  func.func @transform_3(%arg0: i32) -> (i32, i32) {
    %c0_i32 = arith.constant 0 : i32
    %c0_i32_0 = arith.constant 0 : i32
    %c0_i32_1 = arith.constant 0 : i32
    return %c0_i32, %c0_i32_0 : i32, i32
  }
  func.func @transform_4(%arg0: i32) -> (i32, i32, i32) {
    %c0_i32 = arith.constant 0 : i32
    %c0_i32_0 = arith.constant 0 : i32
    %c0_i32_1 = arith.constant 0 : i32
    %c0_i32_2 = arith.constant 0 : i32
    return %c0_i32, %c0_i32_0, %c0_i32_1 : i32, i32, i32
  }
  func.func @transform_5(%arg0: i32) -> (i32, i32, i32) {
    %c0_i32 = arith.constant 0 : i32
    %c0_i32_0 = arith.constant 0 : i32
    %c0_i32_1 = arith.constant 0 : i32
    %c0_i32_2 = arith.constant 0 : i32
    return %c0_i32, %c0_i32_0, %c0_i32_1 : i32, i32, i32
  }
  func.func @transform_6(%arg0: i32) -> (i32, i32) {
    %c0_i32 = arith.constant 0 : i32
    %c0_i32_0 = arith.constant 0 : i32
    %c0_i32_1 = arith.constant 0 : i32
    return %c0_i32, %c0_i32_0 : i32, i32
  }
  func.func @transform_7(%arg0: i32) -> (i32, i32) {
    %c0_i32 = arith.constant 0 : i32
    %c0_i32_0 = arith.constant 0 : i32
    %c0_i32_1 = arith.constant 0 : i32
    return %c0_i32, %c0_i32_0 : i32, i32
  }
  func.func @transform_8(%arg0: i32) -> (i32, i32) {
    %c0_i32 = arith.constant 0 : i32
    %c0_i32_0 = arith.constant 0 : i32
    %c0_i32_1 = arith.constant 0 : i32
    return %c0_i32, %c0_i32_0 : i32, i32
  }
  func.func @transform_9(%arg0: i32) -> (i32, i32) {
    %c0_i32 = arith.constant 0 : i32
    %c0_i32_0 = arith.constant 0 : i32
    %c0_i32_1 = arith.constant 0 : i32
    return %c0_i32, %c0_i32_0 : i32, i32
  }
  func.func @transform_10(%arg0: i32) -> (i32, i32, i32) {
    %c0_i32 = arith.constant 0 : i32
    %c0_i32_0 = arith.constant 0 : i32
    %c0_i32_1 = arith.constant 0 : i32
    return %arg0, %c0_i32, %c0_i32_0 : i32, i32, i32
  }
}

module attributes {stable_mosaic.version = 11 : i64} {
  func.func @kernel(%arg0: i32, %arg1: memref<1x8x1280xf32, #tpu.memory_space<vmem>>, %arg2: memref<32x72xf32, #tpu.memory_space<vmem>>, %arg3: memref<32x1xf32, #tpu.memory_space<vmem>>, %arg4: memref<1x32x1088xf32, #tpu.memory_space<vmem>>, %arg5: memref<72x1088xf32, #tpu.memory_space<vmem>>) attributes {dimension_semantics = [#tpu.dimension_semantics<parallel>], iteration_bounds = array<i64: 2>, scalar_prefetch = 0 : i64, scratch_operands = 1 : i64, tpu.core_type = #tpu.core_type<tc>, window_params = [{transform_indices = @transform_0, window_bounds = array<i64: 1, 8, 1280>}, {pipeline_mode = #tpu.pipeline_mode<synchronous>, transform_indices = @transform_1, window_bounds = array<i64: 32, 72>}, {pipeline_mode = #tpu.pipeline_mode<synchronous>, transform_indices = @transform_2, window_bounds = array<i64: 32, 1>}, {transform_indices = @transform_3, window_bounds = array<i64: 1, 32, 1088>}]} {
    %c0 = arith.constant 0 : index
    %c0_0 = arith.constant 0 : index
    %0 = vector.load %arg2[%c0, %c0_0] : memref<32x72xf32, #tpu.memory_space<vmem>>, vector<32x72xf32>
    %c0_1 = arith.constant 0 : index
    %c0_2 = arith.constant 0 : index
    %1 = vector.load %arg3[%c0_1, %c0_2] : memref<32x1xf32, #tpu.memory_space<vmem>>, vector<32x1xf32>
    %c0_3 = arith.constant 0 : index
    %c0_4 = arith.constant 0 : index
    %c0_5 = arith.constant 0 : index
    %2 = vector.load %arg1[%c0_3, %c0_4, %c0_5] : memref<1x8x1280xf32, #tpu.memory_space<vmem>>, vector<1x8x1088xf32>
    %3 = vector.shape_cast %2 : vector<1x8x1088xf32> to vector<8x1088xf32>
    %c0_6 = arith.constant 0 : index
    %c0_7 = arith.constant 0 : index
    %4 = vector.load %arg5[%c0_6, %c0_7] : memref<72x1088xf32, #tpu.memory_space<vmem>>, vector<8x1088xf32>
    tpu.vector_store %arg5[%c0_6, %c0_7], %3 {strides = array<i32>} : memref<72x1088xf32, #tpu.memory_space<vmem>>, vector<8x1088xf32>,
    %c0_8 = arith.constant 0 : index
    %c0_9 = arith.constant 0 : index
    %c1 = arith.constant 1 : index
    %5 = vector.load %arg1[%c0_8, %c0_9, %c1] : memref<1x8x1280xf32, #tpu.memory_space<vmem>>, vector<1x8x1088xf32>
    %6 = vector.shape_cast %5 : vector<1x8x1088xf32> to vector<8x1088xf32>
    %c8 = arith.constant 8 : index
    %c0_10 = arith.constant 0 : index
    %7 = vector.load %arg5[%c8, %c0_10] : memref<72x1088xf32, #tpu.memory_space<vmem>>, vector<8x1088xf32>
    tpu.vector_store %arg5[%c8, %c0_10], %6 {strides = array<i32>} : memref<72x1088xf32, #tpu.memory_space<vmem>>, vector<8x1088xf32>,
    %c0_11 = arith.constant 0 : index
    %c0_12 = arith.constant 0 : index
    %c2 = arith.constant 2 : index
    %8 = vector.load %arg1[%c0_11, %c0_12, %c2] : memref<1x8x1280xf32, #tpu.memory_space<vmem>>, vector<1x8x1088xf32>
    %9 = vector.shape_cast %8 : vector<1x8x1088xf32> to vector<8x1088xf32>
    %c16 = arith.constant 16 : index
    %c0_13 = arith.constant 0 : index
    %10 = vector.load %arg5[%c16, %c0_13] : memref<72x1088xf32, #tpu.memory_space<vmem>>, vector<8x1088xf32>
    tpu.vector_store %arg5[%c16, %c0_13], %9 {strides = array<i32>} : memref<72x1088xf32, #tpu.memory_space<vmem>>, vector<8x1088xf32>,
    %c0_14 = arith.constant 0 : index
    %c0_15 = arith.constant 0 : index
    %c34 = arith.constant 34 : index
    %11 = vector.load %arg1[%c0_14, %c0_15, %c34] : memref<1x8x1280xf32, #tpu.memory_space<vmem>>, vector<1x8x1088xf32>
    %12 = vector.shape_cast %11 : vector<1x8x1088xf32> to vector<8x1088xf32>
    %c24 = arith.constant 24 : index
    %c0_16 = arith.constant 0 : index
    %13 = vector.load %arg5[%c24, %c0_16] : memref<72x1088xf32, #tpu.memory_space<vmem>>, vector<8x1088xf32>
    tpu.vector_store %arg5[%c24, %c0_16], %12 {strides = array<i32>} : memref<72x1088xf32, #tpu.memory_space<vmem>>, vector<8x1088xf32>,
    %c0_17 = arith.constant 0 : index
    %c0_18 = arith.constant 0 : index
    %c35 = arith.constant 35 : index
    %14 = vector.load %arg1[%c0_17, %c0_18, %c35] : memref<1x8x1280xf32, #tpu.memory_space<vmem>>, vector<1x8x1088xf32>
    %15 = vector.shape_cast %14 : vector<1x8x1088xf32> to vector<8x1088xf32>
    %c32 = arith.constant 32 : index
    %c0_19 = arith.constant 0 : index
    %16 = vector.load %arg5[%c32, %c0_19] : memref<72x1088xf32, #tpu.memory_space<vmem>>, vector<8x1088xf32>
    tpu.vector_store %arg5[%c32, %c0_19], %15 {strides = array<i32>} : memref<72x1088xf32, #tpu.memory_space<vmem>>, vector<8x1088xf32>,
    %c0_20 = arith.constant 0 : index
    %c0_21 = arith.constant 0 : index
    %c36 = arith.constant 36 : index
    %17 = vector.load %arg1[%c0_20, %c0_21, %c36] : memref<1x8x1280xf32, #tpu.memory_space<vmem>>, vector<1x8x1088xf32>
    %18 = vector.shape_cast %17 : vector<1x8x1088xf32> to vector<8x1088xf32>
    %c40 = arith.constant 40 : index
    %c0_22 = arith.constant 0 : index
    %19 = vector.load %arg5[%c40, %c0_22] : memref<72x1088xf32, #tpu.memory_space<vmem>>, vector<8x1088xf32>
    tpu.vector_store %arg5[%c40, %c0_22], %18 {strides = array<i32>} : memref<72x1088xf32, #tpu.memory_space<vmem>>, vector<8x1088xf32>,
    %c0_23 = arith.constant 0 : index
    %c0_24 = arith.constant 0 : index
    %c68 = arith.constant 68 : index
    %20 = vector.load %arg1[%c0_23, %c0_24, %c68] : memref<1x8x1280xf32, #tpu.memory_space<vmem>>, vector<1x8x1088xf32>
    %21 = vector.shape_cast %20 : vector<1x8x1088xf32> to vector<8x1088xf32>
    %c48 = arith.constant 48 : index
    %c0_25 = arith.constant 0 : index
    %22 = vector.load %arg5[%c48, %c0_25] : memref<72x1088xf32, #tpu.memory_space<vmem>>, vector<8x1088xf32>
    tpu.vector_store %arg5[%c48, %c0_25], %21 {strides = array<i32>} : memref<72x1088xf32, #tpu.memory_space<vmem>>, vector<8x1088xf32>,
    %c0_26 = arith.constant 0 : index
    %c0_27 = arith.constant 0 : index
    %c69 = arith.constant 69 : index
    %23 = vector.load %arg1[%c0_26, %c0_27, %c69] : memref<1x8x1280xf32, #tpu.memory_space<vmem>>, vector<1x8x1088xf32>
    %24 = vector.shape_cast %23 : vector<1x8x1088xf32> to vector<8x1088xf32>
    %c56 = arith.constant 56 : index
    %c0_28 = arith.constant 0 : index
    %25 = vector.load %arg5[%c56, %c0_28] : memref<72x1088xf32, #tpu.memory_space<vmem>>, vector<8x1088xf32>
    tpu.vector_store %arg5[%c56, %c0_28], %24 {strides = array<i32>} : memref<72x1088xf32, #tpu.memory_space<vmem>>, vector<8x1088xf32>,
    %c0_29 = arith.constant 0 : index
    %c0_30 = arith.constant 0 : index
    %c70 = arith.constant 70 : index
    %26 = vector.load %arg1[%c0_29, %c0_30, %c70] : memref<1x8x1280xf32, #tpu.memory_space<vmem>>, vector<1x8x1088xf32>
    %27 = vector.shape_cast %26 : vector<1x8x1088xf32> to vector<8x1088xf32>
    %c64 = arith.constant 64 : index
    %c0_31 = arith.constant 0 : index
    %28 = vector.load %arg5[%c64, %c0_31] : memref<72x1088xf32, #tpu.memory_space<vmem>>, vector<8x1088xf32>
    tpu.vector_store %arg5[%c64, %c0_31], %27 {strides = array<i32>} : memref<72x1088xf32, #tpu.memory_space<vmem>>, vector<8x1088xf32>,
    %c0_32 = arith.constant 0 : index
    %c0_33 = arith.constant 0 : index
    %29 = vector.load %arg5[%c0_32, %c0_33] : memref<72x1088xf32, #tpu.memory_space<vmem>>, vector<72x1088xf32>
    %cst = arith.constant dense<0.000000e+00> : vector<32x1088xf32>
    %30 = tpu.matmul %0, %29, %cst {dimension_numbers = #tpu.dot_dimension_numbers<[1], [0], [0], [1], [0, 0, 1, 1], [], []>} : vector<32x72xf32>, vector<72x1088xf32>, vector<32x1088xf32> -> vector<32x1088xf32>
    %31 = vector.broadcast %1 : vector<32x1xf32> to vector<32x1088xf32>
    %32 = arith.addf %30, %31 : vector<32x1088xf32>
    %c0_34 = arith.constant 0 : index
    %c0_35 = arith.constant 0 : index
    %c0_36 = arith.constant 0 : index
    %33 = vector.load %arg4[%c0_34, %c0_35, %c0_36] : memref<1x32x1088xf32, #tpu.memory_space<vmem>>, vector<1x32x1088xf32>
    %34 = vector.shape_cast %33 : vector<1x32x1088xf32> to vector<32x1088xf32>
    %35 = vector.shape_cast %32 : vector<32x1088xf32> to vector<1x32x1088xf32>
    tpu.vector_store %arg4[%c0_34, %c0_35, %c0_36], %35 {strides = array<i32>} : memref<1x32x1088xf32, #tpu.memory_space<vmem>>, vector<1x32x1088xf32>,
    return
  }
  func.func @transform_0(%arg0: i32) -> (i32, i32, i32) {
    %c0_i32 = arith.constant 0 : i32
    %c0_i32_0 = arith.constant 0 : i32
    %c0_i32_1 = arith.constant 0 : i32
    return %arg0, %c0_i32, %c0_i32_0 : i32, i32, i32
  }
  func.func @transform_1(%arg0: i32) -> (i32, i32) {
    %c0_i32 = arith.constant 0 : i32
    %c0_i32_0 = arith.constant 0 : i32
    %c0_i32_1 = arith.constant 0 : i32
    return %c0_i32, %c0_i32_0 : i32, i32
  }
  func.func @transform_2(%arg0: i32) -> (i32, i32) {
    %c0_i32 = arith.constant 0 : i32
    %c0_i32_0 = arith.constant 0 : i32
    %c0_i32_1 = arith.constant 0 : i32
    return %c0_i32, %c0_i32_0 : i32, i32
  }
  func.func @transform_3(%arg0: i32) -> (i32, i32, i32) {
    %c0_i32 = arith.constant 0 : i32
    %c0_i32_0 = arith.constant 0 : i32
    %c0_i32_1 = arith.constant 0 : i32
    return %arg0, %c0_i32, %c0_i32_0 : i32, i32, i32
  }
}

module attributes {stable_mosaic.version = 11 : i64} {
  func.func @kernel(%arg0: i32, %arg1: memref<1x8x4480xf32, #tpu.memory_space<vmem>>, %arg2: memref<3x72xf32, #tpu.memory_space<vmem>>, %arg3: memref<3x1xf32, #tpu.memory_space<vmem>>, %arg4: memref<1x3x4224xf32, #tpu.memory_space<vmem>>, %arg5: memref<72x4224xf32, #tpu.memory_space<vmem>>) attributes {dimension_semantics = [#tpu.dimension_semantics<parallel>], iteration_bounds = array<i64: 2>, scalar_prefetch = 0 : i64, scratch_operands = 1 : i64, tpu.core_type = #tpu.core_type<tc>, window_params = [{transform_indices = @transform_0, window_bounds = array<i64: 1, 8, 4480>}, {pipeline_mode = #tpu.pipeline_mode<synchronous>, transform_indices = @transform_1, window_bounds = array<i64: 3, 72>}, {pipeline_mode = #tpu.pipeline_mode<synchronous>, transform_indices = @transform_2, window_bounds = array<i64: 3, 1>}, {transform_indices = @transform_3, window_bounds = array<i64: 1, 3, 4224>}]} {
    %c0 = arith.constant 0 : index
    %c0_0 = arith.constant 0 : index
    %0 = vector.load %arg2[%c0, %c0_0] : memref<3x72xf32, #tpu.memory_space<vmem>>, vector<3x72xf32>
    %c0_1 = arith.constant 0 : index
    %c0_2 = arith.constant 0 : index
    %1 = vector.load %arg3[%c0_1, %c0_2] : memref<3x1xf32, #tpu.memory_space<vmem>>, vector<3x1xf32>
    %c0_3 = arith.constant 0 : index
    %c0_4 = arith.constant 0 : index
    %c0_5 = arith.constant 0 : index
    %2 = vector.load %arg1[%c0_3, %c0_4, %c0_5] : memref<1x8x4480xf32, #tpu.memory_space<vmem>>, vector<1x8x4224xf32>
    %3 = vector.shape_cast %2 : vector<1x8x4224xf32> to vector<8x4224xf32>
    %c0_6 = arith.constant 0 : index
    %c0_7 = arith.constant 0 : index
    %4 = vector.load %arg5[%c0_6, %c0_7] : memref<72x4224xf32, #tpu.memory_space<vmem>>, vector<8x4224xf32>
    tpu.vector_store %arg5[%c0_6, %c0_7], %3 {strides = array<i32>} : memref<72x4224xf32, #tpu.memory_space<vmem>>, vector<8x4224xf32>,
    %c0_8 = arith.constant 0 : index
    %c0_9 = arith.constant 0 : index
    %c1 = arith.constant 1 : index
    %5 = vector.load %arg1[%c0_8, %c0_9, %c1] : memref<1x8x4480xf32, #tpu.memory_space<vmem>>, vector<1x8x4224xf32>
    %6 = vector.shape_cast %5 : vector<1x8x4224xf32> to vector<8x4224xf32>
    %c8 = arith.constant 8 : index
    %c0_10 = arith.constant 0 : index
    %7 = vector.load %arg5[%c8, %c0_10] : memref<72x4224xf32, #tpu.memory_space<vmem>>, vector<8x4224xf32>
    tpu.vector_store %arg5[%c8, %c0_10], %6 {strides = array<i32>} : memref<72x4224xf32, #tpu.memory_space<vmem>>, vector<8x4224xf32>,
    %c0_11 = arith.constant 0 : index
    %c0_12 = arith.constant 0 : index
    %c2 = arith.constant 2 : index
    %8 = vector.load %arg1[%c0_11, %c0_12, %c2] : memref<1x8x4480xf32, #tpu.memory_space<vmem>>, vector<1x8x4224xf32>
    %9 = vector.shape_cast %8 : vector<1x8x4224xf32> to vector<8x4224xf32>
    %c16 = arith.constant 16 : index
    %c0_13 = arith.constant 0 : index
    %10 = vector.load %arg5[%c16, %c0_13] : memref<72x4224xf32, #tpu.memory_space<vmem>>, vector<8x4224xf32>
    tpu.vector_store %arg5[%c16, %c0_13], %9 {strides = array<i32>} : memref<72x4224xf32, #tpu.memory_space<vmem>>, vector<8x4224xf32>,
    %c0_14 = arith.constant 0 : index
    %c0_15 = arith.constant 0 : index
    %c66 = arith.constant 66 : index
    %11 = vector.load %arg1[%c0_14, %c0_15, %c66] : memref<1x8x4480xf32, #tpu.memory_space<vmem>>, vector<1x8x4224xf32>
    %12 = vector.shape_cast %11 : vector<1x8x4224xf32> to vector<8x4224xf32>
    %c24 = arith.constant 24 : index
    %c0_16 = arith.constant 0 : index
    %13 = vector.load %arg5[%c24, %c0_16] : memref<72x4224xf32, #tpu.memory_space<vmem>>, vector<8x4224xf32>
    tpu.vector_store %arg5[%c24, %c0_16], %12 {strides = array<i32>} : memref<72x4224xf32, #tpu.memory_space<vmem>>, vector<8x4224xf32>,
    %c0_17 = arith.constant 0 : index
    %c0_18 = arith.constant 0 : index
    %c67 = arith.constant 67 : index
    %14 = vector.load %arg1[%c0_17, %c0_18, %c67] : memref<1x8x4480xf32, #tpu.memory_space<vmem>>, vector<1x8x4224xf32>
    %15 = vector.shape_cast %14 : vector<1x8x4224xf32> to vector<8x4224xf32>
    %c32 = arith.constant 32 : index
    %c0_19 = arith.constant 0 : index
    %16 = vector.load %arg5[%c32, %c0_19] : memref<72x4224xf32, #tpu.memory_space<vmem>>, vector<8x4224xf32>
    tpu.vector_store %arg5[%c32, %c0_19], %15 {strides = array<i32>} : memref<72x4224xf32, #tpu.memory_space<vmem>>, vector<8x4224xf32>,
    %c0_20 = arith.constant 0 : index
    %c0_21 = arith.constant 0 : index
    %c68 = arith.constant 68 : index
    %17 = vector.load %arg1[%c0_20, %c0_21, %c68] : memref<1x8x4480xf32, #tpu.memory_space<vmem>>, vector<1x8x4224xf32>
    %18 = vector.shape_cast %17 : vector<1x8x4224xf32> to vector<8x4224xf32>
    %c40 = arith.constant 40 : index
    %c0_22 = arith.constant 0 : index
    %19 = vector.load %arg5[%c40, %c0_22] : memref<72x4224xf32, #tpu.memory_space<vmem>>, vector<8x4224xf32>
    tpu.vector_store %arg5[%c40, %c0_22], %18 {strides = array<i32>} : memref<72x4224xf32, #tpu.memory_space<vmem>>, vector<8x4224xf32>,
    %c0_23 = arith.constant 0 : index
    %c0_24 = arith.constant 0 : index
    %c132 = arith.constant 132 : index
    %20 = vector.load %arg1[%c0_23, %c0_24, %c132] : memref<1x8x4480xf32, #tpu.memory_space<vmem>>, vector<1x8x4224xf32>
    %21 = vector.shape_cast %20 : vector<1x8x4224xf32> to vector<8x4224xf32>
    %c48 = arith.constant 48 : index
    %c0_25 = arith.constant 0 : index
    %22 = vector.load %arg5[%c48, %c0_25] : memref<72x4224xf32, #tpu.memory_space<vmem>>, vector<8x4224xf32>
    tpu.vector_store %arg5[%c48, %c0_25], %21 {strides = array<i32>} : memref<72x4224xf32, #tpu.memory_space<vmem>>, vector<8x4224xf32>,
    %c0_26 = arith.constant 0 : index
    %c0_27 = arith.constant 0 : index
    %c133 = arith.constant 133 : index
    %23 = vector.load %arg1[%c0_26, %c0_27, %c133] : memref<1x8x4480xf32, #tpu.memory_space<vmem>>, vector<1x8x4224xf32>
    %24 = vector.shape_cast %23 : vector<1x8x4224xf32> to vector<8x4224xf32>
    %c56 = arith.constant 56 : index
    %c0_28 = arith.constant 0 : index
    %25 = vector.load %arg5[%c56, %c0_28] : memref<72x4224xf32, #tpu.memory_space<vmem>>, vector<8x4224xf32>
    tpu.vector_store %arg5[%c56, %c0_28], %24 {strides = array<i32>} : memref<72x4224xf32, #tpu.memory_space<vmem>>, vector<8x4224xf32>,
    %c0_29 = arith.constant 0 : index
    %c0_30 = arith.constant 0 : index
    %c134 = arith.constant 134 : index
    %26 = vector.load %arg1[%c0_29, %c0_30, %c134] : memref<1x8x4480xf32, #tpu.memory_space<vmem>>, vector<1x8x4224xf32>
    %27 = vector.shape_cast %26 : vector<1x8x4224xf32> to vector<8x4224xf32>
    %c64 = arith.constant 64 : index
    %c0_31 = arith.constant 0 : index
    %28 = vector.load %arg5[%c64, %c0_31] : memref<72x4224xf32, #tpu.memory_space<vmem>>, vector<8x4224xf32>
    tpu.vector_store %arg5[%c64, %c0_31], %27 {strides = array<i32>} : memref<72x4224xf32, #tpu.memory_space<vmem>>, vector<8x4224xf32>,
    %c0_32 = arith.constant 0 : index
    %c0_33 = arith.constant 0 : index
    %29 = vector.load %arg5[%c0_32, %c0_33] : memref<72x4224xf32, #tpu.memory_space<vmem>>, vector<72x4224xf32>
    %cst = arith.constant dense<0.000000e+00> : vector<3x4224xf32>
    %30 = tpu.matmul %0, %29, %cst {dimension_numbers = #tpu.dot_dimension_numbers<[1], [0], [0], [1], [0, 0, 1, 1], [], []>} : vector<3x72xf32>, vector<72x4224xf32>, vector<3x4224xf32> -> vector<3x4224xf32>
    %31 = vector.broadcast %1 : vector<3x1xf32> to vector<3x4224xf32>
    %32 = arith.addf %30, %31 : vector<3x4224xf32>
    %c0_34 = arith.constant 0 : index
    %c0_35 = arith.constant 0 : index
    %c0_36 = arith.constant 0 : index
    %33 = vector.load %arg4[%c0_34, %c0_35, %c0_36] : memref<1x3x4224xf32, #tpu.memory_space<vmem>>, vector<1x3x4224xf32>
    %34 = vector.shape_cast %33 : vector<1x3x4224xf32> to vector<3x4224xf32>
    %35 = vector.shape_cast %32 : vector<3x4224xf32> to vector<1x3x4224xf32>
    tpu.vector_store %arg4[%c0_34, %c0_35, %c0_36], %35 {strides = array<i32>} : memref<1x3x4224xf32, #tpu.memory_space<vmem>>, vector<1x3x4224xf32>,
    return
  }
  func.func @transform_0(%arg0: i32) -> (i32, i32, i32) {
    %c0_i32 = arith.constant 0 : i32
    %c0_i32_0 = arith.constant 0 : i32
    %c0_i32_1 = arith.constant 0 : i32
    return %arg0, %c0_i32, %c0_i32_0 : i32, i32, i32
  }
  func.func @transform_1(%arg0: i32) -> (i32, i32) {
    %c0_i32 = arith.constant 0 : i32
    %c0_i32_0 = arith.constant 0 : i32
    %c0_i32_1 = arith.constant 0 : i32
    return %c0_i32, %c0_i32_0 : i32, i32
  }
  func.func @transform_2(%arg0: i32) -> (i32, i32) {
    %c0_i32 = arith.constant 0 : i32
    %c0_i32_0 = arith.constant 0 : i32
    %c0_i32_1 = arith.constant 0 : i32
    return %c0_i32, %c0_i32_0 : i32, i32
  }
  func.func @transform_3(%arg0: i32) -> (i32, i32, i32) {
    %c0_i32 = arith.constant 0 : i32
    %c0_i32_0 = arith.constant 0 : i32
    %c0_i32_1 = arith.constant 0 : i32
    return %arg0, %c0_i32, %c0_i32_0 : i32, i32, i32
  }
}

</mosaic_0001>

<bundles_post_ra>
// kernel: nas_forward_pallas.4
= control target key start
LH: loop header
LB: loop body
LE: loop exit
PB: predicated region body
PF: predicated region fallthrough
CT: control target
= control target key end

     0   :  { %s1579_s12 = smov 0   ;;  %s2068_s0 = inlined_call_operand.vmem [shape: f32[2,8,1280], index: 0, kind: input, shape index: {}]   ;;  %s2069_s1 = inlined_call_operand.vmem [shape: f32[32,72], index: 1, kind: input, shape index: {}]   ;;  %s2070_s2 = inlined_call_operand.vmem [shape: f32[32,1], index: 2, kind: input, shape index: {}]   ;;  %s2071_s3 = inlined_call_operand.vmem [shape: f32[2,32,1088], index: 3, kind: output, shape index: {}]  }
   0x1 LB: > { %s1363_s13 = sadd.s32 4294967295, %s1547_s12   ;;  %p1367_p0 = scmp.ge.s32.totalorder %s1547_s12, 1  ;;  %s1547_s12 = sphi %s1579_s12, %s13_s12  }
   0x2   : > { %p137_p1 = scmp.lt.s32.totalorder %s1547_s12, 3 }
   0x4   : > { %p138_p2 = pnand %p1367_p0, %p137_p1 }
   0x5   : > { %p161_p3 = scmp.lt.s32.totalorder (!%p138_p2), %s1363_s13, 1  ;;  %s1549_s18 = smov (!%p138_p2), 127   ;;  %vm196_vm0 = vcmask (!%p138_p2), 523264   ;;  %v1556_v9 = vmov (!%p138_p2), 0.0   ;;  %vm234_vm1 = vcmask (!%p138_p2), 1039360   ;;  %vm297_vm2 = vcmask (!%p138_p2), 1031168  }
   0x6   : > { %141 = sbr.rel (%p138_p2) target bundleno = 511 (0x1ff), region = 32  ;;  %s1550_s19 = smov (!%p138_p2), 126   ;;  %895 = vmatprep.mubr.f32.mxu0 (!%p138_p2), %v1556_v9  ;;  %984 = vmatprep.mubr.f32.mxu1 (!%p138_p2), %v1556_v9  ;;  %vm360_vm3 = vcmask (!%p138_p2), 769024   ;;  %vm423_vm4 = vcmask (!%p138_p2), 760832   ;;  %v175_v51 = vld [vmem:[%s2070_s2] sm:$0xff] (!%p138_p2)  ;;  %v176_v52 = vld [vmem:[%s2070_s2 + $0x8] sm:$0xff] (!%p138_p2) }
   0x7   : > { %s1551_s20 = smov (!%p138_p2), 94   ;;  %s1552_s21 = smov (!%p138_p2), 93   ;;  %v1558_v55 = vmov (!%p138_p2), 0   ;;  %vm486_vm5 = vcmask (!%p138_p2), 752640   ;;  %v177_v57 = vld [vmem:[%s2070_s2 + $0x10] sm:$0xff] (!%p138_p2)  ;;  %v178_v63 = vld [vmem:[%s2070_s2 + $0x18] sm:$0xff] (!%p138_p2) }
   0x8   : > { %s1553_s22 = smov (!%p138_p2), 92   ;;  %s1554_s23 = smov (!%p138_p2), 60   ;;  %1539 = vset.pattern.permute.xlu1 (!%p138_p2), %v1558_v55  ;;  %1540 = vset.pattern.permute.xlu0 (!%p138_p2), %v1558_v55  ;;  %vm553_vm6 = vcmask (!%p138_p2), 490496   ;;  %vm621_vm7 = vcmask (!%p138_p2), 482304   ;;  %vm689_vm8 = vcmask (!%p138_p2), 474112   ;;  %vm818_vm9 = vcmask (!%p138_p2), 588800  }
   0x9   : > { %s1555_s24 = smov (!%p138_p2), 59   ;;  %s1557_s25 = smov (!%p138_p2), 58  }
   0xd   : > { %s2073_s13 = smov (!%p161_p3, %s1363_s13), 1 }
   0xe   : > { %s1519_s14 = smul.u32 80, %s2073_s13 }
  0x10   : > { %s1593_s17 = scalar_lea.vmem %s2068_s0, %s1519_s14 }
  0x11   : > { %v1596_v0 = vld [vmem:[%s1593_s17 + $0x18] sm:$0xff]  ;;  %v1599_v1 = vld [vmem:[%s1593_s17 + $0x8] sm:$0xff]  ;;  %v1602_v2 = vld [vmem:[%s1593_s17 + $0x20] sm:$0xff] }
  0x12   : > { %222 = vrot.lane.b32.xlu1 %v1596_v0, %s1549_s18  ;;  %218 = vrot.lane.b32.xlu0 %v1599_v1, %s1549_s18  ;;  %v1609_v3 = vld [vmem:[%s1593_s17 + $0x10] sm:$0xff]  ;;  %v1612_v4 = vld [vmem:[%s1593_s17] sm:$0xff] }
  0x13   : > { %v1615_v5 = vld [vmem:[%s1593_s17 + $0x28] sm:$0xff]  ;;  %v1618_v6 = vld [vmem:[%s1593_s17 + $0x38] sm:$0xff]  ;;  %v1621_v7 = vld [vmem:[%s1593_s17 + $0x30] sm:$0xff] }
  0x14   : > { %v1684_v8 = vld [vmem:[%s1593_s17 + $0x40] sm:$0xff]  ;;  %v590_v41 = vld [vmem:[%s1593_s17 + $0x48] sm:$0xff]  ;;  %s1520_s17 = smul.u32 288, %s2073_s13 }
  0x15   : > { %197 = vst.msk [vmem:[#allocation2 + $0x40] sm:$0xff] %vm196_vm0, %v1684_v8 }
  0x16   : > { %224 = vrot.lane.b32.xlu1 %v1602_v2, %s1549_s18  ;;  %220 = vrot.lane.b32.xlu0 %v1609_v3, %s1549_s18 }
  0x1a   : > { %281 = vrot.lane.b32.xlu1 %v1599_v1, %s1550_s19  ;;  %216 = vrot.lane.b32.xlu0 %v1612_v4, %s1549_s18 }
  0x1e   : > { %285 = vrot.lane.b32.xlu1 %v1596_v0, %s1550_s19  ;;  %283 = vrot.lane.b32.xlu0 %v1609_v3, %s1550_s19 }
  0x22   : > { %344 = vrot.lane.b32.xlu1 %v1599_v1, %s1551_s20  ;;  %287 = vrot.lane.b32.xlu0 %v1602_v2, %s1550_s19 }
  0x26   : > { %348 = vrot.lane.b32.xlu1 %v1596_v0, %s1551_s20  ;;  %346 = vrot.lane.b32.xlu0 %v1609_v3, %s1551_s20 }
  0x2a   : > { %279 = vrot.lane.b32.xlu1 %v1612_v4, %s1550_s19  ;;  %350 = vrot.lane.b32.xlu0 %v1602_v2, %s1551_s20 }
  0x2e   : > { %407 = vrot.lane.b32.xlu1 %v1599_v1, %s1552_s21  ;;  %342 = vrot.lane.b32.xlu0 %v1612_v4, %s1551_s20 }
  0x32   : > { %411 = vrot.lane.b32.xlu1 %v1596_v0, %s1552_s21  ;;  %409 = vrot.lane.b32.xlu0 %v1609_v3, %s1552_s21 }
  0x36   : > { %470 = vrot.lane.b32.xlu1 %v1599_v1, %s1553_s22  ;;  %413 = vrot.lane.b32.xlu0 %v1602_v2, %s1552_s21 }
  0x3a   : > { %474 = vrot.lane.b32.xlu1 %v1596_v0, %s1553_s22  ;;  %472 = vrot.lane.b32.xlu0 %v1609_v3, %s1553_s22 }
  0x3e   : > { %405 = vrot.lane.b32.xlu1 %v1612_v4, %s1552_s21  ;;  %476 = vrot.lane.b32.xlu0 %v1602_v2, %s1553_s22 }
  0x42   : > { %535 = vrot.lane.b32.xlu1 %v1599_v1, %s1554_s23  ;;  %468 = vrot.lane.b32.xlu0 %v1612_v4, %s1553_s22 }
  0x46   : > { %539 = vrot.lane.b32.xlu1 %v1596_v0, %s1554_s23  ;;  %537 = vrot.lane.b32.xlu0 %v1609_v3, %s1554_s23 }
  0x4a   : > { %603 = vrot.lane.b32.xlu1 %v1599_v1, %s1555_s24  ;;  %541 = vrot.lane.b32.xlu0 %v1602_v2, %s1554_s23 }
  0x4e   : > { %607 = vrot.lane.b32.xlu1 %v1596_v0, %s1555_s24  ;;  %605 = vrot.lane.b32.xlu0 %v1609_v3, %s1555_s24 }
  0x52   : > { %533 = vrot.lane.b32.xlu1 %v1612_v4, %s1554_s23  ;;  %609 = vrot.lane.b32.xlu0 %v1602_v2, %s1555_s24 }
  0x56   : > { %226 = vrot.lane.b32.xlu1 %v1615_v5, %s1549_s18  ;;  %601 = vrot.lane.b32.xlu0 %v1612_v4, %s1555_s24 }
  0x5a   : > { %230 = vrot.lane.b32.xlu1 %v1618_v6, %s1549_s18  ;;  %228 = vrot.lane.b32.xlu0 %v1621_v7, %s1549_s18 }
  0x5e   : > { %671 = vrot.lane.b32.xlu1 %v1599_v1, %s1557_s25  ;;  %232 = vrot.lane.b32.xlu0 %v1684_v8, %s1549_s18 }
  0x62   : > { %675 = vrot.lane.b32.xlu1 %v1596_v0, %s1557_s25  ;;  %673 = vrot.lane.b32.xlu0 %v1609_v3, %s1557_s25 }
  0x66   : > { %669 = vrot.lane.b32.xlu1 %v1612_v4, %s1557_s25  ;;  %677 = vrot.lane.b32.xlu0 %v1602_v2, %s1557_s25 }
  0x6a   : > { %291 = vrot.lane.b32.xlu1 %v1621_v7, %s1550_s19  ;;  %289 = vrot.lane.b32.xlu0 %v1615_v5, %s1550_s19 }
  0x6e   : > { %295 = vrot.lane.b32.xlu1 %v1684_v8, %s1550_s19  ;;  %293 = vrot.lane.b32.xlu0 %v1618_v6, %s1550_s19 }
  0x72   : > { %354 = vrot.lane.b32.xlu1 %v1621_v7, %s1551_s20  ;;  %352 = vrot.lane.b32.xlu0 %v1615_v5, %s1551_s20 }
  0x76   : > { %358 = vrot.lane.b32.xlu1 %v1684_v8, %s1551_s20  ;;  %356 = vrot.lane.b32.xlu0 %v1618_v6, %s1551_s20  ;;  %s1981_s20 = scalar_lea.vmem %s2071_s3, %s1520_s17 }
  0x7a   : > { %417 = vrot.lane.b32.xlu1 %v1621_v7, %s1552_s21  ;;  %415 = vrot.lane.b32.xlu0 %v1615_v5, %s1552_s21 }
  0x7e   : > { %421 = vrot.lane.b32.xlu1 %v1684_v8, %s1552_s21  ;;  %419 = vrot.lane.b32.xlu0 %v1618_v6, %s1552_s21 }
  0x82   : > { %480 = vrot.lane.b32.xlu1 %v1621_v7, %s1553_s22  ;;  %478 = vrot.lane.b32.xlu0 %v1615_v5, %s1553_s22 }
  0x84   : > { %v223_v10 = vpop.permute.xlu1 %222  ;;  %v219_v11 = vpop.permute.xlu0 %218 }
  0x86   : > { %484 = vrot.lane.b32.xlu1 %v1684_v8, %s1553_s22  ;;  %482 = vrot.lane.b32.xlu0 %v1618_v6, %s1553_s22 }
  0x88   : > { %v1746_v12 = vpop.permute.xlu1 %224  ;;  %v221_v13 = vpop.permute.xlu0 %220 }
  0x89   : > { %v238_v14 = vsel %vm234_vm1, %v223_v10, %v1746_v12  ;;  %v236_v15 = vsel %vm234_vm1, %v219_v11, %v221_v13  ;;  %v237_v16 = vsel %vm234_vm1, %v221_v13, %v223_v10 }
  0x8a   : > { %545 = vrot.lane.b32.xlu1 %v1621_v7, %s1554_s23  ;;  %543 = vrot.lane.b32.xlu0 %v1615_v5, %s1554_s23  ;;  %v1429_v17 = vpack.c.bf16 %v236_v15, %v1599_v1  ;;  %v1445_v18 = vpack.c.bf16 %v238_v14, %v1596_v0  ;;  %v1447_v19 = vpack.c.bf16 %v237_v16, %v1609_v3 }
  0x8c   : > { %v282_v20 = vpop.permute.xlu1 %281  ;;  %v217_v21 = vpop.permute.xlu0 %216  ;;  %1430 = vmatprep.subr.bf16.mxu0 %v1429_v17  ;;  %1446 = vmatprep.subr.bf16.mxu1 %v1445_v18 }
  0x8d   : > { %v235_v22 = vsel %vm234_vm1, %v217_v21, %v219_v11  ;;  %1448 = vmatpush1.bf16.msra.mxu1 %v1447_v19 }
  0x8e   : > { %549 = vrot.lane.b32.xlu1 %v1684_v8, %s1554_s23  ;;  %547 = vrot.lane.b32.xlu0 %v1618_v6, %s1554_s23  ;;  %v1431_v23 = vpack.c.bf16 %v235_v22, %v1612_v4 }
  0x90   : > { %v286_v24 = vpop.permute.xlu1 %285  ;;  %v284_v25 = vpop.permute.xlu0 %283  ;;  %1432 = vmatpush1.bf16.msra.mxu0 %v1431_v23 }
  0x91   : > { %v299_v26 = vsel %vm297_vm2, %v282_v20, %v284_v25  ;;  %v300_v27 = vsel %vm297_vm2, %v284_v25, %v286_v24 }
  0x92   : > { %613 = vrot.lane.b32.xlu1 %v1621_v7, %s1555_s24  ;;  %611 = vrot.lane.b32.xlu0 %v1615_v5, %s1555_s24 }
  0x94   : > { %v345_v28 = vpop.permute.xlu1 %344  ;;  %v1771_v29 = vpop.permute.xlu0 %287 }
  0x95   : > { %v301_v30 = vsel %vm297_vm2, %v286_v24, %v1771_v29 }
  0x96   : > { %617 = vrot.lane.b32.xlu1 %v1684_v8, %s1555_s24  ;;  %615 = vrot.lane.b32.xlu0 %v1618_v6, %s1555_s24 }
  0x98   : > { %v349_v31 = vpop.permute.xlu1 %348  ;;  %v347_v32 = vpop.permute.xlu0 %346 }
  0x99   : > { %v362_v33 = vsel %vm360_vm3, %v345_v28, %v347_v32  ;;  %v363_v34 = vsel %vm360_vm3, %v347_v32, %v349_v31 }
  0x9a   : > { %681 = vrot.lane.b32.xlu1 %v1621_v7, %s1557_s25  ;;  %679 = vrot.lane.b32.xlu0 %v1615_v5, %s1557_s25  ;;  %v1433_v35 = vpack.c.bf16 %v362_v33, %v299_v26  ;;  %v1451_v42 = vpack.c.bf16 %v363_v34, %v300_v27 }
  0x9c   : > { %v280_v36 = vpop.permute.xlu1 %279  ;;  %v1785_v37 = vpop.permute.xlu0 %350  ;;  %1434 = vmatprep.subr.bf16.mxu0 %v1433_v35 }
  0x9d   : > { %v298_v38 = vsel %vm297_vm2, %v280_v36, %v282_v20  ;;  %v364_v39 = vsel %vm360_vm3, %v349_v31, %v1785_v37 }
  0x9e   : > { %685 = vrot.lane.b32.xlu1 %v1684_v8, %s1557_s25  ;;  %683 = vrot.lane.b32.xlu0 %v1618_v6, %s1557_s25  ;;  %v1449_v40 = vpack.c.bf16 %v364_v39, %v301_v30 }
  0xa0   : > { %v408_v43 = vpop.permute.xlu1 %407  ;;  %v343_v44 = vpop.permute.xlu0 %342  ;;  %1450 = vmatprep.subr.bf16.mxu1 %v1449_v40 }
  0xa1   : > { %v361_v45 = vsel %vm360_vm3, %v343_v44, %v345_v28  ;;  %1452 = vmatpush1.bf16.msra.mxu1 %v1451_v42 }
  0xa2   : > { %619 = vrot.lane.b32.xlu1 %v590_v41, %s1555_s24  ;;  %551 = vrot.lane.b32.xlu0 %v590_v41, %s1554_s23  ;;  %v1435_v46 = vpack.c.bf16 %v361_v45, %v298_v38 }
  0xa4   : > { %v412_v47 = vpop.permute.xlu1 %411  ;;  %v410_v48 = vpop.permute.xlu0 %409  ;;  %1436 = vmatpush1.bf16.msra.mxu0 %v1435_v46 }
  0xa5   : > { %v425_v49 = vsel %vm423_vm4, %v408_v43, %v410_v48  ;;  %v426_v50 = vsel %vm423_vm4, %v410_v48, %v412_v47 }
  0xa6   : > { %687 = vrot.lane.b32.xlu0 %v590_v41, %s1557_s25  ;;  %800 = vperm.xlu1 %1539, %v175_v51  }
  0xa8   : > { %v471_v53 = vpop.permute.xlu1 %470  ;;  %v1807_v54 = vpop.permute.xlu0 %413 }
  0xa9   : > { %v427_v56 = vsel %vm423_vm4, %v412_v47, %v1807_v54 }
  0xaa   : > { %805 = vperm.xlu0 %1540, %v176_v52   ;;  %810 = vperm.xlu1 %1539, %v177_v57   ;;  %v1856_v57 = vld [vmem:[%s2069_s1] sm:$0xff] }
  0xac   : > { %v475_v58 = vpop.permute.xlu1 %474  ;;  %v473_v59 = vpop.permute.xlu0 %472 }
  0xad   : > { %v488_v60 = vsel %vm486_vm5, %v471_v53, %v473_v59  ;;  %v489_v61 = vsel %vm486_vm5, %v473_v59, %v475_v58 }
  0xae   : > { %v1437_v62 = vpack.c.bf16 %v488_v60, %v425_v49  ;;  %815 = vperm.xlu1 %1539, %v178_v63   ;;  %v1455_v10 = vpack.c.bf16 %v489_v61, %v426_v50 }
  0xb0   : > { %v406_v0 = vpop.permute.xlu1 %405  ;;  %v1819_v1 = vpop.permute.xlu0 %476  ;;  %1438 = vmatprep.subr.bf16.mxu0 %v1437_v62 }
  0xb1   : > { %v424_v3 = vsel %vm423_vm4, %v406_v0, %v408_v43  ;;  %v490_v4 = vsel %vm486_vm5, %v475_v58, %v1819_v1 }
  0xb2   : > { %v1453_v8 = vpack.c.bf16 %v490_v4, %v427_v56 }
  0xb4   : > { %v536_v11 = vpop.permute.xlu1 %535  ;;  %v469_v13 = vpop.permute.xlu0 %468  ;;  %1454 = vmatprep.subr.bf16.mxu1 %v1453_v8 }
  0xb5   : > { %v487_v14 = vsel %vm486_vm5, %v469_v13, %v471_v53  ;;  %1456 = vmatpush1.bf16.msra.mxu1 %v1455_v10  ;;  %v1900_v13 = vld [vmem:[%s2069_s1 + $0x18] sm:$0xff] }
  0xb6   : > { %v1439_v15 = vpack.c.bf16 %v487_v14, %v424_v3  ;;  %v1886_v3 = vld [vmem:[%s2069_s1 + $0x10] sm:$0xff] }
  0xb8   : > { %v540_v16 = vpop.permute.xlu1 %539  ;;  %v538_v17 = vpop.permute.xlu0 %537  ;;  %1440 = vmatpush1.bf16.msra.mxu0 %v1439_v15 }
  0xb9   : > { %v555_v18 = vsel %vm553_vm6, %v536_v11, %v538_v17  ;;  %v556_v19 = vsel %vm553_vm6, %v538_v17, %v540_v16 }
  0xbc   : > { %v604_v20 = vpop.permute.xlu1 %603  ;;  %v1827_v21 = vpop.permute.xlu0 %541 }
  0xbd   : > { %v557_v22 = vsel %vm553_vm6, %v540_v16, %v1827_v21 }
  0xc0   : > { %v608_v23 = vpop.permute.xlu1 %607  ;;  %v606_v24 = vpop.permute.xlu0 %605 }
  0xc1   : > { %v623_v25 = vsel %vm621_vm7, %v604_v20, %v606_v24  ;;  %v624_v26 = vsel %vm621_vm7, %v606_v24, %v608_v23 }
  0xc2   : > { %v1441_v27 = vpack.c.bf16 %v623_v25, %v555_v18  ;;  %v1459_v34 = vpack.c.bf16 %v624_v26, %v556_v19 }
  0xc4   : > { %v534_v28 = vpop.permute.xlu1 %533  ;;  %v1833_v30 = vpop.permute.xlu0 %609  ;;  %1442 = vmatprep.subr.bf16.mxu0 %v1441_v27 }
  0xc5   : > { %v554_v31 = vsel %vm553_vm6, %v534_v28, %v536_v11  ;;  %v625_v32 = vsel %vm621_vm7, %v608_v23, %v1833_v30 }
  0xc6   : > { %v1457_v33 = vpack.c.bf16 %v625_v32, %v557_v22 }
  0xc8   : > { %v227_v35 = vpop.permute.xlu1 %226  ;;  %v602_v36 = vpop.permute.xlu0 %601  ;;  %1458 = vmatprep.subr.bf16.mxu1 %v1457_v33 }
  0xc9   : > { %v239_v38 = vsel %vm234_vm1, %v1746_v12, %v227_v35  ;;  %v622_v39 = vsel %vm621_vm7, %v602_v36, %v604_v20  ;;  %1460 = vmatpush1.bf16.msra.mxu1 %v1459_v34 }
  0xca   : > { %v1443_v40 = vpack.c.bf16 %v622_v39, %v554_v31  ;;  %v1463_v59 = vpack.c.bf16 %v239_v38, %v1602_v2  ;;  %v1871_v2 = vld [vmem:[%s2069_s1 + $0x8] sm:$0xff] }
  0xcc   : > { %v231_v41 = vpop.permute.xlu1 %230  ;;  %v229_v42 = vpop.permute.xlu0 %228  ;;  %1444 = vmatpush1.bf16.msra.mxu0 %v1443_v40 }
  0xcd   : > { %v240_v43 = vsel %vm234_vm1, %v227_v35, %v229_v42  ;;  %v241_v44 = vsel %vm234_vm1, %v229_v42, %v231_v41 }
  0xce   : > { %v1461_v56 = vpack.c.bf16 %v240_v43, %v1615_v5  ;;  %v1479_v5 = vpack.c.bf16 %v241_v44, %v1621_v7 }
  0xd0   : > { %v672_v45 = vpop.permute.xlu1 %671  ;;  %v233_v46 = vpop.permute.xlu0 %232 }
  0xd1   : > { %v242_v47 = vsel %vm234_vm1, %v231_v41, %v233_v46  ;;  %260 = vst.msk [vmem:[#allocation2 + $0x88] sm:$0xff] %vm196_vm0, %v233_v46 }
  0xd2   : > { %v1477_v58 = vpack.c.bf16 %v242_v47, %v1618_v6 }
  0xd4   : > { %v676_v48 = vpop.permute.xlu1 %675  ;;  %v674_v12 = vpop.permute.xlu0 %673 }
  0xd5   : > { %v691_v49 = vsel %vm689_vm8, %v672_v45, %v674_v12  ;;  %v692_v50 = vsel %vm689_vm8, %v674_v12, %v676_v48 }
  0xd6   : > { %847 = vmatprep.subr.mxu0 %v691_v49 }
  0xd8   : > { %v670_v51 = vpop.permute.xlu1 %669  ;;  %v1847_v52 = vpop.permute.xlu0 %677 }
  0xd9   : > { %v690_v53 = vsel %vm689_vm8, %v670_v51, %v672_v45  ;;  %v693_v55 = vsel %vm689_vm8, %v676_v48, %v1847_v52 }
  0xda   : > { %848 = vmatpush1.msra.mxu0 %v690_v53  ;;  %936 = vmatprep.subr.mxu1 %v693_v55 }
  0xdb   : > { %937 = vmatpush1.msra.mxu1 %v692_v50  ;;  %1462 = vmatprep.subr.bf16.mxu0 %v1461_v56 }
  0xdc   : > { %v292_v60 = vpop.permute.xlu1 %291  ;;  %v290_v61 = vpop.permute.xlu0 %289  ;;  %1370 = vmatmul.mubr.msk.f32.vlgmr.msra.gmra.mrb[0].mxu0 %vm818_vm9, %v1856_v57  ;;  %1478 = vmatprep.subr.bf16.mxu1 %v1477_v58 }
  0xdd   : > { %v302_v62 = vsel %vm297_vm2, %v1771_v29, %v290_v61  ;;  %v303_v63 = vsel %vm297_vm2, %v290_v61, %v292_v60  ;;  %1464 = vmatpush1.bf16.msra.mxu0 %v1463_v59  ;;  %1374 = vmatmul.mubr.msk.f32.vlgmr.msra.gmra.mrb[0].mxu1 %vm818_vm9, %v1856_v57 }
  0xde   : > { %1480 = vmatpush1.bf16.msra.mxu1 %v1479_v5  ;;  %901 = vmatprep.mubr.f32.mxu0 %v1556_v9 }
  0xdf   : > { %990 = vmatprep.mubr.f32.mxu1 %v1556_v9 }
  0xe0   : > { %v296_v6 = vpop.permute.xlu1 %295  ;;  %v294_v7 = vpop.permute.xlu0 %293  ;;  %1371 = vmatmul.mubr.msk.f32.gmra.mrb[2].mxu0 %vm818_vm9, %v1871_v2 }
  0xe1   : > { %323 = vst.msk [vmem:[#allocation2 + $0xd0] sm:$0xff] %vm196_vm0, %v296_v6  ;;  %v304_v29 = vsel %vm297_vm2, %v292_v60, %v294_v7  ;;  %v305_v0 = vsel %vm297_vm2, %v294_v7, %v296_v6  ;;  %907 = vmatprep.mubr.f32.mxu0 %v1556_v9  ;;  %1375 = vmatmul.mubr.msk.f32.gmra.mrb[2].mxu1 %vm818_vm9, %v1871_v2  ;;  %v734_v6 = vld [vmem:[#allocation2 + $0x88] sm:$0xff] }
  0xe2   : > { %996 = vmatprep.mubr.f32.mxu1 %v1556_v9 }
  0xe4   : > { %v355_v4 = vpop.permute.xlu1 %354  ;;  %v353_v8 = vpop.permute.xlu0 %352  ;;  %1372 = vmatmul.mubr.msk.f32.gmra.mrb[4].mxu0 %vm818_vm9, %v1886_v3 }
  0xe5   : > { %v365_v10 = vsel %vm360_vm3, %v1785_v37, %v353_v8  ;;  %v366_v11 = vsel %vm360_vm3, %v353_v8, %v355_v4  ;;  %913 = vmatprep.mubr.f32.mxu0 %v1556_v9  ;;  %1376 = vmatmul.mubr.msk.f32.gmra.mrb[4].mxu1 %vm818_vm9, %v1886_v3 }
  0xe6   : > { %v1465_v14 = vpack.c.bf16 %v366_v11, %v303_v63  ;;  %v1467_v15 = vpack.c.bf16 %v365_v10, %v302_v62  ;;  %1002 = vmatprep.mubr.f32.mxu1 %v1556_v9  ;;  %v725_v63 = vld [vmem:[#allocation2 + $0x40] sm:$0xff] }
  0xe7   : > { %v1493_v8 = vpack.c.bf16 %v734_v6, %v725_v63 }
  0xe8   : > { %v359_v16 = vpop.permute.xlu1 %358  ;;  %v357_v17 = vpop.permute.xlu0 %356  ;;  %1466 = vmatprep.subr.bf16.mxu0 %v1465_v14  ;;  %1373 = vmatmul.mubr.msk.f32.gmra.mrb[6].mxu0 %vm818_vm9, %v1900_v13  ;;  %v743_v10 = vld [vmem:[#allocation2 + $0xd0] sm:$0xff] }
  0xe9   : > { %386 = vst.msk [vmem:[#allocation2 + $0x118] sm:$0xff] %vm196_vm0, %v359_v16  ;;  %v367_v37 = vsel %vm360_vm3, %v355_v4, %v357_v17  ;;  %v368_v18 = vsel %vm360_vm3, %v357_v17, %v359_v16  ;;  %1468 = vmatpush1.bf16.msra.mxu0 %v1467_v15  ;;  %1377 = vmatmul.mubr.msk.f32.gmra.mrb[6].mxu1 %vm818_vm9, %v1900_v13 }
  0xea   : > { %v1481_v19 = vpack.c.bf16 %v368_v18, %v305_v0  ;;  %v1483_v20 = vpack.c.bf16 %v367_v37, %v304_v29  ;;  %1073 = vmatprep.mubr.f32.mxu0 %v1556_v9  ;;  %1162 = vmatprep.mubr.f32.mxu1 %v1556_v9 }
  0xec   : > { %v418_v22 = vpop.permute.xlu1 %417  ;;  %v416_v23 = vpop.permute.xlu0 %415  ;;  %1482 = vmatprep.subr.bf16.mxu1 %v1481_v19 }
  0xed   : > { %v428_v24 = vsel %vm423_vm4, %v1807_v54, %v416_v23  ;;  %v429_v25 = vsel %vm423_vm4, %v416_v23, %v418_v22  ;;  %1484 = vmatpush1.bf16.msra.mxu1 %v1483_v20 }
  0xf0   : > { %v422_v26 = vpop.permute.xlu1 %421  ;;  %v420_v27 = vpop.permute.xlu0 %419  ;;  %v752_v4 = vld [vmem:[#allocation2 + $0x118] sm:$0xff] }
  0xf1   : > { %449 = vst.msk [vmem:[#allocation2 + $0x160] sm:$0xff] %vm196_vm0, %v422_v26  ;;  %v430_v28 = vsel %vm423_vm4, %v418_v22, %v420_v27  ;;  %v431_v31 = vsel %vm423_vm4, %v420_v27, %v422_v26  ;;  %v1497_v15 = vpack.c.bf16 %v752_v4, %v743_v10 }
  0xf4   : > { %v481_v32 = vpop.permute.xlu1 %480  ;;  %v479_v33 = vpop.permute.xlu0 %478 }
  0xf5   : > { %v491_v34 = vsel %vm486_vm5, %v1819_v1, %v479_v33  ;;  %v492_v35 = vsel %vm486_vm5, %v479_v33, %v481_v32 }
  0xf6   : > { %v1469_v36 = vpack.c.bf16 %v492_v35, %v429_v25  ;;  %v1471_v54 = vpack.c.bf16 %v491_v34, %v428_v24 }
  0xf8   : > { %v485_v38 = vpop.permute.xlu1 %484  ;;  %v483_v39 = vpop.permute.xlu0 %482  ;;  %1470 = vmatprep.subr.bf16.mxu0 %v1469_v36  ;;  %v761_v19 = vld [vmem:[#allocation2 + $0x160] sm:$0xff] }
  0xf9   : > { %512 = vst.msk [vmem:[#allocation2 + $0x1a8] sm:$0xff] %vm196_vm0, %v485_v38  ;;  %v493_v40 = vsel %vm486_vm5, %v481_v32, %v483_v39  ;;  %v494_v41 = vsel %vm486_vm5, %v483_v39, %v485_v38  ;;  %1472 = vmatpush1.bf16.msra.mxu0 %v1471_v54 }
  0xfa   : > { %v1485_v42 = vpack.c.bf16 %v494_v41, %v431_v31  ;;  %v1487_v43 = vpack.c.bf16 %v493_v40, %v430_v28 }
  0xfc   : > { %v546_v44 = vpop.permute.xlu1 %545  ;;  %v544_v45 = vpop.permute.xlu0 %543  ;;  %1486 = vmatprep.subr.bf16.mxu1 %v1485_v42 }
  0xfd   : > { %v558_v1 = vsel %vm553_vm6, %v1827_v21, %v544_v45  ;;  %v559_v46 = vsel %vm553_vm6, %v544_v45, %v546_v44  ;;  %1488 = vmatpush1.bf16.msra.mxu1 %v1487_v43 }
 0x100   : > { %v550_v47 = vpop.permute.xlu1 %549  ;;  %v548_v48 = vpop.permute.xlu0 %547 }
 0x101   : > { %v560_v12 = vsel %vm553_vm6, %v546_v44, %v548_v48  ;;  %v561_v49 = vsel %vm553_vm6, %v548_v48, %v550_v47 }
 0x104   : > { %v614_v50 = vpop.permute.xlu1 %613  ;;  %v612_v51 = vpop.permute.xlu0 %611 }
 0x105   : > { %v626_v53 = vsel %vm621_vm7, %v1833_v30, %v612_v51  ;;  %v627_v55 = vsel %vm621_vm7, %v612_v51, %v614_v50 }
 0x106   : > { %v1473_v56 = vpack.c.bf16 %v627_v55, %v559_v46  ;;  %v1475_v58 = vpack.c.bf16 %v626_v53, %v558_v1 }
 0x108   : > { %v618_v59 = vpop.permute.xlu1 %617  ;;  %v616_v21 = vpop.permute.xlu0 %615  ;;  %1474 = vmatprep.subr.bf16.mxu0 %v1473_v56 }
 0x109   : > { %v628_v60 = vsel %vm621_vm7, %v614_v50, %v616_v21  ;;  %v629_v61 = vsel %vm621_vm7, %v616_v21, %v618_v59  ;;  %1476 = vmatpush1.bf16.msra.mxu0 %v1475_v58 }
 0x10a   : > { %v1489_v5 = vpack.c.bf16 %v629_v61, %v561_v49  ;;  %v1491_v62 = vpack.c.bf16 %v628_v60, %v560_v12 }
 0x10c   : > { %v682_v7 = vpop.permute.xlu1 %681  ;;  %v680_v29 = vpop.permute.xlu0 %679  ;;  %1490 = vmatprep.subr.bf16.mxu1 %v1489_v5 }
 0x10d   : > { %v694_v30 = vsel %vm689_vm8, %v1847_v52, %v680_v29  ;;  %v695_v0 = vsel %vm689_vm8, %v680_v29, %v682_v7  ;;  %1492 = vmatpush1.bf16.msra.mxu1 %v1491_v62  ;;  %v770_v52 = vld [vmem:[#allocation2 + $0x1a8] sm:$0xff] }
 0x10e   : > { %1025 = vmatprep.subr.mxu0 %v695_v0  ;;  %v1501_v23 = vpack.c.bf16 %v770_v52, %v761_v19 }
 0x10f   : > { %1026 = vmatpush1.msra.mxu0 %v694_v30 }
 0x110   : > { %v686_v11 = vpop.permute.xlu1 %685  ;;  %v684_v14 = vpop.permute.xlu0 %683  ;;  %1494 = vmatprep.subr.bf16.mxu0 %v1493_v8  ;;  %1378 = vmatmul.mubr.msk.f32.vlgmr.msra.gmra.mrb[8].mxu0 %vm818_vm9, %v1856_v57 }
 0x111   : > { %v696_v16 = vsel %vm689_vm8, %v682_v7, %v684_v14  ;;  %v697_v17 = vsel %vm689_vm8, %v684_v14, %v686_v11  ;;  %1496 = vmatpush3.bf16.msra.mxu0 %v1493_v8  ;;  %1079 = vmatprep.mubr.f32.mxu0 %v1556_v9 }
 0x112   : > { %1114 = vmatprep.subr.mxu1 %v697_v17  ;;  %1498 = vmatprep.subr.bf16.mxu0 %v1497_v15 }
 0x113   : > { %1115 = vmatpush1.msra.mxu1 %v696_v16 }
 0x114   : > { %v620_v37 = vpop.permute.xlu1 %619  ;;  %v552_v18 = vpop.permute.xlu0 %551  ;;  %1382 = vmatmul.mubr.msk.f32.vlgmr.msra.gmra.mrb[8].mxu1 %vm818_vm9, %v1856_v57  ;;  %1509 = vmatprep.subr.bf16.mxu1 %v1493_v8 }
 0x115   : > { %v630_v20 = vsel %vm621_vm7, %v618_v59, %v620_v37  ;;  %v562_v22 = vsel %vm553_vm6, %v550_v47, %v552_v18  ;;  %1514 = vmatpush3.bf16.msra.mxu1 %v1493_v8  ;;  %1500 = vmatpush3.bf16.msra.mxu0 %v1497_v15 }
 0x116   : > { %648 = vst.msk [vmem:[#allocation2 + $0x238] sm:$0xff] %vm196_vm0, %v630_v20  ;;  %580 = vst.msk [vmem:[#allocation2 + $0x1f0] sm:$0xff] %vm196_vm0, %v562_v22  ;;  %1379 = vmatmul.mubr.msk.f32.gmra.mrb[10].mxu0 %vm818_vm9, %v1871_v2  ;;  %1510 = vmatprep.subr.bf16.mxu1 %v1497_v15 }
 0x117   : > { %1502 = vmatprep.subr.bf16.mxu0 %v1501_v23  ;;  %1168 = vmatprep.mubr.f32.mxu1 %v1556_v9 }
 0x118   : > { %v688_v24 = vpop.permute.xlu0 %687  ;;  %1383 = vmatmul.mubr.msk.f32.gmra.mrb[10].mxu1 %vm818_vm9, %v1871_v2  ;;  %1085 = vmatprep.mubr.f32.mxu0 %v1556_v9 }
 0x119   : > { %v698_v25 = vsel %vm689_vm8, %v686_v11, %v688_v24  ;;  %1515 = vmatpush3.bf16.msra.mxu1 %v1497_v15  ;;  %1504 = vmatpush3.bf16.msra.mxu0 %v1501_v23 }
 0x11a   : > { %716 = vst.msk [vmem:[#allocation2 + $0x280] sm:$0xff] %vm196_vm0, %v698_v25  ;;  %1380 = vmatmul.mubr.msk.f32.gmra.mrb[12].mxu0 %vm818_vm9, %v1886_v3  ;;  %1511 = vmatprep.subr.bf16.mxu1 %v1501_v23 }
 0x11b   : > { %1174 = vmatprep.mubr.f32.mxu1 %v1556_v9  ;;  %1091 = vmatprep.mubr.f32.mxu0 %v1556_v9 }
 0x11c   : > { %1384 = vmatmul.mubr.msk.f32.gmra.mrb[12].mxu1 %vm818_vm9, %v1886_v3 }
 0x11d   : > { %v779_v26 = vld [vmem:[#allocation2 + $0x1f0] sm:$0xff]  ;;  %v788_v27 = vld [vmem:[#allocation2 + $0x238] sm:$0xff]  ;;  %1516 = vmatpush3.bf16.msra.mxu1 %v1501_v23  ;;  %1180 = vmatprep.mubr.f32.mxu1 %v1556_v9 }
 0x11e   : > { %v1505_v28 = vpack.c.bf16 %v788_v27, %v779_v26  ;;  %1381 = vmatmul.mubr.msk.f32.gmra.mrb[14].mxu0 %vm818_vm9, %v1900_v13 }
 0x11f   : > { %1423 = vmatprep.mubr.msk.f32.mxu0 %vm818_vm9, %v1856_v57 }
 0x120   : > { %1506 = vmatprep.subr.bf16.mxu0 %v1505_v28  ;;  %1512 = vmatprep.subr.bf16.mxu1 %v1505_v28 }
 0x121   : > { %1508 = vmatpush3.bf16.msra.mxu0 %v1505_v28  ;;  %v797_v31 = vld [vmem:[#allocation2 + $0x280] sm:$0xff]  ;;  %1385 = vmatmul.mubr.msk.f32.gmra.mrb[14].mxu1 %vm818_vm9, %v1900_v13 }
 0x122   : > { %1421 = vmatprep.subr.mxu0 %v797_v31  ;;  %1517 = vmatpush3.bf16.msra.mxu1 %v1505_v28 }
 0x123   : > { %1513 = vmatprep.subr.mxu1 %v797_v31  ;;  %1426 = vmatprep.mubr.msk.f32.mxu1 %vm818_vm9, %v1886_v3 }
 0x125   : > { %1422 = vmatpush3.msra.mxu0 %v797_v31  ;;  %v1976_v9 = vpop.permute.xlu1 %800 }
 0x126   : > { %1424 = vmatmul.mubr.msk.f32.vlgmr.msra.gmra.mrb[16].mxu0 %vm818_vm9, %v1871_v2  ;;  %1518 = vmatpush3.msra.mxu1 %v797_v31 }
 0x127   : > { %1427 = vmatmul.mubr.msk.f32.vlgmr.msra.gmra.mrb[16].mxu1 %vm818_vm9, %v1900_v13 }
 0x129   : > { %v1986_v35 = vpop.permute.xlu0 %805  ;;  %v1992_v38 = vpop.permute.xlu1 %810 }
 0x12d   : > { %v2006_v51 = vpop.permute.xlu1 %815 }
 0x1af   : > { %v897_v57 = vpop.f32.mrb[0].mxu0 }
 0x1b0   : > { %v986_v3 = vpop.f32.mrb[0].mxu1  ;;  %v898_v2 = vadd.f32 %v897_v57, %v1976_v9  ;;  %v899_v32 = vpop.f32.mrb[1].mxu0 }
 0x1b1   : > { %v987_v33 = vadd.f32 %v986_v3, %v1976_v9  ;;  %v900_v13 = vadd.f32 %v899_v32, %v1976_v9  ;;  %v988_v34 = vpop.f32.mrb[1].mxu1 }
 0x1b2   : > { %1272 = vst [vmem:[%s1981_s20] sm:$0xff] %v898_v2  ;;  %v989_v36 = vadd.f32 %v988_v34, %v1976_v9 }
 0x1b3   : > { %1274 = vst [vmem:[%s1981_s20 + $0x10] sm:$0xff] %v987_v33  ;;  %1273 = vst [vmem:[%s1981_s20 + $0x8] sm:$0xff] %v900_v13  ;;  %v903_v54 = vpop.f32.mrb[2].mxu0 }
 0x1b4   : > { %1275 = vst [vmem:[%s1981_s20 + $0x18] sm:$0xff] %v989_v36  ;;  %v992_v39 = vpop.f32.mrb[2].mxu1  ;;  %v904_v40 = vadd.f32 %v903_v54, %v1986_v35  ;;  %v905_v41 = vpop.f32.mrb[3].mxu0 }
 0x1b5   : > { %v993_v42 = vadd.f32 %v992_v39, %v1986_v35  ;;  %v906_v43 = vadd.f32 %v905_v41, %v1986_v35  ;;  %v994_v44 = vpop.f32.mrb[3].mxu1 }
 0x1b6   : > { %1281 = vst [vmem:[%s1981_s20 + $0x48] sm:$0xff] %v904_v40  ;;  %v995_v45 = vadd.f32 %v994_v44, %v1986_v35 }
 0x1b7   : > { %1283 = vst [vmem:[%s1981_s20 + $0x58] sm:$0xff] %v993_v42  ;;  %1282 = vst [vmem:[%s1981_s20 + $0x50] sm:$0xff] %v906_v43  ;;  %v909_v1 = vpop.f32.mrb[4].mxu0 }
 0x1b8   : > { %1284 = vst [vmem:[%s1981_s20 + $0x60] sm:$0xff] %v995_v45  ;;  %v998_v46 = vpop.f32.mrb[4].mxu1  ;;  %v910_v47 = vadd.f32 %v909_v1, %v1992_v38  ;;  %v911_v48 = vpop.f32.mrb[5].mxu0 }
 0x1b9   : > { %v999_v12 = vadd.f32 %v998_v46, %v1992_v38  ;;  %v912_v49 = vadd.f32 %v911_v48, %v1992_v38  ;;  %v1000_v50 = vpop.f32.mrb[5].mxu1 }
 0x1ba   : > { %1290 = vst [vmem:[%s1981_s20 + $0x90] sm:$0xff] %v910_v47  ;;  %v1001_v53 = vadd.f32 %v1000_v50, %v1992_v38 }
 0x1bb   : > { %1292 = vst [vmem:[%s1981_s20 + $0xa0] sm:$0xff] %v999_v12  ;;  %1291 = vst [vmem:[%s1981_s20 + $0x98] sm:$0xff] %v912_v49  ;;  %v915_v55 = vpop.f32.mrb[6].mxu0 }
 0x1bc   : > { %1293 = vst [vmem:[%s1981_s20 + $0xa8] sm:$0xff] %v1001_v53  ;;  %v1004_v56 = vpop.f32.mrb[6].mxu1  ;;  %v916_v58 = vadd.f32 %v915_v55, %v2006_v51  ;;  %v917_v59 = vpop.f32.mrb[7].mxu0 }
 0x1bd   : > { %v1005_v21 = vadd.f32 %v1004_v56, %v2006_v51  ;;  %v918_v60 = vadd.f32 %v917_v59, %v2006_v51  ;;  %v1006_v61 = vpop.f32.mrb[7].mxu1 }
 0x1be   : > { %1299 = vst [vmem:[%s1981_s20 + $0xd8] sm:$0xff] %v916_v58  ;;  %v1007_v5 = vadd.f32 %v1006_v61, %v2006_v51 }
 0x1bf   : > { %1301 = vst [vmem:[%s1981_s20 + $0xe8] sm:$0xff] %v1005_v21  ;;  %1300 = vst [vmem:[%s1981_s20 + $0xe0] sm:$0xff] %v918_v60 }
 0x1c0   : > { %1302 = vst [vmem:[%s1981_s20 + $0xf0] sm:$0xff] %v1007_v5 }
 0x1e3   : > { %v1075_v62 = vpop.f32.mrb[8].mxu0 }
 0x1e4   : > { %v1076_v63 = vadd.f32 %v1075_v62, %v1976_v9  ;;  %v1077_v6 = vpop.f32.mrb[9].mxu0 }
 0x1e5   : > { %v1078_v7 = vadd.f32 %v1077_v6, %v1976_v9 }
 0x1e6   : > { %1276 = vst [vmem:[%s1981_s20 + $0x20] sm:$0xff] %v1076_v63 }
 0x1e7   : > { %v1164_v29 = vpop.f32.mrb[8].mxu1  ;;  %1277 = vst [vmem:[%s1981_s20 + $0x28] sm:$0xff] %v1078_v7 }
 0x1e8   : > { %v1165_v30 = vadd.f32 %v1164_v29, %v1976_v9  ;;  %v1166_v0 = vpop.f32.mrb[9].mxu1 }
 0x1e9   : > { %v1167_v4 = vadd.f32 %v1166_v0, %v1976_v9  ;;  %v1081_v8 = vpop.f32.mrb[10].mxu0 }
 0x1ea   : > { %1278 = vst [vmem:[%s1981_s20 + $0x30] sm:$0xff] %v1165_v30  ;;  %v1082_v10 = vadd.f32 %v1081_v8, %v1986_v35  ;;  %v1083_v11 = vpop.f32.mrb[11].mxu0 }
 0x1eb   : > { %1279 = vst [vmem:[%s1981_s20 + $0x38] sm:$0xff] %v1167_v4  ;;  %v1170_v14 = vpop.f32.mrb[10].mxu1  ;;  %v1084_v15 = vadd.f32 %v1083_v11, %v1986_v35 }
 0x1ec   : > { %1285 = vst [vmem:[%s1981_s20 + $0x68] sm:$0xff] %v1082_v10  ;;  %v1171_v16 = vadd.f32 %v1170_v14, %v1986_v35  ;;  %v1172_v17 = vpop.f32.mrb[11].mxu1 }
 0x1ed   : > { %1286 = vst [vmem:[%s1981_s20 + $0x70] sm:$0xff] %v1084_v15  ;;  %v1173_v52 = vadd.f32 %v1172_v17, %v1986_v35  ;;  %v1087_v37 = vpop.f32.mrb[12].mxu0 }
 0x1ee   : > { %1287 = vst [vmem:[%s1981_s20 + $0x78] sm:$0xff] %v1171_v16  ;;  %v1088_v18 = vadd.f32 %v1087_v37, %v1992_v38  ;;  %v1089_v19 = vpop.f32.mrb[13].mxu0 }
 0x1ef   : > { %1288 = vst [vmem:[%s1981_s20 + $0x80] sm:$0xff] %v1173_v52  ;;  %v1176_v20 = vpop.f32.mrb[12].mxu1  ;;  %v1090_v22 = vadd.f32 %v1089_v19, %v1992_v38 }
 0x1f0   : > { %1294 = vst [vmem:[%s1981_s20 + $0xb0] sm:$0xff] %v1088_v18  ;;  %v1177_v23 = vadd.f32 %v1176_v20, %v1992_v38  ;;  %v1178_v24 = vpop.f32.mrb[13].mxu1 }
 0x1f1   : > { %1295 = vst [vmem:[%s1981_s20 + $0xb8] sm:$0xff] %v1090_v22  ;;  %v1179_v25 = vadd.f32 %v1178_v24, %v1992_v38  ;;  %v1093_v26 = vpop.f32.mrb[14].mxu0 }
 0x1f2   : > { %1296 = vst [vmem:[%s1981_s20 + $0xc0] sm:$0xff] %v1177_v23  ;;  %v1094_v27 = vadd.f32 %v1093_v26, %v2006_v51  ;;  %v1095_v28 = vpop.f32.mrb[15].mxu0 }
 0x1f3   : > { %1297 = vst [vmem:[%s1981_s20 + $0xc8] sm:$0xff] %v1179_v25  ;;  %v1096_v31 = vadd.f32 %v1095_v28, %v2006_v51 }
 0x1f4   : > { %1303 = vst [vmem:[%s1981_s20 + $0xf8] sm:$0xff] %v1094_v27  ;;  %v1182_v57 = vpop.f32.mrb[14].mxu1 }
 0x1f5   : > { %v1183_v3 = vadd.f32 %v1182_v57, %v2006_v51  ;;  %1304 = vst [vmem:[%s1981_s20 + $0x100] sm:$0xff] %v1096_v31  ;;  %v1184_v2 = vpop.f32.mrb[15].mxu1 }
 0x1f6   : > { %v1185_v32 = vadd.f32 %v1184_v2, %v2006_v51 }
 0x1f7   : > { %1305 = vst [vmem:[%s1981_s20 + $0x108] sm:$0xff] %v1183_v3 }
 0x1f8   : > { %1306 = vst [vmem:[%s1981_s20 + $0x110] sm:$0xff] %v1185_v32 }
 0x1f9   : > { %v1425_v33 = vpop.f32.mrb[16].mxu0 }
 0x1fa   : > { %v1259_v13 = vadd.f32 %v1425_v33, %v1986_v35  ;;  %v1253_v34 = vpop.f32.mrb[17].mxu0  ;;  %v1428_v36 = vpop.f32.mrb[16].mxu1 }
 0x1fb   : > { %v1254_v54 = vadd.f32 %v1253_v34, %v1976_v9  ;;  %v1269_v39 = vadd.f32 %v1428_v36, %v2006_v51  ;;  %v1263_v40 = vpop.f32.mrb[17].mxu1 }
 0x1fc   : > { %1289 = vst.msk [vmem:[%s1981_s20 + $0x88] sm:$0xff] %vm196_vm0, %v1259_v13  ;;  %v1264_v41 = vadd.f32 %v1263_v40, %v1992_v38 }
 0x1fd   : > { %1280 = vst.msk [vmem:[%s1981_s20 + $0x40] sm:$0xff] %vm196_vm0, %v1254_v54  ;;  %1307 = vst.msk [vmem:[%s1981_s20 + $0x118] sm:$0xff] %vm196_vm0, %v1269_v39 }
 0x1fe   : > { %1298 = vst.msk [vmem:[%s1981_s20 + $0xd0] sm:$0xff] %vm196_vm0, %v1264_v41 }
 0x1ff PF: > { %s13_s12 = sadd.s32 1, %s1547_s12  }
 0x200   : > { %p10_p4 = scmp.ge.s32.totalorder %s13_s12, 4  }
 0x202   :  { %12 = sbr.rel (!%p10_p4) target bundleno = 1 (0x1), region = 62 }

// kernel: nas_forward_pallas.3
= control target key start
LH: loop header
LB: loop body
LE: loop exit
PB: predicated region body
PF: predicated region fallthrough
CT: control target
= control target key end

     0   :  { %15 = vsyncpa [#allocation7], 0  ;;  %s4998_s13 = smov 0   ;;  %s5829_s0 = inlined_call_operand.vmem [shape: f32[2,3,384], index: 0, kind: input, shape index: {}]   ;;  %s5830_s1 = inlined_call_operand.hbm [shape: f32[1,288], index: 1, kind: input, shape index: {}]   ;;  %s5831_s2 = inlined_call_operand.vmem [shape: f32[8,27], index: 2, kind: input, shape index: {}]   ;;  %s5832_s3 = inlined_call_operand.vmem [shape: f32[8,1], index: 3, kind: input, shape index: {}]   ;;  %s5833_s4 = inlined_call_operand.vmem [shape: f32[4,8,72], index: 4, kind: input, shape index: {}]   ;;  %s5834_s5 = inlined_call_operand.vmem [shape: f32[4,8,1], index: 5, kind: input, shape index: {}]   ;;  %s5835_s6 = inlined_call_operand.vmem [shape: f32[8,72], index: 6, kind: input, shape index: {}]   ;;  %s5836_s7 = inlined_call_operand.vmem [shape: f32[8,1], index: 7, kind: input, shape index: {}]   ;;  %s5837_s8 = inlined_call_operand.vmem [shape: f32[32,72], index: 8, kind: input, shape index: {}]   ;;  %s5838_s9 = inlined_call_operand.vmem [shape: f32[32,1], index: 9, kind: input, shape index: {}]   ;;  %s5839_s10 = inlined_call_operand.vmem [shape: f32[2,32,288], index: 10, kind: output, shape index: {}]  }
   0x1 LB: > { %s5004_s14 = sadd.s32 4294967295, %s4920_s13   ;;  %p4310_p0 = scmp.ge.s32.totalorder %s4920_s13, 1  ;;  %s4920_s13 = sphi %s4998_s13, %s21_s13  }
   0x2   : > { %p267_p1 = scmp.lt.s32.totalorder %s4920_s13, 3  ;;  %p5840_p3 = scmp.eq.s32.totalorder %s5004_s14, 0 }
   0x3   : > { %s4922_s16 = smov [#allocation6]   ;;  %s4882_s21 = scalar_lea.hbm %s5830_s1, 48 }
   0x4   : > { %p5008_p2 = pnand %p4310_p0, %p267_p1  ;;  %s280_s17 = sshll.u32 %s4922_s16, 4  ;;  %s281_s17 = int_to_ptr.vmem [resolvable:$true] %s280_s17 }
   0x5   : > { %p4883_p6 = scmp.ne.s32.totalorder %s5830_s1, %s4882_s21  ;;  %p4889_p10 = scmp.lt.u32.totalorder %s4882_s21, %s5830_s1 }
   0x6   : > { %s5842_s15 = scalar_select %p5008_p2, 1, 0 }
   0x7   : > { %p4837_p4 = pneg %p5008_p2 }
   0x9   : > { %p5017_p5 = pnand %p5840_p3, %p4837_p4 }
   0xb   : > { %p4884_p7 = pneg %p5017_p5 }
   0xd   : > { %p4885_p8 = pnand %p4884_p7, %p4883_p6 }
   0xf   : > { %p4886_p9 = pneg %p4885_p8 }
  0x11   : > { %p4891_p11 = pnand %p4889_p10, %p4886_p9 }
  0x13   : > { %4894 = shalt.err (!%p4891_p11)
}
  0x14   : > { %s4895_s26 = scalar_lea.vmem %s281_s17, 48  ;;  %s4902_s27 = scalar_lea.vmem %s281_s17, 64 }
  0x15   : > { %p4896_p12 = scmp.ne.s32.totalorder %s281_s17, %s4895_s26  ;;  %p4903_p1 = scmp.lt.s32.totalorder %s281_s17, %s281_s17 }
  0x16   : > { %p4904_p4 = scmp.lt.s32.totalorder %s4902_s27, %s4895_s26 }
  0x17   : > { %p4898_p13 = pnand %p4896_p12, %p4884_p7 }
  0x18   : > { %p4905_p3 = por %p4904_p4, %p4903_p1 }
  0x19   : > { %p4899_p0 = pneg %p4898_p13 }
  0x1b   : > { %p4906_p2 = pnand %p4905_p3, %p4899_p0 }
  0x1d   : > { %4909 = shalt.err (!%p4906_p2)
}
  0x1e   : > { %4840 = dma.hbm_to_vmem [thread:$0]  (!%p5017_p5), %s5830_s1, 48, %s281_s17, [#allocation7]  }
  0x1f   : > { %p5844_p6 = scmp.ne.s32.totalorder %s5842_s15, 0 }
  0x20   : > { %p5845_p8 = scmp.eq.s32.totalorder (!%p5844_p6), %s5004_s14, 0 }
  0x21   : > { %325 = sbr.rel (%p5844_p6) target bundleno = 3477 (0xd95), region = 60 }
  0x28   : > { %4915 = dma.done.wait (%p5845_p8), [#allocation7], 48   ;;  %p5846_p7 = pmov %p5845_p8 }
  0x29   : > { %p363_p9 = scmp.lt.s32.totalorder %s5004_s14, 1  ;;  %v4923_v0 = vmov 0.0   ;;  %s4924_s16 = smov 126   ;;  %v5068_v4 = vld [vmem:[%s5831_s2] sm:$0xff]  ;;  %vm405_vm0 = vcmask 1042432   ;;  %vm402_vm1 = vcmask 23552  }
  0x2a   : > { %4917 = vsyncadd (%p5846_p7), [#allocation7], 4294967248  ;;  %625 = vmatprep.mubr.f32.mxu0 %v4923_v0  ;;  %374 = vst [vmem:[#allocation2] sm:$0xff] %v4923_v0  ;;  %476 = vmatprep.mubr.f32.mxu1 %v4923_v0  ;;  %s4925_s19 = smov 122   ;;  %s4926_s20 = smov 110   ;;  %v4936_v24 = vmov 0  }
  0x2b   : > { %376 = vst [vmem:[#allocation2 + $0x10] sm:$0xff] %v4923_v0  ;;  %377 = vst [vmem:[#allocation3] sm:$0xff] %v4923_v0  ;;  %s5848_s14 = smov (!%p363_p9, %s5004_s14), 1  ;;  %s4927_s21 = smov 119   ;;  %4872 = vset.pattern.permute.xlu0 %v4936_v24  ;;  %4873 = vset.pattern.permute.xlu1 %v4936_v24  ;;  %v384_v27 = vld [vmem:[%s5832_s3] sm:$0xff]  ;;  %vm715_vm2 = vcmask 1031168  }
  0x2c   : > { %379 = vst [vmem:[#allocation3 + $0x10] sm:$0xff] %v4923_v0  ;;  %380 = vst [vmem:[#allocation4] sm:$0xff] %v4923_v0  ;;  %s4831_s30 = smul.u32 12, %s5848_s14  ;;  %s4928_s22 = smov 127   ;;  %vm883_vm3 = vcmask 900096   ;;  %vm399_vm4 = vcmask 1039360  }
  0x2d   : > { %382 = vst [vmem:[#allocation4 + $0x10] sm:$0xff] %v4923_v0  ;;  %s4929_s23 = smov 125   ;;  %s4930_s24 = smov 109   ;;  %vm1051_vm5 = vcmask 891904   ;;  %vm4940_vm6 = vmmov 0   ;;  %vm1219_vm7 = vcmask 883712  }
  0x2e   : > { %s5059_s15 = scalar_lea.vmem %s5829_s0, %s4831_s30  ;;  %s4931_s25 = smov 116   ;;  %vm1387_vm8 = vcmask 752640   ;;  %vm1555_vm9 = vcmask 744448   ;;  %vm1723_vm10 = vcmask 736256   ;;  %vm1920_vm11 = vcmask 1047704  }
  0x2f   : > { %v703_v1 = vld [vmem:[%s5059_s15 + $0x8] sm:$0x7]  ;;  %v702_v2 = vld [vmem:[%s5059_s15] sm:$0x77]  ;;  %s4932_s26 = smov 108   ;;  %s4933_s27 = smov 113  }
  0x30   : > { %713 = vrot.lane.b32.xlu0 %v703_v1, %s4924_s16  ;;  %709 = vrot.lane.b32.xlu1 %v702_v2, %s4924_s16  ;;  %v708_v3 = vcombine.high %v702_v2, %v702_v2  ;;  %v870_v5 = vld [vmem:[%s5059_s15] sm:$0x77]  ;;  %v871_v9 = vld [vmem:[%s5059_s15 + $0x8] sm:$0x7]  ;;  %s4934_s28 = smov 92   ;;  %s4935_s29 = smov 91  }
  0x31   : > { %v385_v6 = vld [vmem:[%s5059_s15] sm:$0x77]  ;;  %v876_v8 = vcombine.high %v870_v5, %v870_v5  ;;  %v5085_v10 = vld [vmem:[%s5059_s15 + $0x8] sm:$0x7]  ;;  %s4937_s30 = smov 107   ;;  %s4938_s11 = smov 90  }
  0x32   : > { %v392_v7 = vcombine.high %v385_v6, %v385_v6  ;;  %v1038_v11 = vld [vmem:[%s5059_s15] sm:$0x77]  ;;  %v1039_v13 = vld [vmem:[%s5059_s15 + $0x8] sm:$0x7]  ;;  %s4939_s12 = smov 104   ;;  %vm1914_vm12 = vcmask 154624  }
  0x33   : > { %v1044_v12 = vcombine.high %v1038_v11, %v1038_v11  ;;  %v1206_v14 = vld [vmem:[%s5059_s15] sm:$0x77]  ;;  %v1207_v16 = vld [vmem:[%s5059_s15 + $0x8] sm:$0x7]  ;;  %vm1923_vm13 = vcmask 416768   ;;  %vm1935_vm14 = vcmask 261120  }
  0x34   : > { %711 = vrot.lane.b32.xlu0 %v708_v3, %s4924_s16  ;;  %704 = vrot.lane.b32.xlu1 %v5068_v4, %s4925_s19  ;;  %v1212_v15 = vcombine.high %v1206_v14, %v1206_v14  ;;  %v1374_v17 = vld [vmem:[%s5059_s15] sm:$0x77]  ;;  %v1375_v19 = vld [vmem:[%s5059_s15 + $0x8] sm:$0x7]  ;;  %vm2129_vm15 = vcmask 588800   ;;  %s4832_s19 = smul.u32 96, %s5848_s14 }
  0x35   : > { %4322 = vmatprep.subr.msk.mxu0 %vm405_vm0, %v392_v7  ;;  %v1380_v18 = vcombine.high %v1374_v17, %v1374_v17  ;;  %v1542_v20 = vld [vmem:[%s5059_s15] sm:$0x77]  ;;  %v1543_v22 = vld [vmem:[%s5059_s15 + $0x8] sm:$0x7] }
  0x36   : > { %4323 = vmatpush1.msk.msra.mxu0 %vm405_vm0, %v385_v6  ;;  %v1548_v21 = vcombine.high %v1542_v20, %v1542_v20  ;;  %v1710_v23 = vld [vmem:[%s5059_s15] sm:$0x77]  ;;  %v1711_v26 = vld [vmem:[%s5059_s15 + $0x8] sm:$0x7]  ;;  %s4941_s15 = smov 19  }
  0x37   : > { %4324 = vmatmul.mubr.msk.f32.vlgmr.msra.gmra.mrb[0].mxu0 %vm402_vm1, %v5068_v4  ;;  %v1716_v25 = vcombine.high %v1710_v23, %v1710_v23 }
  0x38   : > { %879 = vrot.lane.b32.xlu0 %v876_v8, %s4926_s20  ;;  %881 = vrot.lane.b32.xlu1 %v871_v9, %s4926_s20 }
  0x39   : > { %790 = vmatprep.mubr.f32.mxu0 %v4923_v0 }
  0x3c   : > { %877 = vrot.lane.b32.xlu0 %v870_v5, %s4926_s20  ;;  %872 = vrot.lane.b32.xlu1 %v5068_v4, %s4927_s21 }
  0x40   : > { %395 = vrot.lane.b32.xlu0 %v392_v7, %s4928_s22  ;;  %397 = vrot.lane.b32.xlu1 %v5085_v10, %s4928_s22 }
  0x44   : > { %393 = vrot.lane.b32.xlu0 %v385_v6, %s4928_s22  ;;  %388 = vrot.lane.b32.xlu1 %v5068_v4, %s4929_s23 }
  0x48   : > { %1047 = vrot.lane.b32.xlu0 %v1044_v12, %s4930_s24  ;;  %1049 = vrot.lane.b32.xlu1 %v1039_v13, %s4930_s24 }
  0x4c   : > { %1045 = vrot.lane.b32.xlu0 %v1038_v11, %s4930_s24  ;;  %1040 = vrot.lane.b32.xlu1 %v5068_v4, %s4931_s25 }
  0x50   : > { %1215 = vrot.lane.b32.xlu0 %v1212_v15, %s4932_s26  ;;  %1217 = vrot.lane.b32.xlu1 %v1207_v16, %s4932_s26 }
  0x54   : > { %1213 = vrot.lane.b32.xlu0 %v1206_v14, %s4932_s26  ;;  %1208 = vrot.lane.b32.xlu1 %v5068_v4, %s4933_s27 }
  0x58   : > { %1383 = vrot.lane.b32.xlu0 %v1380_v18, %s4934_s28  ;;  %1385 = vrot.lane.b32.xlu1 %v1375_v19, %s4934_s28 }
  0x5c   : > { %1381 = vrot.lane.b32.xlu0 %v1374_v17, %s4934_s28  ;;  %1376 = vrot.lane.b32.xlu1 %v5068_v4, %s4926_s20 }
  0x60   : > { %1551 = vrot.lane.b32.xlu0 %v1548_v21, %s4935_s29  ;;  %1553 = vrot.lane.b32.xlu1 %v1543_v22, %s4935_s29 }
  0x64   : > { %1549 = vrot.lane.b32.xlu0 %v1542_v20, %s4935_s29  ;;  %1544 = vrot.lane.b32.xlu1 %v5068_v4, %s4937_s30 }
  0x68   : > { %1719 = vrot.lane.b32.xlu0 %v1716_v25, %s4938_s11  ;;  %1721 = vrot.lane.b32.xlu1 %v1711_v26, %s4938_s11 }
  0x6c   : > { %1717 = vrot.lane.b32.xlu0 %v1710_v23, %s4938_s11  ;;  %1712 = vrot.lane.b32.xlu1 %v5068_v4, %s4939_s12 }
  0x70   : > { %1880 = vperm.xlu0 %4872, %v384_v27  }
  0xa2   : > { %v714_v28 = vpop.permute.xlu0 %713  ;;  %v710_v29 = vpop.permute.xlu1 %709 }
  0xa6   : > { %v712_v30 = vpop.permute.xlu0 %711  ;;  %v705_v31 = vpop.permute.xlu1 %704 }
  0xa7   : > { %v716_v32 = vsel %vm715_vm2, %v710_v29, %v712_v30  ;;  %v717_v33 = vsel %vm715_vm2, %v712_v30, %v714_v28 }
  0xa8   : > { %4327 = vmatprep.subr.msk.mxu0 %vm405_vm0, %v717_v33 }
  0xa9   : > { %4328 = vmatpush1.msk.msra.mxu0 %vm405_vm0, %v716_v32  ;;  %v1887_v32 = vlaneseq }
  0xaa   : > { %v880_v34 = vpop.permute.xlu0 %879  ;;  %v882_v35 = vpop.permute.xlu1 %881  ;;  %4329 = vmatmul.mubr.msk.f32.vlgmr.msra.gmra.mrb[0].mxu0 %vm402_vm1, %v705_v31 }
  0xab   : > { %v885_v36 = vsel %vm883_vm3, %v880_v34, %v882_v35  ;;  %958 = vmatprep.mubr.f32.mxu0 %v4923_v0 }
  0xac   : > { %4332 = vmatprep.subr.msk.mxu0 %vm405_vm0, %v885_v36  ;;  %v1888_v36 = vshrl.u32 %v1887_v32, 7 }
  0xae   : > { %v878_v37 = vpop.permute.xlu0 %877  ;;  %v873_v38 = vpop.permute.xlu1 %872 }
  0xaf   : > { %v884_v39 = vsel %vm883_vm3, %v878_v37, %v880_v34 }
  0xb0   : > { %4333 = vmatpush1.msk.msra.mxu0 %vm405_vm0, %v884_v39 }
  0xb2   : > { %v396_v40 = vpop.permute.xlu0 %395  ;;  %v398_v41 = vpop.permute.xlu1 %397  ;;  %4334 = vmatmul.mubr.msk.f32.vlgmr.msra.gmra.mrb[0].mxu0 %vm402_vm1, %v873_v38 }
  0xb3   : > { %v401_v42 = vsel %vm399_vm4, %v396_v40, %v398_v41  ;;  %1126 = vmatprep.mubr.f32.mxu0 %v4923_v0 }
  0xb4   : > { %4317 = vmatprep.subr.msk.mxu1 %vm405_vm0, %v401_v42  ;;  %v1889_v42 = vsub.s32 0, %v1888_v36 }
  0xb6   : > { %v394_v43 = vpop.permute.xlu0 %393  ;;  %v389_v44 = vpop.permute.xlu1 %388 }
  0xb7   : > { %v400_v45 = vsel %vm399_vm4, %v394_v43, %v396_v40  ;;  %v1897_v40 = vsub.s32 2, %v1888_v36 }
  0xb8   : > { %4318 = vmatpush1.msk.msra.mxu1 %vm405_vm0, %v400_v45 }
  0xb9   : > { %4319 = vmatmul.mubr.msk.f32.vlgmr.msra.gmra.mrb[0].mxu1 %vm402_vm1, %v389_v44  ;;  %4469 = vmatprep.subr.mxu1 %v4923_v0 }
  0xba   : > { %v1048_v46 = vpop.permute.xlu0 %1047  ;;  %4470 = vmatpush3.msk.msra.mxu1 %vm405_vm0, %v398_v41  ;;  %v1050_v47 = vpop.permute.xlu1 %1049  ;;  %4471 = vmatprep.mubr.msk.f32.mxu1 %vm4940_vm6, %v4923_v0  ;;  %v373_v41 = vld [vmem:[#allocation6] sm:$0x7] }
  0xbb   : > { %v1053_v48 = vsel %vm1051_vm5, %v1048_v46, %v1050_v47  ;;  %4474 = vmatprep.subr.mxu1 %v4923_v0 }
  0xbc   : > { %4337 = vmatprep.subr.msk.mxu0 %vm405_vm0, %v1053_v48 }
  0xbd   : > { %4472 = vmatmul.mubr.msk.f32.vlgmr.msra.gmra.mrb[2].mxu1 %vm402_vm1, %v389_v44 }
  0xbe   : > { %v1046_v49 = vpop.permute.xlu0 %1045  ;;  %v1041_v50 = vpop.permute.xlu1 %1040  ;;  %4475 = vmatpush3.msk.msra.mxu1 %vm405_vm0, %v5085_v10  ;;  %4476 = vmatprep.mubr.msk.f32.mxu1 %vm4940_vm6, %v4923_v0 }
  0xbf   : > { %v1052_v51 = vsel %vm1051_vm5, %v1046_v49, %v1048_v46  ;;  %4479 = vmatprep.subr.mxu1 %v4923_v0  ;;  %v5222_v46 = vrot.slane %v373_v41, %v1897_v40 }
  0xc0   : > { %4338 = vmatpush1.msk.msra.mxu0 %vm405_vm0, %v1052_v51 }
  0xc1   : > { %4477 = vmatmul.mubr.msk.f32.vlgmr.msra.gmra.mrb[4].mxu1 %vm402_vm1, %v5068_v4  ;;  %4339 = vmatmul.mubr.msk.f32.vlgmr.msra.gmra.mrb[0].mxu0 %vm402_vm1, %v1041_v50 }
  0xc2   : > { %4480 = vmatpush3.msk.msra.mxu1 %vm405_vm0, %v714_v28  ;;  %v1216_v52 = vpop.permute.xlu0 %1215  ;;  %v1218_v53 = vpop.permute.xlu1 %1217  ;;  %4481 = vmatprep.mubr.msk.f32.mxu1 %vm4940_vm6, %v4923_v0 }
  0xc3   : > { %4484 = vmatprep.subr.mxu1 %v4923_v0  ;;  %v1221_v54 = vsel %vm1219_vm7, %v1216_v52, %v1218_v53  ;;  %1294 = vmatprep.mubr.f32.mxu0 %v4923_v0 }
  0xc4   : > { %4342 = vmatprep.subr.msk.mxu0 %vm405_vm0, %v1221_v54 }
  0xc5   : > { %4482 = vmatmul.mubr.msk.f32.vlgmr.msra.gmra.mrb[6].mxu1 %vm402_vm1, %v705_v31 }
  0xc6   : > { %4485 = vmatpush3.msk.msra.mxu1 %vm405_vm0, %v882_v35  ;;  %v1214_v55 = vpop.permute.xlu0 %1213  ;;  %v1209_v56 = vpop.permute.xlu1 %1208  ;;  %4486 = vmatprep.mubr.msk.f32.mxu1 %vm4940_vm6, %v4923_v0 }
  0xc7   : > { %v1220_v57 = vsel %vm1219_vm7, %v1214_v55, %v1216_v52  ;;  %4489 = vmatprep.subr.mxu1 %v4923_v0  ;;  %v5224_v52 = vrot.slane %v373_v41, %v1889_v42 }
  0xc8   : > { %4343 = vmatpush1.msk.msra.mxu0 %vm405_vm0, %v1220_v57 }
  0xc9   : > { %4487 = vmatmul.mubr.msk.f32.vlgmr.msra.gmra.mrb[8].mxu1 %vm402_vm1, %v873_v38  ;;  %4344 = vmatmul.mubr.msk.f32.vlgmr.msra.gmra.mrb[0].mxu0 %vm402_vm1, %v1209_v56 }
  0xca   : > { %4490 = vmatpush3.msk.msra.mxu1 %vm405_vm0, %v1050_v47  ;;  %v1384_v58 = vpop.permute.xlu0 %1383  ;;  %v1386_v59 = vpop.permute.xlu1 %1385  ;;  %4491 = vmatprep.mubr.msk.f32.mxu1 %vm4940_vm6, %v4923_v0 }
  0xcb   : > { %4494 = vmatprep.subr.mxu1 %v4923_v0  ;;  %v1389_v60 = vsel %vm1387_vm8, %v1384_v58, %v1386_v59  ;;  %1462 = vmatprep.mubr.f32.mxu0 %v4923_v0 }
  0xcc   : > { %4347 = vmatprep.subr.msk.mxu0 %vm405_vm0, %v1389_v60 }
  0xcd   : > { %4492 = vmatmul.mubr.msk.f32.vlgmr.msra.gmra.mrb[10].mxu1 %vm402_vm1, %v1041_v50 }
  0xce   : > { %4495 = vmatpush3.msk.msra.mxu1 %vm405_vm0, %v1218_v53  ;;  %v1382_v61 = vpop.permute.xlu0 %1381  ;;  %v1377_v62 = vpop.permute.xlu1 %1376  ;;  %4496 = vmatprep.mubr.msk.f32.mxu1 %vm4940_vm6, %v4923_v0  ;;  %v1893_v53 = vsub.s32 1, %v1888_v36 }
  0xcf   : > { %v1388_v63 = vsel %vm1387_vm8, %v1382_v61, %v1384_v58  ;;  %4499 = vmatprep.subr.mxu1 %v4923_v0 }
  0xd0   : > { %4348 = vmatpush1.msk.msra.mxu0 %vm405_vm0, %v1388_v63 }
  0xd1   : > { %4497 = vmatmul.mubr.msk.f32.vlgmr.msra.gmra.mrb[12].mxu1 %vm402_vm1, %v1209_v56  ;;  %4349 = vmatmul.mubr.msk.f32.vlgmr.msra.gmra.mrb[0].mxu0 %vm402_vm1, %v1377_v62 }
  0xd2   : > { %4500 = vmatpush3.msk.msra.mxu1 %vm405_vm0, %v1386_v59  ;;  %v1552_v1 = vpop.permute.xlu0 %1551  ;;  %v1554_v2 = vpop.permute.xlu1 %1553  ;;  %4501 = vmatprep.mubr.msk.f32.mxu1 %vm4940_vm6, %v4923_v0  ;;  %v5229_v59 = vrot.slane %v373_v41, %v1893_v53 }
  0xd3   : > { %v1557_v3 = vsel %vm1555_vm9, %v1552_v1, %v1554_v2  ;;  %4504 = vmatprep.subr.mxu1 %v4923_v0  ;;  %1630 = vmatprep.mubr.f32.mxu0 %v4923_v0 }
  0xd4   : > { %4352 = vmatprep.subr.msk.mxu0 %vm405_vm0, %v1557_v3 }
  0xd5   : > { %4502 = vmatmul.mubr.msk.f32.vlgmr.msra.gmra.mrb[14].mxu1 %vm402_vm1, %v1377_v62 }
  0xd6   : > { %v1550_v4 = vpop.permute.xlu0 %1549  ;;  %4505 = vmatpush3.msk.msra.mxu1 %vm405_vm0, %v1554_v2  ;;  %v1545_v5 = vpop.permute.xlu1 %1544  ;;  %4506 = vmatprep.mubr.msk.f32.mxu1 %vm4940_vm6, %v4923_v0 }
  0xd7   : > { %v1556_v6 = vsel %vm1555_vm9, %v1550_v4, %v1552_v1  ;;  %4509 = vmatprep.subr.mxu1 %v4923_v0 }
  0xd8   : > { %4353 = vmatpush1.msk.msra.mxu0 %vm405_vm0, %v1556_v6  ;;  %v1929_v6 = vld [vmem:[%s5834_s5] sm:$0xff] }
  0xd9   : > { %4354 = vmatmul.mubr.msk.f32.vlgmr.msra.gmra.mrb[0].mxu0 %vm402_vm1, %v1545_v5  ;;  %4507 = vmatmul.mubr.msk.f32.vlgmr.msra.gmra.mrb[16].mxu1 %vm402_vm1, %v1545_v5  ;;  %v4942_v5 = vmov 0.0|0.0  }
  0xda   : > { %v1720_v7 = vpop.permute.xlu0 %1719  ;;  %v1722_v8 = vpop.permute.xlu1 %1721  ;;  %4511 = vmatprep.mubr.msk.f32.mxu1 %vm4940_vm6, %v4923_v0  ;;  %1798 = vmatprep.mubr.f32.mxu0 %v4923_v0 }
  0xdb   : > { %v1725_v9 = vsel %vm1723_vm10, %v1720_v7, %v1722_v8  ;;  %4510 = vmatpush3.msk.msra.mxu1 %vm405_vm0, %v1722_v8 }
  0xdc   : > { %4357 = vmatprep.subr.msk.mxu0 %vm405_vm0, %v1725_v9  ;;  %4659 = vmatprep.subr.bf16.mxu1 %v4942_v5 }
  0xde   : > { %v1718_v10 = vpop.permute.xlu0 %1717  ;;  %v1713_v11 = vpop.permute.xlu1 %1712 }
  0xdf   : > { %v1724_v12 = vsel %vm1723_vm10, %v1718_v10, %v1720_v7  ;;  %4512 = vmatmul.mubr.msk.f32.vlgmr.msra.gmra.mrb[18].mxu1 %vm402_vm1, %v1713_v11 }
  0xe0   : > { %4358 = vmatpush1.msk.msra.mxu0 %vm405_vm0, %v1724_v12  ;;  %4532 = vmatprep.mubr.msk.f32.mxu1 %vm4940_vm6, %v4923_v0 }
  0xe1   : > { %4359 = vmatmul.mubr.msk.f32.vlgmr.msra.gmra.mrb[0].mxu0 %vm402_vm1, %v1713_v11 }
  0xe2   : > { %2197 = vmatprep.mubr.f32.mxu0 %v4923_v0 }
  0xef   : > { %v1881_v44 = vpop.permute.xlu0 %1880 }
 0x18c   : > { %v478_v13 = vpop.f32.mrb[0].mxu1 }
 0x18d   : > { %v480_v14 = vpop.f32.mrb[1].mxu1 }
 0x190   : > { %v549_v15 = vpop.f32.mrb[2].mxu1 }
 0x191   : > { %v4473_v16 = vpop.f32.mrb[3].mxu1 }
 0x194   : > { %v698_v17 = vpop.f32.mrb[4].mxu1 }
 0x195   : > { %v699_v18 = vadd.f32 %v698_v17, %v549_v15  ;;  %v4478_v19 = vpop.f32.mrb[5].mxu1 }
 0x198   : > { %v863_v20 = vpop.f32.mrb[6].mxu1 }
 0x199   : > { %v869_v21 = vadd.f32 %v863_v20, %v699_v18  ;;  %v4483_v22 = vpop.f32.mrb[7].mxu1 }
 0x19c   : > { %v1031_v23 = vpop.f32.mrb[8].mxu1 }
 0x19d   : > { %v1037_v24 = vadd.f32 %v1031_v23, %v869_v21  ;;  %v4488_v25 = vpop.f32.mrb[9].mxu1 }
 0x1a0   : > { %v1199_v26 = vpop.f32.mrb[10].mxu1 }
 0x1a1   : > { %v1205_v27 = vadd.f32 %v1199_v26, %v1037_v24  ;;  %v4493_v28 = vpop.f32.mrb[11].mxu1 }
 0x1a4   : > { %v1367_v29 = vpop.f32.mrb[12].mxu1 }
 0x1a5   : > { %v1373_v30 = vadd.f32 %v1367_v29, %v1205_v27  ;;  %v4498_v31 = vpop.f32.mrb[13].mxu1 }
 0x1a8   : > { %v1535_v33 = vpop.f32.mrb[14].mxu1 }
 0x1a9   : > { %v1541_v34 = vadd.f32 %v1535_v33, %v1373_v30  ;;  %v4503_v35 = vpop.f32.mrb[15].mxu1 }
 0x1ac   : > { %v1703_v37 = vpop.f32.mrb[16].mxu1 }
 0x1ad   : > { %v1709_v38 = vadd.f32 %v1703_v37, %v1541_v34  ;;  %v4508_v39 = vpop.f32.mrb[17].mxu1 }
 0x1b2   : > { %v1871_v43 = vpop.f32.mrb[18].mxu1 }
 0x1b3   : > { %v1877_v45 = vadd.f32 %v1871_v43, %v1709_v38  ;;  %v4513_v47 = vpop.f32.mrb[19].mxu1 }
 0x1b4   : > { %v1800_v48 = vpop.f32.mrb[0].mxu0 }
 0x1b5   : > { %v1885_v49 = vadd.f32 %v1881_v44, %v1877_v45  ;;  %v4815_v50 = vadd.f32 %v1800_v48, %v478_v13  ;;  %v1802_v51 = vpop.f32.mrb[1].mxu0 }
 0x1b6   : > { %v4816_v54 = vadd.f32 %v1802_v51, %v480_v14 }
 0x1b7   : > { %v1883_v55 = vadd.f32 %v4815_v50, %v1881_v44  ;;  %v1904_v56 = vmul.f32 %v5222_v46, %v1885_v49 }
 0x1b8   : > { %v1884_v57 = vadd.f32 %v4816_v54, %v1881_v44 }
 0x1b9   : > { %1912 = vrot.lane.b32.xlu0 %v1904_v56, %s4941_s15  ;;  %v1902_v58 = vmul.f32 %v5224_v52, %v1883_v55 }
 0x1ba   : > { %v1903_v60 = vmul.f32 %v5229_v59, %v1884_v57 }
 0x1bb   : > { %1908 = vrot.lane.b32.xlu1 %v1902_v58, %s4941_s15 }
 0x1bf   : > { %1910 = vrot.lane.b32.xlu1 %v1903_v60, %s4941_s15 }
 0x22b   : > { %v1913_v62 = vpop.permute.xlu0 %1912 }
 0x22d   : > { %v1909_v61 = vpop.permute.xlu1 %1908 }
 0x22e   : > { %1921 = vst.msk [vmem:[#allocation2] sm:$0xff] %vm1920_vm11, %v1909_v61  ;;  %1925 = vst.msk [vmem:[#allocation3] sm:$0xff] %vm1920_vm11, %v1909_v61 }
 0x231   : > { %v1911_v63 = vpop.permute.xlu1 %1910 }
 0x232   : > { %v5237_v1 = vsel %vm1914_vm12, %v1909_v61, %v1911_v63  ;;  %v1916_v2 = vsel %vm1914_vm12, %v1911_v63, %v1913_v62 }
 0x233   : > { %1922 = vst [vmem:[#allocation2 + $0x8] sm:$0xff] %v5237_v1  ;;  %1924 = vst.msk [vmem:[#allocation2 + $0x10] sm:$0xff] %vm1923_vm13, %v1916_v2 }
 0x234   : > { %1927 = vst.msk [vmem:[#allocation3 + $0x10] sm:$0xff] %vm1923_vm13, %v1916_v2 }
 0x235   : > { %v5243_v3 = vld [vmem:[#allocation3] sm:$0xff] }
 0x236   : > { %1963 = vrot.lane.b32.xlu0 %v5243_v3, %s4924_s16  ;;  %1943 = vrot.lane.b32.xlu1 %v5243_v3, %s4928_s22 }
 0x23a   : > { %2003 = vrot.lane.b32.xlu0 %v5243_v3, %s4930_s24  ;;  %1983 = vrot.lane.b32.xlu1 %v5243_v3, %s4926_s20 }
 0x23b   : > { %v5249_v4 = vld [vmem:[#allocation3 + $0x10] sm:$0xff] }
 0x23c   : > { %1936 = vst.msk [vmem:[#allocation5 + $0x10] sm:$0xff] %vm1935_vm14, %v5249_v4 }
 0x23e   : > { %2043 = vrot.lane.b32.xlu0 %v5243_v3, %s4934_s28  ;;  %2023 = vrot.lane.b32.xlu1 %v5243_v3, %s4932_s26 }
 0x242   : > { %1947 = vrot.lane.b32.xlu0 %v5249_v4, %s4928_s22  ;;  %1945 = vrot.lane.b32.xlu1 %v5237_v1, %s4928_s22 }
 0x243   : > { %v2099_v24 = vld [vmem:[#allocation5 + $0x10] sm:$0xff] }
 0x246   : > { %1965 = vrot.lane.b32.xlu0 %v5237_v1, %s4924_s16  ;;  %1967 = vrot.lane.b32.xlu1 %v5249_v4, %s4924_s16 }
 0x24a   : > { %1985 = vrot.lane.b32.xlu0 %v5237_v1, %s4926_s20  ;;  %1987 = vrot.lane.b32.xlu1 %v5249_v4, %s4926_s20 }
 0x24e   : > { %2005 = vrot.lane.b32.xlu0 %v5237_v1, %s4930_s24  ;;  %2007 = vrot.lane.b32.xlu1 %v5249_v4, %s4930_s24 }
 0x252   : > { %2025 = vrot.lane.b32.xlu0 %v5237_v1, %s4932_s26  ;;  %2027 = vrot.lane.b32.xlu1 %v5249_v4, %s4932_s26 }
 0x256   : > { %2045 = vrot.lane.b32.xlu0 %v5237_v1, %s4934_s28  ;;  %2047 = vrot.lane.b32.xlu1 %v5249_v4, %s4934_s28 }
 0x25a   : > { %2065 = vrot.lane.b32.xlu0 %v5237_v1, %s4935_s29  ;;  %2067 = vrot.lane.b32.xlu1 %v5249_v4, %s4935_s29 }
 0x25e   : > { %2085 = vrot.lane.b32.xlu0 %v5237_v1, %s4938_s11  ;;  %2063 = vrot.lane.b32.xlu1 %v5243_v3, %s4935_s29 }
 0x262   : > { %2083 = vrot.lane.b32.xlu0 %v5243_v3, %s4938_s11  ;;  %2087 = vrot.lane.b32.xlu1 %v5249_v4, %s4938_s11 }
 0x266   : > { %2126 = vperm.xlu1 %4873, %v1929_v6  }
 0x2a8   : > { %v1964_v7 = vpop.permute.xlu0 %1963  ;;  %v1944_v8 = vpop.permute.xlu1 %1943 }
 0x2ac   : > { %v2004_v9 = vpop.permute.xlu0 %2003  ;;  %v1984_v10 = vpop.permute.xlu1 %1983 }
 0x2b0   : > { %v5301_v11 = vpop.permute.xlu0 %2043  ;;  %v2024_v12 = vpop.permute.xlu1 %2023 }
 0x2b4   : > { %v1948_v13 = vpop.permute.xlu0 %1947  ;;  %v1946_v14 = vpop.permute.xlu1 %1945 }
 0x2b5   : > { %1956 = vst.msk [vmem:[#allocation5 + $0x28] sm:$0xff] %vm1935_vm14, %v1948_v13  ;;  %v1949_v15 = vsel %vm399_vm4, %v1944_v8, %v1946_v14  ;;  %v1950_v16 = vsel %vm399_vm4, %v1946_v14, %v1948_v13 }
 0x2b6   : > { %v4643_v17 = vpack.c.bf16 %v1950_v16, %v5237_v1  ;;  %v4645_v18 = vpack.c.bf16 %v1949_v15, %v5243_v3 }
 0x2b8   : > { %v1966_v19 = vpop.permute.xlu0 %1965  ;;  %v1968_v20 = vpop.permute.xlu1 %1967  ;;  %4644 = vmatprep.subr.bf16.mxu0 %v4643_v17 }
 0x2b9   : > { %1976 = vst.msk [vmem:[#allocation5 + $0x40] sm:$0xff] %vm1935_vm14, %v1968_v20  ;;  %4646 = vmatpush1.bf16.msra.mxu0 %v4645_v18  ;;  %v1969_v21 = vsel %vm715_vm2, %v1964_v7, %v1966_v19  ;;  %v1970_v26 = vsel %vm715_vm2, %v1966_v19, %v1968_v20 }
 0x2bc   : > { %v1986_v22 = vpop.permute.xlu0 %1985  ;;  %v1988_v23 = vpop.permute.xlu1 %1987  ;;  %v2102_v25 = vld [vmem:[#allocation5 + $0x28] sm:$0xff] }
 0x2bd   : > { %v1989_v27 = vsel %vm883_vm3, %v1984_v10, %v1986_v22  ;;  %v1990_v28 = vsel %vm883_vm3, %v1986_v22, %v1988_v23  ;;  %1996 = vst.msk [vmem:[#allocation5 + $0x58] sm:$0xff] %vm1935_vm14, %v1988_v23  ;;  %v4660_v29 = vpack.c.bf16 %v2102_v25, %v2099_v24  ;;  %v1928_v10 = vld [vmem:[%s5833_s4] sm:$0xff] }
 0x2be   : > { %v4647_v30 = vpack.c.bf16 %v1990_v28, %v1970_v26  ;;  %v4649_v31 = vpack.c.bf16 %v1989_v27, %v1969_v21 }
 0x2bf   : > { %4661 = vmatpush3.bf16.msra.mxu1 %v4660_v29 }
 0x2c0   : > { %v2006_v32 = vpop.permute.xlu0 %2005  ;;  %v2008_v33 = vpop.permute.xlu1 %2007  ;;  %4662 = vmatprep.subr.bf16.mxu1 %v4942_v5  ;;  %4648 = vmatprep.subr.bf16.mxu0 %v4647_v30  ;;  %v2105_v37 = vld [vmem:[#allocation5 + $0x40] sm:$0xff] }
 0x2c1   : > { %2016 = vst.msk [vmem:[#allocation5 + $0x70] sm:$0xff] %vm1935_vm14, %v2008_v33  ;;  %4650 = vmatpush1.bf16.msra.mxu0 %v4649_v31  ;;  %v2009_v34 = vsel %vm1051_vm5, %v2004_v9, %v2006_v32  ;;  %v2010_v39 = vsel %vm1051_vm5, %v2006_v32, %v2008_v33 }
 0x2c4   : > { %v2026_v35 = vpop.permute.xlu0 %2025  ;;  %v2028_v36 = vpop.permute.xlu1 %2027  ;;  %v2108_v38 = vld [vmem:[#allocation5 + $0x58] sm:$0xff] }
 0x2c5   : > { %v2029_v40 = vsel %vm1219_vm7, %v2024_v12, %v2026_v35  ;;  %v2030_v41 = vsel %vm1219_vm7, %v2026_v35, %v2028_v36  ;;  %2036 = vst.msk [vmem:[#allocation5 + $0x88] sm:$0xff] %vm1935_vm14, %v2028_v36  ;;  %v4663_v42 = vpack.c.bf16 %v2108_v38, %v2105_v37 }
 0x2c6   : > { %v4651_v43 = vpack.c.bf16 %v2030_v41, %v2010_v39  ;;  %v4653_v44 = vpack.c.bf16 %v2029_v40, %v2009_v34  ;;  %v4365_v34 = vld [vmem:[%s5834_s5 + $0x8] sm:$0xff] }
 0x2c7   : > { %4664 = vmatpush3.bf16.msra.mxu1 %v4663_v42 }
 0x2c8   : > { %v2046_v45 = vpop.permute.xlu0 %2045  ;;  %v2048_v47 = vpop.permute.xlu1 %2047  ;;  %4665 = vmatprep.subr.bf16.mxu1 %v4942_v5  ;;  %4652 = vmatprep.subr.bf16.mxu0 %v4651_v43  ;;  %v2111_v50 = vld [vmem:[#allocation5 + $0x70] sm:$0xff] }
 0x2c9   : > { %2056 = vst.msk [vmem:[#allocation5 + $0xa0] sm:$0xff] %vm1935_vm14, %v2048_v47  ;;  %4654 = vmatpush1.bf16.msra.mxu0 %v4653_v44  ;;  %v2050_v53 = vsel %vm1387_vm8, %v2046_v45, %v2048_v47  ;;  %v2049_v60 = vsel %vm1387_vm8, %v5301_v11, %v2046_v45 }
 0x2cc   : > { %v2066_v48 = vpop.permute.xlu0 %2065  ;;  %v2068_v49 = vpop.permute.xlu1 %2067  ;;  %v2114_v51 = vld [vmem:[#allocation5 + $0x88] sm:$0xff] }
 0x2cd   : > { %v2070_v54 = vsel %vm1555_vm9, %v2066_v48, %v2068_v49  ;;  %2076 = vst.msk [vmem:[#allocation5 + $0xb8] sm:$0xff] %vm1935_vm14, %v2068_v49  ;;  %v4666_v55 = vpack.c.bf16 %v2114_v51, %v2111_v50 }
 0x2ce   : > { %v4655_v56 = vpack.c.bf16 %v2070_v54, %v2050_v53 }
 0x2cf   : > { %4667 = vmatpush3.bf16.msra.mxu1 %v4666_v55 }
 0x2d0   : > { %v2086_v57 = vpop.permute.xlu0 %2085  ;;  %v2064_v58 = vpop.permute.xlu1 %2063  ;;  %4668 = vmatprep.subr.bf16.mxu1 %v4942_v5  ;;  %4656 = vmatprep.subr.bf16.mxu0 %v4655_v56  ;;  %v2117_v6 = vld [vmem:[#allocation5 + $0xa0] sm:$0xff] }
 0x2d1   : > { %v2069_v61 = vsel %vm1555_vm9, %v2064_v58, %v2066_v48 }
 0x2d2   : > { %v4657_v62 = vpack.c.bf16 %v2069_v61, %v2049_v60 }
 0x2d4   : > { %v2084_v63 = vpop.permute.xlu0 %2083  ;;  %v2088_v2 = vpop.permute.xlu1 %2087  ;;  %v2120_v7 = vld [vmem:[#allocation5 + $0xb8] sm:$0xff]  ;;  %4658 = vmatpush1.bf16.msra.mxu0 %v4657_v62 }
 0x2d5   : > { %v2090_v8 = vsel %vm1723_vm10, %v2086_v57, %v2088_v2  ;;  %2096 = vst.msk [vmem:[#allocation5 + $0xd0] sm:$0xff] %vm1935_vm14, %v2088_v2  ;;  %v4669_v9 = vpack.c.bf16 %v2120_v7, %v2117_v6  ;;  %v2089_v11 = vsel %vm1723_vm10, %v2084_v63, %v2086_v57 }
 0x2d6   : > { %2149 = vmatprep.subr.mxu0 %v2090_v8 }
 0x2d7   : > { %4670 = vmatpush3.bf16.msra.mxu1 %v4669_v9 }
 0x2d8   : > { %4530 = vmatprep.subr.mxu1 %v4923_v0  ;;  %2150 = vmatpush1.msra.mxu0 %v2089_v11 }
 0x2d9   : > { %4362 = vmatmul.mubr.msk.f32.vlgmr.msra.gmra.mrb[2].mxu0 %vm2129_vm15, %v1928_v10 }
 0x2da   : > { %2566 = vmatprep.mubr.f32.mxu0 %v4923_v0 }
 0x2dc   : > { %v2123_v12 = vld [vmem:[#allocation5 + $0xd0] sm:$0xff] }
 0x2dd   : > { %4531 = vmatpush3.msra.mxu1 %v2123_v12 }
 0x2de   : > { %4533 = vmatmul.mubr.msk.f32.vlgmr.msra.gmra.mrb[20].mxu1 %vm2129_vm15, %v1928_v10  ;;  %4687 = vmatprep.subr.bf16.mxu1 %v4942_v5 }
 0x2df   : > { %4553 = vmatprep.mubr.msk.f32.mxu1 %vm4940_vm6, %v4923_v0 }
 0x2e5   : > { %v2127_v13 = vpop.permute.xlu1 %2126 }
 0x3ac   : > { %v2199_v14 = vpop.f32.mrb[2].mxu0 }
 0x3ad   : > { %v2200_v15 = vadd.f32 %v2199_v14, %v2127_v13  ;;  %v2201_v16 = vpop.f32.mrb[3].mxu0 }
 0x3ae   : > { %v2202_v17 = vadd.f32 %v2201_v16, %v2127_v13 }
 0x3af   : > { %v2274_v18 = vmax.f32 %v2200_v15, 0.0 }
 0x3b0   : > { %v2275_v19 = vmax.f32 %v2202_v17, 0.0 }
 0x3b1   : > { %v2270_v20 = vpop.f32.mrb[20].mxu1  ;;  %v2277_v21 = vmul.f32 %v2274_v18, %v5224_v52 }
 0x3b2   : > { %v2278_v22 = vmul.f32 %v2275_v19, %v5229_v59  ;;  %v2271_v23 = vadd.f32 %v2270_v20, %v2127_v13  ;;  %v4534_v24 = vpop.f32.mrb[21].mxu1 }
 0x3b3   : > { %2283 = vrot.lane.b32.xlu0 %v2277_v21, %s4941_s15 }
 0x3b4   : > { %v2276_v25 = vmax.f32 %v2271_v23, 0.0  ;;  %2285 = vrot.lane.b32.xlu1 %v2278_v22, %s4941_s15 }
 0x3b6   : > { %v2279_v26 = vmul.f32 %v2276_v25, %v5222_v46 }
 0x3b8   : > { %2287 = vrot.lane.b32.xlu0 %v2279_v26, %s4941_s15 }
 0x425   : > { %v2284_v27 = vpop.permute.xlu0 %2283 }
 0x426   : > { %2294 = vst.msk [vmem:[#allocation4] sm:$0xff] %vm1920_vm11, %v2284_v27  ;;  %v2286_v28 = vpop.permute.xlu1 %2285 }
 0x427   : > { %v2289_v33 = vsel %vm1914_vm12, %v2284_v27, %v2286_v28 }
 0x42a   : > { %v2288_v29 = vpop.permute.xlu0 %2287 }
 0x42b   : > { %v2290_v30 = vsel %vm1914_vm12, %v2286_v28, %v2288_v29 }
 0x42c   : > { %2296 = vst.msk [vmem:[#allocation4 + $0x10] sm:$0xff] %vm1923_vm13, %v2290_v30 }
 0x42d   : > { %v2301_v31 = vld [vmem:[#allocation4] sm:$0xff] }
 0x42e   : > { %2333 = vrot.lane.b32.xlu0 %v2301_v31, %s4924_s16  ;;  %2313 = vrot.lane.b32.xlu1 %v2301_v31, %s4928_s22 }
 0x432   : > { %2373 = vrot.lane.b32.xlu0 %v2301_v31, %s4930_s24  ;;  %2353 = vrot.lane.b32.xlu1 %v2301_v31, %s4926_s20 }
 0x433   : > { %v2303_v32 = vld [vmem:[#allocation4 + $0x10] sm:$0xff] }
 0x434   : > { %2306 = vst.msk [vmem:[#allocation5 + $0x10] sm:$0xff] %vm1935_vm14, %v2303_v32 }
 0x436   : > { %2413 = vrot.lane.b32.xlu0 %v2301_v31, %s4934_s28  ;;  %2393 = vrot.lane.b32.xlu1 %v2301_v31, %s4932_s26 }
 0x43a   : > { %2315 = vrot.lane.b32.xlu1 %v2289_v33, %s4928_s22  ;;  %2317 = vrot.lane.b32.xlu0 %v2303_v32, %s4928_s22 }
 0x43b   : > { %v2469_v50 = vld [vmem:[#allocation5 + $0x10] sm:$0xff] }
 0x43e   : > { %2337 = vrot.lane.b32.xlu1 %v2303_v32, %s4924_s16  ;;  %2335 = vrot.lane.b32.xlu0 %v2289_v33, %s4924_s16 }
 0x442   : > { %2357 = vrot.lane.b32.xlu1 %v2303_v32, %s4926_s20  ;;  %2355 = vrot.lane.b32.xlu0 %v2289_v33, %s4926_s20 }
 0x446   : > { %2377 = vrot.lane.b32.xlu1 %v2303_v32, %s4930_s24  ;;  %2375 = vrot.lane.b32.xlu0 %v2289_v33, %s4930_s24 }
 0x44a   : > { %2397 = vrot.lane.b32.xlu1 %v2303_v32, %s4932_s26  ;;  %2395 = vrot.lane.b32.xlu0 %v2289_v33, %s4932_s26 }
 0x44e   : > { %2417 = vrot.lane.b32.xlu1 %v2303_v32, %s4934_s28  ;;  %2415 = vrot.lane.b32.xlu0 %v2289_v33, %s4934_s28 }
 0x452   : > { %2437 = vrot.lane.b32.xlu1 %v2303_v32, %s4935_s29  ;;  %2435 = vrot.lane.b32.xlu0 %v2289_v33, %s4935_s29 }
 0x456   : > { %2433 = vrot.lane.b32.xlu1 %v2301_v31, %s4935_s29  ;;  %2455 = vrot.lane.b32.xlu0 %v2289_v33, %s4938_s11 }
 0x45a   : > { %2457 = vrot.lane.b32.xlu1 %v2303_v32, %s4938_s11  ;;  %2453 = vrot.lane.b32.xlu0 %v2301_v31, %s4938_s11 }
 0x45e   : > { %2496 = vperm.xlu1 %4873, %v4365_v34   ;;  %2652 = vrot.lane.b32.xlu0 %v5243_v3, %s4930_s24 }
 0x462   : > { %2654 = vrot.lane.b32.xlu1 %v5237_v1, %s4930_s24  ;;  %2656 = vrot.lane.b32.xlu0 %v5249_v4, %s4930_s24 }
 0x4a0   : > { %v2314_v35 = vpop.permute.xlu1 %2313  ;;  %v2334_v36 = vpop.permute.xlu0 %2333 }
 0x4a4   : > { %v2354_v37 = vpop.permute.xlu1 %2353  ;;  %v2374_v38 = vpop.permute.xlu0 %2373 }
 0x4a8   : > { %v2394_v39 = vpop.permute.xlu1 %2393  ;;  %v5387_v40 = vpop.permute.xlu0 %2413 }
 0x4ac   : > { %v2316_v41 = vpop.permute.xlu1 %2315  ;;  %v2318_v42 = vpop.permute.xlu0 %2317 }
 0x4ad   : > { %v2319_v43 = vsel %vm399_vm4, %v2314_v35, %v2316_v41  ;;  %v2320_v44 = vsel %vm399_vm4, %v2316_v41, %v2318_v42  ;;  %2326 = vst.msk [vmem:[#allocation5 + $0x28] sm:$0xff] %vm1935_vm14, %v2318_v42  ;;  %v4364_v35 = vld [vmem:[%s5833_s4 + $0x8] sm:$0xff] }
 0x4ae   : > { %v4671_v3 = vpack.c.bf16 %v2320_v44, %v2289_v33  ;;  %v4673_v1 = vpack.c.bf16 %v2319_v43, %v2301_v31 }
 0x4b0   : > { %v2338_v45 = vpop.permute.xlu1 %2337  ;;  %v2336_v47 = vpop.permute.xlu0 %2335  ;;  %4672 = vmatprep.subr.bf16.mxu0 %v4671_v3 }
 0x4b1   : > { %2346 = vst.msk [vmem:[#allocation5 + $0x40] sm:$0xff] %vm1935_vm14, %v2338_v45  ;;  %4674 = vmatpush1.bf16.msra.mxu0 %v4673_v1  ;;  %v2339_v4 = vsel %vm715_vm2, %v2334_v36, %v2336_v47  ;;  %v2340_v53 = vsel %vm715_vm2, %v2336_v47, %v2338_v45 }
 0x4b4   : > { %v2358_v48 = vpop.permute.xlu1 %2357  ;;  %v2356_v49 = vpop.permute.xlu0 %2355  ;;  %v2472_v51 = vld [vmem:[#allocation5 + $0x28] sm:$0xff] }
 0x4b5   : > { %2366 = vst.msk [vmem:[#allocation5 + $0x58] sm:$0xff] %vm1935_vm14, %v2358_v48  ;;  %v2359_v54 = vsel %vm883_vm3, %v2354_v37, %v2356_v49  ;;  %v2360_v55 = vsel %vm883_vm3, %v2356_v49, %v2358_v48  ;;  %v4688_v56 = vpack.c.bf16 %v2472_v51, %v2469_v50 }
 0x4b6   : > { %v4675_v57 = vpack.c.bf16 %v2360_v55, %v2340_v53  ;;  %v4677_v58 = vpack.c.bf16 %v2359_v54, %v2339_v4 }
 0x4b7   : > { %4689 = vmatpush3.bf16.msra.mxu1 %v4688_v56 }
 0x4b8   : > { %v2378_v60 = vpop.permute.xlu1 %2377  ;;  %v2376_v61 = vpop.permute.xlu0 %2375  ;;  %4690 = vmatprep.subr.bf16.mxu1 %v4942_v5  ;;  %4676 = vmatprep.subr.bf16.mxu0 %v4675_v57  ;;  %v2475_v6 = vld [vmem:[#allocation5 + $0x40] sm:$0xff] }
 0x4b9   : > { %2386 = vst.msk [vmem:[#allocation5 + $0x70] sm:$0xff] %vm1935_vm14, %v2378_v60  ;;  %4678 = vmatpush1.bf16.msra.mxu0 %v4677_v58  ;;  %v2379_v62 = vsel %vm1051_vm5, %v2374_v38, %v2376_v61  ;;  %v2380_v8 = vsel %vm1051_vm5, %v2376_v61, %v2378_v60 }
 0x4bc   : > { %v2398_v63 = vpop.permute.xlu1 %2397  ;;  %v2396_v2 = vpop.permute.xlu0 %2395  ;;  %v2478_v7 = vld [vmem:[#allocation5 + $0x58] sm:$0xff] }
 0x4bd   : > { %2406 = vst.msk [vmem:[#allocation5 + $0x88] sm:$0xff] %vm1935_vm14, %v2398_v63  ;;  %v2399_v9 = vsel %vm1219_vm7, %v2394_v39, %v2396_v2  ;;  %v2400_v10 = vsel %vm1219_vm7, %v2396_v2, %v2398_v63  ;;  %v4691_v11 = vpack.c.bf16 %v2478_v7, %v2475_v6  ;;  %v4369_v2 = vld [vmem:[%s5834_s5 + $0x10] sm:$0xff] }
 0x4be   : > { %v4679_v12 = vpack.c.bf16 %v2400_v10, %v2380_v8  ;;  %v4681_v13 = vpack.c.bf16 %v2399_v9, %v2379_v62 }
 0x4bf   : > { %4692 = vmatpush3.bf16.msra.mxu1 %v4691_v11 }
 0x4c0   : > { %v2418_v14 = vpop.permute.xlu1 %2417  ;;  %v2416_v15 = vpop.permute.xlu0 %2415  ;;  %4693 = vmatprep.subr.bf16.mxu1 %v4942_v5  ;;  %4680 = vmatprep.subr.bf16.mxu0 %v4679_v12  ;;  %v2481_v18 = vld [vmem:[#allocation5 + $0x70] sm:$0xff] }
 0x4c1   : > { %2426 = vst.msk [vmem:[#allocation5 + $0xa0] sm:$0xff] %vm1935_vm14, %v2418_v14  ;;  %4682 = vmatpush1.bf16.msra.mxu0 %v4681_v13  ;;  %v2420_v20 = vsel %vm1387_vm8, %v2416_v15, %v2418_v14  ;;  %v2419_v26 = vsel %vm1387_vm8, %v5387_v40, %v2416_v15 }
 0x4c4   : > { %v2438_v16 = vpop.permute.xlu1 %2437  ;;  %v2436_v17 = vpop.permute.xlu0 %2435  ;;  %v2484_v19 = vld [vmem:[#allocation5 + $0x88] sm:$0xff] }
 0x4c5   : > { %2446 = vst.msk [vmem:[#allocation5 + $0xb8] sm:$0xff] %vm1935_vm14, %v2438_v16  ;;  %v2440_v21 = vsel %vm1555_vm9, %v2436_v17, %v2438_v16  ;;  %v4694_v22 = vpack.c.bf16 %v2484_v19, %v2481_v18 }
 0x4c6   : > { %v4683_v23 = vpack.c.bf16 %v2440_v21, %v2420_v20 }
 0x4c7   : > { %4695 = vmatpush3.bf16.msra.mxu1 %v4694_v22 }
 0x4c8   : > { %v2434_v24 = vpop.permute.xlu1 %2433  ;;  %v2456_v25 = vpop.permute.xlu0 %2455  ;;  %4696 = vmatprep.subr.bf16.mxu1 %v4942_v5  ;;  %4684 = vmatprep.subr.bf16.mxu0 %v4683_v23  ;;  %v2487_v31 = vld [vmem:[#allocation5 + $0xa0] sm:$0xff] }
 0x4c9   : > { %v2439_v27 = vsel %vm1555_vm9, %v2434_v24, %v2436_v17 }
 0x4ca   : > { %v4685_v28 = vpack.c.bf16 %v2439_v27, %v2419_v26 }
 0x4cc   : > { %v2458_v29 = vpop.permute.xlu1 %2457  ;;  %v2454_v30 = vpop.permute.xlu0 %2453  ;;  %v2490_v32 = vld [vmem:[#allocation5 + $0xb8] sm:$0xff]  ;;  %4686 = vmatpush1.bf16.msra.mxu0 %v4685_v28 }
 0x4cd   : > { %v2460_v33 = vsel %vm1723_vm10, %v2456_v25, %v2458_v29  ;;  %2466 = vst.msk [vmem:[#allocation5 + $0xd0] sm:$0xff] %vm1935_vm14, %v2458_v29  ;;  %v4697_v34 = vpack.c.bf16 %v2490_v32, %v2487_v31  ;;  %v2459_v36 = vsel %vm1723_vm10, %v2454_v30, %v2456_v25 }
 0x4ce   : > { %2518 = vmatprep.subr.mxu0 %v2460_v33 }
 0x4cf   : > { %4698 = vmatpush3.bf16.msra.mxu1 %v4697_v34 }
 0x4d0   : > { %4551 = vmatprep.subr.mxu1 %v4923_v0  ;;  %2519 = vmatpush1.msra.mxu0 %v2459_v36  ;;  %v2653_v39 = vpop.permute.xlu0 %2652 }
 0x4d1   : > { %4366 = vmatmul.mubr.msk.f32.vlgmr.msra.gmra.mrb[4].mxu0 %vm2129_vm15, %v4364_v35 }
 0x4d2   : > { %2952 = vmatprep.mubr.f32.mxu0 %v4923_v0 }
 0x4d4   : > { %v2493_v37 = vld [vmem:[#allocation5 + $0xd0] sm:$0xff]  ;;  %v2657_v1 = vpop.permute.xlu0 %2656 }
 0x4d5   : > { %4552 = vmatpush3.msra.mxu1 %v2493_v37 }
 0x4d6   : > { %4554 = vmatmul.mubr.msk.f32.vlgmr.msra.gmra.mrb[22].mxu1 %vm2129_vm15, %v4364_v35  ;;  %4715 = vmatprep.subr.bf16.mxu1 %v4942_v5 }
 0x4d7   : > { %4574 = vmatprep.mubr.msk.f32.mxu1 %vm4940_vm6, %v4923_v0 }
 0x4dd   : > { %v2497_v38 = vpop.permute.xlu1 %2496 }
 0x4e1   : > { %v2655_v41 = vpop.permute.xlu1 %2654 }
 0x4e2   : > { %v2658_v45 = vsel %vm1051_vm5, %v2653_v39, %v2655_v41  ;;  %v2659_v4 = vsel %vm1051_vm5, %v2655_v41, %v2657_v1 }
 0x5a4   : > { %v2568_v40 = vpop.f32.mrb[4].mxu0 }
 0x5a5   : > { %v2569_v42 = vadd.f32 %v2568_v40, %v2497_v38  ;;  %v2570_v43 = vpop.f32.mrb[5].mxu0 }
 0x5a6   : > { %v2571_v44 = vadd.f32 %v2570_v43, %v2497_v38 }
 0x5a7   : > { %v2643_v3 = vmul.f32 %v2569_v42, %v5224_v52 }
 0x5a8   : > { %v2644_v47 = vmul.f32 %v2571_v44, %v5229_v59 }
 0x5a9   : > { %v2639_v48 = vpop.f32.mrb[22].mxu1  ;;  %v2663_v49 = vadd.f32 %v2658_v45, %v2643_v3 }
 0x5aa   : > { %v2640_v50 = vadd.f32 %v2639_v48, %v2497_v38  ;;  %v2664_v51 = vadd.f32 %v2659_v4, %v2644_v47  ;;  %v4555_v53 = vpop.f32.mrb[23].mxu1 }
 0x5ab   : > { %2669 = vrot.lane.b32.xlu1 %v2663_v49, %s4941_s15 }
 0x5ac   : > { %v2645_v54 = vmul.f32 %v2640_v50, %v5222_v46  ;;  %2671 = vrot.lane.b32.xlu0 %v2664_v51, %s4941_s15 }
 0x5ae   : > { %v2665_v55 = vadd.f32 %v2657_v1, %v2645_v54 }
 0x5b0   : > { %2673 = vrot.lane.b32.xlu1 %v2665_v55, %s4941_s15 }
 0x61d   : > { %v2670_v56 = vpop.permute.xlu1 %2669 }
 0x61e   : > { %2680 = vst.msk [vmem:[#allocation3] sm:$0xff] %vm1920_vm11, %v2670_v56  ;;  %v2672_v57 = vpop.permute.xlu0 %2671 }
 0x61f   : > { %v5457_v63 = vsel %vm1914_vm12, %v2670_v56, %v2672_v57 }
 0x622   : > { %v2674_v58 = vpop.permute.xlu1 %2673 }
 0x623   : > { %v2676_v60 = vsel %vm1914_vm12, %v2672_v57, %v2674_v58 }
 0x624   : > { %2682 = vst.msk [vmem:[#allocation3 + $0x10] sm:$0xff] %vm1923_vm13, %v2676_v60 }
 0x625   : > { %v5438_v61 = vld [vmem:[#allocation3] sm:$0xff] }
 0x626   : > { %2719 = vrot.lane.b32.xlu1 %v5438_v61, %s4924_s16  ;;  %2699 = vrot.lane.b32.xlu0 %v5438_v61, %s4928_s22 }
 0x62a   : > { %2759 = vrot.lane.b32.xlu1 %v5438_v61, %s4930_s24  ;;  %2739 = vrot.lane.b32.xlu0 %v5438_v61, %s4926_s20 }
 0x62b   : > { %v5448_v62 = vld [vmem:[#allocation3 + $0x10] sm:$0xff] }
 0x62c   : > { %2692 = vst.msk [vmem:[#allocation5 + $0x10] sm:$0xff] %vm1935_vm14, %v5448_v62 }
 0x62e   : > { %2799 = vrot.lane.b32.xlu1 %v5438_v61, %s4934_s28  ;;  %2779 = vrot.lane.b32.xlu0 %v5438_v61, %s4932_s26 }
 0x632   : > { %2703 = vrot.lane.b32.xlu1 %v5448_v62, %s4928_s22  ;;  %2701 = vrot.lane.b32.xlu0 %v5457_v63, %s4928_s22 }
 0x633   : > { %v2855_v23 = vld [vmem:[#allocation5 + $0x10] sm:$0xff] }
 0x636   : > { %2721 = vrot.lane.b32.xlu1 %v5457_v63, %s4924_s16  ;;  %2723 = vrot.lane.b32.xlu0 %v5448_v62, %s4924_s16 }
 0x63a   : > { %2741 = vrot.lane.b32.xlu1 %v5457_v63, %s4926_s20  ;;  %2743 = vrot.lane.b32.xlu0 %v5448_v62, %s4926_s20 }
 0x63e   : > { %2761 = vrot.lane.b32.xlu1 %v5457_v63, %s4930_s24  ;;  %2763 = vrot.lane.b32.xlu0 %v5448_v62, %s4930_s24 }
 0x642   : > { %2781 = vrot.lane.b32.xlu1 %v5457_v63, %s4932_s26  ;;  %2783 = vrot.lane.b32.xlu0 %v5448_v62, %s4932_s26 }
 0x646   : > { %2801 = vrot.lane.b32.xlu1 %v5457_v63, %s4934_s28  ;;  %2803 = vrot.lane.b32.xlu0 %v5448_v62, %s4934_s28 }
 0x64a   : > { %2821 = vrot.lane.b32.xlu1 %v5457_v63, %s4935_s29  ;;  %2823 = vrot.lane.b32.xlu0 %v5448_v62, %s4935_s29 }
 0x64e   : > { %2841 = vrot.lane.b32.xlu1 %v5457_v63, %s4938_s11  ;;  %2819 = vrot.lane.b32.xlu0 %v5438_v61, %s4935_s29 }
 0x652   : > { %2839 = vrot.lane.b32.xlu1 %v5438_v61, %s4938_s11  ;;  %2843 = vrot.lane.b32.xlu0 %v5448_v62, %s4938_s11 }
 0x656   : > { %2882 = vperm.xlu0 %4872, %v4369_v2  }
 0x698   : > { %v2720_v6 = vpop.permute.xlu1 %2719  ;;  %v2700_v7 = vpop.permute.xlu0 %2699 }
 0x69c   : > { %v2760_v8 = vpop.permute.xlu1 %2759  ;;  %v2740_v9 = vpop.permute.xlu0 %2739 }
 0x6a0   : > { %v5498_v10 = vpop.permute.xlu1 %2799  ;;  %v2780_v11 = vpop.permute.xlu0 %2779 }
 0x6a4   : > { %v2704_v12 = vpop.permute.xlu1 %2703  ;;  %v2702_v13 = vpop.permute.xlu0 %2701 }
 0x6a5   : > { %2712 = vst.msk [vmem:[#allocation5 + $0x28] sm:$0xff] %vm1935_vm14, %v2704_v12  ;;  %v2705_v14 = vsel %vm399_vm4, %v2700_v7, %v2702_v13  ;;  %v2706_v15 = vsel %vm399_vm4, %v2702_v13, %v2704_v12 }
 0x6a6   : > { %v4699_v16 = vpack.c.bf16 %v2706_v15, %v5457_v63  ;;  %v4701_v17 = vpack.c.bf16 %v2705_v14, %v5438_v61 }
 0x6a8   : > { %v2722_v18 = vpop.permute.xlu1 %2721  ;;  %v2724_v19 = vpop.permute.xlu0 %2723  ;;  %4700 = vmatprep.subr.bf16.mxu0 %v4699_v16 }
 0x6a9   : > { %2732 = vst.msk [vmem:[#allocation5 + $0x40] sm:$0xff] %vm1935_vm14, %v2724_v19  ;;  %4702 = vmatpush1.bf16.msra.mxu0 %v4701_v17  ;;  %v2725_v20 = vsel %vm715_vm2, %v2720_v6, %v2722_v18  ;;  %v2726_v25 = vsel %vm715_vm2, %v2722_v18, %v2724_v19 }
 0x6ac   : > { %v2742_v21 = vpop.permute.xlu1 %2741  ;;  %v2744_v22 = vpop.permute.xlu0 %2743  ;;  %v2858_v24 = vld [vmem:[#allocation5 + $0x28] sm:$0xff] }
 0x6ad   : > { %v2745_v26 = vsel %vm883_vm3, %v2740_v9, %v2742_v21  ;;  %v2746_v27 = vsel %vm883_vm3, %v2742_v21, %v2744_v22  ;;  %2752 = vst.msk [vmem:[#allocation5 + $0x58] sm:$0xff] %vm1935_vm14, %v2744_v22  ;;  %v4716_v28 = vpack.c.bf16 %v2858_v24, %v2855_v23  ;;  %v4368_v9 = vld [vmem:[%s5833_s4 + $0x10] sm:$0xff] }
 0x6ae   : > { %v4703_v29 = vpack.c.bf16 %v2746_v27, %v2726_v25  ;;  %v4705_v30 = vpack.c.bf16 %v2745_v26, %v2725_v20 }
 0x6af   : > { %4717 = vmatpush3.bf16.msra.mxu1 %v4716_v28 }
 0x6b0   : > { %v2762_v31 = vpop.permute.xlu1 %2761  ;;  %v2764_v32 = vpop.permute.xlu0 %2763  ;;  %4718 = vmatprep.subr.bf16.mxu1 %v4942_v5  ;;  %4704 = vmatprep.subr.bf16.mxu0 %v4703_v29  ;;  %v2861_v36 = vld [vmem:[#allocation5 + $0x40] sm:$0xff] }
 0x6b1   : > { %2772 = vst.msk [vmem:[#allocation5 + $0x70] sm:$0xff] %vm1935_vm14, %v2764_v32  ;;  %4706 = vmatpush1.bf16.msra.mxu0 %v4705_v30  ;;  %v2765_v33 = vsel %vm1051_vm5, %v2760_v8, %v2762_v31  ;;  %v2766_v38 = vsel %vm1051_vm5, %v2762_v31, %v2764_v32 }
 0x6b4   : > { %v2782_v34 = vpop.permute.xlu1 %2781  ;;  %v2784_v35 = vpop.permute.xlu0 %2783  ;;  %v2864_v37 = vld [vmem:[#allocation5 + $0x58] sm:$0xff] }
 0x6b5   : > { %v2785_v39 = vsel %vm1219_vm7, %v2780_v11, %v2782_v34  ;;  %v2786_v40 = vsel %vm1219_vm7, %v2782_v34, %v2784_v35  ;;  %2792 = vst.msk [vmem:[#allocation5 + $0x88] sm:$0xff] %vm1935_vm14, %v2784_v35  ;;  %v4719_v41 = vpack.c.bf16 %v2864_v37, %v2861_v36 }
 0x6b6   : > { %v4707_v42 = vpack.c.bf16 %v2786_v40, %v2766_v38  ;;  %v4709_v43 = vpack.c.bf16 %v2785_v39, %v2765_v33  ;;  %v4373_v33 = vld [vmem:[%s5834_s5 + $0x18] sm:$0xff] }
 0x6b7   : > { %4720 = vmatpush3.bf16.msra.mxu1 %v4719_v41 }
 0x6b8   : > { %v2802_v44 = vpop.permute.xlu1 %2801  ;;  %v2804_v3 = vpop.permute.xlu0 %2803  ;;  %4721 = vmatprep.subr.bf16.mxu1 %v4942_v5  ;;  %4708 = vmatprep.subr.bf16.mxu0 %v4707_v42  ;;  %v2867_v47 = vld [vmem:[#allocation5 + $0x70] sm:$0xff] }
 0x6b9   : > { %2812 = vst.msk [vmem:[#allocation5 + $0xa0] sm:$0xff] %vm1935_vm14, %v2804_v3  ;;  %4710 = vmatpush1.bf16.msra.mxu0 %v4709_v43  ;;  %v2806_v48 = vsel %vm1387_vm8, %v2802_v44, %v2804_v3  ;;  %v2805_v55 = vsel %vm1387_vm8, %v5498_v10, %v2802_v44 }
 0x6bc   : > { %v2822_v1 = vpop.permute.xlu1 %2821  ;;  %v2824_v45 = vpop.permute.xlu0 %2823  ;;  %v2870_v4 = vld [vmem:[#allocation5 + $0x88] sm:$0xff] }
 0x6bd   : > { %v2826_v49 = vsel %vm1555_vm9, %v2822_v1, %v2824_v45  ;;  %2832 = vst.msk [vmem:[#allocation5 + $0xb8] sm:$0xff] %vm1935_vm14, %v2824_v45  ;;  %v4722_v50 = vpack.c.bf16 %v2870_v4, %v2867_v47 }
 0x6be   : > { %v4711_v51 = vpack.c.bf16 %v2826_v49, %v2806_v48 }
 0x6bf   : > { %4723 = vmatpush3.bf16.msra.mxu1 %v4722_v50 }
 0x6c0   : > { %v2842_v53 = vpop.permute.xlu1 %2841  ;;  %v2820_v54 = vpop.permute.xlu0 %2819  ;;  %4724 = vmatprep.subr.bf16.mxu1 %v4942_v5  ;;  %4712 = vmatprep.subr.bf16.mxu0 %v4711_v51  ;;  %v2873_v2 = vld [vmem:[#allocation5 + $0xa0] sm:$0xff] }
 0x6c1   : > { %v2825_v56 = vsel %vm1555_vm9, %v2820_v54, %v2822_v1 }
 0x6c2   : > { %v4713_v57 = vpack.c.bf16 %v2825_v56, %v2805_v55 }
 0x6c4   : > { %v2840_v58 = vpop.permute.xlu1 %2839  ;;  %v2844_v60 = vpop.permute.xlu0 %2843  ;;  %v2876_v6 = vld [vmem:[#allocation5 + $0xb8] sm:$0xff]  ;;  %4714 = vmatpush1.bf16.msra.mxu0 %v4713_v57 }
 0x6c5   : > { %v2846_v7 = vsel %vm1723_vm10, %v2842_v53, %v2844_v60  ;;  %2852 = vst.msk [vmem:[#allocation5 + $0xd0] sm:$0xff] %vm1935_vm14, %v2844_v60  ;;  %v4725_v8 = vpack.c.bf16 %v2876_v6, %v2873_v2  ;;  %v2845_v10 = vsel %vm1723_vm10, %v2840_v58, %v2842_v53 }
 0x6c6   : > { %2904 = vmatprep.subr.mxu0 %v2846_v7 }
 0x6c7   : > { %4726 = vmatpush3.bf16.msra.mxu1 %v4725_v8 }
 0x6c8   : > { %4572 = vmatprep.subr.mxu1 %v4923_v0  ;;  %2905 = vmatpush1.msra.mxu0 %v2845_v10 }
 0x6c9   : > { %4370 = vmatmul.mubr.msk.f32.vlgmr.msra.gmra.mrb[6].mxu0 %vm2129_vm15, %v4368_v9 }
 0x6ca   : > { %3321 = vmatprep.mubr.f32.mxu0 %v4923_v0 }
 0x6cc   : > { %v2879_v11 = vld [vmem:[#allocation5 + $0xd0] sm:$0xff] }
 0x6cd   : > { %4573 = vmatpush3.msra.mxu1 %v2879_v11 }
 0x6ce   : > { %4575 = vmatmul.mubr.msk.f32.vlgmr.msra.gmra.mrb[24].mxu1 %vm2129_vm15, %v4368_v9  ;;  %4743 = vmatprep.subr.bf16.mxu1 %v4942_v5 }
 0x6cf   : > { %4595 = vmatprep.mubr.msk.f32.mxu1 %vm4940_vm6, %v4923_v0 }
 0x6d5   : > { %v2883_v12 = vpop.permute.xlu0 %2882 }
 0x79c   : > { %v2954_v13 = vpop.f32.mrb[6].mxu0 }
 0x79d   : > { %v2955_v14 = vadd.f32 %v2954_v13, %v2883_v12  ;;  %v2956_v15 = vpop.f32.mrb[7].mxu0 }
 0x79e   : > { %v2957_v16 = vadd.f32 %v2956_v15, %v2883_v12 }
 0x79f   : > { %v3029_v17 = vmax.f32 %v2955_v14, 0.0 }
 0x7a0   : > { %v3030_v18 = vmax.f32 %v2957_v16, 0.0 }
 0x7a1   : > { %v3025_v19 = vpop.f32.mrb[24].mxu1  ;;  %v3032_v20 = vmul.f32 %v3029_v17, %v5224_v52 }
 0x7a2   : > { %v3026_v21 = vadd.f32 %v3025_v19, %v2883_v12  ;;  %v3033_v22 = vmul.f32 %v3030_v18, %v5229_v59  ;;  %v4576_v23 = vpop.f32.mrb[25].mxu1 }
 0x7a3   : > { %3038 = vrot.lane.b32.xlu1 %v3032_v20, %s4941_s15 }
 0x7a4   : > { %v3031_v24 = vmax.f32 %v3026_v21, 0.0  ;;  %3040 = vrot.lane.b32.xlu0 %v3033_v22, %s4941_s15 }
 0x7a6   : > { %v3034_v25 = vmul.f32 %v3031_v24, %v5222_v46 }
 0x7a8   : > { %3042 = vrot.lane.b32.xlu1 %v3034_v25, %s4941_s15 }
 0x815   : > { %v3039_v26 = vpop.permute.xlu1 %3038 }
 0x816   : > { %3049 = vst.msk [vmem:[#allocation4] sm:$0xff] %vm1920_vm11, %v3039_v26  ;;  %v3041_v27 = vpop.permute.xlu0 %3040 }
 0x817   : > { %v3044_v28 = vsel %vm1914_vm12, %v3039_v26, %v3041_v27 }
 0x81a   : > { %v3043_v29 = vpop.permute.xlu1 %3042 }
 0x81b   : > { %v3045_v30 = vsel %vm1914_vm12, %v3041_v27, %v3043_v29 }
 0x81c   : > { %3051 = vst.msk [vmem:[#allocation4 + $0x10] sm:$0xff] %vm1923_vm13, %v3045_v30 }
 0x81d   : > { %v3082_v31 = vld [vmem:[#allocation4] sm:$0xff] }
 0x81e   : > { %3088 = vrot.lane.b32.xlu1 %v3082_v31, %s4924_s16  ;;  %3068 = vrot.lane.b32.xlu0 %v3082_v31, %s4928_s22 }
 0x822   : > { %3128 = vrot.lane.b32.xlu1 %v3082_v31, %s4930_s24  ;;  %3108 = vrot.lane.b32.xlu0 %v3082_v31, %s4926_s20 }
 0x823   : > { %v3064_v32 = vld [vmem:[#allocation4 + $0x10] sm:$0xff] }
 0x824   : > { %3061 = vst.msk [vmem:[#allocation5 + $0x10] sm:$0xff] %vm1935_vm14, %v3064_v32 }
 0x826   : > { %3168 = vrot.lane.b32.xlu1 %v3082_v31, %s4934_s28  ;;  %3148 = vrot.lane.b32.xlu0 %v3082_v31, %s4932_s26 }
 0x82a   : > { %3070 = vrot.lane.b32.xlu0 %v3044_v28, %s4928_s22  ;;  %3072 = vrot.lane.b32.xlu1 %v3064_v32, %s4928_s22 }
 0x82b   : > { %v3224_v47 = vld [vmem:[#allocation5 + $0x10] sm:$0xff] }
 0x82e   : > { %3092 = vrot.lane.b32.xlu0 %v3064_v32, %s4924_s16  ;;  %3090 = vrot.lane.b32.xlu1 %v3044_v28, %s4924_s16 }
 0x832   : > { %3112 = vrot.lane.b32.xlu0 %v3064_v32, %s4926_s20  ;;  %3110 = vrot.lane.b32.xlu1 %v3044_v28, %s4926_s20 }
 0x836   : > { %3132 = vrot.lane.b32.xlu0 %v3064_v32, %s4930_s24  ;;  %3130 = vrot.lane.b32.xlu1 %v3044_v28, %s4930_s24 }
 0x83a   : > { %3152 = vrot.lane.b32.xlu0 %v3064_v32, %s4932_s26  ;;  %3150 = vrot.lane.b32.xlu1 %v3044_v28, %s4932_s26 }
 0x83e   : > { %3172 = vrot.lane.b32.xlu0 %v3064_v32, %s4934_s28  ;;  %3170 = vrot.lane.b32.xlu1 %v3044_v28, %s4934_s28 }
 0x842   : > { %3192 = vrot.lane.b32.xlu0 %v3064_v32, %s4935_s29  ;;  %3190 = vrot.lane.b32.xlu1 %v3044_v28, %s4935_s29 }
 0x846   : > { %3188 = vrot.lane.b32.xlu0 %v3082_v31, %s4935_s29  ;;  %3210 = vrot.lane.b32.xlu1 %v3044_v28, %s4938_s11 }
 0x84a   : > { %3212 = vrot.lane.b32.xlu0 %v3064_v32, %s4938_s11  ;;  %3208 = vrot.lane.b32.xlu1 %v3082_v31, %s4938_s11 }
 0x84e   : > { %3251 = vperm.xlu0 %4872, %v4373_v33   ;;  %3407 = vrot.lane.b32.xlu1 %v5438_v61, %s4930_s24 }
 0x852   : > { %3409 = vrot.lane.b32.xlu0 %v5457_v63, %s4930_s24  ;;  %3411 = vrot.lane.b32.xlu1 %v5448_v62, %s4930_s24 }
 0x890   : > { %v3069_v34 = vpop.permute.xlu0 %3068  ;;  %v3089_v35 = vpop.permute.xlu1 %3088 }
 0x894   : > { %v3109_v36 = vpop.permute.xlu0 %3108  ;;  %v3129_v37 = vpop.permute.xlu1 %3128 }
 0x898   : > { %v3149_v38 = vpop.permute.xlu0 %3148  ;;  %v5584_v39 = vpop.permute.xlu1 %3168 }
 0x89c   : > { %v3071_v40 = vpop.permute.xlu0 %3070  ;;  %v3073_v41 = vpop.permute.xlu1 %3072 }
 0x89d   : > { %v3074_v42 = vsel %vm399_vm4, %v3069_v34, %v3071_v40  ;;  %v3075_v43 = vsel %vm399_vm4, %v3071_v40, %v3073_v41  ;;  %3081 = vst.msk [vmem:[#allocation5 + $0x28] sm:$0xff] %vm1935_vm14, %v3073_v41  ;;  %v4372_v34 = vld [vmem:[%s5833_s4 + $0x18] sm:$0xff] }
 0x89e   : > { %v4727_v61 = vpack.c.bf16 %v3075_v43, %v3044_v28  ;;  %v4729_v63 = vpack.c.bf16 %v3074_v42, %v3082_v31 }
 0x8a0   : > { %v3093_v44 = vpop.permute.xlu0 %3092  ;;  %v3091_v3 = vpop.permute.xlu1 %3090  ;;  %4728 = vmatprep.subr.bf16.mxu0 %v4727_v61 }
 0x8a1   : > { %3101 = vst.msk [vmem:[#allocation5 + $0x40] sm:$0xff] %vm1935_vm14, %v3093_v44  ;;  %4730 = vmatpush1.bf16.msra.mxu0 %v4729_v63  ;;  %v3094_v62 = vsel %vm715_vm2, %v3089_v35, %v3091_v3  ;;  %v3095_v48 = vsel %vm715_vm2, %v3091_v3, %v3093_v44 }
 0x8a4   : > { %v3113_v1 = vpop.permute.xlu0 %3112  ;;  %v3111_v45 = vpop.permute.xlu1 %3110  ;;  %v3227_v4 = vld [vmem:[#allocation5 + $0x28] sm:$0xff] }
 0x8a5   : > { %3121 = vst.msk [vmem:[#allocation5 + $0x58] sm:$0xff] %vm1935_vm14, %v3113_v1  ;;  %v3114_v49 = vsel %vm883_vm3, %v3109_v36, %v3111_v45  ;;  %v3115_v50 = vsel %vm883_vm3, %v3111_v45, %v3113_v1  ;;  %v4744_v51 = vpack.c.bf16 %v3227_v4, %v3224_v47 }
 0x8a6   : > { %v4731_v53 = vpack.c.bf16 %v3115_v50, %v3095_v48  ;;  %v4733_v54 = vpack.c.bf16 %v3114_v49, %v3094_v62 }
 0x8a7   : > { %4745 = vmatpush3.bf16.msra.mxu1 %v4744_v51 }
 0x8a8   : > { %v3133_v55 = vpop.permute.xlu0 %3132  ;;  %v3131_v56 = vpop.permute.xlu1 %3130  ;;  %4746 = vmatprep.subr.bf16.mxu1 %v4942_v5  ;;  %4732 = vmatprep.subr.bf16.mxu0 %v4731_v53  ;;  %v3230_v2 = vld [vmem:[#allocation5 + $0x40] sm:$0xff] }
 0x8a9   : > { %3141 = vst.msk [vmem:[#allocation5 + $0x70] sm:$0xff] %vm1935_vm14, %v3133_v55  ;;  %4734 = vmatpush1.bf16.msra.mxu0 %v4733_v54  ;;  %v3134_v57 = vsel %vm1051_vm5, %v3129_v37, %v3131_v56  ;;  %v3135_v7 = vsel %vm1051_vm5, %v3131_v56, %v3133_v55 }
 0x8ac   : > { %v3153_v58 = vpop.permute.xlu0 %3152  ;;  %v3151_v60 = vpop.permute.xlu1 %3150  ;;  %v3233_v6 = vld [vmem:[#allocation5 + $0x58] sm:$0xff] }
 0x8ad   : > { %3161 = vst.msk [vmem:[#allocation5 + $0x88] sm:$0xff] %vm1935_vm14, %v3153_v58  ;;  %v3154_v8 = vsel %vm1219_vm7, %v3149_v38, %v3151_v60  ;;  %v3155_v9 = vsel %vm1219_vm7, %v3151_v60, %v3153_v58  ;;  %v4747_v10 = vpack.c.bf16 %v3233_v6, %v3230_v2  ;;  %v3439_v60 = vld [vmem:[%s5836_s7] sm:$0xff]  ;;  %v3787_v6 = vld [vmem:[#allocation2 + $0x10] sm:$0xff] }
 0x8ae   : > { %v4735_v11 = vpack.c.bf16 %v3155_v9, %v3135_v7  ;;  %v4737_v12 = vpack.c.bf16 %v3154_v8, %v3134_v57  ;;  %v3785_v2 = vld [vmem:[#allocation2] sm:$0xff]  ;;  %v3786_v7 = vld [vmem:[#allocation2 + $0x8] sm:$0xff] }
 0x8af   : > { %4748 = vmatpush3.bf16.msra.mxu1 %v4747_v10 }
 0x8b0   : > { %v3173_v13 = vpop.permute.xlu0 %3172  ;;  %v3171_v14 = vpop.permute.xlu1 %3170  ;;  %4749 = vmatprep.subr.bf16.mxu1 %v4942_v5  ;;  %4736 = vmatprep.subr.bf16.mxu0 %v4735_v11  ;;  %v3236_v17 = vld [vmem:[#allocation5 + $0x70] sm:$0xff] }
 0x8b1   : > { %3181 = vst.msk [vmem:[#allocation5 + $0xa0] sm:$0xff] %vm1935_vm14, %v3173_v13  ;;  %4738 = vmatpush1.bf16.msra.mxu0 %v4737_v12  ;;  %v3175_v19 = vsel %vm1387_vm8, %v3171_v14, %v3173_v13  ;;  %v3174_v25 = vsel %vm1387_vm8, %v5584_v39, %v3171_v14 }
 0x8b4   : > { %v3193_v15 = vpop.permute.xlu0 %3192  ;;  %v3191_v16 = vpop.permute.xlu1 %3190  ;;  %v3239_v18 = vld [vmem:[#allocation5 + $0x88] sm:$0xff] }
 0x8b5   : > { %3201 = vst.msk [vmem:[#allocation5 + $0xb8] sm:$0xff] %vm1935_vm14, %v3193_v15  ;;  %v3195_v20 = vsel %vm1555_vm9, %v3191_v16, %v3193_v15  ;;  %v4750_v21 = vpack.c.bf16 %v3239_v18, %v3236_v17 }
 0x8b6   : > { %v4739_v22 = vpack.c.bf16 %v3195_v20, %v3175_v19 }
 0x8b7   : > { %4751 = vmatpush3.bf16.msra.mxu1 %v4750_v21 }
 0x8b8   : > { %v3189_v23 = vpop.permute.xlu0 %3188  ;;  %v3211_v24 = vpop.permute.xlu1 %3210  ;;  %4752 = vmatprep.subr.bf16.mxu1 %v4942_v5  ;;  %4740 = vmatprep.subr.bf16.mxu0 %v4739_v22  ;;  %v3242_v30 = vld [vmem:[#allocation5 + $0xa0] sm:$0xff] }
 0x8b9   : > { %v3194_v26 = vsel %vm1555_vm9, %v3189_v23, %v3191_v16 }
 0x8ba   : > { %v4741_v27 = vpack.c.bf16 %v3194_v26, %v3174_v25 }
 0x8bc   : > { %v3213_v28 = vpop.permute.xlu0 %3212  ;;  %v3209_v29 = vpop.permute.xlu1 %3208  ;;  %v3245_v31 = vld [vmem:[#allocation5 + $0xb8] sm:$0xff]  ;;  %4742 = vmatpush1.bf16.msra.mxu0 %v4741_v27 }
 0x8bd   : > { %v3215_v32 = vsel %vm1723_vm10, %v3211_v24, %v3213_v28  ;;  %3221 = vst.msk [vmem:[#allocation5 + $0xd0] sm:$0xff] %vm1935_vm14, %v3213_v28  ;;  %v4753_v33 = vpack.c.bf16 %v3245_v31, %v3242_v30  ;;  %v3214_v35 = vsel %vm1723_vm10, %v3209_v29, %v3211_v24 }
 0x8be   : > { %3273 = vmatprep.subr.mxu0 %v3215_v32 }
 0x8bf   : > { %4754 = vmatpush3.bf16.msra.mxu1 %v4753_v33 }
 0x8c0   : > { %4593 = vmatprep.subr.mxu1 %v4923_v0  ;;  %3274 = vmatpush1.msra.mxu0 %v3214_v35  ;;  %v3408_v38 = vpop.permute.xlu1 %3407 }
 0x8c1   : > { %4374 = vmatmul.mubr.msk.f32.vlgmr.msra.gmra.mrb[8].mxu0 %vm2129_vm15, %v4372_v34 }
 0x8c2   : > { %3705 = vmatprep.mubr.f32.mxu0 %v4923_v0 }
 0x8c4   : > { %v3248_v36 = vld [vmem:[#allocation5 + $0xd0] sm:$0xff]  ;;  %v3412_v63 = vpop.permute.xlu1 %3411 }
 0x8c5   : > { %4594 = vmatpush3.msra.mxu1 %v3248_v36 }
 0x8c6   : > { %4596 = vmatmul.mubr.msk.f32.vlgmr.msra.gmra.mrb[26].mxu1 %vm2129_vm15, %v4372_v34  ;;  %4771 = vmatprep.subr.bf16.mxu1 %v4942_v5 }
 0x8c7   : > { %4616 = vmatprep.mubr.msk.f32.mxu1 %vm4940_vm6, %v4923_v0 }
 0x8cd   : > { %v3252_v37 = vpop.permute.xlu0 %3251 }
 0x8d1   : > { %v3410_v40 = vpop.permute.xlu0 %3409 }
 0x8d2   : > { %v3413_v44 = vsel %vm1051_vm5, %v3408_v38, %v3410_v40  ;;  %v3414_v62 = vsel %vm1051_vm5, %v3410_v40, %v3412_v63 }
 0x994   : > { %v3323_v39 = vpop.f32.mrb[8].mxu0 }
 0x995   : > { %v3324_v41 = vadd.f32 %v3323_v39, %v3252_v37  ;;  %v3325_v42 = vpop.f32.mrb[9].mxu0 }
 0x996   : > { %v3326_v43 = vadd.f32 %v3325_v42, %v3252_v37 }
 0x997   : > { %v3398_v61 = vmul.f32 %v3324_v41, %v5224_v52 }
 0x998   : > { %v3399_v3 = vmul.f32 %v3326_v43, %v5229_v59 }
 0x999   : > { %v3394_v1 = vpop.f32.mrb[26].mxu1  ;;  %v3418_v45 = vadd.f32 %v3413_v44, %v3398_v61 }
 0x99a   : > { %v3395_v47 = vadd.f32 %v3394_v1, %v3252_v37  ;;  %v3419_v4 = vadd.f32 %v3414_v62, %v3399_v3  ;;  %v4597_v48 = vpop.f32.mrb[27].mxu1 }
 0x99b   : > { %3424 = vrot.lane.b32.xlu0 %v3418_v45, %s4941_s15 }
 0x99c   : > { %v3400_v49 = vmul.f32 %v3395_v47, %v5222_v46  ;;  %3426 = vrot.lane.b32.xlu1 %v3419_v4, %s4941_s15 }
 0x99e   : > { %v3420_v50 = vadd.f32 %v3412_v63, %v3400_v49 }
 0x9a0   : > { %3428 = vrot.lane.b32.xlu0 %v3420_v50, %s4941_s15 }
 0xa0d   : > { %v3425_v51 = vpop.permute.xlu0 %3424 }
 0xa0e   : > { %3435 = vst.msk [vmem:[#allocation3] sm:$0xff] %vm1920_vm11, %v3425_v51  ;;  %v3427_v53 = vpop.permute.xlu1 %3426 }
 0xa0f   : > { %v3430_v58 = vsel %vm1914_vm12, %v3425_v51, %v3427_v53 }
 0xa12   : > { %v3429_v54 = vpop.permute.xlu0 %3428 }
 0xa13   : > { %v3431_v55 = vsel %vm1914_vm12, %v3427_v53, %v3429_v54 }
 0xa14   : > { %3437 = vst.msk [vmem:[#allocation3 + $0x10] sm:$0xff] %vm1923_vm13, %v3431_v55 }
 0xa15   : > { %v3466_v56 = vld [vmem:[#allocation3] sm:$0xff] }
 0xa16   : > { %3472 = vrot.lane.b32.xlu0 %v3466_v56, %s4924_s16  ;;  %3452 = vrot.lane.b32.xlu1 %v3466_v56, %s4928_s22 }
 0xa1a   : > { %3512 = vrot.lane.b32.xlu0 %v3466_v56, %s4930_s24  ;;  %3492 = vrot.lane.b32.xlu1 %v3466_v56, %s4926_s20 }
 0xa1b   : > { %v3448_v57 = vld [vmem:[#allocation3 + $0x10] sm:$0xff] }
 0xa1c   : > { %3445 = vst.msk [vmem:[#allocation5 + $0x10] sm:$0xff] %vm1935_vm14, %v3448_v57 }
 0xa1e   : > { %3552 = vrot.lane.b32.xlu0 %v3466_v56, %s4934_s28  ;;  %3532 = vrot.lane.b32.xlu1 %v3466_v56, %s4932_s26 }
 0xa22   : > { %3456 = vrot.lane.b32.xlu0 %v3448_v57, %s4928_s22  ;;  %3454 = vrot.lane.b32.xlu1 %v3430_v58, %s4928_s22 }
 0xa23   : > { %v3608_v25 = vld [vmem:[#allocation5 + $0x10] sm:$0xff] }
 0xa26   : > { %3474 = vrot.lane.b32.xlu0 %v3430_v58, %s4924_s16  ;;  %3476 = vrot.lane.b32.xlu1 %v3448_v57, %s4924_s16 }
 0xa2a   : > { %3494 = vrot.lane.b32.xlu0 %v3430_v58, %s4926_s20  ;;  %3496 = vrot.lane.b32.xlu1 %v3448_v57, %s4926_s20 }
 0xa2e   : > { %3514 = vrot.lane.b32.xlu0 %v3430_v58, %s4930_s24  ;;  %3516 = vrot.lane.b32.xlu1 %v3448_v57, %s4930_s24 }
 0xa32   : > { %3534 = vrot.lane.b32.xlu0 %v3430_v58, %s4932_s26  ;;  %3536 = vrot.lane.b32.xlu1 %v3448_v57, %s4932_s26 }
 0xa36   : > { %3554 = vrot.lane.b32.xlu0 %v3430_v58, %s4934_s28  ;;  %3556 = vrot.lane.b32.xlu1 %v3448_v57, %s4934_s28 }
 0xa3a   : > { %3574 = vrot.lane.b32.xlu0 %v3430_v58, %s4935_s29  ;;  %3576 = vrot.lane.b32.xlu1 %v3448_v57, %s4935_s29 }
 0xa3e   : > { %3594 = vrot.lane.b32.xlu0 %v3430_v58, %s4938_s11  ;;  %3572 = vrot.lane.b32.xlu1 %v3466_v56, %s4935_s29 }
 0xa42   : > { %3592 = vrot.lane.b32.xlu0 %v3466_v56, %s4938_s11  ;;  %3596 = vrot.lane.b32.xlu1 %v3448_v57, %s4938_s11 }
 0xa46   : > { %3791 = vrot.lane.b32.xlu0 %v3785_v2, %s4930_s24  ;;  %3635 = vperm.xlu1 %4873, %v3439_v60  }
 0xa4a   : > { %3795 = vrot.lane.b32.xlu0 %v3787_v6, %s4930_s24  ;;  %3793 = vrot.lane.b32.xlu1 %v3786_v7, %s4930_s24 }
 0xa88   : > { %v3473_v8 = vpop.permute.xlu0 %3472  ;;  %v3453_v9 = vpop.permute.xlu1 %3452 }
 0xa8c   : > { %v3513_v10 = vpop.permute.xlu0 %3512  ;;  %v3493_v11 = vpop.permute.xlu1 %3492 }
 0xa90   : > { %v5667_v12 = vpop.permute.xlu0 %3552  ;;  %v3533_v13 = vpop.permute.xlu1 %3532 }
 0xa94   : > { %v3457_v14 = vpop.permute.xlu0 %3456  ;;  %v3455_v15 = vpop.permute.xlu1 %3454 }
 0xa95   : > { %3465 = vst.msk [vmem:[#allocation5 + $0x28] sm:$0xff] %vm1935_vm14, %v3457_v14  ;;  %v3458_v16 = vsel %vm399_vm4, %v3453_v9, %v3455_v15  ;;  %v3459_v17 = vsel %vm399_vm4, %v3455_v15, %v3457_v14 }
 0xa96   : > { %v4755_v18 = vpack.c.bf16 %v3459_v17, %v3430_v58  ;;  %v4757_v19 = vpack.c.bf16 %v3458_v16, %v3466_v56 }
 0xa98   : > { %v3475_v20 = vpop.permute.xlu0 %3474  ;;  %v3477_v21 = vpop.permute.xlu1 %3476  ;;  %4756 = vmatprep.subr.bf16.mxu0 %v4755_v18 }
 0xa99   : > { %3485 = vst.msk [vmem:[#allocation5 + $0x40] sm:$0xff] %vm1935_vm14, %v3477_v21  ;;  %4758 = vmatpush1.bf16.msra.mxu0 %v4757_v19  ;;  %v3478_v22 = vsel %vm715_vm2, %v3473_v8, %v3475_v20  ;;  %v3479_v27 = vsel %vm715_vm2, %v3475_v20, %v3477_v21 }
 0xa9c   : > { %v3495_v23 = vpop.permute.xlu0 %3494  ;;  %v3497_v24 = vpop.permute.xlu1 %3496  ;;  %v3611_v26 = vld [vmem:[#allocation5 + $0x28] sm:$0xff] }
 0xa9d   : > { %v3498_v28 = vsel %vm883_vm3, %v3493_v11, %v3495_v23  ;;  %v3499_v29 = vsel %vm883_vm3, %v3495_v23, %v3497_v24  ;;  %3505 = vst.msk [vmem:[#allocation5 + $0x58] sm:$0xff] %vm1935_vm14, %v3497_v24  ;;  %v4772_v30 = vpack.c.bf16 %v3611_v26, %v3608_v25 }
 0xa9e   : > { %v4759_v31 = vpack.c.bf16 %v3499_v29, %v3479_v27  ;;  %v4761_v32 = vpack.c.bf16 %v3498_v28, %v3478_v22 }
 0xa9f   : > { %4773 = vmatpush3.bf16.msra.mxu1 %v4772_v30 }
 0xaa0   : > { %v3515_v33 = vpop.permute.xlu0 %3514  ;;  %v3517_v34 = vpop.permute.xlu1 %3516  ;;  %4774 = vmatprep.subr.bf16.mxu1 %v4942_v5  ;;  %4760 = vmatprep.subr.bf16.mxu0 %v4759_v31  ;;  %v3614_v38 = vld [vmem:[#allocation5 + $0x40] sm:$0xff] }
 0xaa1   : > { %3525 = vst.msk [vmem:[#allocation5 + $0x70] sm:$0xff] %vm1935_vm14, %v3517_v34  ;;  %4762 = vmatpush1.bf16.msra.mxu0 %v4761_v32  ;;  %v3518_v35 = vsel %vm1051_vm5, %v3513_v10, %v3515_v33  ;;  %v3519_v40 = vsel %vm1051_vm5, %v3515_v33, %v3517_v34  ;;  %v5740_v33 = vld [vmem:[%s5837_s8] sm:$0xff] }
 0xaa2   : > { %v3826_v34 = vld [vmem:[%s5838_s9] sm:$0xff] }
 0xaa4   : > { %v3535_v36 = vpop.permute.xlu0 %3534  ;;  %v3537_v37 = vpop.permute.xlu1 %3536  ;;  %v3617_v39 = vld [vmem:[#allocation5 + $0x58] sm:$0xff] }
 0xaa5   : > { %v3538_v41 = vsel %vm1219_vm7, %v3533_v13, %v3535_v36  ;;  %v3539_v42 = vsel %vm1219_vm7, %v3535_v36, %v3537_v37  ;;  %3545 = vst.msk [vmem:[#allocation5 + $0x88] sm:$0xff] %vm1935_vm14, %v3537_v37  ;;  %v4775_v43 = vpack.c.bf16 %v3617_v39, %v3614_v38  ;;  %v3828_v36 = vld [vmem:[%s5838_s9 + $0x10] sm:$0xff]  ;;  %v3829_v37 = vld [vmem:[%s5838_s9 + $0x18] sm:$0xff] }
 0xaa6   : > { %v4763_v61 = vpack.c.bf16 %v3539_v42, %v3519_v40  ;;  %v4765_v63 = vpack.c.bf16 %v3538_v41, %v3518_v35  ;;  %v3827_v35 = vld [vmem:[%s5838_s9 + $0x8] sm:$0xff] }
 0xaa7   : > { %4776 = vmatpush3.bf16.msra.mxu1 %v4775_v43 }
 0xaa8   : > { %v3555_v44 = vpop.permute.xlu0 %3554  ;;  %v3557_v3 = vpop.permute.xlu1 %3556  ;;  %4777 = vmatprep.subr.bf16.mxu1 %v4942_v5  ;;  %4764 = vmatprep.subr.bf16.mxu0 %v4763_v61  ;;  %v3620_v45 = vld [vmem:[#allocation5 + $0x70] sm:$0xff] }
 0xaa9   : > { %3565 = vst.msk [vmem:[#allocation5 + $0xa0] sm:$0xff] %vm1935_vm14, %v3557_v3  ;;  %4766 = vmatpush1.bf16.msra.mxu0 %v4765_v63  ;;  %v3559_v4 = vsel %vm1387_vm8, %v3555_v44, %v3557_v3  ;;  %v3558_v54 = vsel %vm1387_vm8, %v5667_v12, %v3555_v44 }
 0xaac   : > { %v3575_v62 = vpop.permute.xlu0 %3574  ;;  %v3577_v1 = vpop.permute.xlu1 %3576  ;;  %v3623_v47 = vld [vmem:[#allocation5 + $0x88] sm:$0xff] }
 0xaad   : > { %v3579_v48 = vsel %vm1555_vm9, %v3575_v62, %v3577_v1  ;;  %3585 = vst.msk [vmem:[#allocation5 + $0xb8] sm:$0xff] %vm1935_vm14, %v3577_v1  ;;  %v4778_v49 = vpack.c.bf16 %v3623_v47, %v3620_v45 }
 0xaae   : > { %v4767_v50 = vpack.c.bf16 %v3579_v48, %v3559_v4 }
 0xaaf   : > { %4779 = vmatpush3.bf16.msra.mxu1 %v4778_v49 }
 0xab0   : > { %v3595_v51 = vpop.permute.xlu0 %3594  ;;  %v3573_v53 = vpop.permute.xlu1 %3572  ;;  %4780 = vmatprep.subr.bf16.mxu1 %v4942_v5  ;;  %4768 = vmatprep.subr.bf16.mxu0 %v4767_v50  ;;  %v3626_v60 = vld [vmem:[#allocation5 + $0xa0] sm:$0xff]  ;;  %v3438_v5 = vld [vmem:[%s5835_s6] sm:$0xff] }
 0xab1   : > { %v3578_v55 = vsel %vm1555_vm9, %v3573_v53, %v3575_v62 }
 0xab2   : > { %v4769_v56 = vpack.c.bf16 %v3578_v55, %v3558_v54 }
 0xab4   : > { %v3593_v57 = vpop.permute.xlu0 %3592  ;;  %v3597_v58 = vpop.permute.xlu1 %3596  ;;  %v3629_v2 = vld [vmem:[#allocation5 + $0xb8] sm:$0xff]  ;;  %4770 = vmatpush1.bf16.msra.mxu0 %v4769_v56 }
 0xab5   : > { %v3599_v6 = vsel %vm1723_vm10, %v3595_v51, %v3597_v58  ;;  %3605 = vst.msk [vmem:[#allocation5 + $0xd0] sm:$0xff] %vm1935_vm14, %v3597_v58  ;;  %v4781_v7 = vpack.c.bf16 %v3629_v2, %v3626_v60  ;;  %v3598_v8 = vsel %vm1723_vm10, %v3593_v57, %v3595_v51 }
 0xab6   : > { %3657 = vmatprep.subr.mxu0 %v3599_v6 }
 0xab7   : > { %4782 = vmatpush3.bf16.msra.mxu1 %v4781_v7 }
 0xab8   : > { %4614 = vmatprep.subr.mxu1 %v4923_v0  ;;  %3658 = vmatpush1.msra.mxu0 %v3598_v8  ;;  %v3792_v11 = vpop.permute.xlu0 %3791 }
 0xab9   : > { %4376 = vmatmul.mubr.msk.f32.vlgmr.msra.gmra.mrb[10].mxu0 %vm2129_vm15, %v3438_v5 }
 0xaba   : > { %4119 = vmatprep.mubr.f32.mxu0 %v4923_v0 }
 0xabc   : > { %v3632_v9 = vld [vmem:[#allocation5 + $0xd0] sm:$0xff]  ;;  %v3796_v18 = vpop.permute.xlu0 %3795 }
 0xabd   : > { %4615 = vmatpush3.msra.mxu1 %v3632_v9 }
 0xabe   : > { %4617 = vmatmul.mubr.msk.f32.vlgmr.msra.gmra.mrb[28].mxu1 %vm2129_vm15, %v3438_v5 }
 0xabf   : > { %4637 = vmatprep.mubr.msk.f32.mxu1 %vm2129_vm15, %v5740_v33 }
 0xac5   : > { %v3636_v10 = vpop.permute.xlu1 %3635 }
 0xac9   : > { %v3794_v13 = vpop.permute.xlu1 %3793 }
 0xaca   : > { %v3797_v19 = vsel %vm1051_vm5, %v3792_v11, %v3794_v13  ;;  %v3798_v21 = vsel %vm1051_vm5, %v3794_v13, %v3796_v18 }
 0xb8c   : > { %v3707_v12 = vpop.f32.mrb[10].mxu0 }
 0xb8d   : > { %v3708_v14 = vadd.f32 %v3707_v12, %v3636_v10  ;;  %v3709_v15 = vpop.f32.mrb[11].mxu0 }
 0xb8e   : > { %v3710_v16 = vadd.f32 %v3709_v15, %v3636_v10 }
 0xb8f   : > { %v3782_v17 = vmul.f32 %v3708_v14, %v5224_v52 }
 0xb90   : > { %v3783_v20 = vmul.f32 %v3710_v16, %v5229_v59 }
 0xb91   : > { %v3778_v22 = vpop.f32.mrb[28].mxu1  ;;  %v3802_v23 = vadd.f32 %v3797_v19, %v3782_v17 }
 0xb92   : > { %v3779_v24 = vadd.f32 %v3778_v22, %v3636_v10  ;;  %v3803_v25 = vadd.f32 %v3798_v21, %v3783_v20  ;;  %v4618_v26 = vpop.f32.mrb[29].mxu1 }
 0xb93   : > { %3808 = vrot.lane.b32.xlu1 %v3802_v23, %s4941_s15 }
 0xb94   : > { %v3784_v27 = vmul.f32 %v3779_v24, %v5222_v46  ;;  %3810 = vrot.lane.b32.xlu0 %v3803_v25, %s4941_s15 }
 0xb96   : > { %v3804_v28 = vadd.f32 %v3796_v18, %v3784_v27 }
 0xb98   : > { %3812 = vrot.lane.b32.xlu1 %v3804_v28, %s4941_s15 }
 0xc05   : > { %v3809_v52 = vpop.permute.xlu1 %3808 }
 0xc06   : > { %3819 = vst.msk [vmem:[#allocation3] sm:$0xff] %vm1920_vm11, %v3809_v52  ;;  %v3811_v59 = vpop.permute.xlu0 %3810 }
 0xc07   : > { %v3814_v29 = vsel %vm1914_vm12, %v3809_v52, %v3811_v59 }
 0xc0a   : > { %v3813_v30 = vpop.permute.xlu1 %3812 }
 0xc0b   : > { %v3815_v31 = vsel %vm1914_vm12, %v3811_v59, %v3813_v30 }
 0xc0c   : > { %3821 = vst.msk [vmem:[#allocation3 + $0x10] sm:$0xff] %vm1923_vm13, %v3815_v31 }
 0xc0d   : > { %v3856_v32 = vld [vmem:[#allocation3] sm:$0xff] }
 0xc0e   : > { %3862 = vrot.lane.b32.xlu1 %v3856_v32, %s4924_s16  ;;  %3842 = vrot.lane.b32.xlu0 %v3856_v32, %s4928_s22 }
 0xc12   : > { %3902 = vrot.lane.b32.xlu1 %v3856_v32, %s4930_s24  ;;  %3882 = vrot.lane.b32.xlu0 %v3856_v32, %s4926_s20 }
 0xc13   : > { %v3838_v46 = vld [vmem:[#allocation3 + $0x10] sm:$0xff] }
 0xc14   : > { %3835 = vst.msk [vmem:[#allocation5 + $0x10] sm:$0xff] %vm1935_vm14, %v3838_v46 }
 0xc16   : > { %3942 = vrot.lane.b32.xlu1 %v3856_v32, %s4934_s28  ;;  %3922 = vrot.lane.b32.xlu0 %v3856_v32, %s4932_s26 }
 0xc1a   : > { %3844 = vrot.lane.b32.xlu0 %v3814_v29, %s4928_s22  ;;  %3846 = vrot.lane.b32.xlu1 %v3838_v46, %s4928_s22  ;;  %s5808_s22 = scalar_lea.vmem %s5839_s10, %s4832_s19 }
 0xc1b   : > { %v3998_v51 = vld [vmem:[#allocation5 + $0x10] sm:$0xff] }
 0xc1e   : > { %3866 = vrot.lane.b32.xlu0 %v3838_v46, %s4924_s16  ;;  %3864 = vrot.lane.b32.xlu1 %v3814_v29, %s4924_s16 }
 0xc22   : > { %3886 = vrot.lane.b32.xlu0 %v3838_v46, %s4926_s20  ;;  %3884 = vrot.lane.b32.xlu1 %v3814_v29, %s4926_s20 }
 0xc26   : > { %3906 = vrot.lane.b32.xlu0 %v3838_v46, %s4930_s24  ;;  %3904 = vrot.lane.b32.xlu1 %v3814_v29, %s4930_s24 }
 0xc2a   : > { %3926 = vrot.lane.b32.xlu0 %v3838_v46, %s4932_s26  ;;  %3924 = vrot.lane.b32.xlu1 %v3814_v29, %s4932_s26 }
 0xc2e   : > { %3946 = vrot.lane.b32.xlu0 %v3838_v46, %s4934_s28  ;;  %3944 = vrot.lane.b32.xlu1 %v3814_v29, %s4934_s28 }
 0xc32   : > { %3966 = vrot.lane.b32.xlu0 %v3838_v46, %s4935_s29  ;;  %3964 = vrot.lane.b32.xlu1 %v3814_v29, %s4935_s29 }
 0xc36   : > { %3962 = vrot.lane.b32.xlu0 %v3856_v32, %s4935_s29  ;;  %3984 = vrot.lane.b32.xlu1 %v3814_v29, %s4938_s11 }
 0xc3a   : > { %3986 = vrot.lane.b32.xlu0 %v3838_v46, %s4938_s11  ;;  %3982 = vrot.lane.b32.xlu1 %v3856_v32, %s4938_s11 }
 0xc3e   : > { %4025 = vperm.xlu0 %4872, %v3826_v34   ;;  %4030 = vperm.xlu1 %4873, %v3827_v35  }
 0xc42   : > { %4035 = vperm.xlu0 %4872, %v3828_v36   ;;  %4040 = vperm.xlu1 %4873, %v3829_v37   ;;  %v3823_v36 = vld [vmem:[%s5837_s8 + $0x8] sm:$0xff] }
 0xc80   : > { %v3843_v38 = vpop.permute.xlu0 %3842  ;;  %v3863_v39 = vpop.permute.xlu1 %3862 }
 0xc84   : > { %v3883_v40 = vpop.permute.xlu0 %3882  ;;  %v3903_v41 = vpop.permute.xlu1 %3902 }
 0xc88   : > { %v3923_v42 = vpop.permute.xlu0 %3922  ;;  %v3943_v43 = vpop.permute.xlu1 %3942 }
 0xc8c   : > { %v3845_v61 = vpop.permute.xlu0 %3844  ;;  %v3847_v63 = vpop.permute.xlu1 %3846 }
 0xc8d   : > { %v3848_v44 = vsel %vm399_vm4, %v3843_v38, %v3845_v61  ;;  %v3849_v3 = vsel %vm399_vm4, %v3845_v61, %v3847_v63  ;;  %3855 = vst.msk [vmem:[#allocation5 + $0x28] sm:$0xff] %vm1935_vm14, %v3847_v63  ;;  %v3824_v38 = vld [vmem:[%s5837_s8 + $0x10] sm:$0xff] }
 0xc8e   : > { %v4783_v62 = vpack.c.bf16 %v3849_v3, %v3814_v29  ;;  %v4785_v1 = vpack.c.bf16 %v3848_v44, %v3856_v32 }
 0xc90   : > { %v3867_v45 = vpop.permute.xlu0 %3866  ;;  %v3865_v47 = vpop.permute.xlu1 %3864  ;;  %4784 = vmatprep.subr.bf16.mxu0 %v4783_v62 }
 0xc91   : > { %3875 = vst.msk [vmem:[#allocation5 + $0x40] sm:$0xff] %vm1935_vm14, %v3867_v45  ;;  %v3868_v4 = vsel %vm715_vm2, %v3863_v39, %v3865_v47  ;;  %v3869_v48 = vsel %vm715_vm2, %v3865_v47, %v3867_v45  ;;  %4786 = vmatpush1.bf16.msra.mxu0 %v4785_v1 }
 0xc94   : > { %v3887_v49 = vpop.permute.xlu0 %3886  ;;  %v3885_v50 = vpop.permute.xlu1 %3884  ;;  %v4001_v53 = vld [vmem:[#allocation5 + $0x28] sm:$0xff] }
 0xc95   : > { %3895 = vst.msk [vmem:[#allocation5 + $0x58] sm:$0xff] %vm1935_vm14, %v3887_v49  ;;  %v3888_v54 = vsel %vm883_vm3, %v3883_v40, %v3885_v50  ;;  %v3889_v55 = vsel %vm883_vm3, %v3885_v50, %v3887_v49  ;;  %v4799_v56 = vpack.c.bf16 %v4001_v53, %v3998_v51 }
 0xc96   : > { %v4787_v57 = vpack.c.bf16 %v3889_v55, %v3869_v48  ;;  %v4789_v58 = vpack.c.bf16 %v3888_v54, %v3868_v4 }
 0xc97   : > { %4800 = vmatprep.subr.bf16.mxu1 %v4799_v56 }
 0xc98   : > { %v3907_v60 = vpop.permute.xlu0 %3906  ;;  %4802 = vmatpush3.bf16.msra.mxu1 %v4799_v56  ;;  %v3905_v2 = vpop.permute.xlu1 %3904  ;;  %4788 = vmatprep.subr.bf16.mxu0 %v4787_v57  ;;  %v4004_v9 = vld [vmem:[#allocation5 + $0x40] sm:$0xff] }
 0xc99   : > { %3915 = vst.msk [vmem:[#allocation5 + $0x70] sm:$0xff] %vm1935_vm14, %v3907_v60  ;;  %v3908_v6 = vsel %vm1051_vm5, %v3903_v41, %v3905_v2  ;;  %v3909_v7 = vsel %vm1051_vm5, %v3905_v2, %v3907_v60  ;;  %4790 = vmatpush1.bf16.msra.mxu0 %v4789_v58 }
 0xc9c   : > { %v3927_v5 = vpop.permute.xlu0 %3926  ;;  %v3925_v8 = vpop.permute.xlu1 %3924  ;;  %v4007_v10 = vld [vmem:[#allocation5 + $0x58] sm:$0xff] }
 0xc9d   : > { %3935 = vst.msk [vmem:[#allocation5 + $0x88] sm:$0xff] %vm1935_vm14, %v3927_v5  ;;  %v3928_v11 = vsel %vm1219_vm7, %v3923_v42, %v3925_v8  ;;  %v3929_v12 = vsel %vm1219_vm7, %v3925_v8, %v3927_v5  ;;  %v4803_v13 = vpack.c.bf16 %v4007_v10, %v4004_v9 }
 0xc9e   : > { %v4791_v14 = vpack.c.bf16 %v3929_v12, %v3909_v7  ;;  %v4793_v15 = vpack.c.bf16 %v3928_v11, %v3908_v6 }
 0xc9f   : > { %4804 = vmatprep.subr.bf16.mxu1 %v4803_v13 }
 0xca0   : > { %v3947_v16 = vpop.permute.xlu0 %3946  ;;  %4806 = vmatpush3.bf16.msra.mxu1 %v4803_v13  ;;  %v3945_v17 = vpop.permute.xlu1 %3944  ;;  %4792 = vmatprep.subr.bf16.mxu0 %v4791_v14  ;;  %v4010_v22 = vld [vmem:[#allocation5 + $0x70] sm:$0xff] }
 0xca1   : > { %3955 = vst.msk [vmem:[#allocation5 + $0xa0] sm:$0xff] %vm1935_vm14, %v3947_v16  ;;  %v3948_v18 = vsel %vm1387_vm8, %v3943_v43, %v3945_v17  ;;  %v3949_v19 = vsel %vm1387_vm8, %v3945_v17, %v3947_v16  ;;  %4794 = vmatpush1.bf16.msra.mxu0 %v4793_v15 }
 0xca4   : > { %v3967_v20 = vpop.permute.xlu0 %3966  ;;  %v3965_v21 = vpop.permute.xlu1 %3964  ;;  %v4013_v23 = vld [vmem:[#allocation5 + $0x88] sm:$0xff] }
 0xca5   : > { %3975 = vst.msk [vmem:[#allocation5 + $0xb8] sm:$0xff] %vm1935_vm14, %v3967_v20  ;;  %v3969_v24 = vsel %vm1555_vm9, %v3965_v21, %v3967_v20  ;;  %v4807_v25 = vpack.c.bf16 %v4013_v23, %v4010_v22 }
 0xca6   : > { %v4795_v26 = vpack.c.bf16 %v3969_v24, %v3949_v19 }
 0xca7   : > { %4808 = vmatprep.subr.bf16.mxu1 %v4807_v25 }
 0xca8   : > { %v3963_v27 = vpop.permute.xlu0 %3962  ;;  %4810 = vmatpush3.bf16.msra.mxu1 %v4807_v25  ;;  %v3985_v28 = vpop.permute.xlu1 %3984  ;;  %4796 = vmatprep.subr.bf16.mxu0 %v4795_v26  ;;  %v4016_v31 = vld [vmem:[#allocation5 + $0xa0] sm:$0xff] }
 0xca9   : > { %v3968_v52 = vsel %vm1555_vm9, %v3963_v27, %v3965_v21 }
 0xcaa   : > { %v4797_v59 = vpack.c.bf16 %v3968_v52, %v3948_v18 }
 0xcac   : > { %v3987_v29 = vpop.permute.xlu0 %3986  ;;  %v3983_v30 = vpop.permute.xlu1 %3982  ;;  %v4019_v32 = vld [vmem:[#allocation5 + $0xb8] sm:$0xff]  ;;  %4798 = vmatpush1.bf16.msra.mxu0 %v4797_v59 }
 0xcad   : > { %v3989_v46 = vsel %vm1723_vm10, %v3985_v28, %v3987_v29  ;;  %3995 = vst.msk [vmem:[#allocation5 + $0xd0] sm:$0xff] %vm1935_vm14, %v3987_v29  ;;  %v3988_v34 = vsel %vm1723_vm10, %v3983_v30, %v3985_v28  ;;  %v4811_v35 = vpack.c.bf16 %v4019_v32, %v4016_v31 }
 0xcae   : > { %4071 = vmatprep.subr.mxu0 %v3989_v46 }
 0xcaf   : > { %4812 = vmatprep.subr.bf16.mxu1 %v4811_v35 }
 0xcb0   : > { %4814 = vmatpush3.bf16.msra.mxu1 %v4811_v35  ;;  %4072 = vmatpush1.msra.mxu0 %v3988_v34 }
 0xcb1   : > { %4378 = vmatmul.mubr.msk.f32.vlgmr.msra.gmra.mrb[12].mxu0 %vm2129_vm15, %v5740_v33  ;;  %v3825_v33 = vld [vmem:[%s5837_s8 + $0x18] sm:$0xff] }
 0xcb2   : > { %4125 = vmatprep.mubr.f32.mxu0 %v4923_v0 }
 0xcb4   : > { %v4022_v37 = vld [vmem:[#allocation5 + $0xd0] sm:$0xff] }
 0xcb5   : > { %4635 = vmatprep.subr.mxu1 %v4022_v37  ;;  %4379 = vmatmul.mubr.msk.f32.gmra.mrb[14].mxu0 %vm2129_vm15, %v3823_v36 }
 0xcb6   : > { %4636 = vmatpush3.msra.mxu1 %v4022_v37  ;;  %4131 = vmatprep.mubr.f32.mxu0 %v4923_v0 }
 0xcb7   : > { %4638 = vmatmul.mubr.msk.f32.vlgmr.msra.gmra.mrb[30].mxu1 %vm2129_vm15, %v3823_v36 }
 0xcb8   : > { %4640 = vmatprep.mubr.msk.f32.mxu1 %vm2129_vm15, %v3824_v38 }
 0xcb9   : > { %4380 = vmatmul.mubr.msk.f32.gmra.mrb[16].mxu0 %vm2129_vm15, %v3824_v38 }
 0xcba   : > { %4137 = vmatprep.mubr.f32.mxu0 %v4923_v0 }
 0xcbb   : > { %4641 = vmatmul.mubr.msk.f32.gmra.mrb[32].mxu1 %vm2129_vm15, %v3825_v33 }
 0xcbd   : > { %4381 = vmatmul.mubr.msk.f32.gmra.mrb[18].mxu0 %vm2129_vm15, %v3825_v33  ;;  %v4026_v39 = vpop.permute.xlu0 %4025  ;;  %v4031_v0 = vpop.permute.xlu1 %4030 }
 0xcc1   : > { %v4036_v47 = vpop.permute.xlu0 %4035  ;;  %v4041_v51 = vpop.permute.xlu1 %4040 }
 0xd84   : > { %v4121_v40 = vpop.f32.mrb[12].mxu0 }
 0xd85   : > { %v4122_v41 = vadd.f32 %v4121_v40, %v4026_v39  ;;  %v4123_v42 = vpop.f32.mrb[13].mxu0 }
 0xd86   : > { %v4124_v43 = vadd.f32 %v4123_v42, %v4026_v39 }
 0xd87   : > { %4229 = vst [vmem:[%s5808_s22] sm:$0xff] %v4122_v41 }
 0xd88   : > { %4230 = vst [vmem:[%s5808_s22 + $0x8] sm:$0xff] %v4124_v43  ;;  %v4127_v61 = vpop.f32.mrb[14].mxu0 }
 0xd89   : > { %v4128_v63 = vadd.f32 %v4127_v61, %v4031_v0  ;;  %v4129_v44 = vpop.f32.mrb[15].mxu0 }
 0xd8a   : > { %v4639_v3 = vpop.f32.mrb[30].mxu1  ;;  %v4130_v62 = vadd.f32 %v4129_v44, %v4031_v0 }
 0xd8b   : > { %v4216_v1 = vadd.f32 %v4639_v3, %v4031_v0  ;;  %v4210_v45 = vpop.f32.mrb[31].mxu1  ;;  %4232 = vst [vmem:[%s5808_s22 + $0x18] sm:$0xff] %v4128_v63 }
 0xd8c   : > { %v4211_v4 = vadd.f32 %v4210_v45, %v4026_v39  ;;  %4233 = vst [vmem:[%s5808_s22 + $0x20] sm:$0xff] %v4130_v62  ;;  %v4133_v48 = vpop.f32.mrb[16].mxu0 }
 0xd8d   : > { %4234 = vst.msk [vmem:[%s5808_s22 + $0x28] sm:$0xff] %vm1935_vm14, %v4216_v1  ;;  %v4134_v49 = vadd.f32 %v4133_v48, %v4036_v47  ;;  %v4135_v50 = vpop.f32.mrb[17].mxu0 }
 0xd8e   : > { %4231 = vst.msk [vmem:[%s5808_s22 + $0x10] sm:$0xff] %vm1935_vm14, %v4211_v4  ;;  %v4642_v53 = vpop.f32.mrb[32].mxu1  ;;  %v4136_v54 = vadd.f32 %v4135_v50, %v4036_v47 }
 0xd8f   : > { %v4226_v55 = vadd.f32 %v4642_v53, %v4041_v51  ;;  %v4220_v56 = vpop.f32.mrb[33].mxu1  ;;  %4235 = vst [vmem:[%s5808_s22 + $0x30] sm:$0xff] %v4134_v49 }
 0xd90   : > { %v4221_v57 = vadd.f32 %v4220_v56, %v4036_v47  ;;  %4236 = vst [vmem:[%s5808_s22 + $0x38] sm:$0xff] %v4136_v54  ;;  %v4139_v58 = vpop.f32.mrb[18].mxu0 }
 0xd91   : > { %4240 = vst.msk [vmem:[%s5808_s22 + $0x58] sm:$0xff] %vm1935_vm14, %v4226_v55  ;;  %v4140_v60 = vadd.f32 %v4139_v58, %v4041_v51  ;;  %v4141_v2 = vpop.f32.mrb[19].mxu0 }
 0xd92   : > { %4237 = vst.msk [vmem:[%s5808_s22 + $0x40] sm:$0xff] %vm1935_vm14, %v4221_v57  ;;  %v4142_v6 = vadd.f32 %v4141_v2, %v4041_v51 }
 0xd93   : > { %4238 = vst [vmem:[%s5808_s22 + $0x48] sm:$0xff] %v4140_v60 }
 0xd94   : > { %4239 = vst [vmem:[%s5808_s22 + $0x50] sm:$0xff] %v4142_v6 }
 0xd95 PF: > { %s21_s13 = sadd.s32 1, %s4920_s13  }
 0xd96   : > { %p18_p2 = scmp.ge.s32.totalorder %s21_s13, 4  }
 0xd98   :  { %20 = sbr.rel (!%p18_p2) target bundleno = 1 (0x1), region = 101 }
 0xd9f   :  { %4262 = vsyncpa [#allocation7], 1 }
 0xda0   :  { %4264 = vsyncpa [#allocation7 + $0x1], 1 }

// kernel: nas_forward_pallas.5
= control target key start
LH: loop header
LB: loop body
LE: loop exit
PB: predicated region body
PF: predicated region fallthrough
CT: control target
= control target key end

     0   :  { %s4744_s12 = smov 0   ;;  %s6205_s0 = inlined_call_operand.vmem [shape: f32[2,8,4480], index: 0, kind: input, shape index: {}]   ;;  %s6206_s1 = inlined_call_operand.vmem [shape: f32[3,72], index: 1, kind: input, shape index: {}]   ;;  %s6207_s2 = inlined_call_operand.vmem [shape: f32[3,1], index: 2, kind: input, shape index: {}]   ;;  %s6208_s3 = inlined_call_operand.vmem [shape: f32[2,3,4224], index: 3, kind: output, shape index: {}]  }
   0x1 LB: > { %s3775_s13 = sadd.s32 4294967295, %s4710_s12   ;;  %p3779_p0 = scmp.ge.s32.totalorder %s4710_s12, 1  ;;  %s4710_s12 = sphi %s4744_s12, %s13_s12  }
   0x2   : > { %p137_p1 = scmp.lt.s32.totalorder %s4710_s12, 3 }
   0x4   : > { %p138_p2 = pnand %p3779_p0, %p137_p1 }
   0x5   : > { %p161_p3 = scmp.lt.s32.totalorder (!%p138_p2), %s3775_s13, 1  ;;  %s4712_s18 = smov (!%p138_p2), 127   ;;  %v6213_v54 = vmov (!%p138_p2), 0.0   ;;  %vm375_vm0 = vcmask (!%p138_p2), 1039360   ;;  %vm611_vm1 = vcmask (!%p138_p2), 1031168   ;;  %vm847_vm2 = vcmask (!%p138_p2), 506880  }
   0x6   : > { %141 = sbr.rel (%p138_p2) target bundleno = 666 (0x29a), region = 32  ;;  %s4713_s19 = smov (!%p138_p2), 126   ;;  %2497 = vmatprep.mubr.f32.mxu0 (!%p138_p2), %v6213_v54  ;;  %2568 = vmatprep.mubr.f32.mxu1 (!%p138_p2), %v6213_v54  ;;  %vm1083_vm3 = vcmask (!%p138_p2), 498688   ;;  %vm1319_vm4 = vcmask (!%p138_p2), 490496   ;;  %vm1555_vm5 = vcmask (!%p138_p2), 1014784   ;;  %vm1791_vm6 = vcmask (!%p138_p2), 1006592  }
   0x7   : > { %s4714_s20 = smov (!%p138_p2), 62   ;;  %s4715_s21 = smov (!%p138_p2), 61   ;;  %vm2027_vm7 = vcmask (!%p138_p2), 998400   ;;  %vm2429_vm8 = vcmask (!%p138_p2), 588800   ;;  %vm4723_vm9 = vmmov (!%p138_p2), 0  }
   0x8   : > { %s4716_s22 = smov (!%p138_p2), 60   ;;  %s4717_s23 = smov (!%p138_p2), 124  }
   0x9   : > { %s4718_s24 = smov (!%p138_p2), 123   ;;  %s4720_s25 = smov (!%p138_p2), 122  }
   0xd   : > { %s6225_s13 = smov (!%p161_p3, %s3775_s13), 1 }
   0xe   : > { %s4100_s14 = smul.u32 280, %s6225_s13 }
   0xf   : > { %s4101_s5 = smul.u32 132, %s6225_s13 }
  0x10   : > { %s4758_s17 = scalar_lea.vmem %s6205_s0, %s4100_s14 }
  0x11   : > { %v4761_v0 = vld [vmem:[%s4758_s17 + $0x20] sm:$0xff]  ;;  %v4764_v1 = vld [vmem:[%s4758_s17 + $0x28] sm:$0xff]  ;;  %v4777_v5 = vld [vmem:[%s4758_s17 + $0x30] sm:$0xff]  ;;  %s6154_s8 = scalar_lea.vmem %s6208_s3, %s4101_s5 }
  0x12   : > { %v4767_v2 = vld [vmem:[%s4758_s17] sm:$0xff]  ;;  %v4771_v3 = vpack.i.bf16 %v4764_v1, %v4761_v0  ;;  %v4774_v4 = vld [vmem:[%s4758_s17 + $0x8] sm:$0xff]  ;;  %v4780_v6 = vld [vmem:[%s4758_s17 + $0x38] sm:$0xff]  ;;  %v4352_v55 = vpack.i.bf16 %v4777_v5, %v4764_v1 }
  0x13   : > { %v4122_v7 = vpack.i.bf16 %v4774_v4, %v4767_v2  ;;  %v4785_v8 = vld [vmem:[%s4758_s17 + $0x10] sm:$0xff]  ;;  %v4788_v9 = vld [vmem:[%s4758_s17 + $0x18] sm:$0xff]  ;;  %v4794_v10 = vpack.i.bf16 %v4780_v6, %v4777_v5  ;;  %v4808_v14 = vld [vmem:[%s4758_s17 + $0x40] sm:$0xff]  ;;  %v4307_v53 = vpack.i.bf16 %v4761_v0, %v4774_v4 }
  0x14   : > { %4133 = vrot.lane.b32.xlu1 %v4771_v3, %s4712_s18  ;;  %v4799_v11 = vpack.i.bf16 %v4788_v9, %v4785_v8  ;;  %v4802_v12 = vld [vmem:[%s4758_s17 + $0x50] sm:$0xff]  ;;  %v4805_v13 = vld [vmem:[%s4758_s17 + $0x58] sm:$0xff]  ;;  %v4811_v15 = vld [vmem:[%s4758_s17 + $0x48] sm:$0xff]  ;;  %v4267_v51 = vpack.i.bf16 %v4785_v8, %v4774_v4  ;;  %v4272_v52 = vpack.i.bf16 %v4788_v9, %v4767_v2  ;;  %v4362_v56 = vpack.i.bf16 %v4808_v14, %v4780_v6 }
  0x15   : > { %4123 = vrot.lane.b32.xlu0 %v4122_v7, %s4712_s18  ;;  %v4817_v16 = vpack.i.bf16 %v4805_v13, %v4802_v12  ;;  %v4823_v17 = vpack.i.bf16 %v4811_v15, %v4808_v14  ;;  %v4826_v18 = vld [vmem:[%s4758_s17 + $0x70] sm:$0xff]  ;;  %v4829_v19 = vld [vmem:[%s4758_s17 + $0x78] sm:$0xff]  ;;  %v4832_v20 = vld [vmem:[%s4758_s17 + $0x60] sm:$0xff] }
  0x16   : > { %v4835_v21 = vld [vmem:[%s4758_s17 + $0x68] sm:$0xff]  ;;  %v4841_v22 = vpack.i.bf16 %v4829_v19, %v4826_v18  ;;  %v4850_v24 = vld [vmem:[%s4758_s17 + $0x90] sm:$0xff]  ;;  %v4853_v25 = vld [vmem:[%s4758_s17 + $0x98] sm:$0xff] }
  0x17   : > { %v4847_v23 = vpack.i.bf16 %v4835_v21, %v4832_v20  ;;  %v4856_v26 = vld [vmem:[%s4758_s17 + $0x80] sm:$0xff]  ;;  %v4859_v27 = vld [vmem:[%s4758_s17 + $0x88] sm:$0xff]  ;;  %v4865_v28 = vpack.i.bf16 %v4853_v25, %v4850_v24  ;;  %v261_v30 = vld [vmem:[%s4758_s17 + $0xb0] sm:$0xff] }
  0x18   : > { %4138 = vrot.lane.b32.xlu1 %v4794_v10, %s4712_s18  ;;  %v4871_v29 = vpack.i.bf16 %v4859_v27, %v4856_v26  ;;  %v262_v31 = vld [vmem:[%s4758_s17 + $0xb8] sm:$0xff]  ;;  %v4876_v32 = vld [vmem:[%s4758_s17 + $0xa0] sm:$0xff]  ;;  %v260_v33 = vld [vmem:[%s4758_s17 + $0xa8] sm:$0xff] }
  0x19   : > { %4128 = vrot.lane.b32.xlu0 %v4799_v11, %s4712_s18  ;;  %v4881_v34 = vpack.i.bf16 %v262_v31, %v261_v30  ;;  %v4886_v35 = vpack.i.bf16 %v260_v33, %v4876_v32  ;;  %v265_v36 = vld [vmem:[%s4758_s17 + $0xd0] sm:$0xff]  ;;  %v266_v37 = vld [vmem:[%s4758_s17 + $0xd8] sm:$0xff]  ;;  %v263_v38 = vld [vmem:[%s4758_s17 + $0xc0] sm:$0xff] }
  0x1a   : > { %v264_v39 = vld [vmem:[%s4758_s17 + $0xc8] sm:$0xff]  ;;  %v4187_v40 = vpack.i.bf16 %v266_v37, %v265_v36  ;;  %v269_v42 = vld [vmem:[%s4758_s17 + $0xf0] sm:$0xff]  ;;  %v270_v43 = vld [vmem:[%s4758_s17 + $0xf8] sm:$0xff] }
  0x1b   : > { %v4182_v41 = vpack.i.bf16 %v264_v39, %v263_v38  ;;  %v267_v44 = vld [vmem:[%s4758_s17 + $0xe0] sm:$0xff]  ;;  %v268_v45 = vld [vmem:[%s4758_s17 + $0xe8] sm:$0xff]  ;;  %v4197_v46 = vpack.i.bf16 %v270_v43, %v269_v42  ;;  %v4412_v38 = vpack.i.bf16 %v4832_v20, %v4805_v13  ;;  %v4452_v43 = vpack.i.bf16 %v4826_v18, %v4835_v21 }
  0x1c   : > { %4148 = vrot.lane.b32.xlu1 %v4817_v16, %s4712_s18  ;;  %v4192_v47 = vpack.i.bf16 %v268_v45, %v267_v44  ;;  %v271_v48 = vld [vmem:[%s4758_s17 + $0x100] sm:$0xff]  ;;  %v272_v49 = vld [vmem:[%s4758_s17 + $0x108] sm:$0xff] }
  0x1d   : > { %4143 = vrot.lane.b32.xlu0 %v4823_v17, %s4712_s18  ;;  %v4202_v50 = vpack.i.bf16 %v272_v49, %v271_v48 }
  0x20   : > { %4158 = vrot.lane.b32.xlu1 %v4841_v22, %s4712_s18 }
  0x21   : > { %4153 = vrot.lane.b32.xlu0 %v4847_v23, %s4712_s18 }
  0x24   : > { %4168 = vrot.lane.b32.xlu1 %v4865_v28, %s4712_s18 }
  0x25   : > { %4163 = vrot.lane.b32.xlu0 %v4871_v29, %s4712_s18 }
  0x28   : > { %4178 = vrot.lane.b32.xlu1 %v4881_v34, %s4712_s18 }
  0x29   : > { %4173 = vrot.lane.b32.xlu0 %v4886_v35, %s4712_s18 }
  0x2c   : > { %4188 = vrot.lane.b32.xlu1 %v4187_v40, %s4712_s18 }
  0x2d   : > { %4183 = vrot.lane.b32.xlu0 %v4182_v41, %s4712_s18 }
  0x30   : > { %4198 = vrot.lane.b32.xlu1 %v4197_v46, %s4712_s18 }
  0x31   : > { %4193 = vrot.lane.b32.xlu0 %v4192_v47, %s4712_s18 }
  0x34   : > { %4208 = vrot.lane.b32.xlu1 %v4122_v7, %s4713_s19 }
  0x35   : > { %4203 = vrot.lane.b32.xlu0 %v4202_v50, %s4712_s18 }
  0x38   : > { %4218 = vrot.lane.b32.xlu1 %v4771_v3, %s4713_s19 }
  0x39   : > { %4213 = vrot.lane.b32.xlu0 %v4799_v11, %s4713_s19 }
  0x3c   : > { %4228 = vrot.lane.b32.xlu1 %v4823_v17, %s4713_s19 }
  0x3d   : > { %4223 = vrot.lane.b32.xlu0 %v4794_v10, %s4713_s19 }
  0x40   : > { %4238 = vrot.lane.b32.xlu1 %v4847_v23, %s4713_s19 }
  0x41   : > { %4233 = vrot.lane.b32.xlu0 %v4817_v16, %s4713_s19 }
  0x44   : > { %4248 = vrot.lane.b32.xlu1 %v4871_v29, %s4713_s19 }
  0x45   : > { %4243 = vrot.lane.b32.xlu0 %v4841_v22, %s4713_s19 }
  0x48   : > { %4258 = vrot.lane.b32.xlu1 %v4886_v35, %s4713_s19 }
  0x49   : > { %4253 = vrot.lane.b32.xlu0 %v4865_v28, %s4713_s19 }
  0x4c   : > { %4268 = vrot.lane.b32.xlu1 %v4267_v51, %s4714_s20 }
  0x4d   : > { %4263 = vrot.lane.b32.xlu0 %v4881_v34, %s4713_s19 }
  0x50   : > { %4278 = vrot.lane.b32.xlu1 %v4267_v51, %s4715_s21 }
  0x51   : > { %4273 = vrot.lane.b32.xlu0 %v4272_v52, %s4714_s20 }
  0x54   : > { %4288 = vrot.lane.b32.xlu1 %v4272_v52, %s4715_s21 }
  0x55   : > { %4283 = vrot.lane.b32.xlu0 %v4267_v51, %s4716_s22 }
  0x58   : > { %4298 = vrot.lane.b32.xlu1 %v4799_v11, %s4717_s23 }
  0x59   : > { %4293 = vrot.lane.b32.xlu0 %v4272_v52, %s4716_s22 }
  0x5c   : > { %4308 = vrot.lane.b32.xlu1 %v4307_v53, %s4717_s23 }
  0x5d   : > { %4303 = vrot.lane.b32.xlu0 %v4799_v11, %s4718_s24 }
  0x60   : > { %1961 = vrot.lane.b32.xlu1 %v4785_v8, %s4720_s25 }
  0x61   : > { %4313 = vrot.lane.b32.xlu0 %v4307_v53, %s4718_s24 }
  0x64   : > { %4318 = vrot.lane.b32.xlu1 %v4771_v3, %s4714_s20 }
  0x65   : > { %1963 = vrot.lane.b32.xlu0 %v4788_v9, %s4720_s25 }
  0x68   : > { %4323 = vrot.lane.b32.xlu1 %v4794_v10, %s4714_s20 }
  0x69   : > { %1959 = vrot.lane.b32.xlu0 %v4774_v4, %s4720_s25 }
  0x6c   : > { %4333 = vrot.lane.b32.xlu1 %v4771_v3, %s4716_s22 }
  0x6d   : > { %4328 = vrot.lane.b32.xlu0 %v4771_v3, %s4715_s21 }
  0x70   : > { %4343 = vrot.lane.b32.xlu1 %v4794_v10, %s4716_s22 }
  0x71   : > { %4338 = vrot.lane.b32.xlu0 %v4794_v10, %s4715_s21 }
  0x74   : > { %4353 = vrot.lane.b32.xlu1 %v4352_v55, %s4718_s24 }
  0x75   : > { %4348 = vrot.lane.b32.xlu0 %v4352_v55, %s4717_s23 }
  0x78   : > { %4363 = vrot.lane.b32.xlu1 %v4362_v56, %s4718_s24 }
  0x79   : > { %4358 = vrot.lane.b32.xlu0 %v4362_v56, %s4717_s23 }
  0x7c   : > { %1967 = vrot.lane.b32.xlu1 %v4764_v1, %s4720_s25 }
  0x7d   : > { %1965 = vrot.lane.b32.xlu0 %v4761_v0, %s4720_s25 }
  0x80   : > { %1971 = vrot.lane.b32.xlu1 %v4780_v6, %s4720_s25  ;;  %v4402_v6 = vpack.i.bf16 %v4802_v12, %v4811_v15 }
  0x81   : > { %1969 = vrot.lane.b32.xlu0 %v4777_v5, %s4720_s25 }
  0x84   : > { %4373 = vrot.lane.b32.xlu1 %v4817_v16, %s4714_s20 }
  0x85   : > { %4368 = vrot.lane.b32.xlu0 %v4823_v17, %s4714_s20 }
  0x86   : > { %v4988_v57 = vpop.permute.xlu1 %4133 }
  0x87   : > { %v4136_v58 = vunpack.i.h.bf16 %v4988_v57  ;;  %v4135_v59 = vunpack.i.l.bf16 %v4988_v57  ;;  %v4124_v60 = vpop.permute.xlu0 %4123 }
  0x88   : > { %4383 = vrot.lane.b32.xlu1 %v4823_v17, %s4716_s22  ;;  %v4126_v62 = vunpack.i.h.bf16 %v4124_v60  ;;  %v4125_v63 = vunpack.i.l.bf16 %v4124_v60 }
  0x89   : > { %v4997_v61 = vsel %vm375_vm0, %v4135_v59, %v4136_v58  ;;  %4378 = vrot.lane.b32.xlu0 %v4823_v17, %s4715_s21 }
  0x8a   : > { %v5001_v0 = vpop.permute.xlu1 %4138  ;;  %v376_v7 = vsel %vm375_vm0, %v4125_v63, %v4126_v62 }
  0x8b   : > { %v4129_v1 = vpop.permute.xlu0 %4128 }
  0x8c   : > { %v4131_v3 = vunpack.i.h.bf16 %v4129_v1  ;;  %v4130_v5 = vunpack.i.l.bf16 %v4129_v1  ;;  %4393 = vrot.lane.b32.xlu1 %v4817_v16, %s4716_s22 }
  0x8d   : > { %4388 = vrot.lane.b32.xlu0 %v4817_v16, %s4715_s21  ;;  %v3834_v16 = vpack.c.bf16 %v376_v7, %v4767_v2 }
  0x8e   : > { %v5010_v10 = vpop.permute.xlu1 %4148  ;;  %v377_v11 = vsel %vm375_vm0, %v4126_v62, %v4130_v5  ;;  %v379_v17 = vsel %vm375_vm0, %v4131_v3, %v4135_v59  ;;  %v378_v30 = vsel %vm375_vm0, %v4130_v5, %v4131_v3 }
  0x8f   : > { %v5015_v31 = vpop.permute.xlu0 %4143  ;;  %v3832_v33 = vpack.c.bf16 %v377_v11, %v4774_v4  ;;  %v3848_v36 = vpack.c.bf16 %v379_v17, %v4788_v9  ;;  %v3850_v37 = vpack.c.bf16 %v378_v30, %v4785_v8 }
  0x90   : > { %4403 = vrot.lane.b32.xlu1 %v4402_v6, %s4718_s24 }
  0x91   : > { %4398 = vrot.lane.b32.xlu0 %v4402_v6, %s4717_s23  ;;  %3833 = vmatprep.subr.bf16.mxu0 %v3832_v33  ;;  %v4502_v6 = vpack.i.bf16 %v4850_v24, %v4859_v27 }
  0x92   : > { %3849 = vmatprep.subr.bf16.mxu1 %v3848_v36  ;;  %3835 = vmatpush1.bf16.msra.mxu0 %v3834_v16  ;;  %v5025_v39 = vpop.permute.xlu1 %4158 }
  0x93   : > { %3851 = vmatpush1.bf16.msra.mxu1 %v3850_v37  ;;  %v5027_v4 = vpop.permute.xlu0 %4153 }
  0x94   : > { %4413 = vrot.lane.b32.xlu1 %v4412_v38, %s4718_s24 }
  0x95   : > { %4408 = vrot.lane.b32.xlu0 %v4412_v38, %s4717_s23 }
  0x96   : > { %v5031_v2 = vpop.permute.xlu1 %4168 }
  0x97   : > { %v5033_v8 = vpop.permute.xlu0 %4163 }
  0x98   : > { %1975 = vrot.lane.b32.xlu1 %v4811_v15, %s4720_s25 }
  0x99   : > { %1973 = vrot.lane.b32.xlu0 %v4808_v14, %s4720_s25 }
  0x9a   : > { %v5039_v9 = vpop.permute.xlu1 %4178 }
  0x9b   : > { %v5041_v40 = vpop.permute.xlu0 %4173 }
  0x9c   : > { %1979 = vrot.lane.b32.xlu1 %v4805_v13, %s4720_s25 }
  0x9d   : > { %1977 = vrot.lane.b32.xlu0 %v4802_v12, %s4720_s25 }
  0x9e   : > { %v5047_v41 = vpop.permute.xlu1 %4188 }
  0x9f   : > { %v5049_v42 = vpop.permute.xlu0 %4183 }
  0xa0   : > { %4423 = vrot.lane.b32.xlu1 %v4841_v22, %s4714_s20 }
  0xa1   : > { %4418 = vrot.lane.b32.xlu0 %v4847_v23, %s4714_s20 }
  0xa2   : > { %v5055_v14 = vpop.permute.xlu1 %4198 }
  0xa3   : > { %v5057_v15 = vpop.permute.xlu0 %4193 }
  0xa4   : > { %4433 = vrot.lane.b32.xlu1 %v4847_v23, %s4716_s22 }
  0xa5   : > { %4428 = vrot.lane.b32.xlu0 %v4847_v23, %s4715_s21  ;;  %v4462_v23 = vpack.i.bf16 %v4856_v26, %v4829_v19 }
  0xa6   : > { %v4209_v12 = vpop.permute.xlu1 %4208 }
  0xa7   : > { %v5063_v13 = vpop.permute.xlu0 %4203  ;;  %v4210_v60 = vunpack.i.l.bf16 %v4209_v12 }
  0xa8   : > { %4443 = vrot.lane.b32.xlu1 %v4841_v22, %s4716_s22 }
  0xa9   : > { %4438 = vrot.lane.b32.xlu0 %v4841_v22, %s4715_s21 }
  0xaa   : > { %v5071_v44 = vpop.permute.xlu1 %4218 }
  0xab   : > { %v5073_v45 = vpop.permute.xlu0 %4213 }
  0xac   : > { %4453 = vrot.lane.b32.xlu1 %v4452_v43, %s4718_s24 }
  0xad   : > { %4448 = vrot.lane.b32.xlu0 %v4452_v43, %s4717_s23 }
  0xae   : > { %v5079_v46 = vpop.permute.xlu1 %4228 }
  0xaf   : > { %v5081_v47 = vpop.permute.xlu0 %4223 }
  0xb0   : > { %4463 = vrot.lane.b32.xlu1 %v4462_v23, %s4718_s24 }
  0xb1   : > { %4458 = vrot.lane.b32.xlu0 %v4462_v23, %s4717_s23 }
  0xb2   : > { %v5085_v22 = vpop.permute.xlu1 %4238 }
  0xb3   : > { %v5087_v48 = vpop.permute.xlu0 %4233 }
  0xb4   : > { %1983 = vrot.lane.b32.xlu1 %v4835_v21, %s4720_s25  ;;  %v4211_v21 = vunpack.i.h.bf16 %v4209_v12 }
  0xb5   : > { %1981 = vrot.lane.b32.xlu0 %v4832_v20, %s4720_s25  ;;  %v4215_v20 = vunpack.i.l.bf16 %v5073_v45 }
  0xb6   : > { %v5093_v49 = vpop.permute.xlu1 %4248  ;;  %v612_v11 = vsel %vm611_vm1, %v4210_v60, %v4211_v21 }
  0xb7   : > { %v5095_v50 = vpop.permute.xlu0 %4243  ;;  %v613_v56 = vsel %vm611_vm1, %v4211_v21, %v4215_v20 }
  0xb8   : > { %1987 = vrot.lane.b32.xlu1 %v4829_v19, %s4720_s25 }
  0xb9   : > { %1985 = vrot.lane.b32.xlu0 %v4826_v18, %s4720_s25 }
  0xba   : > { %v5101_v51 = vpop.permute.xlu1 %4258 }
  0xbb   : > { %v5103_v52 = vpop.permute.xlu0 %4253 }
  0xbc   : > { %4473 = vrot.lane.b32.xlu1 %v4865_v28, %s4714_s20 }
  0xbd   : > { %4468 = vrot.lane.b32.xlu0 %v4871_v29, %s4714_s20 }
  0xbe   : > { %v5110_v53 = vpop.permute.xlu1 %4268 }
  0xbf   : > { %v4271_v19 = vunpack.i.h.bf16 %v5110_v53  ;;  %v4270_v18 = vunpack.i.l.bf16 %v5110_v53  ;;  %v5114_v55 = vpop.permute.xlu0 %4263 }
  0xc0   : > { %4483 = vrot.lane.b32.xlu1 %v4871_v29, %s4716_s22 }
  0xc1   : > { %4478 = vrot.lane.b32.xlu0 %v4871_v29, %s4715_s21  ;;  %v849_v59 = vsel %vm847_vm2, %v4270_v18, %v4271_v19 }
  0xc2   : > { %v5126_v62 = vpop.permute.xlu1 %4278  ;;  %v3836_v63 = vpack.c.bf16 %v849_v59, %v613_v56 }
  0xc3   : > { %v5128_v1 = vpop.permute.xlu0 %4273  ;;  %v6212_v3 = vunpack.i.h.bf16 %v5126_v62  ;;  %v4280_v5 = vunpack.i.l.bf16 %v5126_v62 }
  0xc4   : > { %v4275_v29 = vunpack.i.l.bf16 %v5128_v1  ;;  %4493 = vrot.lane.b32.xlu1 %v4865_v28, %s4716_s22  ;;  %3837 = vmatprep.subr.bf16.mxu0 %v3836_v63 }
  0xc5   : > { %4488 = vrot.lane.b32.xlu0 %v4865_v28, %s4715_s21  ;;  %v4512_v28 = vpack.i.bf16 %v4876_v32, %v4853_v25  ;;  %v1085_v37 = vsel %vm1083_vm3, %v4280_v5, %v6212_v3 }
  0xc6   : > { %v5139_v7 = vpop.permute.xlu1 %4288  ;;  %v848_v17 = vsel %vm847_vm2, %v4275_v29, %v4270_v18 }
  0xc7   : > { %v5143_v30 = vpop.permute.xlu0 %4283  ;;  %v3838_v33 = vpack.c.bf16 %v848_v17, %v612_v11  ;;  %v4290_v38 = vunpack.i.l.bf16 %v5139_v7 }
  0xc8   : > { %v6215_v36 = vunpack.i.h.bf16 %v5143_v30  ;;  %v4285_v16 = vunpack.i.l.bf16 %v5143_v30  ;;  %4503 = vrot.lane.b32.xlu1 %v4502_v6, %s4718_s24 }
  0xc9   : > { %4498 = vrot.lane.b32.xlu0 %v4502_v6, %s4717_s23  ;;  %3839 = vmatpush1.bf16.msra.mxu0 %v3838_v33  ;;  %v1084_v60 = vsel %vm1083_vm3, %v4290_v38, %v4280_v5  ;;  %v6211_v38 = vunpack.i.l.bf16 %v5001_v0 }
  0xca   : > { %v5155_v12 = vpop.permute.xlu1 %4298  ;;  %v1321_v43 = vsel %vm1319_vm4, %v4285_v16, %v6215_v36 }
  0xcb   : > { %v5160_v23 = vpop.permute.xlu0 %4293  ;;  %v3840_v21 = vpack.c.bf16 %v1321_v43, %v1085_v37  ;;  %v6209_v32 = vunpack.i.h.bf16 %v5155_v12  ;;  %v4300_v18 = vunpack.i.l.bf16 %v5155_v12 }
  0xcc   : > { %v4295_v56 = vunpack.i.l.bf16 %v5160_v23  ;;  %4513 = vrot.lane.b32.xlu1 %v4512_v28, %s4718_s24 }
  0xcd   : > { %4508 = vrot.lane.b32.xlu0 %v4512_v28, %s4717_s23  ;;  %3841 = vmatprep.subr.bf16.mxu0 %v3840_v21  ;;  %v1557_v33 = vsel %vm1555_vm5, %v4300_v18, %v6209_v32  ;;  %v4216_v21 = vunpack.i.h.bf16 %v5073_v45  ;;  %v4296_v45 = vunpack.i.h.bf16 %v5160_v23 }
  0xce   : > { %v5167_v59 = vpop.permute.xlu1 %4308  ;;  %v1320_v63 = vsel %vm1319_vm4, %v4295_v56, %v4285_v16  ;;  %v4276_v56 = vunpack.i.h.bf16 %v5128_v1 }
  0xcf   : > { %v5171_v29 = vpop.permute.xlu0 %4303  ;;  %v3842_v6 = vpack.c.bf16 %v1320_v63, %v1084_v60  ;;  %v4310_v5 = vunpack.i.l.bf16 %v5167_v59  ;;  %v5198_v60 = vld [vmem:[%s4758_s17 + $0xa0] sm:$0xff]  ;;  %v5201_v63 = vld [vmem:[%s4758_s17 + $0xa8] sm:$0xff] }
  0xd0   : > { %v6210_v11 = vunpack.i.h.bf16 %v5171_v29  ;;  %v4305_v17 = vunpack.i.l.bf16 %v5171_v29  ;;  %1991 = vrot.lane.b32.xlu1 %v4859_v27, %s4720_s25  ;;  %v850_v57 = vsel %vm847_vm2, %v4271_v19, %v4276_v56 }
  0xd1   : > { %1989 = vrot.lane.b32.xlu0 %v4856_v26, %s4720_s25  ;;  %3843 = vmatpush1.bf16.msra.mxu0 %v3842_v6  ;;  %v4220_v26 = vunpack.i.l.bf16 %v5071_v44 }
  0xd2   : > { %v1962_v16 = vpop.permute.xlu1 %1961  ;;  %v1793_v28 = vsel %vm1791_vm6, %v4305_v17, %v6210_v11  ;;  %v4532_v11 = vpack.i.bf16 %v5201_v63, %v5198_v60 }
  0xd3   : > { %v5186_v37 = vpop.permute.xlu0 %4313  ;;  %v3844_v27 = vpack.c.bf16 %v1793_v28, %v1557_v33 }
  0xd4   : > { %v4315_v43 = vunpack.i.l.bf16 %v5186_v37  ;;  %1995 = vrot.lane.b32.xlu1 %v4853_v25, %s4720_s25  ;;  %v1556_v25 = vsel %vm1555_vm5, %v4310_v5, %v4300_v18  ;;  %v381_v18 = vsel %vm375_vm0, %v4136_v58, %v6211_v38  ;;  %v5223_v5 = vld [vmem:[%s4758_s17 + $0xb8] sm:$0xff]  ;;  %v178_v58 = vld [vmem:[%s4758_s17 + $0x28] sm:$0xff] }
  0xd5   : > { %1993 = vrot.lane.b32.xlu0 %v4850_v24, %s4720_s25  ;;  %3845 = vmatprep.subr.bf16.mxu0 %v3844_v27  ;;  %v4221_v24 = vunpack.i.h.bf16 %v5071_v44  ;;  %v4225_v44 = vunpack.i.l.bf16 %v5081_v47 }
  0xd6   : > { %v4319_v6 = vpop.permute.xlu1 %4318  ;;  %v1792_v33 = vsel %vm1791_vm6, %v4315_v43, %v4305_v17  ;;  %v5220_v17 = vld [vmem:[%s4758_s17 + $0xb0] sm:$0xff] }
  0xd7   : > { %v4320_v28 = vunpack.i.l.bf16 %v4319_v6  ;;  %v5205_v32 = vpop.permute.xlu0 %1963  ;;  %v3846_v1 = vpack.c.bf16 %v1792_v33, %v1556_v25  ;;  %v4321_v38 = vunpack.i.h.bf16 %v4319_v6  ;;  %v4542_v36 = vpack.i.bf16 %v5223_v5, %v5220_v17  ;;  %v5248_v6 = vld [vmem:[%s6206_s1] sm:$0x7] }
  0xd8   : > { %4523 = vrot.lane.b32.xlu1 %v4881_v34, %s4714_s20  ;;  %v2029_v27 = vsel %vm2027_vm7, %v1962_v16, %v5205_v32  ;;  %v615_v34 = vsel %vm611_vm1, %v4216_v21, %v4220_v26 }
  0xd9   : > { %4518 = vrot.lane.b32.xlu0 %v4886_v35, %s4714_s20  ;;  %3847 = vmatpush1.bf16.msra.mxu0 %v3846_v1  ;;  %v851_v43 = vsel %vm847_vm2, %v4276_v56, %v4320_v28  ;;  %v614_v35 = vsel %vm611_vm1, %v4215_v20, %v4216_v21  ;;  %v177_v1 = vld [vmem:[%s4758_s17 + $0x20] sm:$0xff]  ;;  %v3864_v56 = vpack.c.bf16 %v381_v18, %v178_v58  ;;  %v4291_v18 = vunpack.i.h.bf16 %v5139_v7 }
  0xda   : > { %2449 = vmatprep.subr.mxu0 %v2029_v27  ;;  %v5234_v25 = vpop.permute.xlu1 %4323  ;;  %v3852_v33 = vpack.c.bf16 %v851_v43, %v615_v34  ;;  %v3854_v19 = vpack.c.bf16 %v850_v57, %v614_v35  ;;  %v617_v20 = vsel %vm611_vm1, %v4221_v24, %v4225_v44  ;;  %v3866_v21 = vpack.c.bf16 %v4997_v61, %v177_v1  ;;  %v5273_v35 = vld [vmem:[%s4758_s17 + $0xc0] sm:$0xff] }
  0xdb   : > { %v4325_v3 = vunpack.i.l.bf16 %v5234_v25  ;;  %v1960_v54 = vpop.permute.xlu0 %1959  ;;  %v852_v23 = vsel %vm847_vm2, %v4320_v28, %v4321_v38  ;;  %v616_v43 = vsel %vm611_vm1, %v4220_v26, %v4221_v24  ;;  %v4552_v61 = vpack.i.bf16 %v5220_v17, %v5201_v63 }
  0xdc   : > { %4533 = vrot.lane.b32.xlu1 %v4532_v11, %s4716_s22  ;;  %v2028_v53 = vsel %vm2027_vm7, %v1960_v54, %v1962_v16  ;;  %3853 = vmatprep.subr.bf16.mxu1 %v3852_v33  ;;  %v3870_v24 = vpack.c.bf16 %v852_v23, %v616_v43  ;;  %v4311_v43 = vunpack.i.h.bf16 %v5167_v59  ;;  %v4145_v59 = vunpack.i.l.bf16 %v5015_v31 }
  0xdd   : > { %4528 = vrot.lane.b32.xlu0 %v4532_v11, %s4715_s21  ;;  %2450 = vmatpush1.msra.mxu0 %v2028_v53  ;;  %v853_v54 = vsel %vm847_vm2, %v4321_v38, %v4325_v3  ;;  %v6217_v38 = vunpack.i.h.bf16 %v5143_v30  ;;  %v6218_v53 = vmov 0.0  }
  0xde   : > { %3855 = vmatpush1.bf16.msra.mxu1 %v3854_v19  ;;  %3865 = vmatprep.subr.bf16.mxu0 %v3864_v56  ;;  %v4334_v16 = vpop.permute.xlu1 %4333  ;;  %v3868_v27 = vpack.c.bf16 %v853_v54, %v617_v20  ;;  %v6219_v20 = vunpack.i.h.bf16 %v5126_v62 }
  0xdf   : > { %v4335_v11 = vunpack.i.l.bf16 %v4334_v16  ;;  %v4329_v34 = vpop.permute.xlu0 %4328  ;;  %3782 = vmatmul.mubr.msk.f32.vlgmr.msra.gmra.mrb[0].mxu0 %vm2429_vm8, %v5248_v6  ;;  %v4336_v58 = vunpack.i.h.bf16 %v4334_v16  ;;  %v1322_v28 = vsel %vm1319_vm4, %v6217_v38, %v4296_v45  ;;  %v4562_v16 = vpack.i.bf16 %v5273_v35, %v5223_v5 }
  0xe0   : > { %v4330_v57 = vunpack.i.l.bf16 %v4329_v34  ;;  %3867 = vmatpush1.bf16.msra.mxu0 %v3866_v21  ;;  %4543 = vrot.lane.b32.xlu1 %v4542_v36, %s4716_s22  ;;  %v4331_v33 = vunpack.i.h.bf16 %v4329_v34  ;;  %v1086_v30 = vsel %vm1083_vm3, %v6219_v20, %v4291_v18  ;;  %v4316_v21 = vunpack.i.h.bf16 %v5186_v37 }
  0xe1   : > { %4538 = vrot.lane.b32.xlu0 %v4542_v36, %s4715_s21  ;;  %3869 = vmatprep.subr.bf16.mxu0 %v3868_v27  ;;  %v1323_v7 = vsel %vm1319_vm4, %v4296_v45, %v4335_v11  ;;  %v3858_v54 = vpack.c.bf16 %v1322_v28, %v1086_v30  ;;  %v1324_v27 = vsel %vm1319_vm4, %v4335_v11, %v4336_v58  ;;  %v6220_v28 = vunpack.i.h.bf16 %v5171_v29 }
  0xe2   : > { %v5275_v26 = vpop.permute.xlu1 %4343  ;;  %v1087_v1 = vsel %vm1083_vm3, %v4291_v18, %v4330_v57  ;;  %2639 = vmatprep.mubr.f32.mxu0 %v6218_v53  ;;  %v1088_v23 = vsel %vm1083_vm3, %v4330_v57, %v4331_v33  ;;  %v6221_v29 = vunpack.i.h.bf16 %v5155_v12 }
  0xe3   : > { %v4345_v19 = vunpack.i.l.bf16 %v5275_v26  ;;  %v5280_v56 = vpop.permute.xlu0 %4338  ;;  %v3856_v36 = vpack.c.bf16 %v1323_v7, %v1087_v1  ;;  %v3874_v57 = vpack.c.bf16 %v1324_v27, %v1088_v23 }
  0xe4   : > { %v4340_v45 = vunpack.i.l.bf16 %v5280_v56  ;;  %3871 = vmatpush1.bf16.msra.mxu0 %v3870_v24  ;;  %4553 = vrot.lane.b32.xlu1 %v4552_v61, %s4718_s24 }
  0xe5   : > { %4548 = vrot.lane.b32.xlu0 %v4552_v61, %s4717_s23  ;;  %3857 = vmatprep.subr.bf16.mxu1 %v3856_v36  ;;  %v1325_v62 = vsel %vm1319_vm4, %v4336_v58, %v4345_v19  ;;  %v4141_v61 = vunpack.i.h.bf16 %v5001_v0 }
  0xe6   : > { %3859 = vmatpush1.bf16.msra.mxu1 %v3858_v54  ;;  %v4354_v18 = vpop.permute.xlu1 %4353  ;;  %v1089_v34 = vsel %vm1083_vm3, %v4331_v33, %v4340_v45  ;;  %v1794_v33 = vsel %vm1791_vm6, %v6220_v28, %v4316_v21 }
  0xe7   : > { %v4355_v37 = vunpack.i.l.bf16 %v4354_v18  ;;  %v4349_v7 = vpop.permute.xlu0 %4348  ;;  %v3872_v11 = vpack.c.bf16 %v1325_v62, %v1089_v34  ;;  %v4356_v24 = vunpack.i.h.bf16 %v4354_v18  ;;  %v5326_v18 = vld [vmem:[%s4758_s17 + $0xc8] sm:$0xff] }
  0xe8   : > { %v4350_v38 = vunpack.i.l.bf16 %v4349_v7  ;;  %4563 = vrot.lane.b32.xlu1 %v4562_v16, %s4718_s24  ;;  %v4351_v1 = vunpack.i.h.bf16 %v4349_v7  ;;  %v383_v7 = vsel %vm375_vm0, %v4141_v61, %v4145_v59 }
  0xe9   : > { %4558 = vrot.lane.b32.xlu0 %v4562_v16, %s4717_s23  ;;  %3873 = vmatprep.subr.bf16.mxu0 %v3872_v11  ;;  %v1795_v58 = vsel %vm1791_vm6, %v4316_v21, %v4355_v37  ;;  %v1558_v21 = vsel %vm1555_vm5, %v6221_v29, %v4311_v43  ;;  %v1796_v12 = vsel %vm1791_vm6, %v4355_v37, %v4356_v24  ;;  %v4150_v11 = vunpack.i.l.bf16 %v5010_v10 }
  0xea   : > { %3875 = vmatpush1.bf16.msra.mxu0 %v3874_v57  ;;  %v5308_v36 = vpop.permute.xlu1 %4363  ;;  %v1559_v20 = vsel %vm1555_vm5, %v4311_v43, %v4350_v38  ;;  %v3862_v23 = vpack.c.bf16 %v1794_v33, %v1558_v21  ;;  %v1560_v34 = vsel %vm1555_vm5, %v4350_v38, %v4351_v1  ;;  %v180_v43 = vld [vmem:[%s4758_s17 + $0x38] sm:$0xff]  ;;  %v4146_v57 = vunpack.i.h.bf16 %v5015_v31  ;;  %v5351_v31 = vld [vmem:[%s4758_s17 + $0xd0] sm:$0xff]  ;;  %v182_v21 = vld [vmem:[%s4758_s17 + $0x48] sm:$0xff] }
  0xeb   : > { %v4365_v30 = vunpack.i.l.bf16 %v5308_v36  ;;  %v5312_v54 = vpop.permute.xlu0 %4358  ;;  %v3860_v16 = vpack.c.bf16 %v1795_v58, %v1559_v20  ;;  %v6222_v37 = vunpack.i.l.bf16 %v5001_v0  ;;  %v5348_v20 = vpack.i.bf16 %v5326_v18, %v5273_v35 }
  0xec   : > { %v4360_v27 = vunpack.i.l.bf16 %v5312_v54  ;;  %1999 = vrot.lane.b32.xlu1 %v5201_v63, %s4720_s25  ;;  %v3878_v0 = vpack.c.bf16 %v1796_v12, %v1560_v34  ;;  %v4231_v12 = vunpack.i.h.bf16 %v5079_v46 }
  0xed   : > { %1997 = vrot.lane.b32.xlu0 %v5198_v60, %s4720_s25  ;;  %3861 = vmatprep.subr.bf16.mxu1 %v3860_v16  ;;  %v1797_v62 = vsel %vm1791_vm6, %v4356_v24, %v4365_v30  ;;  %v382_v38 = vsel %vm375_vm0, %v6222_v37, %v4141_v61  ;;  %v5354_v16 = vld [vmem:[%s4758_s17 + $0xd8] sm:$0xff] }
  0xee   : > { %3863 = vmatpush1.bf16.msra.mxu1 %v3862_v23  ;;  %v1968_v63 = vpop.permute.xlu1 %1967  ;;  %v1561_v60 = vsel %vm1555_vm5, %v4351_v1, %v4360_v27  ;;  %v179_v1 = vld [vmem:[%s4758_s17 + $0x30] sm:$0xff]  ;;  %v385_v23 = vsel %vm375_vm0, %v4146_v57, %v4150_v11 }
  0xef   : > { %v1966_v58 = vpop.permute.xlu0 %1965  ;;  %v3876_v28 = vpack.c.bf16 %v1797_v62, %v1561_v60  ;;  %v3882_v29 = vpack.c.bf16 %v382_v38, %v179_v1  ;;  %v384_v62 = vsel %vm375_vm0, %v4145_v59, %v4146_v57  ;;  %v4235_v59 = vunpack.i.l.bf16 %v5087_v48 }
  0xf0   : > { %2003 = vrot.lane.b32.xlu1 %v5223_v5, %s4720_s25  ;;  %v2031_v33 = vsel %vm2027_vm7, %v1966_v58, %v1968_v63  ;;  %v2030_v24 = vsel %vm2027_vm7, %v5205_v32, %v1966_v58  ;;  %v3880_v5 = vpack.c.bf16 %v383_v7, %v180_v43  ;;  %v181_v43 = vld [vmem:[%s4758_s17 + $0x40] sm:$0xff]  ;;  %v4230_v7 = vunpack.i.l.bf16 %v5079_v46 }
  0xf1   : > { %2001 = vrot.lane.b32.xlu0 %v5220_v17, %s4720_s25  ;;  %2520 = vmatprep.subr.mxu1 %v2031_v33  ;;  %v5366_v17 = vpack.i.bf16 %v5354_v16, %v5351_v31  ;;  %v4226_v58 = vunpack.i.h.bf16 %v5081_v47  ;;  %v4326_v57 = vunpack.i.h.bf16 %v5234_v25  ;;  %v3896_v37 = vpack.c.bf16 %v385_v23, %v182_v21 }
  0xf2   : > { %3877 = vmatprep.subr.bf16.mxu0 %v3876_v28  ;;  %2521 = vmatpush1.msra.mxu1 %v2030_v24  ;;  %v5358_v32 = vpop.permute.xlu1 %1971  ;;  %v3898_v38 = vpack.c.bf16 %v384_v62, %v181_v43  ;;  %v620_v33 = vsel %vm611_vm1, %v4230_v7, %v4231_v12  ;;  %v4346_v24 = vunpack.i.h.bf16 %v5275_v26  ;;  %v621_v21 = vsel %vm611_vm1, %v4231_v12, %v4235_v59 }
  0xf3   : > { %3879 = vmatpush1.bf16.msra.mxu0 %v3878_v0  ;;  %v1970_v61 = vpop.permute.xlu0 %1969  ;;  %3881 = vmatprep.subr.bf16.mxu1 %v3880_v5  ;;  %v854_v5 = vsel %vm847_vm2, %v4325_v3, %v4326_v57 }
  0xf4   : > { %3783 = vmatmul.mubr.msk.f32.vlgmr.msra.gmra.mrb[0].mxu1 %vm2429_vm8, %v5248_v6  ;;  %4573 = vrot.lane.b32.xlu1 %v5348_v20, %s4714_s20  ;;  %v2033_v34 = vsel %vm2027_vm7, %v1970_v61, %v5358_v32  ;;  %v2032_v60 = vsel %vm2027_vm7, %v1968_v63, %v1970_v61  ;;  %v4341_v61 = vunpack.i.h.bf16 %v5280_v56 }
  0xf5   : > { %3883 = vmatpush1.bf16.msra.mxu1 %v3882_v29  ;;  %4568 = vrot.lane.b32.xlu0 %v5348_v20, %s4713_s19  ;;  %v619_v29 = vsel %vm611_vm1, %v4226_v58, %v4230_v7 }
  0xf6   : > { %2591 = vmatprep.subr.mxu0 %v2033_v34  ;;  %v5384_v28 = vpop.permute.xlu1 %4373  ;;  %2710 = vmatprep.mubr.f32.mxu1 %v6218_v53  ;;  %v618_v34 = vsel %vm611_vm1, %v4225_v44, %v4226_v58  ;;  %v4366_v58 = vunpack.i.h.bf16 %v5308_v36 }
  0xf7   : > { %2592 = vmatpush1.msra.mxu0 %v2032_v60  ;;  %v6216_v63 = vunpack.i.l.bf16 %v5384_v28  ;;  %v4369_v46 = vpop.permute.xlu0 %4368 }
  0xf8   : > { %v4371_v1 = vunpack.i.h.bf16 %v4369_v46  ;;  %v4370_v0 = vunpack.i.l.bf16 %v4369_v46  ;;  %3897 = vmatprep.subr.bf16.mxu0 %v3896_v37  ;;  %3784 = vmatmul.mubr.msk.f32.vlgmr.msra.gmra.mrb[2].mxu0 %vm2429_vm8, %v5248_v6  ;;  %v1326_v37 = vsel %vm1319_vm4, %v4345_v19, %v4346_v24 }
  0xf9   : > { %3899 = vmatpush1.bf16.msra.mxu0 %v3898_v38  ;;  %4583 = vrot.lane.b32.xlu1 %v5366_v17, %s4714_s20 }
  0xfa   : > { %v856_v23 = vsel %vm847_vm2, %v4370_v0, %v4371_v1  ;;  %4578 = vrot.lane.b32.xlu0 %v5366_v17, %s4713_s19  ;;  %v4384_v25 = vpop.permute.xlu1 %4383  ;;  %v855_v3 = vsel %vm847_vm2, %v4326_v57, %v4370_v0  ;;  %v857_v62 = vsel %vm847_vm2, %v4371_v1, %v6216_v63  ;;  %2781 = vmatprep.mubr.f32.mxu0 %v6218_v53 }
  0xfb   : > { %v4385_v60 = vunpack.i.l.bf16 %v4384_v25  ;;  %v4379_v12 = vpop.permute.xlu0 %4378  ;;  %v3884_v43 = vpack.c.bf16 %v855_v3, %v619_v29  ;;  %v3900_v7 = vpack.c.bf16 %v857_v62, %v621_v21  ;;  %v3886_v57 = vpack.c.bf16 %v854_v5, %v618_v34 }
  0xfc   : > { %v4380_v46 = vunpack.i.l.bf16 %v4379_v12  ;;  %v3902_v38 = vpack.c.bf16 %v856_v23, %v620_v33  ;;  %v1090_v1 = vsel %vm1083_vm3, %v4340_v45, %v4341_v61  ;;  %v4386_v0 = vunpack.i.h.bf16 %v4384_v25  ;;  %v5443_v23 = vld [vmem:[%s4758_s17 + $0xe0] sm:$0xff] }
  0xfd   : > { %v4381_v63 = vunpack.i.h.bf16 %v4379_v12  ;;  %4593 = vrot.lane.b32.xlu1 %v5348_v20, %s4716_s22  ;;  %3885 = vmatprep.subr.bf16.mxu1 %v3884_v43  ;;  %v1327_v47 = vsel %vm1319_vm4, %v4346_v24, %v4385_v60  ;;  %v3890_v24 = vpack.c.bf16 %v1326_v37, %v1090_v1  ;;  %v4361_v5 = vunpack.i.h.bf16 %v5312_v54 }
  0xfe   : > { %4588 = vrot.lane.b32.xlu0 %v5348_v20, %s4715_s21  ;;  %3901 = vmatprep.subr.bf16.mxu0 %v3900_v7  ;;  %v5424_v44 = vpop.permute.xlu1 %4393  ;;  %v1091_v26 = vsel %vm1083_vm3, %v4341_v61, %v4380_v46  ;;  %v4612_v20 = vpack.i.bf16 %v5351_v31, %v5326_v18  ;;  %v1328_v61 = vsel %vm1319_vm4, %v4385_v60, %v4386_v0  ;;  %v4155_v54 = vunpack.i.l.bf16 %v5027_v4 }
  0xff   : > { %3887 = vmatpush1.bf16.msra.mxu1 %v3886_v57  ;;  %3903 = vmatpush1.bf16.msra.mxu0 %v3902_v38  ;;  %v4395_v19 = vunpack.i.l.bf16 %v5424_v44  ;;  %v5428_v56 = vpop.permute.xlu0 %4388  ;;  %v3888_v45 = vpack.c.bf16 %v1327_v47, %v1091_v26  ;;  %v1092_v29 = vsel %vm1083_vm3, %v4380_v46, %v4381_v63  ;;  %v4622_v7 = vpack.i.bf16 %v5443_v23, %v5354_v16 }
 0x100   : > { %v4390_v33 = vunpack.i.l.bf16 %v5428_v56  ;;  %v3906_v43 = vpack.c.bf16 %v1328_v61, %v1092_v29  ;;  %v1798_v37 = vsel %vm1791_vm6, %v4365_v30, %v4366_v58  ;;  %v4151_v30 = vunpack.i.h.bf16 %v5010_v10 }
 0x101   : > { %4603 = vrot.lane.b32.xlu1 %v5366_v17, %s4716_s22  ;;  %3889 = vmatprep.subr.bf16.mxu1 %v3888_v45  ;;  %v1329_v21 = vsel %vm1319_vm4, %v4386_v0, %v4395_v19  ;;  %v4721_v47 = vmov 0   ;;  %v4160_v29 = vunpack.i.l.bf16 %v5025_v39 }
 0x102   : > { %4598 = vrot.lane.b32.xlu0 %v5366_v17, %s4715_s21  ;;  %v4404_v25 = vpop.permute.xlu1 %4403  ;;  %v1093_v3 = vsel %vm1083_vm3, %v4381_v63, %v4390_v33  ;;  %v1562_v17 = vsel %vm1555_vm5, %v4360_v27, %v4361_v5 }
 0x103   : > { %3891 = vmatpush1.bf16.msra.mxu1 %v3890_v24  ;;  %v4405_v62 = vunpack.i.l.bf16 %v4404_v25  ;;  %v4399_v34 = vpop.permute.xlu0 %4398  ;;  %v3904_v60 = vpack.c.bf16 %v1329_v21, %v1093_v3  ;;  %v4406_v46 = vunpack.i.h.bf16 %v4404_v25  ;;  %4702 = vset.pattern.permute.xlu0 %v4721_v47  ;;  %v3894_v45 = vpack.c.bf16 %v1798_v37, %v1562_v17 }
 0x104   : > { %v4400_v12 = vunpack.i.l.bf16 %v4399_v34  ;;  %v4401_v57 = vunpack.i.h.bf16 %v4399_v34  ;;  %v4156_v21 = vunpack.i.h.bf16 %v5027_v4  ;;  %v184_v34 = vld [vmem:[%s4758_s17 + $0x58] sm:$0xff]  ;;  %v4376_v47 = vunpack.i.h.bf16 %v5384_v28 }
 0x105   : > { %4613 = vrot.lane.b32.xlu1 %v4612_v20, %s4718_s24  ;;  %3905 = vmatprep.subr.bf16.mxu0 %v3904_v60  ;;  %v1799_v63 = vsel %vm1791_vm6, %v4366_v58, %v4405_v62  ;;  %v1800_v24 = vsel %vm1791_vm6, %v4405_v62, %v4406_v46  ;;  %v387_v62 = vsel %vm375_vm0, %v4151_v30, %v4155_v54 }
 0x106   : > { %4608 = vrot.lane.b32.xlu0 %v4612_v20, %s4717_s23  ;;  %3907 = vmatpush1.bf16.msra.mxu0 %v3906_v43  ;;  %v5461_v38 = vpop.permute.xlu1 %4413  ;;  %v1563_v36 = vsel %vm1555_vm5, %v4361_v5, %v4400_v12  ;;  %v1564_v20 = vsel %vm1555_vm5, %v4400_v12, %v4401_v57  ;;  %v386_v60 = vsel %vm375_vm0, %v4150_v11, %v4151_v30  ;;  %v5498_v11 = vld [vmem:[%s4758_s17 + $0xe8] sm:$0xff]  ;;  %v4241_v30 = vunpack.i.h.bf16 %v5085_v22 }
 0x107   : > { %v4415_v27 = vunpack.i.l.bf16 %v5461_v38  ;;  %v5467_v1 = vpop.permute.xlu0 %4408  ;;  %v3892_v0 = vpack.c.bf16 %v1799_v63, %v1563_v36  ;;  %v3910_v37 = vpack.c.bf16 %v1800_v24, %v1564_v20  ;;  %v3912_v4 = vpack.c.bf16 %v387_v62, %v184_v34  ;;  %v186_v63 = vld [vmem:[%s4758_s17 + $0x68] sm:$0xff]  ;;  %v185_v36 = vld [vmem:[%s4758_s17 + $0x60] sm:$0xff] }
 0x108   : > { %v4410_v26 = vunpack.i.l.bf16 %v5467_v1  ;;  %v4240_v24 = vunpack.i.l.bf16 %v5085_v22 }
 0x109   : > { %4623 = vrot.lane.b32.xlu1 %v4622_v7, %s4718_s24  ;;  %3893 = vmatprep.subr.bf16.mxu1 %v3892_v0  ;;  %v1801_v58 = vsel %vm1791_vm6, %v4406_v46, %v4415_v27  ;;  %v4236_v0 = vunpack.i.h.bf16 %v5087_v48 }
 0x10a   : > { %4618 = vrot.lane.b32.xlu0 %v4622_v7, %s4717_s23  ;;  %3895 = vmatpush1.bf16.msra.mxu1 %v3894_v45  ;;  %v1976_v5 = vpop.permute.xlu1 %1975  ;;  %v1565_v61 = vsel %vm1555_vm5, %v4401_v57, %v4410_v26  ;;  %v183_v7 = vld [vmem:[%s4758_s17 + $0x50] sm:$0xff]  ;;  %v624_v62 = vsel %vm611_vm1, %v4240_v24, %v4241_v30 }
 0x10b   : > { %v1974_v25 = vpop.permute.xlu0 %1973  ;;  %v3908_v3 = vpack.c.bf16 %v1801_v58, %v1565_v61  ;;  %v3914_v17 = vpack.c.bf16 %v386_v60, %v183_v7  ;;  %v5521_v45 = vld [vmem:[%s4758_s17 + $0xf0] sm:$0xff]  ;;  %v5524_v58 = vld [vmem:[%s4758_s17 + $0xf8] sm:$0xff]  ;;  %v4245_v61 = vunpack.i.l.bf16 %v5095_v50  ;;  %v622_v60 = vsel %vm611_vm1, %v4235_v59, %v4236_v0 }
 0x10c   : > { %v2034_v12 = vsel %vm2027_vm7, %v5358_v32, %v1974_v25  ;;  %v2035_v43 = vsel %vm2027_vm7, %v1974_v25, %v1976_v5  ;;  %v4391_v7 = vunpack.i.h.bf16 %v5428_v56  ;;  %v623_v48 = vsel %vm611_vm1, %v4236_v0, %v4240_v24 }
 0x10d   : > { %2007 = vrot.lane.b32.xlu1 %v5326_v18, %s4720_s25  ;;  %2662 = vmatprep.subr.mxu1 %v2035_v43  ;;  %v389_v18 = vsel %vm375_vm0, %v4156_v21, %v4160_v29 }
 0x10e   : > { %2005 = vrot.lane.b32.xlu0 %v5273_v35, %s4720_s25  ;;  %3909 = vmatprep.subr.bf16.mxu0 %v3908_v3  ;;  %v5495_v10 = vpop.permute.xlu1 %1979  ;;  %v388_v35 = vsel %vm375_vm0, %v4155_v54, %v4156_v21  ;;  %v5518_v54 = vpack.i.bf16 %v5498_v11, %v5443_v23  ;;  %v4396_v3 = vunpack.i.h.bf16 %v5424_v44 }
 0x10f   : > { %2663 = vmatpush1.msra.mxu1 %v2034_v12  ;;  %3911 = vmatpush1.bf16.msra.mxu0 %v3910_v37  ;;  %v1978_v32 = vpop.permute.xlu0 %1977  ;;  %v3930_v25 = vpack.c.bf16 %v388_v35, %v185_v36  ;;  %v6223_v12 = vunpack.i.l.bf16 %v5384_v28  ;;  %v625_v35 = vsel %vm611_vm1, %v4241_v30, %v4245_v61 }
 0x110   : > { %v2036_v46 = vsel %vm2027_vm7, %v1976_v5, %v1978_v32  ;;  %3913 = vmatprep.subr.bf16.mxu1 %v3912_v4  ;;  %3785 = vmatmul.mubr.msk.f32.vlgmr.msra.gmra.mrb[2].mxu1 %vm2429_vm8, %v5248_v6  ;;  %v2037_v57 = vsel %vm2027_vm7, %v1978_v32, %v5495_v10  ;;  %v3928_v5 = vpack.c.bf16 %v389_v18, %v186_v63 }
 0x111   : > { %3915 = vmatpush1.bf16.msra.mxu1 %v3914_v17  ;;  %2011 = vrot.lane.b32.xlu1 %v5354_v16, %s4720_s25  ;;  %v858_v43 = vsel %vm847_vm2, %v6223_v12, %v4376_v47 }
 0x112   : > { %2009 = vrot.lane.b32.xlu0 %v5351_v31, %s4720_s25  ;;  %2733 = vmatprep.subr.mxu0 %v2037_v57  ;;  %v5529_v20 = vpop.permute.xlu1 %4423  ;;  %v5539_v31 = vpack.i.bf16 %v5524_v58, %v5521_v45  ;;  %v3918_v0 = vpack.c.bf16 %v858_v43, %v622_v60 }
 0x113   : > { %2734 = vmatpush1.msra.mxu0 %v2036_v46  ;;  %v4425_v16 = vunpack.i.l.bf16 %v5529_v20  ;;  %v4419_v21 = vpop.permute.xlu0 %4418  ;;  %2852 = vmatprep.mubr.f32.mxu1 %v6218_v53  ;;  %v1330_v46 = vsel %vm1319_vm4, %v4395_v19, %v4396_v3 }
 0x114   : > { %v4421_v34 = vunpack.i.h.bf16 %v4419_v21  ;;  %v4420_v22 = vunpack.i.l.bf16 %v4419_v21  ;;  %3929 = vmatprep.subr.bf16.mxu0 %v3928_v5  ;;  %3786 = vmatmul.mubr.msk.f32.vlgmr.msra.gmra.mrb[4].mxu0 %vm2429_vm8, %v5248_v6 }
 0x115   : > { %3931 = vmatpush1.bf16.msra.mxu0 %v3930_v25  ;;  %4633 = vrot.lane.b32.xlu1 %v5518_v54, %s4714_s20 }
 0x116   : > { %v860_v37 = vsel %vm847_vm2, %v4420_v22, %v4421_v34  ;;  %4628 = vrot.lane.b32.xlu0 %v5518_v54, %s4713_s19  ;;  %v4434_v4 = vpop.permute.xlu1 %4433  ;;  %v859_v59 = vsel %vm847_vm2, %v4376_v47, %v4420_v22  ;;  %v861_v28 = vsel %vm847_vm2, %v4421_v34, %v4425_v16  ;;  %2923 = vmatprep.mubr.f32.mxu0 %v6218_v53  ;;  %v4416_v34 = vunpack.i.h.bf16 %v5461_v38 }
 0x117   : > { %v3934_v32 = vpack.c.bf16 %v860_v37, %v624_v62  ;;  %v4435_v17 = vunpack.i.l.bf16 %v4434_v4  ;;  %v4429_v63 = vpop.permute.xlu0 %4428  ;;  %v3916_v18 = vpack.c.bf16 %v859_v59, %v623_v48  ;;  %v3932_v36 = vpack.c.bf16 %v861_v28, %v625_v35 }
 0x118   : > { %v4430_v57 = vunpack.i.l.bf16 %v4429_v63  ;;  %v1094_v47 = vsel %vm1083_vm3, %v4390_v33, %v4391_v7  ;;  %v4436_v24 = vunpack.i.h.bf16 %v4434_v4  ;;  %v4431_v5 = vunpack.i.h.bf16 %v4429_v63 }
 0x119   : > { %4643 = vrot.lane.b32.xlu1 %v5539_v31, %s4714_s20  ;;  %3917 = vmatprep.subr.bf16.mxu1 %v3916_v18  ;;  %v1331_v30 = vsel %vm1319_vm4, %v4396_v3, %v4435_v17  ;;  %v3922_v25 = vpack.c.bf16 %v1330_v46, %v1094_v47  ;;  %v4411_v22 = vunpack.i.h.bf16 %v5467_v1  ;;  %v4165_v1 = vunpack.i.l.bf16 %v5033_v8 }
 0x11a   : > { %4638 = vrot.lane.b32.xlu0 %v5539_v31, %s4713_s19  ;;  %3933 = vmatprep.subr.bf16.mxu0 %v3932_v36  ;;  %v5574_v44 = vpop.permute.xlu1 %4443  ;;  %v1095_v19 = vsel %vm1083_vm3, %v4391_v7, %v4430_v57  ;;  %v1332_v62 = vsel %vm1319_vm4, %v4435_v17, %v4436_v24  ;;  %v1096_v60 = vsel %vm1083_vm3, %v4430_v57, %v4431_v5 }
 0x11b   : > { %3919 = vmatpush1.bf16.msra.mxu1 %v3918_v0  ;;  %3935 = vmatpush1.bf16.msra.mxu0 %v3934_v32  ;;  %v4445_v56 = vunpack.i.l.bf16 %v5574_v44  ;;  %v5578_v33 = vpop.permute.xlu0 %4438  ;;  %v3920_v21 = vpack.c.bf16 %v1331_v30, %v1095_v19  ;;  %v3938_v59 = vpack.c.bf16 %v1332_v62, %v1096_v60  ;;  %v4667_v32 = vpack.i.bf16 %v5521_v45, %v5498_v11  ;;  %v188_v62 = vld [vmem:[%s4758_s17 + $0x78] sm:$0xff] }
 0x11c   : > { %v4440_v3 = vunpack.i.l.bf16 %v5578_v33  ;;  %v1802_v17 = vsel %vm1791_vm6, %v4415_v27, %v4416_v34  ;;  %v4161_v27 = vunpack.i.h.bf16 %v5025_v39 }
 0x11d   : > { %4653 = vrot.lane.b32.xlu1 %v5518_v54, %s4716_s22  ;;  %3921 = vmatprep.subr.bf16.mxu1 %v3920_v21  ;;  %v1333_v12 = vsel %vm1319_vm4, %v4436_v24, %v4445_v56  ;;  %v4170_v21 = vunpack.i.l.bf16 %v5031_v2 }
 0x11e   : > { %4648 = vrot.lane.b32.xlu0 %v5518_v54, %s4715_s21  ;;  %v4454_v43 = vpop.permute.xlu1 %4453  ;;  %v1097_v7 = vsel %vm1083_vm3, %v4431_v5, %v4440_v3  ;;  %v1566_v54 = vsel %vm1555_vm5, %v4410_v26, %v4411_v22  ;;  %v391_v60 = vsel %vm375_vm0, %v4161_v27, %v4165_v1 }
 0x11f   : > { %3923 = vmatpush1.bf16.msra.mxu1 %v3922_v25  ;;  %v4455_v37 = vunpack.i.l.bf16 %v4454_v43  ;;  %v4449_v4 = vpop.permute.xlu0 %4448  ;;  %v3936_v48 = vpack.c.bf16 %v1333_v12, %v1097_v7  ;;  %v4456_v18 = vunpack.i.h.bf16 %v4454_v43  ;;  %v3926_v0 = vpack.c.bf16 %v1802_v17, %v1566_v54  ;;  %v189_v54 = vld [vmem:[%s4758_s17 + $0x80] sm:$0xff] }
 0x120   : > { %v4450_v28 = vunpack.i.l.bf16 %v4449_v4  ;;  %v4451_v35 = vunpack.i.h.bf16 %v4449_v4  ;;  %v4166_v25 = vunpack.i.h.bf16 %v5033_v8  ;;  %v390_v12 = vsel %vm375_vm0, %v4160_v29, %v4161_v27 }
 0x121   : > { %1311 = vrot.lane.b32.xlu1 %v5521_v45, %s4716_s22  ;;  %3937 = vmatprep.subr.bf16.mxu0 %v3936_v48  ;;  %v1803_v63 = vsel %vm1791_vm6, %v4416_v34, %v4455_v37  ;;  %v1804_v24 = vsel %vm1791_vm6, %v4455_v37, %v4456_v18  ;;  %v187_v37 = vld [vmem:[%s4758_s17 + $0x70] sm:$0xff]  ;;  %v3944_v8 = vpack.c.bf16 %v391_v60, %v188_v62  ;;  %v190_v48 = vld [vmem:[%s4758_s17 + $0x88] sm:$0xff]  ;;  %v4250_v27 = vunpack.i.l.bf16 %v5093_v49 }
 0x122   : > { %4658 = vrot.lane.b32.xlu0 %v5539_v31, %s4715_s21  ;;  %3939 = vmatpush1.bf16.msra.mxu0 %v3938_v59  ;;  %v5608_v46 = vpop.permute.xlu1 %4463  ;;  %v1567_v38 = vsel %vm1555_vm5, %v4411_v22, %v4450_v28  ;;  %v1568_v5 = vsel %vm1555_vm5, %v4450_v28, %v4451_v35  ;;  %v393_v59 = vsel %vm375_vm0, %v4166_v25, %v4170_v21  ;;  %v4441_v60 = vunpack.i.h.bf16 %v5578_v33 }
 0x123   : > { %v4465_v26 = vunpack.i.l.bf16 %v5608_v46  ;;  %v5614_v57 = vpop.permute.xlu0 %4458  ;;  %v3924_v36 = vpack.c.bf16 %v1803_v63, %v1567_v38  ;;  %v3942_v4 = vpack.c.bf16 %v1804_v24, %v1568_v5  ;;  %v392_v28 = vsel %vm375_vm0, %v4165_v1, %v4166_v25  ;;  %v5656_v63 = vld [vmem:[%s4758_s17 + $0x108] sm:$0xff] }
 0x124   : > { %v4460_v47 = vunpack.i.l.bf16 %v5614_v57  ;;  %v4426_v38 = vunpack.i.h.bf16 %v5529_v20 }
 0x125   : > { %4668 = vrot.lane.b32.xlu1 %v4667_v32, %s4718_s24  ;;  %3925 = vmatprep.subr.bf16.mxu1 %v3924_v36  ;;  %v1805_v31 = vsel %vm1791_vm6, %v4456_v18, %v4465_v26  ;;  %v4251_v18 = vunpack.i.h.bf16 %v5093_v49  ;;  %v3960_v36 = vpack.c.bf16 %v393_v59, %v190_v48  ;;  %v4446_v49 = vunpack.i.h.bf16 %v5574_v44 }
 0x126   : > { %4663 = vrot.lane.b32.xlu0 %v4667_v32, %s4717_s23  ;;  %3927 = vmatpush1.bf16.msra.mxu1 %v3926_v0  ;;  %v1984_v30 = vpop.permute.xlu1 %1983  ;;  %v1569_v19 = vsel %vm1555_vm5, %v4451_v35, %v4460_v47  ;;  %v4246_v35 = vunpack.i.h.bf16 %v5095_v50  ;;  %v5669_v0 = vld [vmem:[%s4758_s17 + $0x100] sm:$0xff]  ;;  %v862_v62 = vsel %vm847_vm2, %v4425_v16, %v4426_v38 }
 0x127   : > { %v1982_v34 = vpop.permute.xlu0 %1981  ;;  %v3940_v22 = vpack.c.bf16 %v1805_v31, %v1569_v19  ;;  %v4255_v31 = vunpack.i.l.bf16 %v5103_v52  ;;  %v4687_v25 = vpack.i.bf16 %v5669_v0, %v5524_v58 }
 0x128   : > { %v2038_v43 = vsel %vm2027_vm7, %v5495_v10, %v1982_v34  ;;  %v2039_v7 = vsel %vm2027_vm7, %v1982_v34, %v1984_v30  ;;  %v3946_v10 = vpack.c.bf16 %v390_v12, %v187_v37  ;;  %v628_v34 = vsel %vm611_vm1, %v4250_v27, %v4251_v18 }
 0x129   : > { %1783 = vrot.lane.b32.xlu1 %v5524_v58, %s4718_s24  ;;  %2804 = vmatprep.subr.mxu1 %v2039_v7  ;;  %v627_v50 = vsel %vm611_vm1, %v4246_v35, %v4250_v27 }
 0x12a   : > { %1547 = vrot.lane.b32.xlu0 %v5524_v58, %s4717_s23  ;;  %3941 = vmatprep.subr.bf16.mxu0 %v3940_v22  ;;  %v5642_v39 = vpop.permute.xlu1 %1987  ;;  %v626_v22 = vsel %vm611_vm1, %v4245_v61, %v4246_v35  ;;  %v4461_v35 = vunpack.i.h.bf16 %v5614_v57  ;;  %v4171_v57 = vunpack.i.h.bf16 %v5031_v2 }
 0x12b   : > { %2805 = vmatpush1.msra.mxu1 %v2038_v43  ;;  %3943 = vmatpush1.bf16.msra.mxu0 %v3942_v4  ;;  %v1986_v29 = vpop.permute.xlu0 %1985  ;;  %v1334_v4 = vsel %vm1319_vm4, %v4445_v56, %v4446_v49 }
 0x12c   : > { %v2040_v32 = vsel %vm2027_vm7, %v1984_v30, %v1986_v29  ;;  %3945 = vmatprep.subr.bf16.mxu1 %v3944_v8  ;;  %3787 = vmatmul.mubr.msk.f32.vlgmr.msra.gmra.mrb[4].mxu1 %vm2429_vm8, %v5248_v6  ;;  %v2041_v17 = vsel %vm2027_vm7, %v1986_v29, %v5642_v39  ;;  %v3962_v30 = vpack.c.bf16 %v392_v28, %v189_v54  ;;  %v4466_v54 = vunpack.i.h.bf16 %v5608_v46  ;;  %v1452_v46 = vld [vmem:[%s4758_s17 + $0x110] sm:$0xff] }
 0x12d   : > { %3947 = vmatpush1.bf16.msra.mxu1 %v3946_v10  ;;  %2015 = vrot.lane.b32.xlu1 %v5498_v11, %s4720_s25  ;;  %v5675_v11 = vpack.i.bf16 %v5656_v63, %v5669_v0  ;;  %v1098_v10 = vsel %vm1083_vm3, %v4440_v3, %v4441_v60 }
 0x12e   : > { %2013 = vrot.lane.b32.xlu0 %v5443_v23, %s4720_s25  ;;  %2875 = vmatprep.subr.mxu0 %v2041_v17  ;;  %v5666_v1 = vpop.permute.xlu1 %4473  ;;  %v3954_v17 = vpack.c.bf16 %v1334_v4, %v1098_v10  ;;  %v4176_v10 = vunpack.i.h.bf16 %v5041_v40 }
 0x12f   : > { %2876 = vmatpush1.msra.mxu0 %v2040_v32  ;;  %v4475_v24 = vunpack.i.l.bf16 %v5666_v1  ;;  %v4469_v5 = vpop.permute.xlu0 %4468  ;;  %2994 = vmatprep.mubr.f32.mxu1 %v6218_v53 }
 0x130   : > { %v4471_v23 = vunpack.i.h.bf16 %v4469_v5  ;;  %v4470_v19 = vunpack.i.l.bf16 %v4469_v5  ;;  %3961 = vmatprep.subr.bf16.mxu0 %v3960_v36  ;;  %3788 = vmatmul.mubr.msk.f32.vlgmr.msra.gmra.mrb[6].mxu0 %vm2429_vm8, %v5248_v6 }
 0x131   : > { %3963 = vmatpush1.bf16.msra.mxu0 %v3962_v30  ;;  %2019 = vrot.lane.b32.xlu1 %v5524_v58, %s4720_s25  ;;  %v629_v58 = vsel %vm611_vm1, %v4251_v18, %v4255_v31 }
 0x132   : > { %v864_v6 = vsel %vm847_vm2, %v4470_v19, %v4471_v23  ;;  %2017 = vrot.lane.b32.xlu0 %v5521_v45, %s4720_s25  ;;  %v4484_v12 = vpop.permute.xlu1 %4483  ;;  %v863_v61 = vsel %vm847_vm2, %v4426_v38, %v4470_v19  ;;  %v865_v20 = vsel %vm847_vm2, %v4471_v23, %v4475_v24  ;;  %3065 = vmatprep.mubr.f32.mxu0 %v6218_v53 }
 0x133   : > { %v3966_v16 = vpack.c.bf16 %v864_v6, %v628_v34  ;;  %v4485_v43 = vunpack.i.l.bf16 %v4484_v12  ;;  %v4479_v7 = vpop.permute.xlu0 %4478  ;;  %v3948_v37 = vpack.c.bf16 %v863_v61, %v627_v50  ;;  %v3950_v45 = vpack.c.bf16 %v862_v62, %v626_v22 }
 0x134   : > { %v4480_v8 = vunpack.i.l.bf16 %v4479_v7  ;;  %v3964_v29 = vpack.c.bf16 %v865_v20, %v629_v58  ;;  %v4486_v48 = vunpack.i.h.bf16 %v4484_v12  ;;  %v4481_v59 = vunpack.i.h.bf16 %v4479_v7 }
 0x135   : > { %4678 = vrot.lane.b32.xlu1 %v5675_v11, %s4714_s20  ;;  %3949 = vmatprep.subr.bf16.mxu1 %v3948_v37  ;;  %v1335_v28 = vsel %vm1319_vm4, %v4446_v49, %v4485_v43  ;;  %v1806_v22 = vsel %vm1791_vm6, %v4465_v26, %v4466_v54  ;;  %v1570_v62 = vsel %vm1555_vm5, %v4460_v47, %v4461_v35  ;;  %v4175_v47 = vunpack.i.l.bf16 %v5041_v40 }
 0x136   : > { %4673 = vrot.lane.b32.xlu0 %v5675_v11, %s4713_s19  ;;  %3965 = vmatprep.subr.bf16.mxu0 %v3964_v29  ;;  %v5716_v44 = vpop.permute.xlu1 %4493  ;;  %v1099_v56 = vsel %vm1083_vm3, %v4441_v60, %v4480_v8  ;;  %v1336_v38 = vsel %vm1319_vm4, %v4485_v43, %v4486_v48  ;;  %v1100_v27 = vsel %vm1083_vm3, %v4480_v8, %v4481_v59  ;;  %v4180_v29 = vunpack.i.l.bf16 %v5039_v9 }
 0x137   : > { %3951 = vmatpush1.bf16.msra.mxu1 %v3950_v45  ;;  %3967 = vmatpush1.bf16.msra.mxu0 %v3966_v16  ;;  %v4495_v33 = vunpack.i.l.bf16 %v5716_v44  ;;  %v5720_v3 = vpop.permute.xlu0 %4488  ;;  %v3952_v32 = vpack.c.bf16 %v1335_v28, %v1099_v56  ;;  %v3970_v34 = vpack.c.bf16 %v1336_v38, %v1100_v27  ;;  %v3958_v43 = vpack.c.bf16 %v1806_v22, %v1570_v62  ;;  %v192_v28 = vld [vmem:[%s4758_s17 + $0x98] sm:$0xff] }
 0x138   : > { %v4490_v18 = vunpack.i.l.bf16 %v5720_v3  ;;  %v395_v56 = vsel %vm375_vm0, %v4171_v57, %v4175_v47  ;;  %v397_v27 = vsel %vm375_vm0, %v4176_v10, %v4180_v29  ;;  %v4260_v22 = vunpack.i.l.bf16 %v5101_v51 }
 0x139   : > { %4688 = vrot.lane.b32.xlu1 %v4687_v25, %s4716_s22  ;;  %3953 = vmatprep.subr.bf16.mxu1 %v3952_v32  ;;  %v1337_v36 = vsel %vm1319_vm4, %v4486_v48, %v4495_v33  ;;  %v3976_v2 = vpack.c.bf16 %v395_v56, %v192_v28 }
 0x13a   : > { %4683 = vrot.lane.b32.xlu0 %v5675_v11, %s4715_s21  ;;  %v4504_v5 = vpop.permute.xlu1 %4503  ;;  %v1101_v30 = vsel %vm1083_vm3, %v4481_v59, %v4490_v18 }
 0x13b   : > { %3955 = vmatpush1.bf16.msra.mxu1 %v3954_v17  ;;  %v4505_v49 = vunpack.i.l.bf16 %v4504_v5  ;;  %v4499_v23 = vpop.permute.xlu0 %4498  ;;  %v3968_v19 = vpack.c.bf16 %v1337_v36, %v1101_v30  ;;  %v4506_v6 = vunpack.i.h.bf16 %v4504_v5  ;;  %v396_v36 = vsel %vm375_vm0, %v4175_v47, %v4176_v10  ;;  %v5793_v30 = vld [vmem:[%s6206_s1] sm:$0x7] }
 0x13c   : > { %v4500_v25 = vunpack.i.l.bf16 %v4499_v23  ;;  %v4501_v12 = vunpack.i.h.bf16 %v4499_v23  ;;  %v193_v23 = vld [vmem:[%s4758_s17 + $0xa0] sm:$0xff] }
 0x13d   : > { %4693 = vrot.lane.b32.xlu1 %v5675_v11, %s4717_s23  ;;  %3969 = vmatprep.subr.bf16.mxu0 %v3968_v19  ;;  %v1807_v60 = vsel %vm1791_vm6, %v4466_v54, %v4505_v49  ;;  %v1808_v58 = vsel %vm1791_vm6, %v4505_v49, %v4506_v6  ;;  %v191_v54 = vld [vmem:[%s4758_s17 + $0x90] sm:$0xff]  ;;  %v4261_v19 = vunpack.i.h.bf16 %v5101_v51  ;;  %v172_v51 = vld [vmem:[%s6207_s2] sm:$0x7] }
 0x13e   : > { %1317 = vrot.lane.b32.xlu0 %v5656_v63, %s4716_s22  ;;  %3971 = vmatpush1.bf16.msra.mxu0 %v3970_v34  ;;  %v5747_v50 = vpop.permute.xlu1 %4513  ;;  %v1571_v26 = vsel %vm1555_vm5, %v4461_v35, %v4500_v25  ;;  %v1572_v45 = vsel %vm1555_vm5, %v4500_v25, %v4501_v12  ;;  %v4256_v34 = vunpack.i.h.bf16 %v5103_v52  ;;  %v4476_v25 = vunpack.i.h.bf16 %v5666_v1 }
 0x13f   : > { %v4515_v61 = vunpack.i.l.bf16 %v5747_v50  ;;  %v5754_v20 = vpop.permute.xlu0 %4508  ;;  %v3956_v16 = vpack.c.bf16 %v1807_v60, %v1571_v26  ;;  %v3974_v35 = vpack.c.bf16 %v1808_v58, %v1572_v45  ;;  %v4491_v58 = vunpack.i.h.bf16 %v5720_v3 }
 0x140   : > { %v4510_v7 = vunpack.i.l.bf16 %v5754_v20 }
 0x141   : > { %1553 = vrot.lane.b32.xlu1 %v1452_v46, %s4717_s23  ;;  %3957 = vmatprep.subr.bf16.mxu1 %v3956_v16  ;;  %v1809_v37 = vsel %vm1791_vm6, %v4506_v6, %v4515_v61  ;;  %v4265_v6 = vunpack.i.l.bf16 %v5114_v55  ;;  %v632_v16 = vsel %vm611_vm1, %v4260_v22, %v4261_v19 }
 0x142   : > { %4698 = vrot.lane.b32.xlu0 %v5675_v11, %s4718_s24  ;;  %3959 = vmatpush1.bf16.msra.mxu1 %v3958_v43  ;;  %v1992_v4 = vpop.permute.xlu1 %1991  ;;  %v1573_v8 = vsel %vm1555_vm5, %v4501_v12, %v4510_v7  ;;  %v394_v11 = vsel %vm375_vm0, %v4170_v21, %v4171_v57  ;;  %v3994_v57 = vpack.c.bf16 %v396_v36, %v193_v23  ;;  %v4511_v36 = vunpack.i.h.bf16 %v5754_v20 }
 0x143   : > { %v1990_v48 = vpop.permute.xlu0 %1989  ;;  %v3972_v59 = vpack.c.bf16 %v1809_v37, %v1573_v8  ;;  %v3978_v38 = vpack.c.bf16 %v394_v11, %v191_v54  ;;  %v630_v43 = vsel %vm611_vm1, %v4255_v31, %v4256_v34  ;;  %v866_v37 = vsel %vm847_vm2, %v4475_v24, %v4476_v25 }
 0x144   : > { %v2042_v32 = vsel %vm2027_vm7, %v5642_v39, %v1990_v48  ;;  %v2043_v17 = vsel %vm2027_vm7, %v1990_v48, %v1992_v4  ;;  %v194_v39 = vld [vmem:[%s4758_s17 + $0xa8] sm:$0xff]  ;;  %v631_v8 = vsel %vm611_vm1, %v4256_v34, %v4260_v22  ;;  %v3982_v28 = vpack.c.bf16 %v866_v37, %v630_v43 }
 0x145   : > { %2021 = vrot.lane.b32.xlu1 %v5669_v0, %s4720_s25  ;;  %2946 = vmatprep.subr.mxu1 %v2043_v17  ;;  %v3992_v60 = vpack.c.bf16 %v397_v27, %v194_v39  ;;  %v1102_v17 = vsel %vm1083_vm3, %v4490_v18, %v4491_v58  ;;  %v4516_v18 = vunpack.i.h.bf16 %v5747_v50  ;;  %v4181_v43 = vunpack.i.h.bf16 %v5039_v9 }
 0x146   : > { %1789 = vrot.lane.b32.xlu0 %v1452_v46, %s4718_s24  ;;  %3973 = vmatprep.subr.bf16.mxu0 %v3972_v59  ;;  %v5782_v40 = vpop.permute.xlu1 %1995  ;;  %v633_v59 = vsel %vm611_vm1, %v4261_v19, %v4265_v6  ;;  %v4185_v37 = vunpack.i.l.bf16 %v5049_v42 }
 0x147   : > { %2947 = vmatpush1.msra.mxu1 %v2042_v32  ;;  %3975 = vmatpush1.bf16.msra.mxu0 %v3974_v35  ;;  %v1994_v21 = vpop.permute.xlu0 %1993 }
 0x148   : > { %v2044_v5 = vsel %vm2027_vm7, %v1992_v4, %v1994_v21  ;;  %3977 = vmatprep.subr.bf16.mxu1 %v3976_v2  ;;  %3789 = vmatmul.mubr.msk.f32.vlgmr.msra.gmra.mrb[6].mxu1 %vm2429_vm8, %v5793_v30  ;;  %v2045_v49 = vsel %vm2027_vm7, %v1994_v21, %v5782_v40 }
 0x149   : > { %3979 = vmatpush1.bf16.msra.mxu1 %v3978_v38  ;;  %2025 = vrot.lane.b32.xlu1 %v1452_v46, %s4720_s25  ;;  %v4496_v46 = vunpack.i.h.bf16 %v5716_v44 }
 0x14a   : > { %2023 = vrot.lane.b32.xlu0 %v5656_v63, %s4720_s25  ;;  %3017 = vmatprep.subr.mxu0 %v2045_v49  ;;  %v5807_v62 = vpop.permute.xlu1 %4523 }
 0x14b   : > { %3018 = vmatpush1.msra.mxu0 %v2044_v5  ;;  %v4525_v12 = vunpack.i.l.bf16 %v5807_v62  ;;  %v4519_v26 = vpop.permute.xlu0 %4518  ;;  %3136 = vmatprep.mubr.f32.mxu1 %v6218_v53  ;;  %v1338_v56 = vsel %vm1319_vm4, %v4495_v33, %v4496_v46 }
 0x14c   : > { %v4521_v63 = vunpack.i.h.bf16 %v4519_v26  ;;  %v4520_v47 = vunpack.i.l.bf16 %v4519_v26  ;;  %3993 = vmatprep.subr.bf16.mxu0 %v3992_v60  ;;  %3790 = vmatmul.mubr.msk.f32.vlgmr.msra.gmra.mrb[8].mxu0 %vm2429_vm8, %v5793_v30  ;;  %v3986_v3 = vpack.c.bf16 %v1338_v56, %v1102_v17  ;;  %v1810_v26 = vsel %vm1791_vm6, %v4515_v61, %v4516_v18  ;;  %v195_v17 = vld [vmem:[%s4758_s17 + $0xb0] sm:$0xff] }
 0x14d   : > { %3995 = vmatpush1.bf16.msra.mxu0 %v3994_v57  ;;  %3207 = vmatprep.mubr.f32.mxu0 %v6218_v53  ;;  %v398_v56 = vsel %vm375_vm0, %v4180_v29, %v4181_v43 }
 0x14e   : > { %v868_v45 = vsel %vm847_vm2, %v4520_v47, %v4521_v63  ;;  %v4534_v4 = vpop.permute.xlu1 %4533  ;;  %v867_v10 = vsel %vm847_vm2, %v4476_v25, %v4520_v47  ;;  %v869_v52 = vsel %vm847_vm2, %v4521_v63, %v4525_v12  ;;  %2426 = vperm.xlu0 %4702, %v172_v51   ;;  %v4010_v9 = vpack.c.bf16 %v398_v56, %v195_v17 }
 0x14f   : > { %v3998_v1 = vpack.c.bf16 %v868_v45, %v632_v16  ;;  %v4535_v31 = vunpack.i.l.bf16 %v4534_v4  ;;  %v4529_v24 = vpop.permute.xlu0 %4528  ;;  %v3980_v48 = vpack.c.bf16 %v867_v10, %v631_v8  ;;  %v3996_v32 = vpack.c.bf16 %v869_v52, %v633_v59  ;;  %v196_v59 = vld [vmem:[%s4758_s17 + $0xb8] sm:$0xff] }
 0x150   : > { %v4530_v11 = vunpack.i.l.bf16 %v4529_v24  ;;  %v4536_v54 = vunpack.i.h.bf16 %v4534_v4  ;;  %v4531_v35 = vunpack.i.h.bf16 %v4529_v24 }
 0x151   : > { %3981 = vmatprep.subr.bf16.mxu1 %v3980_v48  ;;  %v1339_v2 = vsel %vm1319_vm4, %v4496_v46, %v4535_v31  ;;  %3997 = vmatprep.subr.bf16.mxu0 %v3996_v32  ;;  %v1574_v46 = vsel %vm1555_vm5, %v4510_v7, %v4511_v36 }
 0x152   : > { %3983 = vmatpush1.bf16.msra.mxu1 %v3982_v28  ;;  %v5843_v21 = vpop.permute.xlu1 %4543  ;;  %v1103_v38 = vsel %vm1083_vm3, %v4491_v58, %v4530_v11  ;;  %3999 = vmatpush1.bf16.msra.mxu0 %v3998_v1  ;;  %v1340_v5 = vsel %vm1319_vm4, %v4535_v31, %v4536_v54  ;;  %v1104_v49 = vsel %vm1083_vm3, %v4530_v11, %v4531_v35  ;;  %v4190_v1 = vunpack.i.l.bf16 %v5047_v41 }
 0x153   : > { %v4545_v44 = vunpack.i.l.bf16 %v5843_v21  ;;  %v5847_v33 = vpop.permute.xlu0 %4538  ;;  %v3984_v39 = vpack.c.bf16 %v1339_v2, %v1103_v38  ;;  %v4002_v57 = vpack.c.bf16 %v1340_v5, %v1104_v49  ;;  %v3990_v45 = vpack.c.bf16 %v1810_v26, %v1574_v46 }
 0x154   : > { %v4540_v27 = vunpack.i.l.bf16 %v5847_v33  ;;  %v4186_v31 = vunpack.i.h.bf16 %v5049_v42  ;;  %v399_v28 = vsel %vm375_vm0, %v4181_v43, %v4185_v37  ;;  %v4526_v49 = vunpack.i.h.bf16 %v5807_v62 }
 0x155   : > { %3985 = vmatprep.subr.bf16.mxu1 %v3984_v39  ;;  %v1341_v23 = vsel %vm1319_vm4, %v4536_v54, %v4545_v44  ;;  %v4008_v2 = vpack.c.bf16 %v399_v28, %v196_v59  ;;  %v198_v39 = vld [vmem:[%s4758_s17 + $0xc8] sm:$0xff]  ;;  %v4546_v62 = vunpack.i.h.bf16 %v5843_v21 }
 0x156   : > { %3987 = vmatpush1.bf16.msra.mxu1 %v3986_v3  ;;  %v4554_v19 = vpop.permute.xlu1 %4553  ;;  %v1105_v34 = vsel %vm1083_vm3, %v4531_v35, %v4540_v27  ;;  %v401_v29 = vsel %vm375_vm0, %v4186_v31, %v4190_v1  ;;  %v400_v3 = vsel %vm375_vm0, %v4185_v37, %v4186_v31 }
 0x157   : > { %v4555_v25 = vunpack.i.l.bf16 %v4554_v19  ;;  %v4549_v22 = vpop.permute.xlu0 %4548  ;;  %v4000_v60 = vpack.c.bf16 %v1341_v23, %v1105_v34  ;;  %v4556_v63 = vunpack.i.h.bf16 %v4554_v19  ;;  %v4024_v23 = vpack.c.bf16 %v401_v29, %v198_v39 }
 0x158   : > { %v4550_v51 = vunpack.i.l.bf16 %v4549_v22  ;;  %v4551_v47 = vunpack.i.h.bf16 %v4549_v22  ;;  %v1342_v28 = vsel %vm1319_vm4, %v4545_v44, %v4546_v62 }
 0x159   : > { %4001 = vmatprep.subr.bf16.mxu0 %v4000_v60  ;;  %v1811_v16 = vsel %vm1791_vm6, %v4516_v18, %v4555_v25  ;;  %v1812_v8 = vsel %vm1791_vm6, %v4555_v25, %v4556_v63  ;;  %v4266_v25 = vunpack.i.h.bf16 %v5114_v55 }
 0x15a   : > { %4003 = vmatpush1.bf16.msra.mxu0 %v4002_v57  ;;  %v5869_v58 = vpop.permute.xlu1 %4563  ;;  %v1575_v50 = vsel %vm1555_vm5, %v4511_v36, %v4550_v51  ;;  %v1576_v10 = vsel %vm1555_vm5, %v4550_v51, %v4551_v47  ;;  %v870_v57 = vsel %vm847_vm2, %v4525_v12, %v4526_v49 }
 0x15b   : > { %v4565_v61 = vunpack.i.l.bf16 %v5869_v58  ;;  %v5873_v20 = vpop.permute.xlu0 %4558  ;;  %v3988_v7 = vpack.c.bf16 %v1811_v16, %v1575_v50  ;;  %v4006_v54 = vpack.c.bf16 %v1812_v8, %v1576_v10  ;;  %v634_v16 = vsel %vm611_vm1, %v4265_v6, %v4266_v25 }
 0x15c   : > { %v4560_v4 = vunpack.i.l.bf16 %v5873_v20  ;;  %v4014_v50 = vpack.c.bf16 %v870_v57, %v634_v16  ;;  %v4541_v8 = vunpack.i.h.bf16 %v5847_v33  ;;  %v4566_v33 = vunpack.i.h.bf16 %v5869_v58 }
 0x15d   : > { %3989 = vmatprep.subr.bf16.mxu1 %v3988_v7  ;;  %v1813_v52 = vsel %vm1791_vm6, %v4556_v63, %v4565_v61  ;;  %v4561_v29 = vunpack.i.h.bf16 %v5873_v20 }
 0x15e   : > { %3991 = vmatpush1.bf16.msra.mxu1 %v3990_v45  ;;  %v2000_v24 = vpop.permute.xlu1 %1999  ;;  %v1577_v48 = vsel %vm1555_vm5, %v4551_v47, %v4560_v4 }
 0x15f   : > { %v1998_v11 = vpop.permute.xlu0 %1997  ;;  %v4004_v32 = vpack.c.bf16 %v1813_v52, %v1577_v48 }
 0x160   : > { %v2046_v42 = vsel %vm2027_vm7, %v5782_v40, %v1998_v11  ;;  %v2047_v35 = vsel %vm2027_vm7, %v1998_v11, %v2000_v24  ;;  %v197_v40 = vld [vmem:[%s4758_s17 + $0xc0] sm:$0xff] }
 0x161   : > { %3088 = vmatprep.subr.mxu1 %v2047_v35  ;;  %4005 = vmatprep.subr.bf16.mxu0 %v4004_v32  ;;  %v4026_v34 = vpack.c.bf16 %v400_v3, %v197_v40  ;;  %v1106_v32 = vsel %vm1083_vm3, %v4540_v27, %v4541_v8 }
 0x162   : > { %3089 = vmatpush1.msra.mxu1 %v2046_v42  ;;  %4007 = vmatpush1.bf16.msra.mxu0 %v4006_v54  ;;  %v5895_v38 = vpop.permute.xlu1 %2003  ;;  %v4018_v39 = vpack.c.bf16 %v1342_v28, %v1106_v32 }
 0x163   : > { %v2002_v18 = vpop.permute.xlu0 %2001  ;;  %4009 = vmatprep.subr.bf16.mxu1 %v4008_v2  ;;  %3791 = vmatmul.mubr.msk.f32.vlgmr.msra.gmra.mrb[8].mxu1 %vm2429_vm8, %v5793_v30 }
 0x164   : > { %v2048_v36 = vsel %vm2027_vm7, %v2000_v24, %v2002_v18  ;;  %4011 = vmatpush1.bf16.msra.mxu1 %v4010_v9  ;;  %v2049_v5 = vsel %vm2027_vm7, %v2002_v18, %v5895_v38  ;;  %3278 = vmatprep.mubr.f32.mxu1 %v6218_v53 }
 0x165   : > { %3159 = vmatprep.subr.mxu0 %v2049_v5 }
 0x166   : > { %3160 = vmatpush1.msra.mxu0 %v2048_v36  ;;  %v4574_v19 = vpop.permute.xlu1 %4573 }
 0x167   : > { %v4575_v22 = vunpack.i.l.bf16 %v4574_v19  ;;  %v4569_v60 = vpop.permute.xlu0 %4568  ;;  %4025 = vmatprep.subr.bf16.mxu0 %v4024_v23  ;;  %3792 = vmatmul.mubr.msk.f32.vlgmr.msra.gmra.mrb[10].mxu0 %vm2429_vm8, %v5793_v30  ;;  %v4576_v46 = vunpack.i.h.bf16 %v4574_v19 }
 0x168   : > { %v4570_v26 = vunpack.i.l.bf16 %v4569_v60  ;;  %4027 = vmatpush1.bf16.msra.mxu0 %v4026_v34  ;;  %3349 = vmatprep.mubr.f32.mxu0 %v6218_v53  ;;  %v4571_v63 = vunpack.i.h.bf16 %v4569_v60  ;;  %v1814_v34 = vsel %vm1791_vm6, %v4565_v61, %v4566_v33  ;;  %v1578_v60 = vsel %vm1555_vm5, %v4560_v4, %v4561_v29 }
 0x169   : > { %v871_v51 = vsel %vm847_vm2, %v4526_v49, %v4575_v22  ;;  %v872_v10 = vsel %vm847_vm2, %v4575_v22, %v4576_v46  ;;  %v4022_v16 = vpack.c.bf16 %v1814_v34, %v1578_v60 }
 0x16a   : > { %v635_v47 = vsel %vm611_vm1, %v4266_v25, %v4570_v26  ;;  %v636_v55 = vsel %vm611_vm1, %v4570_v26, %v4571_v63 }
 0x16b   : > { %v5922_v43 = vpop.permute.xlu1 %4583  ;;  %v4012_v37 = vpack.c.bf16 %v871_v51, %v635_v47  ;;  %v4030_v56 = vpack.c.bf16 %v872_v10, %v636_v55  ;;  %v4200_v10 = vunpack.i.l.bf16 %v5055_v14  ;;  %v4196_v55 = vunpack.i.h.bf16 %v5057_v15 }
 0x16c   : > { %v4585_v7 = vunpack.i.l.bf16 %v5922_v43  ;;  %v5925_v45 = vpop.permute.xlu0 %4578 }
 0x16d   : > { %v4580_v12 = vunpack.i.l.bf16 %v5925_v45  ;;  %4013 = vmatprep.subr.bf16.mxu1 %v4012_v37 }
 0x16e   : > { %4015 = vmatpush1.bf16.msra.mxu1 %v4014_v50  ;;  %v873_v6 = vsel %vm847_vm2, %v4576_v46, %v4585_v7  ;;  %v4191_v46 = vunpack.i.h.bf16 %v5047_v41 }
 0x16f   : > { %v4594_v52 = vpop.permute.xlu1 %4593  ;;  %v637_v31 = vsel %vm611_vm1, %v4571_v63, %v4580_v12  ;;  %v4195_v63 = vunpack.i.l.bf16 %v5057_v15 }
 0x170   : > { %v4595_v24 = vunpack.i.l.bf16 %v4594_v52  ;;  %v4589_v48 = vpop.permute.xlu0 %4588  ;;  %v4028_v59 = vpack.c.bf16 %v873_v6, %v637_v31  ;;  %v4596_v17 = vunpack.i.h.bf16 %v4594_v52  ;;  %v200_v31 = vld [vmem:[%s4758_s17 + $0xd8] sm:$0xff] }
 0x171   : > { %v4590_v11 = vunpack.i.l.bf16 %v4589_v48  ;;  %v4591_v54 = vunpack.i.h.bf16 %v4589_v48  ;;  %v402_v48 = vsel %vm375_vm0, %v4190_v1, %v4191_v46  ;;  %v405_v1 = vsel %vm375_vm0, %v4196_v55, %v4200_v10 }
 0x172   : > { %4029 = vmatprep.subr.bf16.mxu0 %v4028_v59  ;;  %v1343_v42 = vsel %vm1319_vm4, %v4546_v62, %v4595_v24  ;;  %v1344_v3 = vsel %vm1319_vm4, %v4595_v24, %v4596_v17  ;;  %v403_v24 = vsel %vm375_vm0, %v4191_v46, %v4195_v63 }
 0x173   : > { %4031 = vmatpush1.bf16.msra.mxu0 %v4030_v56  ;;  %v5945_v35 = vpop.permute.xlu1 %4603  ;;  %v1107_v2 = vsel %vm1083_vm3, %v4541_v8, %v4590_v11  ;;  %v1108_v18 = vsel %vm1083_vm3, %v4590_v11, %v4591_v54  ;;  %v199_v56 = vld [vmem:[%s4758_s17 + $0xd0] sm:$0xff] }
 0x174   : > { %v4605_v21 = vunpack.i.l.bf16 %v5945_v35  ;;  %v5949_v9 = vpop.permute.xlu0 %4598  ;;  %v4016_v44 = vpack.c.bf16 %v1343_v42, %v1107_v2  ;;  %v4034_v25 = vpack.c.bf16 %v1344_v3, %v1108_v18  ;;  %v4042_v41 = vpack.c.bf16 %v402_v48, %v199_v56  ;;  %v202_v42 = vld [vmem:[%s4758_s17 + $0xe8] sm:$0xff] }
 0x175   : > { %v4600_v27 = vunpack.i.l.bf16 %v5949_v9  ;;  %v404_v2 = vsel %vm375_vm0, %v4195_v63, %v4196_v55  ;;  %v4581_v3 = vunpack.i.h.bf16 %v5925_v45  ;;  %v4056_v18 = vpack.c.bf16 %v405_v1, %v202_v42 }
 0x176   : > { %4017 = vmatprep.subr.bf16.mxu1 %v4016_v44  ;;  %v1345_v40 = vsel %vm1319_vm4, %v4596_v17, %v4605_v21  ;;  %v4040_v17 = vpack.c.bf16 %v403_v24, %v200_v31  ;;  %v4606_v63 = vunpack.i.h.bf16 %v5945_v35 }
 0x177   : > { %4019 = vmatpush1.bf16.msra.mxu1 %v4018_v39  ;;  %v4614_v36 = vpop.permute.xlu1 %4613  ;;  %v1109_v5 = vsel %vm1083_vm3, %v4591_v54, %v4600_v27  ;;  %v4586_v39 = vunpack.i.h.bf16 %v5922_v43  ;;  %v638_v34 = vsel %vm611_vm1, %v4580_v12, %v4581_v3  ;;  %v4601_v12 = vunpack.i.h.bf16 %v5949_v9 }
 0x178   : > { %v4615_v49 = vunpack.i.l.bf16 %v4614_v36  ;;  %v4609_v23 = vpop.permute.xlu0 %4608  ;;  %v4032_v19 = vpack.c.bf16 %v1345_v40, %v1109_v5  ;;  %v4616_v26 = vunpack.i.h.bf16 %v4614_v36 }
 0x179   : > { %v4610_v22 = vunpack.i.l.bf16 %v4609_v23  ;;  %v4611_v57 = vunpack.i.h.bf16 %v4609_v23  ;;  %v874_v23 = vsel %vm847_vm2, %v4585_v7, %v4586_v39  ;;  %v1110_v48 = vsel %vm1083_vm3, %v4600_v27, %v4601_v12 }
 0x17a   : > { %4033 = vmatprep.subr.bf16.mxu0 %v4032_v19  ;;  %v1815_v51 = vsel %vm1791_vm6, %v4566_v33, %v4615_v49  ;;  %v1816_v50 = vsel %vm1791_vm6, %v4615_v49, %v4616_v26  ;;  %v4046_v46 = vpack.c.bf16 %v874_v23, %v638_v34  ;;  %v4201_v23 = vunpack.i.h.bf16 %v5055_v14 }
 0x17b   : > { %4035 = vmatpush1.bf16.msra.mxu0 %v4034_v25  ;;  %v5971_v47 = vpop.permute.xlu1 %4623  ;;  %v1579_v58 = vsel %vm1555_vm5, %v4561_v29, %v4610_v22  ;;  %v1580_v62 = vsel %vm1555_vm5, %v4610_v22, %v4611_v57 }
 0x17c   : > { %v4625_v61 = vunpack.i.l.bf16 %v5971_v47  ;;  %v5975_v20 = vpop.permute.xlu0 %4618  ;;  %v4020_v4 = vpack.c.bf16 %v1815_v51, %v1579_v58  ;;  %v4038_v11 = vpack.c.bf16 %v1816_v50, %v1580_v62  ;;  %v4626_v27 = vunpack.i.h.bf16 %v5971_v47 }
 0x17d   : > { %v4620_v37 = vunpack.i.l.bf16 %v5975_v20 }
 0x17e   : > { %4021 = vmatprep.subr.bf16.mxu1 %v4020_v4  ;;  %v1817_v8 = vsel %vm1791_vm6, %v4616_v26, %v4625_v61 }
 0x17f   : > { %4023 = vmatpush1.bf16.msra.mxu1 %v4022_v16  ;;  %v2008_v6 = vpop.permute.xlu1 %2007  ;;  %v1581_v52 = vsel %vm1555_vm5, %v4611_v57, %v4620_v37 }
 0x180   : > { %v2006_v59 = vpop.permute.xlu0 %2005  ;;  %v4036_v28 = vpack.c.bf16 %v1817_v8, %v1581_v52  ;;  %v1346_v52 = vsel %vm1319_vm4, %v4605_v21, %v4606_v63 }
 0x181   : > { %v2050_v15 = vsel %vm2027_vm7, %v5895_v38, %v2006_v59  ;;  %v2051_v32 = vsel %vm2027_vm7, %v2006_v59, %v2008_v6  ;;  %v201_v38 = vld [vmem:[%s4758_s17 + $0xe0] sm:$0xff]  ;;  %v4050_v21 = vpack.c.bf16 %v1346_v52, %v1110_v48 }
 0x182   : > { %3230 = vmatprep.subr.mxu1 %v2051_v32  ;;  %4037 = vmatprep.subr.bf16.mxu0 %v4036_v28  ;;  %v4058_v36 = vpack.c.bf16 %v404_v2, %v201_v38 }
 0x183   : > { %3231 = vmatpush1.msra.mxu1 %v2050_v15  ;;  %4039 = vmatpush1.bf16.msra.mxu0 %v4038_v11  ;;  %v5997_v54 = vpop.permute.xlu1 %2011 }
 0x184   : > { %v2010_v44 = vpop.permute.xlu0 %2009  ;;  %4041 = vmatprep.subr.bf16.mxu1 %v4040_v17  ;;  %3793 = vmatmul.mubr.msk.f32.vlgmr.msra.gmra.mrb[10].mxu1 %vm2429_vm8, %v5793_v30 }
 0x185   : > { %v2052_v33 = vsel %vm2027_vm7, %v2008_v6, %v2010_v44  ;;  %4043 = vmatpush1.bf16.msra.mxu1 %v4042_v41  ;;  %v2053_v29 = vsel %vm2027_vm7, %v2010_v44, %v5997_v54  ;;  %3420 = vmatprep.mubr.f32.mxu1 %v6218_v53  ;;  %v4621_v41 = vunpack.i.h.bf16 %v5975_v20 }
 0x186   : > { %3301 = vmatprep.subr.mxu0 %v2053_v29 }
 0x187   : > { %3302 = vmatpush1.msra.mxu0 %v2052_v33  ;;  %v4634_v40 = vpop.permute.xlu1 %4633 }
 0x188   : > { %v4635_v5 = vunpack.i.l.bf16 %v4634_v40  ;;  %v4629_v49 = vpop.permute.xlu0 %4628  ;;  %4057 = vmatprep.subr.bf16.mxu0 %v4056_v18  ;;  %3794 = vmatmul.mubr.msk.f32.vlgmr.msra.gmra.mrb[12].mxu0 %vm2429_vm8, %v5793_v30  ;;  %v4636_v25 = vunpack.i.h.bf16 %v4634_v40 }
 0x189   : > { %v4630_v19 = vunpack.i.l.bf16 %v4629_v49  ;;  %4059 = vmatpush1.bf16.msra.mxu0 %v4058_v36  ;;  %3491 = vmatprep.mubr.f32.mxu0 %v6218_v53  ;;  %v4631_v22 = vunpack.i.h.bf16 %v4629_v49  ;;  %v1818_v36 = vsel %vm1791_vm6, %v4625_v61, %v4626_v27 }
 0x18a   : > { %v875_v60 = vsel %vm847_vm2, %v4586_v39, %v4635_v5  ;;  %v876_v58 = vsel %vm847_vm2, %v4635_v5, %v4636_v25  ;;  %v1582_v5 = vsel %vm1555_vm5, %v4620_v37, %v4621_v41 }
 0x18b   : > { %v6023_v26 = vpop.permute.xlu1 %4643  ;;  %v639_v57 = vsel %vm611_vm1, %v4581_v3, %v4630_v19  ;;  %v640_v4 = vsel %vm611_vm1, %v4630_v19, %v4631_v22  ;;  %v4205_v19 = vunpack.i.l.bf16 %v5063_v13 }
 0x18c   : > { %v4645_v43 = vunpack.i.l.bf16 %v6023_v26  ;;  %v6027_v51 = vpop.permute.xlu0 %4638  ;;  %v4044_v7 = vpack.c.bf16 %v875_v60, %v639_v57  ;;  %v4062_v31 = vpack.c.bf16 %v876_v58, %v640_v4  ;;  %v4054_v60 = vpack.c.bf16 %v1818_v36, %v1582_v5 }
 0x18d   : > { %v4640_v45 = vunpack.i.l.bf16 %v6027_v51  ;;  %v407_v58 = vsel %vm375_vm0, %v4201_v23, %v4205_v19  ;;  %v406_v4 = vsel %vm375_vm0, %v4200_v10, %v4201_v23  ;;  %v4641_v48 = vunpack.i.h.bf16 %v6027_v51 }
 0x18e   : > { %4045 = vmatprep.subr.bf16.mxu1 %v4044_v7  ;;  %v877_v16 = vsel %vm847_vm2, %v4636_v25, %v4645_v43 }
 0x18f   : > { %4047 = vmatpush1.bf16.msra.mxu1 %v4046_v46  ;;  %v4654_v50 = vpop.permute.xlu1 %4653  ;;  %v641_v62 = vsel %vm611_vm1, %v4631_v22, %v4640_v45 }
 0x190   : > { %v4655_v8 = vunpack.i.l.bf16 %v4654_v50  ;;  %v4649_v55 = vpop.permute.xlu0 %4648  ;;  %v4060_v6 = vpack.c.bf16 %v877_v16, %v641_v62  ;;  %v4656_v59 = vunpack.i.h.bf16 %v4654_v50  ;;  %v4206_v16 = vunpack.i.h.bf16 %v5063_v13  ;;  %v203_v62 = vld [vmem:[%s4758_s17 + $0xf0] sm:$0xff] }
 0x191   : > { %v4650_v24 = vunpack.i.l.bf16 %v4649_v55  ;;  %v4651_v28 = vunpack.i.h.bf16 %v4649_v55  ;;  %v4646_v13 = vunpack.i.h.bf16 %v6023_v26 }
 0x192   : > { %4061 = vmatprep.subr.bf16.mxu0 %v4060_v6  ;;  %v1347_v56 = vsel %vm1319_vm4, %v4606_v63, %v4655_v8  ;;  %v1348_v42 = vsel %vm1319_vm4, %v4655_v8, %v4656_v59  ;;  %v408_v14 = vsel %vm375_vm0, %v4205_v19, %v4206_v16 }
 0x193   : > { %4063 = vmatpush1.bf16.msra.mxu0 %v4062_v31  ;;  %v6047_v11 = vpop.permute.xlu1 %1311  ;;  %v1111_v15 = vsel %vm1083_vm3, %v4601_v12, %v4650_v24  ;;  %v1112_v1 = vsel %vm1083_vm3, %v4650_v24, %v4651_v28  ;;  %v204_v12 = vld [vmem:[%s4758_s17 + $0xf8] sm:$0xff]  ;;  %v4074_v31 = vpack.c.bf16 %v406_v4, %v203_v62 }
 0x194   : > { %v6050_v32 = vpop.permute.xlu0 %4658  ;;  %v4048_v35 = vpack.c.bf16 %v1347_v56, %v1111_v15  ;;  %v1349_v17 = vsel %vm1319_vm4, %v4656_v59, %v6047_v11  ;;  %v4066_v3 = vpack.c.bf16 %v1348_v42, %v1112_v1  ;;  %v4072_v6 = vpack.c.bf16 %v407_v58, %v204_v12 }
 0x195   : > { %v4660_v9 = vunpack.i.l.bf16 %v6050_v32  ;;  %v4661_v42 = vunpack.i.h.bf16 %v6050_v32 }
 0x196   : > { %4049 = vmatprep.subr.bf16.mxu1 %v4048_v35 }
 0x197   : > { %4051 = vmatpush1.bf16.msra.mxu1 %v4050_v21  ;;  %v4669_v2 = vpop.permute.xlu1 %4668  ;;  %v1113_v44 = vsel %vm1083_vm3, %v4651_v28, %v4660_v9  ;;  %v4089_v28 = vpack.c.bf16 %v408_v14, %v5669_v0  ;;  %v4722_v21 = vmov 0.0|0.0   ;;  %v642_v0 = vsel %vm611_vm1, %v4640_v45, %v4641_v48 }
 0x198   : > { %v4671_v38 = vunpack.i.h.bf16 %v4669_v2  ;;  %v4670_v39 = vunpack.i.l.bf16 %v4669_v2  ;;  %v4664_v33 = vpop.permute.xlu0 %4663  ;;  %v4064_v29 = vpack.c.bf16 %v1349_v17, %v1113_v44  ;;  %v878_v17 = vsel %vm847_vm2, %v4645_v43, %v4646_v13 }
 0x199   : > { %v4666_v18 = vunpack.i.h.bf16 %v4664_v33  ;;  %v4665_v40 = vunpack.i.l.bf16 %v4664_v33  ;;  %v4078_v51 = vpack.c.bf16 %v878_v17, %v642_v0 }
 0x19a   : > { %4065 = vmatprep.subr.bf16.mxu0 %v4064_v29  ;;  %v1819_v49 = vsel %vm1791_vm6, %v4626_v27, %v4670_v39  ;;  %v1820_v47 = vsel %vm1791_vm6, %v4670_v39, %v4671_v38 }
 0x19b   : > { %4067 = vmatpush1.bf16.msra.mxu0 %v4066_v3  ;;  %v6071_v34 = vpop.permute.xlu1 %1783  ;;  %v1583_v25 = vsel %vm1555_vm5, %v4621_v41, %v4665_v40  ;;  %v1584_v61 = vsel %vm1555_vm5, %v4665_v40, %v4666_v18  ;;  %v1114_v40 = vsel %vm1083_vm3, %v4660_v9, %v4661_v42 }
 0x19c   : > { %v1821_v20 = vsel %vm1791_vm6, %v4671_v38, %v6071_v34  ;;  %v6078_v37 = vpop.permute.xlu0 %1547  ;;  %v4052_v22 = vpack.c.bf16 %v1819_v49, %v1583_v25  ;;  %v4070_v46 = vpack.c.bf16 %v1820_v47, %v1584_v61 }
 0x19d   : > { %v1585_v57 = vsel %vm1555_vm5, %v4666_v18, %v6078_v37 }
 0x19e   : > { %v4068_v7 = vpack.c.bf16 %v1821_v20, %v1585_v57  ;;  %4053 = vmatprep.subr.bf16.mxu1 %v4052_v22 }
 0x19f   : > { %4055 = vmatpush1.bf16.msra.mxu1 %v4054_v60  ;;  %v2016_v63 = vpop.permute.xlu1 %2015 }
 0x1a0   : > { %v2014_v50 = vpop.permute.xlu0 %2013  ;;  %4069 = vmatprep.subr.bf16.mxu0 %v4068_v7 }
 0x1a1   : > { %v2054_v8 = vsel %vm2027_vm7, %v5997_v54, %v2014_v50  ;;  %4071 = vmatpush1.bf16.msra.mxu0 %v4070_v46  ;;  %v2055_v55 = vsel %vm2027_vm7, %v2014_v50, %v2016_v63 }
 0x1a2   : > { %3372 = vmatprep.subr.mxu1 %v2055_v55 }
 0x1a3   : > { %3373 = vmatpush1.msra.mxu1 %v2054_v8  ;;  %v6092_v52 = vpop.permute.xlu1 %2019 }
 0x1a4   : > { %v2018_v10 = vpop.permute.xlu0 %2017  ;;  %4073 = vmatprep.subr.bf16.mxu1 %v4072_v6  ;;  %3795 = vmatmul.mubr.msk.f32.vlgmr.msra.gmra.mrb[12].mxu1 %vm2429_vm8, %v5793_v30 }
 0x1a5   : > { %v2056_v54 = vsel %vm2027_vm7, %v2016_v63, %v2018_v10  ;;  %4075 = vmatpush1.bf16.msra.mxu1 %v4074_v31  ;;  %v2057_v24 = vsel %vm2027_vm7, %v2018_v10, %v6092_v52  ;;  %3562 = vmatprep.mubr.f32.mxu1 %v6218_v53 }
 0x1a6   : > { %3443 = vmatprep.subr.mxu0 %v2057_v24 }
 0x1a7   : > { %3444 = vmatpush1.msra.mxu0 %v2056_v54  ;;  %v4679_v59 = vpop.permute.xlu1 %4678 }
 0x1a8   : > { %v4681_v56 = vunpack.i.h.bf16 %v4679_v59  ;;  %v4680_v15 = vunpack.i.l.bf16 %v4679_v59  ;;  %v4674_v35 = vpop.permute.xlu0 %4673  ;;  %4088 = vmatprep.subr.bf16.mxu0 %v4722_v21  ;;  %3796 = vmatmul.mubr.msk.f32.vlgmr.msra.gmra.mrb[14].mxu0 %vm2429_vm8, %v5793_v30 }
 0x1a9   : > { %v4676_v27 = vunpack.i.h.bf16 %v4674_v35  ;;  %v4675_v41 = vunpack.i.l.bf16 %v4674_v35  ;;  %4090 = vmatpush3.bf16.msra.mxu0 %v4089_v28  ;;  %3829 = vmatprep.mubr.msk.f32.mxu0 %vm4723_vm9, %v6218_v53 }
 0x1aa   : > { %v880_v1 = vsel %vm847_vm2, %v4680_v15, %v4681_v56  ;;  %4091 = vmatprep.subr.bf16.mxu0 %v4722_v21  ;;  %v879_v2 = vsel %vm847_vm2, %v4646_v13, %v4680_v15 }
 0x1ab   : > { %v644_v26 = vsel %vm611_vm1, %v4675_v41, %v4676_v27  ;;  %v4689_v43 = vpop.permute.xlu1 %4688  ;;  %v643_v44 = vsel %vm611_vm1, %v4641_v48, %v4675_v41 }
 0x1ac   : > { %v4092_v38 = vpack.c.bf16 %v880_v1, %v644_v26  ;;  %v4691_v39 = vunpack.i.h.bf16 %v4689_v43  ;;  %v4690_v33 = vunpack.i.l.bf16 %v4689_v43  ;;  %v4684_v29 = vpop.permute.xlu0 %4683  ;;  %v4076_v3 = vpack.c.bf16 %v879_v2, %v643_v44 }
 0x1ad   : > { %v4686_v18 = vunpack.i.h.bf16 %v4684_v29  ;;  %v4685_v45 = vunpack.i.l.bf16 %v4684_v29 }
 0x1ae   : > { %v1350_v36 = vsel %vm1319_vm4, %v6047_v11, %v4690_v33  ;;  %4077 = vmatprep.subr.bf16.mxu1 %v4076_v3  ;;  %4093 = vmatpush3.bf16.msra.mxu0 %v4092_v38  ;;  %v1351_v5 = vsel %vm1319_vm4, %v4690_v33, %v4691_v39 }
 0x1af   : > { %v4082_v49 = vpack.c.bf16 %v1350_v36, %v1114_v40  ;;  %4079 = vmatpush1.bf16.msra.mxu1 %v4078_v51  ;;  %v4694_v23 = vpop.permute.xlu1 %4693  ;;  %v1115_v19 = vsel %vm1083_vm3, %v4661_v42, %v4685_v45  ;;  %4094 = vmatprep.subr.bf16.mxu0 %v4722_v21  ;;  %v1116_v32 = vsel %vm1083_vm3, %v4685_v45, %v4686_v18 }
 0x1b0   : > { %v1318_v25 = vpop.permute.xlu0 %1317  ;;  %v4080_v47 = vpack.c.bf16 %v1351_v5, %v1115_v19  ;;  %v4696_v61 = vunpack.i.h.bf16 %v4694_v23  ;;  %v4695_v22 = vunpack.i.l.bf16 %v4694_v23 }
 0x1b1   : > { %v1352_v9 = vsel %vm1319_vm4, %v4691_v39, %v1318_v25 }
 0x1b2   : > { %v4095_v20 = vpack.c.bf16 %v1352_v9, %v1116_v32  ;;  %4081 = vmatprep.subr.bf16.mxu1 %v4080_v47  ;;  %v2499_v11 = vpop.f32.mrb[0].mxu0  ;;  %v1587_v12 = vsel %vm1555_vm5, %v4695_v22, %v4696_v61  ;;  %v1586_v58 = vsel %vm1555_vm5, %v6078_v37, %v4695_v22 }
 0x1b3   : > { %4083 = vmatpush1.bf16.msra.mxu1 %v4082_v49  ;;  %v1554_v60 = vpop.permute.xlu1 %1553  ;;  %v2501_v57 = vpop.f32.mrb[1].mxu0 }
 0x1b4   : > { %v4699_v7 = vpop.permute.xlu0 %4698  ;;  %4096 = vmatpush3.bf16.msra.mxu0 %v4095_v20  ;;  %v1588_v6 = vsel %vm1555_vm5, %v4696_v61, %v1554_v60 }
 0x1b5   : > { %v4701_v46 = vunpack.i.h.bf16 %v4699_v7  ;;  %v4700_v63 = vunpack.i.l.bf16 %v4699_v7  ;;  %4097 = vmatprep.subr.bf16.mxu0 %v4722_v21 }
 0x1b7   : > { %v1822_v4 = vsel %vm1791_vm6, %v6071_v34, %v4700_v63  ;;  %v2022_v16 = vpop.permute.xlu1 %2021  ;;  %v1823_v50 = vsel %vm1791_vm6, %v4700_v63, %v4701_v46 }
 0x1b8   : > { %v4086_v62 = vpack.c.bf16 %v1822_v4, %v1586_v58  ;;  %v1790_v8 = vpop.permute.xlu0 %1789  ;;  %v4084_v55 = vpack.c.bf16 %v1823_v50, %v1587_v12  ;;  %v2058_v34 = vsel %vm2027_vm7, %v6092_v52, %v2022_v16 }
 0x1b9   : > { %v1824_v31 = vsel %vm1791_vm6, %v4701_v46, %v1790_v8 }
 0x1ba   : > { %v4098_v14 = vpack.c.bf16 %v1824_v31, %v1588_v6  ;;  %4085 = vmatprep.subr.bf16.mxu1 %v4084_v55 }
 0x1bb   : > { %4087 = vmatpush1.bf16.msra.mxu1 %v4086_v62  ;;  %v2026_v10 = vpop.permute.xlu1 %2025 }
 0x1bc   : > { %v2024_v13 = vpop.permute.xlu0 %2023  ;;  %4099 = vmatpush3.bf16.msra.mxu0 %v4098_v14 }
 0x1bd   : > { %v2059_v37 = vsel %vm2027_vm7, %v2022_v16, %v2024_v13  ;;  %3827 = vmatprep.subr.mxu0 %v6218_v53  ;;  %v2060_v54 = vsel %vm2027_vm7, %v2024_v13, %v2026_v10 }
 0x1be   : > { %3514 = vmatprep.subr.mxu1 %v2059_v37 }
 0x1bf   : > { %3515 = vmatpush1.msra.mxu1 %v2058_v34 }
 0x1c0   : > { %3797 = vmatmul.mubr.msk.f32.vlgmr.msra.gmra.mrb[14].mxu1 %vm2429_vm8, %v5793_v30  ;;  %3828 = vmatpush3.msra.mxu0 %v2060_v54 }
 0x1c1   : > { %3830 = vmatmul.mubr.msk.f32.vlgmr.msra.gmra.mrb[16].mxu0 %vm2429_vm8, %v5793_v30 }
 0x1c7   : > { %v2570_v24 = vpop.f32.mrb[0].mxu1 }
 0x1c8   : > { %v2572_v48 = vpop.f32.mrb[1].mxu1 }
 0x1cb   : > { %v2641_v59 = vpop.f32.mrb[2].mxu0 }
 0x1cc   : > { %v2643_v28 = vpop.f32.mrb[3].mxu0 }
 0x1cd   : > { %v6145_v53 = vpop.permute.xlu0 %2426 }
 0x1ce   : > { %v2500_v52 = vadd.f32 %v2499_v11, %v6145_v53  ;;  %v2502_v56 = vadd.f32 %v2501_v57, %v6145_v53  ;;  %v2571_v15 = vadd.f32 %v2570_v24, %v6145_v53  ;;  %v2573_v35 = vadd.f32 %v2572_v48, %v6145_v53 }
 0x1cf   : > { %v2642_v30 = vadd.f32 %v2641_v59, %v6145_v53  ;;  %v2644_v21 = vadd.f32 %v2643_v28, %v6145_v53 }
 0x1d0   : > { %v3671_v17 = vcombine.low %v2500_v52, %v2502_v56  ;;  %v3672_v27 = vcombine.low %v2571_v15, %v2573_v35 }
 0x1d1   : > { %v3673_v41 = vcombine.low %v2642_v30, %v2644_v21 }
 0x1d2   : > { %3703 = vst [vmem:[%s6154_s8] sm:$0x77] %v3671_v17  ;;  %3704 = vst [vmem:[%s6154_s8 + $0x8] sm:$0x77] %v3672_v27 }
 0x1d3   : > { %3705 = vst [vmem:[%s6154_s8 + $0x10] sm:$0x77] %v3673_v41 }
 0x1e3   : > { %v2712_v0 = vpop.f32.mrb[2].mxu1 }
 0x1e4   : > { %v2713_v42 = vadd.f32 %v2712_v0, %v6145_v53  ;;  %v2714_v1 = vpop.f32.mrb[3].mxu1 }
 0x1e5   : > { %v2715_v2 = vadd.f32 %v2714_v1, %v6145_v53 }
 0x1e7   : > { %v3674_v26 = vcombine.low %v2713_v42, %v2715_v2  ;;  %v2783_v43 = vpop.f32.mrb[4].mxu0 }
 0x1e8   : > { %v2784_v44 = vadd.f32 %v2783_v43, %v6145_v53  ;;  %v2785_v38 = vpop.f32.mrb[5].mxu0 }
 0x1e9   : > { %3706 = vst [vmem:[%s6154_s8 + $0x18] sm:$0x77] %v3674_v26  ;;  %v2786_v39 = vadd.f32 %v2785_v38, %v6145_v53 }
 0x1eb   : > { %v3675_v33 = vcombine.low %v2784_v44, %v2786_v39 }
 0x1ed   : > { %3707 = vst [vmem:[%s6154_s8 + $0x20] sm:$0x77] %v3675_v33 }
 0x1ff   : > { %v2854_v29 = vpop.f32.mrb[4].mxu1 }
 0x200   : > { %v2855_v3 = vadd.f32 %v2854_v29, %v6145_v53  ;;  %v2856_v51 = vpop.f32.mrb[5].mxu1 }
 0x201   : > { %v2857_v18 = vadd.f32 %v2856_v51, %v6145_v53 }
 0x203   : > { %v3676_v45 = vcombine.low %v2855_v3, %v2857_v18  ;;  %v2925_v40 = vpop.f32.mrb[6].mxu0 }
 0x204   : > { %v2926_v36 = vadd.f32 %v2925_v40, %v6145_v53  ;;  %v2927_v5 = vpop.f32.mrb[7].mxu0 }
 0x205   : > { %3708 = vst [vmem:[%s6154_s8 + $0x28] sm:$0x77] %v3676_v45  ;;  %v2928_v49 = vadd.f32 %v2927_v5, %v6145_v53 }
 0x207   : > { %v3677_v23 = vcombine.low %v2926_v36, %v2928_v49 }
 0x209   : > { %3709 = vst [vmem:[%s6154_s8 + $0x30] sm:$0x77] %v3677_v23 }
 0x21b   : > { %v2996_v19 = vpop.f32.mrb[6].mxu1 }
 0x21c   : > { %v2997_v25 = vadd.f32 %v2996_v19, %v6145_v53  ;;  %v2998_v47 = vpop.f32.mrb[7].mxu1 }
 0x21d   : > { %v2999_v61 = vadd.f32 %v2998_v47, %v6145_v53 }
 0x21f   : > { %v3678_v32 = vcombine.low %v2997_v25, %v2999_v61  ;;  %v3067_v9 = vpop.f32.mrb[8].mxu0 }
 0x220   : > { %v3068_v20 = vadd.f32 %v3067_v9, %v6145_v53  ;;  %v3069_v11 = vpop.f32.mrb[9].mxu0 }
 0x221   : > { %3710 = vst [vmem:[%s6154_s8 + $0x38] sm:$0x77] %v3678_v32  ;;  %v3070_v22 = vadd.f32 %v3069_v11, %v6145_v53 }
 0x223   : > { %v3679_v60 = vcombine.low %v3068_v20, %v3070_v22 }
 0x225   : > { %3711 = vst [vmem:[%s6154_s8 + $0x40] sm:$0x77] %v3679_v60 }
 0x236   : > { %v3138_v57 = vpop.f32.mrb[8].mxu1 }
 0x237   : > { %v3139_v7 = vadd.f32 %v3138_v57, %v6145_v53  ;;  %v3140_v46 = vpop.f32.mrb[9].mxu1 }
 0x238   : > { %v3141_v63 = vadd.f32 %v3140_v46, %v6145_v53 }
 0x23a   : > { %v3680_v12 = vcombine.low %v3139_v7, %v3141_v63  ;;  %v3209_v58 = vpop.f32.mrb[10].mxu0 }
 0x23b   : > { %v3210_v4 = vadd.f32 %v3209_v58, %v6145_v53  ;;  %v3211_v16 = vpop.f32.mrb[11].mxu0 }
 0x23c   : > { %3712 = vst [vmem:[%s6154_s8 + $0x48] sm:$0x77] %v3680_v12  ;;  %v3212_v50 = vadd.f32 %v3211_v16, %v6145_v53 }
 0x23e   : > { %v3681_v62 = vcombine.low %v3210_v4, %v3212_v50 }
 0x240   : > { %3713 = vst [vmem:[%s6154_s8 + $0x50] sm:$0x77] %v3681_v62 }
 0x257   : > { %v3280_v8 = vpop.f32.mrb[10].mxu1 }
 0x258   : > { %v3281_v55 = vadd.f32 %v3280_v8, %v6145_v53  ;;  %v3282_v6 = vpop.f32.mrb[11].mxu1 }
 0x259   : > { %v3283_v31 = vadd.f32 %v3282_v6, %v6145_v53 }
 0x25b   : > { %v3682_v14 = vcombine.low %v3281_v55, %v3283_v31  ;;  %v3351_v10 = vpop.f32.mrb[12].mxu0 }
 0x25c   : > { %v3352_v13 = vadd.f32 %v3351_v10, %v6145_v53  ;;  %v3353_v37 = vpop.f32.mrb[13].mxu0 }
 0x25d   : > { %3714 = vst [vmem:[%s6154_s8 + $0x58] sm:$0x77] %v3682_v14  ;;  %v3354_v34 = vadd.f32 %v3353_v37, %v6145_v53 }
 0x25f   : > { %v3683_v54 = vcombine.low %v3352_v13, %v3354_v34 }
 0x261   : > { %3715 = vst [vmem:[%s6154_s8 + $0x60] sm:$0x77] %v3683_v54 }
 0x277   : > { %v3422_v24 = vpop.f32.mrb[12].mxu1 }
 0x278   : > { %v3423_v48 = vadd.f32 %v3422_v24, %v6145_v53  ;;  %v3424_v59 = vpop.f32.mrb[13].mxu1 }
 0x279   : > { %v3425_v28 = vadd.f32 %v3424_v59, %v6145_v53 }
 0x27b   : > { %v3684_v52 = vcombine.low %v3423_v48, %v3425_v28  ;;  %v3493_v56 = vpop.f32.mrb[14].mxu0 }
 0x27c   : > { %v3494_v15 = vadd.f32 %v3493_v56, %v6145_v53  ;;  %v3495_v35 = vpop.f32.mrb[15].mxu0 }
 0x27d   : > { %3716 = vst [vmem:[%s6154_s8 + $0x68] sm:$0x77] %v3684_v52  ;;  %v3496_v30 = vadd.f32 %v3495_v35, %v6145_v53 }
 0x27f   : > { %v3685_v21 = vcombine.low %v3494_v15, %v3496_v30 }
 0x281   : > { %3717 = vst [vmem:[%s6154_s8 + $0x70] sm:$0x77] %v3685_v21 }
 0x293   : > { %v3564_v17 = vpop.f32.mrb[14].mxu1 }
 0x294   : > { %v3565_v27 = vadd.f32 %v3564_v17, %v6145_v53  ;;  %v3566_v41 = vpop.f32.mrb[15].mxu1  ;;  %v3635_v0 = vpop.f32.mrb[16].mxu0 }
 0x295   : > { %v3567_v42 = vadd.f32 %v3566_v41, %v6145_v53  ;;  %v3636_v1 = vadd.f32 %v3635_v0, %v6145_v53  ;;  %v3831_v2 = vpop.f32.mrb[17].mxu0 }
 0x297   : > { %v3686_v26 = vcombine.low %v3565_v27, %v3567_v42  ;;  %3719 = vst [vmem:[%s6154_s8 + $0x80] sm:$0x7] %v3636_v1 }
 0x299   : > { %3718 = vst [vmem:[%s6154_s8 + $0x78] sm:$0x77] %v3686_v26 }
 0x29a PF: > { %s13_s12 = sadd.s32 1, %s4710_s12  }
 0x29b   : > { %p10_p4 = scmp.ge.s32.totalorder %s13_s12, 4  }
 0x29d   :  { %12 = sbr.rel (!%p10_p4) target bundleno = 1 (0x1), region = 62 }

</bundles_post_ra>
